<compile_context>
chip_gen: v6e
topology: v6e:2x2x1
jax: 0.10.0
libtpu: 0.0.40
codegen_flags: <defaults>
</compile_context>

<pallas_src>
import jax
import jax.numpy as jnp
from jax.experimental import pallas as pl
from jax.experimental.pallas import tpu as pltpu


# ---------------------------------------------------------------------------
# Mish with a single transcendental (exp); matches PyTorch softplus threshold=20.
#   mish(y) = y * tanh(softplus(y)) = y * ((1+e^y)^2 - 1) / ((1+e^y)^2 + 1)
# For y > 20 the ratio saturates to 1.0 in f32, matching tanh(y>=20) == 1.0.
# ---------------------------------------------------------------------------
def _mish(y):
    t = jnp.exp(jnp.minimum(y, 20.0))
    z = (1.0 + t) * (1.0 + t)
    return y * ((z - 1.0) / (z + 1.0))


# ---------------------------------------------------------------------------
# Generic fused row-tiled matmul + BN-shift + Mish (used for the merged 1x1
# branches).  x:(M,K) bf16 @ w:(K,C) bf16 -> f32 acc -> +shift -> mish.
# ---------------------------------------------------------------------------
def _mm_mish_kernel(x_ref, w_ref, shift_ref, o_ref):
    y = jnp.dot(x_ref[...], w_ref[...], preferred_element_type=jnp.float32)
    y = y + shift_ref[...]
    o_ref[...] = _mish(y).astype(o_ref.dtype)


def _row_tile(M, target=512):
    """Row tile: 512 when possible, otherwise sized to keep >=2 grid steps."""
    if M >= 2 * target:
        return target
    return max(8, (((M + 1) // 2) + 7) // 8 * 8)


def _pad_rows(a, M_pad):
    M = a.shape[0]
    if M_pad == M:
        return a
    return jnp.pad(a, ((0, M_pad - M), (0, 0)))


def _vmem_limit(nbytes):
    return int(min(48 * 2**20, max(16 * 2**20, 2 * int(nbytes))))


def fused_mm_mish(x_rows, w_mat, shift, out_dtype):
    """x_rows:(M,K) bf16, w_mat:(K,C) bf16, shift:(1,C) f32 -> (M,C) out_dtype."""
    M, K = x_rows.shape
    C = w_mat.shape[1]
    tm = _row_tile(M)
    M_pad = -(-M // tm) * tm
    xp = _pad_rows(x_rows, M_pad)
    budget = (2 * tm * K * 2 + K * C * 2 + 2 * tm * C * jnp.dtype(out_dtype).itemsize
              + 8 * C * 4)
    out = pl.pallas_call(
        _mm_mish_kernel,
        out_shape=jax.ShapeDtypeStruct((M_pad, C), out_dtype),
        grid_spec=pltpu.PrefetchScalarGridSpec(
            num_scalar_prefetch=0,
            grid=(M_pad // tm,),
            in_specs=[
                pl.BlockSpec((tm, K), lambda i: (i, 0)),
                pl.BlockSpec((K, C), lambda i: (0, 0)),
                pl.BlockSpec((1, C), lambda i: (0, 0)),
            ],
            out_specs=pl.BlockSpec((tm, C), lambda i: (i, 0)),
        ),
        compiler_params=pltpu.CompilerParams(
            dimension_semantics=("parallel",),
            vmem_limit_bytes=_vmem_limit(budget)),
    )(xp, w_mat, shift)
    return out[:M] if M_pad != M else out


# ---------------------------------------------------------------------------
# Final 1x1 ConvBlock: concat of the 4 branch outputs happens in VMEM inside
# the kernel (no (M, 5*Cout) HBM concat), then one MXU matmul + shift + Mish.
# ---------------------------------------------------------------------------
def _final_kernel(a_ref, b_ref, c_ref, d_ref, w_ref, shift_ref, o_ref):
    cat = jnp.concatenate(
        [a_ref[...], b_ref[...], c_ref[...], d_ref[...]], axis=-1)
    y = jnp.dot(cat, w_ref[...], preferred_element_type=jnp.float32)
    y = y + shift_ref[...]
    o_ref[...] = _mish(y).astype(o_ref.dtype)


def fused_final_mish(parts, w_mat, shift, out_dtype):
    """parts: 4 arrays (M, Ci) bf16; w_mat:(sum Ci, C) bf16; shift:(1,C) f32."""
    M = parts[0].shape[0]
    K, C = w_mat.shape
    tm = _row_tile(M)
    M_pad = -(-M // tm) * tm
    parts = [_pad_rows(p, M_pad) for p in parts]
    in_specs = [pl.BlockSpec((tm, p.shape[1]), lambda i: (i, 0)) for p in parts]
    in_specs += [pl.BlockSpec((K, C), lambda i: (0, 0)),
                 pl.BlockSpec((1, C), lambda i: (0, 0))]
    budget = (sum(2 * tm * p.shape[1] * 2 for p in parts)
              + K * C * 2 + 2 * tm * C * jnp.dtype(out_dtype).itemsize)
    out = pl.pallas_call(
        _final_kernel,
        out_shape=jax.ShapeDtypeStruct((M_pad, C), out_dtype),
        grid_spec=pltpu.PrefetchScalarGridSpec(
            num_scalar_prefetch=0,
            grid=(M_pad // tm,),
            in_specs=in_specs,
            out_specs=pl.BlockSpec((tm, C), lambda i: (i, 0)),
        ),
        compiler_params=pltpu.CompilerParams(
            dimension_semantics=("parallel",),
            vmem_limit_bytes=_vmem_limit(budget)),
    )(*parts, w_mat, shift)
    return out[:M] if M_pad != M else out


# ---------------------------------------------------------------------------
# Fused dilated 3x3x3 ConvBlock: im2col fused into the kernel.
# Grid = (N, D_out, kD).  Each step reads one padded (Hp, Wp, Cin) plane and
# accumulates the 9 (kh, kw) tap matmuls for that kd into a VMEM f32
# accumulator; BN-shift + Mish on the last kd (pl.when).
# ---------------------------------------------------------------------------
def _make_dilated_kernel(dil, H, W, Cin):
    HW = H * W

    def kernel(x_ref, w_ref, shift_ref, o_ref, acc_ref):
        kd = pl.program_id(2)

        @pl.when(kd == 0)
        def _():
            acc_ref[...] = jnp.zeros_like(acc_ref)

        plane = x_ref[0, 0]                      # (Hp, Wp, Cin) bf16
        acc = acc_ref[...]
        for kh in range(3):
            for kw in range(3):
                lhs = plane[kh * dil:kh * dil + H, kw * dil:kw * dil + W, :]
                lhs = lhs.reshape(HW, Cin)
                tap = kh * 3 + kw
                wmat = w_ref[0, tap * Cin:(tap + 1) * Cin, :]   # (Cin, Cout)
                acc = acc + jnp.dot(lhs, wmat,
                                    preferred_element_type=jnp.float32)
        acc_ref[...] = acc

        @pl.when(kd == pl.num_programs(2) - 1)
        def _():
            y = acc_ref[...] + shift_ref[...]
            o_ref[0, 0] = _mish(y).astype(o_ref.dtype)

    return kernel


def dilated_conv_block(x_cl, p, dil):
    """x_cl: (N, D, H, W, Cin) bf16 channels-last. Returns (N*D*H*W, Cout) bf16."""
    N, D, H, W, Cin = x_cl.shape
    w, shift = _fold_convblock(p)                       # (Cout,Cin,3,3,3), (Cout,)
    Cout = w.shape[0]
    # (Cout, Cin, kD, kH, kW) -> (kD, kH*kW*Cin, Cout), taps ordered (kh, kw, cin)
    w_taps = jnp.transpose(w, (2, 3, 4, 1, 0)).reshape(3, 9 * Cin, Cout)
    w_taps = w_taps.astype(jnp.bfloat16)
    shift = shift.reshape(1, Cout).astype(jnp.float32)

    pad = dil                                           # Conv3d padding == dilation
    xp = jnp.pad(x_cl, ((0, 0), (pad, pad), (pad, pad), (pad, pad), (0, 0)))
    Dp, Hp, Wp = D + 2 * pad, H + 2 * pad, W + 2 * pad
    HW = H * W

    kernel = _make_dilated_kernel(dil, H, W, Cin)
    budget = (2 * Hp * Wp * Cin * 2 + 2 * 9 * Cin * Cout * 2
              + HW * Cout * 4 + 2 * HW * Cout * 2)

    out = pl.pallas_call(
        kernel,
        out_shape=jax.ShapeDtypeStruct((N, D, HW, Cout), jnp.bfloat16),
        grid_spec=pltpu.PrefetchScalarGridSpec(
            num_scalar_prefetch=0,
            grid=(N, D, 3),
            in_specs=[
                # one padded HW plane per (n, d_out, kd): Dp index = d + kd*dil
                pl.BlockSpec((1, 1, Hp, Wp, Cin),
                             lambda n, d, kd: (n, d + kd * dil, 0, 0, 0)),
                pl.BlockSpec((1, 9 * Cin, Cout), lambda n, d, kd: (kd, 0, 0)),
                pl.BlockSpec((1, Cout), lambda n, d, kd: (0, 0)),
            ],
            out_specs=pl.BlockSpec((1, 1, HW, Cout),
                                   lambda n, d, kd: (n, d, 0, 0)),
            scratch_shapes=[pltpu.VMEM((HW, Cout), jnp.float32)],
        ),
        compiler_params=pltpu.CompilerParams(
            dimension_semantics=("parallel", "parallel", "arbitrary"),
            vmem_limit_bytes=_vmem_limit(budget)),
    )(xp, w_taps, shift)
    return out.reshape(N * D * HW, Cout)


# ---------------------------------------------------------------------------
# Parameter prep: fold eval-mode BatchNorm (scale into weights, shift separate)
# ---------------------------------------------------------------------------
def _fold_convblock(p, eps=1e-5):
    scale = p['gamma'] / jnp.sqrt(p['rvar'] + eps)                 # (Cout,)
    shift = p['beta'] + (p['b'] - p['rmean']) * scale              # (Cout,)
    w = p['w'] * scale[:, None, None, None, None]
    return w, shift


def _prep_1x1(p):
    w, shift = _fold_convblock(p)
    Cout, Cin = w.shape[0], w.shape[1]
    w_mat = w.reshape(Cout, Cin).T.astype(jnp.bfloat16)            # (Cin, Cout)
    return w_mat, shift.astype(jnp.float32)


def init_convblock(key, cin, cout, k):
    k1, k2, k3, k4 = jax.random.split(key, 4)
    fan_in = cin * k ** 3
    bound = 1.0 / (fan_in ** 0.5)
    return dict(
        w=jax.random.uniform(k1, (cout, cin, k, k, k), jnp.float32, -bound, bound),
        b=jax.random.uniform(k2, (cout,), jnp.float32, -bound, bound),
        gamma=jax.random.uniform(k3, (cout,), jnp.float32, 0.5, 1.5),
        beta=jax.random.uniform(k4, (cout,), jnp.float32, -0.5, 0.5),
        rmean=jnp.zeros((cout,), jnp.float32),
        rvar=jnp.ones((cout,), jnp.float32),
    )


def init_assp_params(key, in_channels, out_channels):
    keys = jax.random.split(key, 6)
    return dict(
        conv_1x1=init_convblock(keys[0], in_channels, out_channels, 1),
        conv_6x6=init_convblock(keys[1], in_channels, out_channels, 3),
        conv_12x12=init_convblock(keys[2], in_channels, out_channels, 3),
        conv_18x18=init_convblock(keys[3], in_channels, out_channels, 3),
        avg_pool_conv=init_convblock(keys[4], in_channels, out_channels, 1),
        final_conv=init_convblock(keys[5], out_channels * 5, out_channels, 1),
    )


# ---------------------------------------------------------------------------
# Forward pass
# ---------------------------------------------------------------------------
@jax.jit
def assp_forward(x, params):
    """x: (N, Cin, D, H, W) float32 -> (N, Cout, D, H, W) float32."""
    N, Cin, D, H, W = x.shape
    M = N * D * H * W

    # NCDHW -> NDHWC once; bf16 once (f32 accumulation inside the kernels).
    x_cl = jnp.transpose(x, (0, 2, 3, 4, 1)).astype(jnp.bfloat16)
    x_rows = x_cl.reshape(M, Cin)

    # conv_1x1 and avg_pool's 1x1 conv consume identical inputs
    # (AdaptiveAvgPool3d((None, None, None)) keeps the spatial size == identity)
    # -> merge into one matmul with doubled output lanes: columns = [x1 | x5].
    w1, s1 = _prep_1x1(params['conv_1x1'])
    w5, s5 = _prep_1x1(params['avg_pool_conv'])
    Cout = w1.shape[1]
    w15 = jnp.concatenate([w1, w5], axis=1)                      # (Cin, 2*Cout)
    s15 = jnp.concatenate([s1, s5]).reshape(1, -1)
    y15 = fused_mm_mish(x_rows, w15, s15, jnp.bfloat16)          # (M, 2*Cout)

    # dilated 3x3x3 branches with im2col fused into the kernel
    y2 = dilated_conv_block(x_cl, params['conv_6x6'], 6)         # (M, Cout)
    y3 = dilated_conv_block(x_cl, params['conv_12x12'], 12)
    y4 = dilated_conv_block(x_cl, params['conv_18x18'], 18)

    # final 1x1 ConvBlock; reorder its K rows to the in-kernel concat order
    # [x1, x5, x2, x3, x4] (torch.cat order is [x1, x2, x3, x4, x5]).
    wf, sf = _prep_1x1(params['final_conv'])                     # (5*Cout, Cout)
    wf = jnp.concatenate([wf[0:Cout], wf[4 * Cout:5 * Cout],
                          wf[Cout:2 * Cout], wf[2 * Cout:3 * Cout],
                          wf[3 * Cout:4 * Cout]], axis=0)
    out = fused_final_mish([y15, y2, y3, y4], wf, sf.reshape(1, -1),
                           jnp.float32)                          # (M, Cout) f32

    out = out.reshape(N, D, H, W, Cout)
    return jnp.transpose(out, (0, 4, 1, 2, 3))                   # back to NCDHW


# ---------------------------------------------------------------------------
if __name__ == "__main__":
    key = jax.random.PRNGKey(0)
    kx, kp = jax.random.split(key)

    N, Cin, Cout = 2, 4, 8
    D = H = W = 8
    x = jax.random.normal(kx, (N, Cin, D, H, W), jnp.float32)

    params = init_assp_params(kp, Cin, Cout)

    y = assp_forward(x, params)
    jax.block_until_ready(y)

    assert y.shape == (N, Cout, D, H, W), y.shape
    assert bool(jnp.all(jnp.isfinite(y)))
    print("KERNEL_OK")
</pallas_src>

<mosaic_0001>
module attributes {stable_mosaic.version = 11 : i64} {
  func.func @_mm_mish_kernel(%arg0: i32, %arg1: memref<512x4xbf16, #tpu.memory_space<vmem>>, %arg2: memref<4x16xbf16, #tpu.memory_space<vmem>>, %arg3: memref<1x16xf32, #tpu.memory_space<vmem>>, %arg4: memref<512x16xbf16, #tpu.memory_space<vmem>>) attributes {dimension_semantics = [#tpu.dimension_semantics<parallel>], iteration_bounds = array<i64: 2>, scalar_prefetch = 0 : i64, scratch_operands = 0 : i64, tpu.core_type = #tpu.core_type<tc>, window_params = [{transform_indices = @transform_0, window_bounds = array<i64: 512, 4>}, {pipeline_mode = #tpu.pipeline_mode<synchronous>, transform_indices = @transform_1, window_bounds = array<i64: 4, 16>}, {pipeline_mode = #tpu.pipeline_mode<synchronous>, transform_indices = @transform_2, window_bounds = array<i64: 1, 16>}, {transform_indices = @transform_3, window_bounds = array<i64: 512, 16>}]} {
    %c0 = arith.constant 0 : index
    %c0_0 = arith.constant 0 : index
    %0 = vector.load %arg1[%c0, %c0_0] : memref<512x4xbf16, #tpu.memory_space<vmem>>, vector<512x4xbf16>
    %c0_1 = arith.constant 0 : index
    %c0_2 = arith.constant 0 : index
    %1 = vector.load %arg2[%c0_1, %c0_2] : memref<4x16xbf16, #tpu.memory_space<vmem>>, vector<4x16xbf16>
    %cst = arith.constant dense<0.000000e+00> : vector<512x16xf32>
    %2 = tpu.matmul %0, %1, %cst {dimension_numbers = #tpu.dot_dimension_numbers<[1], [0], [0], [1], [0, 0, 1, 1], [], []>} : vector<512x4xbf16>, vector<4x16xbf16>, vector<512x16xf32> -> vector<512x16xf32>
    %c0_3 = arith.constant 0 : index
    %c0_4 = arith.constant 0 : index
    %3 = vector.load %arg3[%c0_3, %c0_4] : memref<1x16xf32, #tpu.memory_space<vmem>>, vector<1x16xf32>
    %4 = vector.broadcast %3 : vector<1x16xf32> to vector<512x16xf32>
    %5 = arith.addf %2, %4 : vector<512x16xf32>
    %cst_5 = arith.constant 2.000000e+01 : f32
    %6 = vector.broadcast %cst_5 : f32 to vector<512x16xf32>
    %7 = arith.minimumf %5, %6 : vector<512x16xf32>
    %8 = math.exp %7 : vector<512x16xf32>
    %cst_6 = arith.constant 1.000000e+00 : f32
    %9 = vector.broadcast %cst_6 : f32 to vector<512x16xf32>
    %10 = arith.addf %9, %8 : vector<512x16xf32>
    %cst_7 = arith.constant 1.000000e+00 : f32
    %11 = vector.broadcast %cst_7 : f32 to vector<512x16xf32>
    %12 = arith.addf %11, %8 : vector<512x16xf32>
    %13 = arith.mulf %10, %12 : vector<512x16xf32>
    %cst_8 = arith.constant 1.000000e+00 : f32
    %14 = vector.broadcast %cst_8 : f32 to vector<512x16xf32>
    %15 = arith.subf %13, %14 : vector<512x16xf32>
    %cst_9 = arith.constant 1.000000e+00 : f32
    %16 = vector.broadcast %cst_9 : f32 to vector<512x16xf32>
    %17 = arith.addf %13, %16 : vector<512x16xf32>
    %18 = arith.divf %15, %17 : vector<512x16xf32>
    %19 = arith.mulf %5, %18 : vector<512x16xf32>
    %20 = arith.truncf %19 : vector<512x16xf32> to vector<512x16xbf16>
    %c0_10 = arith.constant 0 : index
    %c0_11 = arith.constant 0 : index
    %21 = vector.load %arg4[%c0_10, %c0_11] : memref<512x16xbf16, #tpu.memory_space<vmem>>, vector<512x16xbf16>
    tpu.vector_store %arg4[%c0_10, %c0_11], %20 {strides = array<i32>} : memref<512x16xbf16, #tpu.memory_space<vmem>>, vector<512x16xbf16>,
    return
  }
  func.func @transform_0(%arg0: i32) -> (i32, i32) {
    %c0_i32 = arith.constant 0 : i32
    %c0_i32_0 = arith.constant 0 : i32
    return %arg0, %c0_i32 : i32, i32
  }
  func.func @transform_1(%arg0: i32) -> (i32, i32) {
    %c0_i32 = arith.constant 0 : i32
    %c0_i32_0 = arith.constant 0 : i32
    %c0_i32_1 = arith.constant 0 : i32
    return %c0_i32, %c0_i32_0 : i32, i32
  }
  func.func @transform_2(%arg0: i32) -> (i32, i32) {
    %c0_i32 = arith.constant 0 : i32
    %c0_i32_0 = arith.constant 0 : i32
    %c0_i32_1 = arith.constant 0 : i32
    return %c0_i32, %c0_i32_0 : i32, i32
  }
  func.func @transform_3(%arg0: i32) -> (i32, i32) {
    %c0_i32 = arith.constant 0 : i32
    %c0_i32_0 = arith.constant 0 : i32
    return %arg0, %c0_i32 : i32, i32
  }
}

module attributes {stable_mosaic.version = 11 : i64} {
  func.func @kernel(%arg0: i32, %arg1: i32, %arg2: i32, %arg3: memref<1x1x44x44x4xbf16, #tpu.memory_space<vmem>>, %arg4: memref<1x36x8xbf16, #tpu.memory_space<vmem>>, %arg5: memref<1x8xf32, #tpu.memory_space<vmem>>, %arg6: memref<1x1x64x8xbf16, #tpu.memory_space<vmem>>, %arg7: memref<64x8xf32, #tpu.memory_space<vmem>>) attributes {dimension_semantics = [#tpu.dimension_semantics<parallel>, #tpu.dimension_semantics<parallel>, #tpu.dimension_semantics<arbitrary>], iteration_bounds = array<i64: 2, 8, 3>, scalar_prefetch = 0 : i64, scratch_operands = 1 : i64, tpu.core_type = #tpu.core_type<tc>, window_params = [{transform_indices = @transform_0, window_bounds = array<i64: 1, 1, 44, 44, 4>}, {transform_indices = @transform_1, window_bounds = array<i64: 1, 36, 8>}, {pipeline_mode = #tpu.pipeline_mode<synchronous>, transform_indices = @transform_2, window_bounds = array<i64: 1, 8>}, {transform_indices = @transform_3, window_bounds = array<i64: 1, 1, 64, 8>}]} {
    %c0_i32 = arith.constant 0 : i32
    %0 = arith.cmpi eq, %arg2, %c0_i32 : i32
    %1 = arith.extui %0 : i1 to i32
    %c0_i32_0 = arith.constant 0 : i32
    %2 = arith.cmpi ne, %1, %c0_i32_0 : i32
    scf.if %2 {
      %cst_37 = arith.constant 0.000000e+00 : f32
      %64 = vector.broadcast %cst_37 : f32 to vector<64x8xf32>
      %c0_38 = arith.constant 0 : index
      %c0_39 = arith.constant 0 : index
      %65 = vector.load %arg7[%c0_38, %c0_39] : memref<64x8xf32, #tpu.memory_space<vmem>>, vector<64x8xf32>
      tpu.vector_store %arg7[%c0_38, %c0_39], %64 {strides = array<i32>} : memref<64x8xf32, #tpu.memory_space<vmem>>, vector<64x8xf32>,
    } else {
    }
    %c0 = arith.constant 0 : index
    %c0_1 = arith.constant 0 : index
    %c0_2 = arith.constant 0 : index
    %c0_3 = arith.constant 0 : index
    %c0_4 = arith.constant 0 : index
    %3 = vector.load %arg3[%c0, %c0_1, %c0_2, %c0_3, %c0_4] : memref<1x1x44x44x4xbf16, #tpu.memory_space<vmem>>, vector<1x1x44x44x4xbf16>
    %4 = vector.shape_cast %3 : vector<1x1x44x44x4xbf16> to vector<44x44x4xbf16>
    %c0_5 = arith.constant 0 : index
    %c0_6 = arith.constant 0 : index
    %5 = vector.load %arg7[%c0_5, %c0_6] : memref<64x8xf32, #tpu.memory_space<vmem>>, vector<64x8xf32>
    %6 = vector.extract_strided_slice %4 {offsets = [0, 0, 0], sizes = [8, 8, 4], strides = [1, 1, 1]} : vector<44x44x4xbf16> to vector<8x8x4xbf16>
    %7 = vector.shape_cast %6 : vector<8x8x4xbf16> to vector<64x4xbf16>
    %c0_7 = arith.constant 0 : index
    %c0_8 = arith.constant 0 : index
    %c0_9 = arith.constant 0 : index
    %8 = vector.load %arg4[%c0_7, %c0_8, %c0_9] : memref<1x36x8xbf16, #tpu.memory_space<vmem>>, vector<1x4x8xbf16>
    %9 = vector.shape_cast %8 : vector<1x4x8xbf16> to vector<4x8xbf16>
    %cst = arith.constant dense<0.000000e+00> : vector<64x8xf32>
    %10 = tpu.matmul %7, %9, %cst {dimension_numbers = #tpu.dot_dimension_numbers<[1], [0], [0], [1], [0, 0, 1, 1], [], []>} : vector<64x4xbf16>, vector<4x8xbf16>, vector<64x8xf32> -> vector<64x8xf32>
    %11 = arith.addf %5, %10 : vector<64x8xf32>
    %12 = vector.extract_strided_slice %4 {offsets = [0, 18, 0], sizes = [8, 8, 4], strides = [1, 1, 1]} : vector<44x44x4xbf16> to vector<8x8x4xbf16>
    %13 = vector.shape_cast %12 : vector<8x8x4xbf16> to vector<64x4xbf16>
    %c0_10 = arith.constant 0 : index
    %c4 = arith.constant 4 : index
    %c0_11 = arith.constant 0 : index
    %14 = vector.load %arg4[%c0_10, %c4, %c0_11] : memref<1x36x8xbf16, #tpu.memory_space<vmem>>, vector<1x4x8xbf16>
    %15 = vector.shape_cast %14 : vector<1x4x8xbf16> to vector<4x8xbf16>
    %cst_12 = arith.constant dense<0.000000e+00> : vector<64x8xf32>
    %16 = tpu.matmul %13, %15, %cst_12 {dimension_numbers = #tpu.dot_dimension_numbers<[1], [0], [0], [1], [0, 0, 1, 1], [], []>} : vector<64x4xbf16>, vector<4x8xbf16>, vector<64x8xf32> -> vector<64x8xf32>
    %17 = arith.addf %11, %16 : vector<64x8xf32>
    %18 = vector.extract_strided_slice %4 {offsets = [0, 36, 0], sizes = [8, 8, 4], strides = [1, 1, 1]} : vector<44x44x4xbf16> to vector<8x8x4xbf16>
    %19 = vector.shape_cast %18 : vector<8x8x4xbf16> to vector<64x4xbf16>
    %c0_13 = arith.constant 0 : index
    %c8 = arith.constant 8 : index
    %c0_14 = arith.constant 0 : index
    %20 = vector.load %arg4[%c0_13, %c8, %c0_14] : memref<1x36x8xbf16, #tpu.memory_space<vmem>>, vector<1x4x8xbf16>
    %21 = vector.shape_cast %20 : vector<1x4x8xbf16> to vector<4x8xbf16>
    %cst_15 = arith.constant dense<0.000000e+00> : vector<64x8xf32>
    %22 = tpu.matmul %19, %21, %cst_15 {dimension_numbers = #tpu.dot_dimension_numbers<[1], [0], [0], [1], [0, 0, 1, 1], [], []>} : vector<64x4xbf16>, vector<4x8xbf16>, vector<64x8xf32> -> vector<64x8xf32>
    %23 = arith.addf %17, %22 : vector<64x8xf32>
    %24 = vector.extract_strided_slice %4 {offsets = [18, 0, 0], sizes = [8, 8, 4], strides = [1, 1, 1]} : vector<44x44x4xbf16> to vector<8x8x4xbf16>
    %25 = vector.shape_cast %24 : vector<8x8x4xbf16> to vector<64x4xbf16>
    %c0_16 = arith.constant 0 : index
    %c12 = arith.constant 12 : index
    %c0_17 = arith.constant 0 : index
    %26 = vector.load %arg4[%c0_16, %c12, %c0_17] : memref<1x36x8xbf16, #tpu.memory_space<vmem>>, vector<1x4x8xbf16>
    %27 = vector.shape_cast %26 : vector<1x4x8xbf16> to vector<4x8xbf16>
    %cst_18 = arith.constant dense<0.000000e+00> : vector<64x8xf32>
    %28 = tpu.matmul %25, %27, %cst_18 {dimension_numbers = #tpu.dot_dimension_numbers<[1], [0], [0], [1], [0, 0, 1, 1], [], []>} : vector<64x4xbf16>, vector<4x8xbf16>, vector<64x8xf32> -> vector<64x8xf32>
    %29 = arith.addf %23, %28 : vector<64x8xf32>
    %30 = vector.extract_strided_slice %4 {offsets = [18, 18, 0], sizes = [8, 8, 4], strides = [1, 1, 1]} : vector<44x44x4xbf16> to vector<8x8x4xbf16>
    %31 = vector.shape_cast %30 : vector<8x8x4xbf16> to vector<64x4xbf16>
    %c0_19 = arith.constant 0 : index
    %c16 = arith.constant 16 : index
    %c0_20 = arith.constant 0 : index
    %32 = vector.load %arg4[%c0_19, %c16, %c0_20] : memref<1x36x8xbf16, #tpu.memory_space<vmem>>, vector<1x4x8xbf16>
    %33 = vector.shape_cast %32 : vector<1x4x8xbf16> to vector<4x8xbf16>
    %cst_21 = arith.constant dense<0.000000e+00> : vector<64x8xf32>
    %34 = tpu.matmul %31, %33, %cst_21 {dimension_numbers = #tpu.dot_dimension_numbers<[1], [0], [0], [1], [0, 0, 1, 1], [], []>} : vector<64x4xbf16>, vector<4x8xbf16>, vector<64x8xf32> -> vector<64x8xf32>
    %35 = arith.addf %29, %34 : vector<64x8xf32>
    %36 = vector.extract_strided_slice %4 {offsets = [18, 36, 0], sizes = [8, 8, 4], strides = [1, 1, 1]} : vector<44x44x4xbf16> to vector<8x8x4xbf16>
    %37 = vector.shape_cast %36 : vector<8x8x4xbf16> to vector<64x4xbf16>
    %c0_22 = arith.constant 0 : index
    %c20 = arith.constant 20 : index
    %c0_23 = arith.constant 0 : index
    %38 = vector.load %arg4[%c0_22, %c20, %c0_23] : memref<1x36x8xbf16, #tpu.memory_space<vmem>>, vector<1x4x8xbf16>
    %39 = vector.shape_cast %38 : vector<1x4x8xbf16> to vector<4x8xbf16>
    %cst_24 = arith.constant dense<0.000000e+00> : vector<64x8xf32>
    %40 = tpu.matmul %37, %39, %cst_24 {dimension_numbers = #tpu.dot_dimension_numbers<[1], [0], [0], [1], [0, 0, 1, 1], [], []>} : vector<64x4xbf16>, vector<4x8xbf16>, vector<64x8xf32> -> vector<64x8xf32>
    %41 = arith.addf %35, %40 : vector<64x8xf32>
    %42 = vector.extract_strided_slice %4 {offsets = [36, 0, 0], sizes = [8, 8, 4], strides = [1, 1, 1]} : vector<44x44x4xbf16> to vector<8x8x4xbf16>
    %43 = vector.shape_cast %42 : vector<8x8x4xbf16> to vector<64x4xbf16>
    %c0_25 = arith.constant 0 : index
    %c24 = arith.constant 24 : index
    %c0_26 = arith.constant 0 : index
    %44 = vector.load %arg4[%c0_25, %c24, %c0_26] : memref<1x36x8xbf16, #tpu.memory_space<vmem>>, vector<1x4x8xbf16>
    %45 = vector.shape_cast %44 : vector<1x4x8xbf16> to vector<4x8xbf16>
    %cst_27 = arith.constant dense<0.000000e+00> : vector<64x8xf32>
    %46 = tpu.matmul %43, %45, %cst_27 {dimension_numbers = #tpu.dot_dimension_numbers<[1], [0], [0], [1], [0, 0, 1, 1], [], []>} : vector<64x4xbf16>, vector<4x8xbf16>, vector<64x8xf32> -> vector<64x8xf32>
    %47 = arith.addf %41, %46 : vector<64x8xf32>
    %48 = vector.extract_strided_slice %4 {offsets = [36, 18, 0], sizes = [8, 8, 4], strides = [1, 1, 1]} : vector<44x44x4xbf16> to vector<8x8x4xbf16>
    %49 = vector.shape_cast %48 : vector<8x8x4xbf16> to vector<64x4xbf16>
    %c0_28 = arith.constant 0 : index
    %c28 = arith.constant 28 : index
    %c0_29 = arith.constant 0 : index
    %50 = vector.load %arg4[%c0_28, %c28, %c0_29] : memref<1x36x8xbf16, #tpu.memory_space<vmem>>, vector<1x4x8xbf16>
    %51 = vector.shape_cast %50 : vector<1x4x8xbf16> to vector<4x8xbf16>
    %cst_30 = arith.constant dense<0.000000e+00> : vector<64x8xf32>
    %52 = tpu.matmul %49, %51, %cst_30 {dimension_numbers = #tpu.dot_dimension_numbers<[1], [0], [0], [1], [0, 0, 1, 1], [], []>} : vector<64x4xbf16>, vector<4x8xbf16>, vector<64x8xf32> -> vector<64x8xf32>
    %53 = arith.addf %47, %52 : vector<64x8xf32>
    %54 = vector.extract_strided_slice %4 {offsets = [36, 36, 0], sizes = [8, 8, 4], strides = [1, 1, 1]} : vector<44x44x4xbf16> to vector<8x8x4xbf16>
    %55 = vector.shape_cast %54 : vector<8x8x4xbf16> to vector<64x4xbf16>
    %c0_31 = arith.constant 0 : index
    %c32 = arith.constant 32 : index
    %c0_32 = arith.constant 0 : index
    %56 = vector.load %arg4[%c0_31, %c32, %c0_32] : memref<1x36x8xbf16, #tpu.memory_space<vmem>>, vector<1x4x8xbf16>
    %57 = vector.shape_cast %56 : vector<1x4x8xbf16> to vector<4x8xbf16>
    %cst_33 = arith.constant dense<0.000000e+00> : vector<64x8xf32>
    %58 = tpu.matmul %55, %57, %cst_33 {dimension_numbers = #tpu.dot_dimension_numbers<[1], [0], [0], [1], [0, 0, 1, 1], [], []>} : vector<64x4xbf16>, vector<4x8xbf16>, vector<64x8xf32> -> vector<64x8xf32>
    %59 = arith.addf %53, %58 : vector<64x8xf32>
    %c0_34 = arith.constant 0 : index
    %c0_35 = arith.constant 0 : index
    %60 = vector.load %arg7[%c0_34, %c0_35] : memref<64x8xf32, #tpu.memory_space<vmem>>, vector<64x8xf32>
    tpu.vector_store %arg7[%c0_34, %c0_35], %59 {strides = array<i32>} : memref<64x8xf32, #tpu.memory_space<vmem>>, vector<64x8xf32>,
    %c2_i32 = arith.constant 2 : i32
    %61 = arith.cmpi eq, %arg2, %c2_i32 : i32
    %62 = arith.extui %61 : i1 to i32
    %c0_i32_36 = arith.constant 0 : i32
    %63 = arith.cmpi ne, %62, %c0_i32_36 : i32
    scf.if %63 {
      %c0_37 = arith.constant 0 : index
      %c0_38 = arith.constant 0 : index
      %64 = vector.load %arg7[%c0_37, %c0_38] : memref<64x8xf32, #tpu.memory_space<vmem>>, vector<64x8xf32>
      %c0_39 = arith.constant 0 : index
      %c0_40 = arith.constant 0 : index
      %65 = vector.load %arg5[%c0_39, %c0_40] : memref<1x8xf32, #tpu.memory_space<vmem>>, vector<1x8xf32>
      %66 = vector.broadcast %65 : vector<1x8xf32> to vector<64x8xf32>
      %67 = arith.addf %64, %66 : vector<64x8xf32>
      %cst_41 = arith.constant 2.000000e+01 : f32
      %68 = vector.broadcast %cst_41 : f32 to vector<64x8xf32>
      %69 = arith.minimumf %67, %68 : vector<64x8xf32>
      %70 = math.exp %69 : vector<64x8xf32>
      %cst_42 = arith.constant 1.000000e+00 : f32
      %71 = vector.broadcast %cst_42 : f32 to vector<64x8xf32>
      %72 = arith.addf %71, %70 : vector<64x8xf32>
      %cst_43 = arith.constant 1.000000e+00 : f32
      %73 = vector.broadcast %cst_43 : f32 to vector<64x8xf32>
      %74 = arith.addf %73, %70 : vector<64x8xf32>
      %75 = arith.mulf %72, %74 : vector<64x8xf32>
      %cst_44 = arith.constant 1.000000e+00 : f32
      %76 = vector.broadcast %cst_44 : f32 to vector<64x8xf32>
      %77 = arith.subf %75, %76 : vector<64x8xf32>
      %cst_45 = arith.constant 1.000000e+00 : f32
      %78 = vector.broadcast %cst_45 : f32 to vector<64x8xf32>
      %79 = arith.addf %75, %78 : vector<64x8xf32>
      %80 = arith.divf %77, %79 : vector<64x8xf32>
      %81 = arith.mulf %67, %80 : vector<64x8xf32>
      %82 = arith.truncf %81 : vector<64x8xf32> to vector<64x8xbf16>
      %c0_46 = arith.constant 0 : index
      %c0_47 = arith.constant 0 : index
      %c0_48 = arith.constant 0 : index
      %c0_49 = arith.constant 0 : index
      %83 = vector.load %arg6[%c0_46, %c0_47, %c0_48, %c0_49] : memref<1x1x64x8xbf16, #tpu.memory_space<vmem>>, vector<1x1x64x8xbf16>
      %84 = vector.shape_cast %83 : vector<1x1x64x8xbf16> to vector<64x8xbf16>
      %85 = vector.shape_cast %82 : vector<64x8xbf16> to vector<1x1x64x8xbf16>
      tpu.vector_store %arg6[%c0_46, %c0_47, %c0_48, %c0_49], %85 {strides = array<i32>} : memref<1x1x64x8xbf16, #tpu.memory_space<vmem>>, vector<1x1x64x8xbf16>,
    } else {
    }
    return
  }
  func.func @transform_0(%arg0: i32, %arg1: i32, %arg2: i32) -> (i32, i32, i32, i32, i32) {
    %c18_i32 = arith.constant 18 : i32
    %0 = arith.muli %arg2, %c18_i32 : i32
    %1 = arith.addi %arg1, %0 : i32
    %c0_i32 = arith.constant 0 : i32
    %c0_i32_0 = arith.constant 0 : i32
    %c0_i32_1 = arith.constant 0 : i32
    %c0_i32_2 = arith.constant 0 : i32
    return %arg0, %1, %c0_i32, %c0_i32_0, %c0_i32_1 : i32, i32, i32, i32, i32
  }
  func.func @transform_1(%arg0: i32, %arg1: i32, %arg2: i32) -> (i32, i32, i32) {
    %c0_i32 = arith.constant 0 : i32
    %c0_i32_0 = arith.constant 0 : i32
    %c0_i32_1 = arith.constant 0 : i32
    return %arg2, %c0_i32, %c0_i32_0 : i32, i32, i32
  }
  func.func @transform_2(%arg0: i32, %arg1: i32, %arg2: i32) -> (i32, i32) {
    %c0_i32 = arith.constant 0 : i32
    %c0_i32_0 = arith.constant 0 : i32
    %c0_i32_1 = arith.constant 0 : i32
    return %c0_i32, %c0_i32_0 : i32, i32
  }
  func.func @transform_3(%arg0: i32, %arg1: i32, %arg2: i32) -> (i32, i32, i32, i32) {
    %c0_i32 = arith.constant 0 : i32
    %c0_i32_0 = arith.constant 0 : i32
    %c0_i32_1 = arith.constant 0 : i32
    return %arg0, %arg1, %c0_i32, %c0_i32_0 : i32, i32, i32, i32
  }
}

module attributes {stable_mosaic.version = 11 : i64} {
  func.func @kernel(%arg0: i32, %arg1: i32, %arg2: i32, %arg3: memref<1x1x32x32x4xbf16, #tpu.memory_space<vmem>>, %arg4: memref<1x36x8xbf16, #tpu.memory_space<vmem>>, %arg5: memref<1x8xf32, #tpu.memory_space<vmem>>, %arg6: memref<1x1x64x8xbf16, #tpu.memory_space<vmem>>, %arg7: memref<64x8xf32, #tpu.memory_space<vmem>>) attributes {dimension_semantics = [#tpu.dimension_semantics<parallel>, #tpu.dimension_semantics<parallel>, #tpu.dimension_semantics<arbitrary>], iteration_bounds = array<i64: 2, 8, 3>, scalar_prefetch = 0 : i64, scratch_operands = 1 : i64, tpu.core_type = #tpu.core_type<tc>, window_params = [{transform_indices = @transform_0, window_bounds = array<i64: 1, 1, 32, 32, 4>}, {transform_indices = @transform_1, window_bounds = array<i64: 1, 36, 8>}, {pipeline_mode = #tpu.pipeline_mode<synchronous>, transform_indices = @transform_2, window_bounds = array<i64: 1, 8>}, {transform_indices = @transform_3, window_bounds = array<i64: 1, 1, 64, 8>}]} {
    %c0_i32 = arith.constant 0 : i32
    %0 = arith.cmpi eq, %arg2, %c0_i32 : i32
    %1 = arith.extui %0 : i1 to i32
    %c0_i32_0 = arith.constant 0 : i32
    %2 = arith.cmpi ne, %1, %c0_i32_0 : i32
    scf.if %2 {
      %cst_37 = arith.constant 0.000000e+00 : f32
      %64 = vector.broadcast %cst_37 : f32 to vector<64x8xf32>
      %c0_38 = arith.constant 0 : index
      %c0_39 = arith.constant 0 : index
      %65 = vector.load %arg7[%c0_38, %c0_39] : memref<64x8xf32, #tpu.memory_space<vmem>>, vector<64x8xf32>
      tpu.vector_store %arg7[%c0_38, %c0_39], %64 {strides = array<i32>} : memref<64x8xf32, #tpu.memory_space<vmem>>, vector<64x8xf32>,
    } else {
    }
    %c0 = arith.constant 0 : index
    %c0_1 = arith.constant 0 : index
    %c0_2 = arith.constant 0 : index
    %c0_3 = arith.constant 0 : index
    %c0_4 = arith.constant 0 : index
    %3 = vector.load %arg3[%c0, %c0_1, %c0_2, %c0_3, %c0_4] : memref<1x1x32x32x4xbf16, #tpu.memory_space<vmem>>, vector<1x1x32x32x4xbf16>
    %4 = vector.shape_cast %3 : vector<1x1x32x32x4xbf16> to vector<32x32x4xbf16>
    %c0_5 = arith.constant 0 : index
    %c0_6 = arith.constant 0 : index
    %5 = vector.load %arg7[%c0_5, %c0_6] : memref<64x8xf32, #tpu.memory_space<vmem>>, vector<64x8xf32>
    %6 = vector.extract_strided_slice %4 {offsets = [0, 0, 0], sizes = [8, 8, 4], strides = [1, 1, 1]} : vector<32x32x4xbf16> to vector<8x8x4xbf16>
    %7 = vector.shape_cast %6 : vector<8x8x4xbf16> to vector<64x4xbf16>
    %c0_7 = arith.constant 0 : index
    %c0_8 = arith.constant 0 : index
    %c0_9 = arith.constant 0 : index
    %8 = vector.load %arg4[%c0_7, %c0_8, %c0_9] : memref<1x36x8xbf16, #tpu.memory_space<vmem>>, vector<1x4x8xbf16>
    %9 = vector.shape_cast %8 : vector<1x4x8xbf16> to vector<4x8xbf16>
    %cst = arith.constant dense<0.000000e+00> : vector<64x8xf32>
    %10 = tpu.matmul %7, %9, %cst {dimension_numbers = #tpu.dot_dimension_numbers<[1], [0], [0], [1], [0, 0, 1, 1], [], []>} : vector<64x4xbf16>, vector<4x8xbf16>, vector<64x8xf32> -> vector<64x8xf32>
    %11 = arith.addf %5, %10 : vector<64x8xf32>
    %12 = vector.extract_strided_slice %4 {offsets = [0, 12, 0], sizes = [8, 8, 4], strides = [1, 1, 1]} : vector<32x32x4xbf16> to vector<8x8x4xbf16>
    %13 = vector.shape_cast %12 : vector<8x8x4xbf16> to vector<64x4xbf16>
    %c0_10 = arith.constant 0 : index
    %c4 = arith.constant 4 : index
    %c0_11 = arith.constant 0 : index
    %14 = vector.load %arg4[%c0_10, %c4, %c0_11] : memref<1x36x8xbf16, #tpu.memory_space<vmem>>, vector<1x4x8xbf16>
    %15 = vector.shape_cast %14 : vector<1x4x8xbf16> to vector<4x8xbf16>
    %cst_12 = arith.constant dense<0.000000e+00> : vector<64x8xf32>
    %16 = tpu.matmul %13, %15, %cst_12 {dimension_numbers = #tpu.dot_dimension_numbers<[1], [0], [0], [1], [0, 0, 1, 1], [], []>} : vector<64x4xbf16>, vector<4x8xbf16>, vector<64x8xf32> -> vector<64x8xf32>
    %17 = arith.addf %11, %16 : vector<64x8xf32>
    %18 = vector.extract_strided_slice %4 {offsets = [0, 24, 0], sizes = [8, 8, 4], strides = [1, 1, 1]} : vector<32x32x4xbf16> to vector<8x8x4xbf16>
    %19 = vector.shape_cast %18 : vector<8x8x4xbf16> to vector<64x4xbf16>
    %c0_13 = arith.constant 0 : index
    %c8 = arith.constant 8 : index
    %c0_14 = arith.constant 0 : index
    %20 = vector.load %arg4[%c0_13, %c8, %c0_14] : memref<1x36x8xbf16, #tpu.memory_space<vmem>>, vector<1x4x8xbf16>
    %21 = vector.shape_cast %20 : vector<1x4x8xbf16> to vector<4x8xbf16>
    %cst_15 = arith.constant dense<0.000000e+00> : vector<64x8xf32>
    %22 = tpu.matmul %19, %21, %cst_15 {dimension_numbers = #tpu.dot_dimension_numbers<[1], [0], [0], [1], [0, 0, 1, 1], [], []>} : vector<64x4xbf16>, vector<4x8xbf16>, vector<64x8xf32> -> vector<64x8xf32>
    %23 = arith.addf %17, %22 : vector<64x8xf32>
    %24 = vector.extract_strided_slice %4 {offsets = [12, 0, 0], sizes = [8, 8, 4], strides = [1, 1, 1]} : vector<32x32x4xbf16> to vector<8x8x4xbf16>
    %25 = vector.shape_cast %24 : vector<8x8x4xbf16> to vector<64x4xbf16>
    %c0_16 = arith.constant 0 : index
    %c12 = arith.constant 12 : index
    %c0_17 = arith.constant 0 : index
    %26 = vector.load %arg4[%c0_16, %c12, %c0_17] : memref<1x36x8xbf16, #tpu.memory_space<vmem>>, vector<1x4x8xbf16>
    %27 = vector.shape_cast %26 : vector<1x4x8xbf16> to vector<4x8xbf16>
    %cst_18 = arith.constant dense<0.000000e+00> : vector<64x8xf32>
    %28 = tpu.matmul %25, %27, %cst_18 {dimension_numbers = #tpu.dot_dimension_numbers<[1], [0], [0], [1], [0, 0, 1, 1], [], []>} : vector<64x4xbf16>, vector<4x8xbf16>, vector<64x8xf32> -> vector<64x8xf32>
    %29 = arith.addf %23, %28 : vector<64x8xf32>
    %30 = vector.extract_strided_slice %4 {offsets = [12, 12, 0], sizes = [8, 8, 4], strides = [1, 1, 1]} : vector<32x32x4xbf16> to vector<8x8x4xbf16>
    %31 = vector.shape_cast %30 : vector<8x8x4xbf16> to vector<64x4xbf16>
    %c0_19 = arith.constant 0 : index
    %c16 = arith.constant 16 : index
    %c0_20 = arith.constant 0 : index
    %32 = vector.load %arg4[%c0_19, %c16, %c0_20] : memref<1x36x8xbf16, #tpu.memory_space<vmem>>, vector<1x4x8xbf16>
    %33 = vector.shape_cast %32 : vector<1x4x8xbf16> to vector<4x8xbf16>
    %cst_21 = arith.constant dense<0.000000e+00> : vector<64x8xf32>
    %34 = tpu.matmul %31, %33, %cst_21 {dimension_numbers = #tpu.dot_dimension_numbers<[1], [0], [0], [1], [0, 0, 1, 1], [], []>} : vector<64x4xbf16>, vector<4x8xbf16>, vector<64x8xf32> -> vector<64x8xf32>
    %35 = arith.addf %29, %34 : vector<64x8xf32>
    %36 = vector.extract_strided_slice %4 {offsets = [12, 24, 0], sizes = [8, 8, 4], strides = [1, 1, 1]} : vector<32x32x4xbf16> to vector<8x8x4xbf16>
    %37 = vector.shape_cast %36 : vector<8x8x4xbf16> to vector<64x4xbf16>
    %c0_22 = arith.constant 0 : index
    %c20 = arith.constant 20 : index
    %c0_23 = arith.constant 0 : index
    %38 = vector.load %arg4[%c0_22, %c20, %c0_23] : memref<1x36x8xbf16, #tpu.memory_space<vmem>>, vector<1x4x8xbf16>
    %39 = vector.shape_cast %38 : vector<1x4x8xbf16> to vector<4x8xbf16>
    %cst_24 = arith.constant dense<0.000000e+00> : vector<64x8xf32>
    %40 = tpu.matmul %37, %39, %cst_24 {dimension_numbers = #tpu.dot_dimension_numbers<[1], [0], [0], [1], [0, 0, 1, 1], [], []>} : vector<64x4xbf16>, vector<4x8xbf16>, vector<64x8xf32> -> vector<64x8xf32>
    %41 = arith.addf %35, %40 : vector<64x8xf32>
    %42 = vector.extract_strided_slice %4 {offsets = [24, 0, 0], sizes = [8, 8, 4], strides = [1, 1, 1]} : vector<32x32x4xbf16> to vector<8x8x4xbf16>
    %43 = vector.shape_cast %42 : vector<8x8x4xbf16> to vector<64x4xbf16>
    %c0_25 = arith.constant 0 : index
    %c24 = arith.constant 24 : index
    %c0_26 = arith.constant 0 : index
    %44 = vector.load %arg4[%c0_25, %c24, %c0_26] : memref<1x36x8xbf16, #tpu.memory_space<vmem>>, vector<1x4x8xbf16>
    %45 = vector.shape_cast %44 : vector<1x4x8xbf16> to vector<4x8xbf16>
    %cst_27 = arith.constant dense<0.000000e+00> : vector<64x8xf32>
    %46 = tpu.matmul %43, %45, %cst_27 {dimension_numbers = #tpu.dot_dimension_numbers<[1], [0], [0], [1], [0, 0, 1, 1], [], []>} : vector<64x4xbf16>, vector<4x8xbf16>, vector<64x8xf32> -> vector<64x8xf32>
    %47 = arith.addf %41, %46 : vector<64x8xf32>
    %48 = vector.extract_strided_slice %4 {offsets = [24, 12, 0], sizes = [8, 8, 4], strides = [1, 1, 1]} : vector<32x32x4xbf16> to vector<8x8x4xbf16>
    %49 = vector.shape_cast %48 : vector<8x8x4xbf16> to vector<64x4xbf16>
    %c0_28 = arith.constant 0 : index
    %c28 = arith.constant 28 : index
    %c0_29 = arith.constant 0 : index
    %50 = vector.load %arg4[%c0_28, %c28, %c0_29] : memref<1x36x8xbf16, #tpu.memory_space<vmem>>, vector<1x4x8xbf16>
    %51 = vector.shape_cast %50 : vector<1x4x8xbf16> to vector<4x8xbf16>
    %cst_30 = arith.constant dense<0.000000e+00> : vector<64x8xf32>
    %52 = tpu.matmul %49, %51, %cst_30 {dimension_numbers = #tpu.dot_dimension_numbers<[1], [0], [0], [1], [0, 0, 1, 1], [], []>} : vector<64x4xbf16>, vector<4x8xbf16>, vector<64x8xf32> -> vector<64x8xf32>
    %53 = arith.addf %47, %52 : vector<64x8xf32>
    %54 = vector.extract_strided_slice %4 {offsets = [24, 24, 0], sizes = [8, 8, 4], strides = [1, 1, 1]} : vector<32x32x4xbf16> to vector<8x8x4xbf16>
    %55 = vector.shape_cast %54 : vector<8x8x4xbf16> to vector<64x4xbf16>
    %c0_31 = arith.constant 0 : index
    %c32 = arith.constant 32 : index
    %c0_32 = arith.constant 0 : index
    %56 = vector.load %arg4[%c0_31, %c32, %c0_32] : memref<1x36x8xbf16, #tpu.memory_space<vmem>>, vector<1x4x8xbf16>
    %57 = vector.shape_cast %56 : vector<1x4x8xbf16> to vector<4x8xbf16>
    %cst_33 = arith.constant dense<0.000000e+00> : vector<64x8xf32>
    %58 = tpu.matmul %55, %57, %cst_33 {dimension_numbers = #tpu.dot_dimension_numbers<[1], [0], [0], [1], [0, 0, 1, 1], [], []>} : vector<64x4xbf16>, vector<4x8xbf16>, vector<64x8xf32> -> vector<64x8xf32>
    %59 = arith.addf %53, %58 : vector<64x8xf32>
    %c0_34 = arith.constant 0 : index
    %c0_35 = arith.constant 0 : index
    %60 = vector.load %arg7[%c0_34, %c0_35] : memref<64x8xf32, #tpu.memory_space<vmem>>, vector<64x8xf32>
    tpu.vector_store %arg7[%c0_34, %c0_35], %59 {strides = array<i32>} : memref<64x8xf32, #tpu.memory_space<vmem>>, vector<64x8xf32>,
    %c2_i32 = arith.constant 2 : i32
    %61 = arith.cmpi eq, %arg2, %c2_i32 : i32
    %62 = arith.extui %61 : i1 to i32
    %c0_i32_36 = arith.constant 0 : i32
    %63 = arith.cmpi ne, %62, %c0_i32_36 : i32
    scf.if %63 {
      %c0_37 = arith.constant 0 : index
      %c0_38 = arith.constant 0 : index
      %64 = vector.load %arg7[%c0_37, %c0_38] : memref<64x8xf32, #tpu.memory_space<vmem>>, vector<64x8xf32>
      %c0_39 = arith.constant 0 : index
      %c0_40 = arith.constant 0 : index
      %65 = vector.load %arg5[%c0_39, %c0_40] : memref<1x8xf32, #tpu.memory_space<vmem>>, vector<1x8xf32>
      %66 = vector.broadcast %65 : vector<1x8xf32> to vector<64x8xf32>
      %67 = arith.addf %64, %66 : vector<64x8xf32>
      %cst_41 = arith.constant 2.000000e+01 : f32
      %68 = vector.broadcast %cst_41 : f32 to vector<64x8xf32>
      %69 = arith.minimumf %67, %68 : vector<64x8xf32>
      %70 = math.exp %69 : vector<64x8xf32>
      %cst_42 = arith.constant 1.000000e+00 : f32
      %71 = vector.broadcast %cst_42 : f32 to vector<64x8xf32>
      %72 = arith.addf %71, %70 : vector<64x8xf32>
      %cst_43 = arith.constant 1.000000e+00 : f32
      %73 = vector.broadcast %cst_43 : f32 to vector<64x8xf32>
      %74 = arith.addf %73, %70 : vector<64x8xf32>
      %75 = arith.mulf %72, %74 : vector<64x8xf32>
      %cst_44 = arith.constant 1.000000e+00 : f32
      %76 = vector.broadcast %cst_44 : f32 to vector<64x8xf32>
      %77 = arith.subf %75, %76 : vector<64x8xf32>
      %cst_45 = arith.constant 1.000000e+00 : f32
      %78 = vector.broadcast %cst_45 : f32 to vector<64x8xf32>
      %79 = arith.addf %75, %78 : vector<64x8xf32>
      %80 = arith.divf %77, %79 : vector<64x8xf32>
      %81 = arith.mulf %67, %80 : vector<64x8xf32>
      %82 = arith.truncf %81 : vector<64x8xf32> to vector<64x8xbf16>
      %c0_46 = arith.constant 0 : index
      %c0_47 = arith.constant 0 : index
      %c0_48 = arith.constant 0 : index
      %c0_49 = arith.constant 0 : index
      %83 = vector.load %arg6[%c0_46, %c0_47, %c0_48, %c0_49] : memref<1x1x64x8xbf16, #tpu.memory_space<vmem>>, vector<1x1x64x8xbf16>
      %84 = vector.shape_cast %83 : vector<1x1x64x8xbf16> to vector<64x8xbf16>
      %85 = vector.shape_cast %82 : vector<64x8xbf16> to vector<1x1x64x8xbf16>
      tpu.vector_store %arg6[%c0_46, %c0_47, %c0_48, %c0_49], %85 {strides = array<i32>} : memref<1x1x64x8xbf16, #tpu.memory_space<vmem>>, vector<1x1x64x8xbf16>,
    } else {
    }
    return
  }
  func.func @transform_0(%arg0: i32, %arg1: i32, %arg2: i32) -> (i32, i32, i32, i32, i32) {
    %c12_i32 = arith.constant 12 : i32
    %0 = arith.muli %arg2, %c12_i32 : i32
    %1 = arith.addi %arg1, %0 : i32
    %c0_i32 = arith.constant 0 : i32
    %c0_i32_0 = arith.constant 0 : i32
    %c0_i32_1 = arith.constant 0 : i32
    %c0_i32_2 = arith.constant 0 : i32
    return %arg0, %1, %c0_i32, %c0_i32_0, %c0_i32_1 : i32, i32, i32, i32, i32
  }
  func.func @transform_1(%arg0: i32, %arg1: i32, %arg2: i32) -> (i32, i32, i32) {
    %c0_i32 = arith.constant 0 : i32
    %c0_i32_0 = arith.constant 0 : i32
    %c0_i32_1 = arith.constant 0 : i32
    return %arg2, %c0_i32, %c0_i32_0 : i32, i32, i32
  }
  func.func @transform_2(%arg0: i32, %arg1: i32, %arg2: i32) -> (i32, i32) {
    %c0_i32 = arith.constant 0 : i32
    %c0_i32_0 = arith.constant 0 : i32
    %c0_i32_1 = arith.constant 0 : i32
    return %c0_i32, %c0_i32_0 : i32, i32
  }
  func.func @transform_3(%arg0: i32, %arg1: i32, %arg2: i32) -> (i32, i32, i32, i32) {
    %c0_i32 = arith.constant 0 : i32
    %c0_i32_0 = arith.constant 0 : i32
    %c0_i32_1 = arith.constant 0 : i32
    return %arg0, %arg1, %c0_i32, %c0_i32_0 : i32, i32, i32, i32
  }
}

module attributes {stable_mosaic.version = 11 : i64} {
  func.func @kernel(%arg0: i32, %arg1: i32, %arg2: i32, %arg3: memref<1x1x20x20x4xbf16, #tpu.memory_space<vmem>>, %arg4: memref<1x36x8xbf16, #tpu.memory_space<vmem>>, %arg5: memref<1x8xf32, #tpu.memory_space<vmem>>, %arg6: memref<1x1x64x8xbf16, #tpu.memory_space<vmem>>, %arg7: memref<64x8xf32, #tpu.memory_space<vmem>>) attributes {dimension_semantics = [#tpu.dimension_semantics<parallel>, #tpu.dimension_semantics<parallel>, #tpu.dimension_semantics<arbitrary>], iteration_bounds = array<i64: 2, 8, 3>, scalar_prefetch = 0 : i64, scratch_operands = 1 : i64, tpu.core_type = #tpu.core_type<tc>, window_params = [{transform_indices = @transform_0, window_bounds = array<i64: 1, 1, 20, 20, 4>}, {transform_indices = @transform_1, window_bounds = array<i64: 1, 36, 8>}, {pipeline_mode = #tpu.pipeline_mode<synchronous>, transform_indices = @transform_2, window_bounds = array<i64: 1, 8>}, {transform_indices = @transform_3, window_bounds = array<i64: 1, 1, 64, 8>}]} {
    %c0_i32 = arith.constant 0 : i32
    %0 = arith.cmpi eq, %arg2, %c0_i32 : i32
    %1 = arith.extui %0 : i1 to i32
    %c0_i32_0 = arith.constant 0 : i32
    %2 = arith.cmpi ne, %1, %c0_i32_0 : i32
    scf.if %2 {
      %cst_37 = arith.constant 0.000000e+00 : f32
      %64 = vector.broadcast %cst_37 : f32 to vector<64x8xf32>
      %c0_38 = arith.constant 0 : index
      %c0_39 = arith.constant 0 : index
      %65 = vector.load %arg7[%c0_38, %c0_39] : memref<64x8xf32, #tpu.memory_space<vmem>>, vector<64x8xf32>
      tpu.vector_store %arg7[%c0_38, %c0_39], %64 {strides = array<i32>} : memref<64x8xf32, #tpu.memory_space<vmem>>, vector<64x8xf32>,
    } else {
    }
    %c0 = arith.constant 0 : index
    %c0_1 = arith.constant 0 : index
    %c0_2 = arith.constant 0 : index
    %c0_3 = arith.constant 0 : index
    %c0_4 = arith.constant 0 : index
    %3 = vector.load %arg3[%c0, %c0_1, %c0_2, %c0_3, %c0_4] : memref<1x1x20x20x4xbf16, #tpu.memory_space<vmem>>, vector<1x1x20x20x4xbf16>
    %4 = vector.shape_cast %3 : vector<1x1x20x20x4xbf16> to vector<20x20x4xbf16>
    %c0_5 = arith.constant 0 : index
    %c0_6 = arith.constant 0 : index
    %5 = vector.load %arg7[%c0_5, %c0_6] : memref<64x8xf32, #tpu.memory_space<vmem>>, vector<64x8xf32>
    %6 = vector.extract_strided_slice %4 {offsets = [0, 0, 0], sizes = [8, 8, 4], strides = [1, 1, 1]} : vector<20x20x4xbf16> to vector<8x8x4xbf16>
    %7 = vector.shape_cast %6 : vector<8x8x4xbf16> to vector<64x4xbf16>
    %c0_7 = arith.constant 0 : index
    %c0_8 = arith.constant 0 : index
    %c0_9 = arith.constant 0 : index
    %8 = vector.load %arg4[%c0_7, %c0_8, %c0_9] : memref<1x36x8xbf16, #tpu.memory_space<vmem>>, vector<1x4x8xbf16>
    %9 = vector.shape_cast %8 : vector<1x4x8xbf16> to vector<4x8xbf16>
    %cst = arith.constant dense<0.000000e+00> : vector<64x8xf32>
    %10 = tpu.matmul %7, %9, %cst {dimension_numbers = #tpu.dot_dimension_numbers<[1], [0], [0], [1], [0, 0, 1, 1], [], []>} : vector<64x4xbf16>, vector<4x8xbf16>, vector<64x8xf32> -> vector<64x8xf32>
    %11 = arith.addf %5, %10 : vector<64x8xf32>
    %12 = vector.extract_strided_slice %4 {offsets = [0, 6, 0], sizes = [8, 8, 4], strides = [1, 1, 1]} : vector<20x20x4xbf16> to vector<8x8x4xbf16>
    %13 = vector.shape_cast %12 : vector<8x8x4xbf16> to vector<64x4xbf16>
    %c0_10 = arith.constant 0 : index
    %c4 = arith.constant 4 : index
    %c0_11 = arith.constant 0 : index
    %14 = vector.load %arg4[%c0_10, %c4, %c0_11] : memref<1x36x8xbf16, #tpu.memory_space<vmem>>, vector<1x4x8xbf16>
    %15 = vector.shape_cast %14 : vector<1x4x8xbf16> to vector<4x8xbf16>
    %cst_12 = arith.constant dense<0.000000e+00> : vector<64x8xf32>
    %16 = tpu.matmul %13, %15, %cst_12 {dimension_numbers = #tpu.dot_dimension_numbers<[1], [0], [0], [1], [0, 0, 1, 1], [], []>} : vector<64x4xbf16>, vector<4x8xbf16>, vector<64x8xf32> -> vector<64x8xf32>
    %17 = arith.addf %11, %16 : vector<64x8xf32>
    %18 = vector.extract_strided_slice %4 {offsets = [0, 12, 0], sizes = [8, 8, 4], strides = [1, 1, 1]} : vector<20x20x4xbf16> to vector<8x8x4xbf16>
    %19 = vector.shape_cast %18 : vector<8x8x4xbf16> to vector<64x4xbf16>
    %c0_13 = arith.constant 0 : index
    %c8 = arith.constant 8 : index
    %c0_14 = arith.constant 0 : index
    %20 = vector.load %arg4[%c0_13, %c8, %c0_14] : memref<1x36x8xbf16, #tpu.memory_space<vmem>>, vector<1x4x8xbf16>
    %21 = vector.shape_cast %20 : vector<1x4x8xbf16> to vector<4x8xbf16>
    %cst_15 = arith.constant dense<0.000000e+00> : vector<64x8xf32>
    %22 = tpu.matmul %19, %21, %cst_15 {dimension_numbers = #tpu.dot_dimension_numbers<[1], [0], [0], [1], [0, 0, 1, 1], [], []>} : vector<64x4xbf16>, vector<4x8xbf16>, vector<64x8xf32> -> vector<64x8xf32>
    %23 = arith.addf %17, %22 : vector<64x8xf32>
    %24 = vector.extract_strided_slice %4 {offsets = [6, 0, 0], sizes = [8, 8, 4], strides = [1, 1, 1]} : vector<20x20x4xbf16> to vector<8x8x4xbf16>
    %25 = vector.shape_cast %24 : vector<8x8x4xbf16> to vector<64x4xbf16>
    %c0_16 = arith.constant 0 : index
    %c12 = arith.constant 12 : index
    %c0_17 = arith.constant 0 : index
    %26 = vector.load %arg4[%c0_16, %c12, %c0_17] : memref<1x36x8xbf16, #tpu.memory_space<vmem>>, vector<1x4x8xbf16>
    %27 = vector.shape_cast %26 : vector<1x4x8xbf16> to vector<4x8xbf16>
    %cst_18 = arith.constant dense<0.000000e+00> : vector<64x8xf32>
    %28 = tpu.matmul %25, %27, %cst_18 {dimension_numbers = #tpu.dot_dimension_numbers<[1], [0], [0], [1], [0, 0, 1, 1], [], []>} : vector<64x4xbf16>, vector<4x8xbf16>, vector<64x8xf32> -> vector<64x8xf32>
    %29 = arith.addf %23, %28 : vector<64x8xf32>
    %30 = vector.extract_strided_slice %4 {offsets = [6, 6, 0], sizes = [8, 8, 4], strides = [1, 1, 1]} : vector<20x20x4xbf16> to vector<8x8x4xbf16>
    %31 = vector.shape_cast %30 : vector<8x8x4xbf16> to vector<64x4xbf16>
    %c0_19 = arith.constant 0 : index
    %c16 = arith.constant 16 : index
    %c0_20 = arith.constant 0 : index
    %32 = vector.load %arg4[%c0_19, %c16, %c0_20] : memref<1x36x8xbf16, #tpu.memory_space<vmem>>, vector<1x4x8xbf16>
    %33 = vector.shape_cast %32 : vector<1x4x8xbf16> to vector<4x8xbf16>
    %cst_21 = arith.constant dense<0.000000e+00> : vector<64x8xf32>
    %34 = tpu.matmul %31, %33, %cst_21 {dimension_numbers = #tpu.dot_dimension_numbers<[1], [0], [0], [1], [0, 0, 1, 1], [], []>} : vector<64x4xbf16>, vector<4x8xbf16>, vector<64x8xf32> -> vector<64x8xf32>
    %35 = arith.addf %29, %34 : vector<64x8xf32>
    %36 = vector.extract_strided_slice %4 {offsets = [6, 12, 0], sizes = [8, 8, 4], strides = [1, 1, 1]} : vector<20x20x4xbf16> to vector<8x8x4xbf16>
    %37 = vector.shape_cast %36 : vector<8x8x4xbf16> to vector<64x4xbf16>
    %c0_22 = arith.constant 0 : index
    %c20 = arith.constant 20 : index
    %c0_23 = arith.constant 0 : index
    %38 = vector.load %arg4[%c0_22, %c20, %c0_23] : memref<1x36x8xbf16, #tpu.memory_space<vmem>>, vector<1x4x8xbf16>
    %39 = vector.shape_cast %38 : vector<1x4x8xbf16> to vector<4x8xbf16>
    %cst_24 = arith.constant dense<0.000000e+00> : vector<64x8xf32>
    %40 = tpu.matmul %37, %39, %cst_24 {dimension_numbers = #tpu.dot_dimension_numbers<[1], [0], [0], [1], [0, 0, 1, 1], [], []>} : vector<64x4xbf16>, vector<4x8xbf16>, vector<64x8xf32> -> vector<64x8xf32>
    %41 = arith.addf %35, %40 : vector<64x8xf32>
    %42 = vector.extract_strided_slice %4 {offsets = [12, 0, 0], sizes = [8, 8, 4], strides = [1, 1, 1]} : vector<20x20x4xbf16> to vector<8x8x4xbf16>
    %43 = vector.shape_cast %42 : vector<8x8x4xbf16> to vector<64x4xbf16>
    %c0_25 = arith.constant 0 : index
    %c24 = arith.constant 24 : index
    %c0_26 = arith.constant 0 : index
    %44 = vector.load %arg4[%c0_25, %c24, %c0_26] : memref<1x36x8xbf16, #tpu.memory_space<vmem>>, vector<1x4x8xbf16>
    %45 = vector.shape_cast %44 : vector<1x4x8xbf16> to vector<4x8xbf16>
    %cst_27 = arith.constant dense<0.000000e+00> : vector<64x8xf32>
    %46 = tpu.matmul %43, %45, %cst_27 {dimension_numbers = #tpu.dot_dimension_numbers<[1], [0], [0], [1], [0, 0, 1, 1], [], []>} : vector<64x4xbf16>, vector<4x8xbf16>, vector<64x8xf32> -> vector<64x8xf32>
    %47 = arith.addf %41, %46 : vector<64x8xf32>
    %48 = vector.extract_strided_slice %4 {offsets = [12, 6, 0], sizes = [8, 8, 4], strides = [1, 1, 1]} : vector<20x20x4xbf16> to vector<8x8x4xbf16>
    %49 = vector.shape_cast %48 : vector<8x8x4xbf16> to vector<64x4xbf16>
    %c0_28 = arith.constant 0 : index
    %c28 = arith.constant 28 : index
    %c0_29 = arith.constant 0 : index
    %50 = vector.load %arg4[%c0_28, %c28, %c0_29] : memref<1x36x8xbf16, #tpu.memory_space<vmem>>, vector<1x4x8xbf16>
    %51 = vector.shape_cast %50 : vector<1x4x8xbf16> to vector<4x8xbf16>
    %cst_30 = arith.constant dense<0.000000e+00> : vector<64x8xf32>
    %52 = tpu.matmul %49, %51, %cst_30 {dimension_numbers = #tpu.dot_dimension_numbers<[1], [0], [0], [1], [0, 0, 1, 1], [], []>} : vector<64x4xbf16>, vector<4x8xbf16>, vector<64x8xf32> -> vector<64x8xf32>
    %53 = arith.addf %47, %52 : vector<64x8xf32>
    %54 = vector.extract_strided_slice %4 {offsets = [12, 12, 0], sizes = [8, 8, 4], strides = [1, 1, 1]} : vector<20x20x4xbf16> to vector<8x8x4xbf16>
    %55 = vector.shape_cast %54 : vector<8x8x4xbf16> to vector<64x4xbf16>
    %c0_31 = arith.constant 0 : index
    %c32 = arith.constant 32 : index
    %c0_32 = arith.constant 0 : index
    %56 = vector.load %arg4[%c0_31, %c32, %c0_32] : memref<1x36x8xbf16, #tpu.memory_space<vmem>>, vector<1x4x8xbf16>
    %57 = vector.shape_cast %56 : vector<1x4x8xbf16> to vector<4x8xbf16>
    %cst_33 = arith.constant dense<0.000000e+00> : vector<64x8xf32>
    %58 = tpu.matmul %55, %57, %cst_33 {dimension_numbers = #tpu.dot_dimension_numbers<[1], [0], [0], [1], [0, 0, 1, 1], [], []>} : vector<64x4xbf16>, vector<4x8xbf16>, vector<64x8xf32> -> vector<64x8xf32>
    %59 = arith.addf %53, %58 : vector<64x8xf32>
    %c0_34 = arith.constant 0 : index
    %c0_35 = arith.constant 0 : index
    %60 = vector.load %arg7[%c0_34, %c0_35] : memref<64x8xf32, #tpu.memory_space<vmem>>, vector<64x8xf32>
    tpu.vector_store %arg7[%c0_34, %c0_35], %59 {strides = array<i32>} : memref<64x8xf32, #tpu.memory_space<vmem>>, vector<64x8xf32>,
    %c2_i32 = arith.constant 2 : i32
    %61 = arith.cmpi eq, %arg2, %c2_i32 : i32
    %62 = arith.extui %61 : i1 to i32
    %c0_i32_36 = arith.constant 0 : i32
    %63 = arith.cmpi ne, %62, %c0_i32_36 : i32
    scf.if %63 {
      %c0_37 = arith.constant 0 : index
      %c0_38 = arith.constant 0 : index
      %64 = vector.load %arg7[%c0_37, %c0_38] : memref<64x8xf32, #tpu.memory_space<vmem>>, vector<64x8xf32>
      %c0_39 = arith.constant 0 : index
      %c0_40 = arith.constant 0 : index
      %65 = vector.load %arg5[%c0_39, %c0_40] : memref<1x8xf32, #tpu.memory_space<vmem>>, vector<1x8xf32>
      %66 = vector.broadcast %65 : vector<1x8xf32> to vector<64x8xf32>
      %67 = arith.addf %64, %66 : vector<64x8xf32>
      %cst_41 = arith.constant 2.000000e+01 : f32
      %68 = vector.broadcast %cst_41 : f32 to vector<64x8xf32>
      %69 = arith.minimumf %67, %68 : vector<64x8xf32>
      %70 = math.exp %69 : vector<64x8xf32>
      %cst_42 = arith.constant 1.000000e+00 : f32
      %71 = vector.broadcast %cst_42 : f32 to vector<64x8xf32>
      %72 = arith.addf %71, %70 : vector<64x8xf32>
      %cst_43 = arith.constant 1.000000e+00 : f32
      %73 = vector.broadcast %cst_43 : f32 to vector<64x8xf32>
      %74 = arith.addf %73, %70 : vector<64x8xf32>
      %75 = arith.mulf %72, %74 : vector<64x8xf32>
      %cst_44 = arith.constant 1.000000e+00 : f32
      %76 = vector.broadcast %cst_44 : f32 to vector<64x8xf32>
      %77 = arith.subf %75, %76 : vector<64x8xf32>
      %cst_45 = arith.constant 1.000000e+00 : f32
      %78 = vector.broadcast %cst_45 : f32 to vector<64x8xf32>
      %79 = arith.addf %75, %78 : vector<64x8xf32>
      %80 = arith.divf %77, %79 : vector<64x8xf32>
      %81 = arith.mulf %67, %80 : vector<64x8xf32>
      %82 = arith.truncf %81 : vector<64x8xf32> to vector<64x8xbf16>
      %c0_46 = arith.constant 0 : index
      %c0_47 = arith.constant 0 : index
      %c0_48 = arith.constant 0 : index
      %c0_49 = arith.constant 0 : index
      %83 = vector.load %arg6[%c0_46, %c0_47, %c0_48, %c0_49] : memref<1x1x64x8xbf16, #tpu.memory_space<vmem>>, vector<1x1x64x8xbf16>
      %84 = vector.shape_cast %83 : vector<1x1x64x8xbf16> to vector<64x8xbf16>
      %85 = vector.shape_cast %82 : vector<64x8xbf16> to vector<1x1x64x8xbf16>
      tpu.vector_store %arg6[%c0_46, %c0_47, %c0_48, %c0_49], %85 {strides = array<i32>} : memref<1x1x64x8xbf16, #tpu.memory_space<vmem>>, vector<1x1x64x8xbf16>,
    } else {
    }
    return
  }
  func.func @transform_0(%arg0: i32, %arg1: i32, %arg2: i32) -> (i32, i32, i32, i32, i32) {
    %c6_i32 = arith.constant 6 : i32
    %0 = arith.muli %arg2, %c6_i32 : i32
    %1 = arith.addi %arg1, %0 : i32
    %c0_i32 = arith.constant 0 : i32
    %c0_i32_0 = arith.constant 0 : i32
    %c0_i32_1 = arith.constant 0 : i32
    %c0_i32_2 = arith.constant 0 : i32
    return %arg0, %1, %c0_i32, %c0_i32_0, %c0_i32_1 : i32, i32, i32, i32, i32
  }
  func.func @transform_1(%arg0: i32, %arg1: i32, %arg2: i32) -> (i32, i32, i32) {
    %c0_i32 = arith.constant 0 : i32
    %c0_i32_0 = arith.constant 0 : i32
    %c0_i32_1 = arith.constant 0 : i32
    return %arg2, %c0_i32, %c0_i32_0 : i32, i32, i32
  }
  func.func @transform_2(%arg0: i32, %arg1: i32, %arg2: i32) -> (i32, i32) {
    %c0_i32 = arith.constant 0 : i32
    %c0_i32_0 = arith.constant 0 : i32
    %c0_i32_1 = arith.constant 0 : i32
    return %c0_i32, %c0_i32_0 : i32, i32
  }
  func.func @transform_3(%arg0: i32, %arg1: i32, %arg2: i32) -> (i32, i32, i32, i32) {
    %c0_i32 = arith.constant 0 : i32
    %c0_i32_0 = arith.constant 0 : i32
    %c0_i32_1 = arith.constant 0 : i32
    return %arg0, %arg1, %c0_i32, %c0_i32_0 : i32, i32, i32, i32
  }
}

module attributes {stable_mosaic.version = 11 : i64} {
  func.func @_final_kernel(%arg0: i32, %arg1: memref<512x16xbf16, #tpu.memory_space<vmem>>, %arg2: memref<512x8xbf16, #tpu.memory_space<vmem>>, %arg3: memref<512x8xbf16, #tpu.memory_space<vmem>>, %arg4: memref<512x8xbf16, #tpu.memory_space<vmem>>, %arg5: memref<40x8xbf16, #tpu.memory_space<vmem>>, %arg6: memref<1x8xf32, #tpu.memory_space<vmem>>, %arg7: memref<512x8xf32, #tpu.memory_space<vmem>>) attributes {dimension_semantics = [#tpu.dimension_semantics<parallel>], iteration_bounds = array<i64: 2>, scalar_prefetch = 0 : i64, scratch_operands = 0 : i64, tpu.core_type = #tpu.core_type<tc>, window_params = [{transform_indices = @transform_0, window_bounds = array<i64: 512, 16>}, {transform_indices = @transform_1, window_bounds = array<i64: 512, 8>}, {transform_indices = @transform_2, window_bounds = array<i64: 512, 8>}, {transform_indices = @transform_3, window_bounds = array<i64: 512, 8>}, {pipeline_mode = #tpu.pipeline_mode<synchronous>, transform_indices = @transform_4, window_bounds = array<i64: 40, 8>}, {pipeline_mode = #tpu.pipeline_mode<synchronous>, transform_indices = @transform_5, window_bounds = array<i64: 1, 8>}, {transform_indices = @transform_6, window_bounds = array<i64: 512, 8>}]} {
    %c0 = arith.constant 0 : index
    %c0_0 = arith.constant 0 : index
    %0 = vector.load %arg1[%c0, %c0_0] : memref<512x16xbf16, #tpu.memory_space<vmem>>, vector<512x16xbf16>
    %c0_1 = arith.constant 0 : index
    %c0_2 = arith.constant 0 : index
    %1 = vector.load %arg2[%c0_1, %c0_2] : memref<512x8xbf16, #tpu.memory_space<vmem>>, vector<512x8xbf16>
    %c0_3 = arith.constant 0 : index
    %c0_4 = arith.constant 0 : index
    %2 = vector.load %arg3[%c0_3, %c0_4] : memref<512x8xbf16, #tpu.memory_space<vmem>>, vector<512x8xbf16>
    %c0_5 = arith.constant 0 : index
    %c0_6 = arith.constant 0 : index
    %3 = vector.load %arg4[%c0_5, %c0_6] : memref<512x8xbf16, #tpu.memory_space<vmem>>, vector<512x8xbf16>
    %4 = tpu.concatenate %0, %1, %2, %3 in 1 : vector<512x16xbf16>, vector<512x8xbf16>, vector<512x8xbf16>, vector<512x8xbf16> -> vector<512x40xbf16>
    %c0_7 = arith.constant 0 : index
    %c0_8 = arith.constant 0 : index
    %5 = vector.load %arg5[%c0_7, %c0_8] : memref<40x8xbf16, #tpu.memory_space<vmem>>, vector<40x8xbf16>
    %cst = arith.constant dense<0.000000e+00> : vector<512x8xf32>
    %6 = tpu.matmul %4, %5, %cst {dimension_numbers = #tpu.dot_dimension_numbers<[1], [0], [0], [1], [0, 0, 1, 1], [], []>} : vector<512x40xbf16>, vector<40x8xbf16>, vector<512x8xf32> -> vector<512x8xf32>
    %c0_9 = arith.constant 0 : index
    %c0_10 = arith.constant 0 : index
    %7 = vector.load %arg6[%c0_9, %c0_10] : memref<1x8xf32, #tpu.memory_space<vmem>>, vector<1x8xf32>
    %8 = vector.broadcast %7 : vector<1x8xf32> to vector<512x8xf32>
    %9 = arith.addf %6, %8 : vector<512x8xf32>
    %cst_11 = arith.constant 2.000000e+01 : f32
    %10 = vector.broadcast %cst_11 : f32 to vector<512x8xf32>
    %11 = arith.minimumf %9, %10 : vector<512x8xf32>
    %12 = math.exp %11 : vector<512x8xf32>
    %cst_12 = arith.constant 1.000000e+00 : f32
    %13 = vector.broadcast %cst_12 : f32 to vector<512x8xf32>
    %14 = arith.addf %13, %12 : vector<512x8xf32>
    %cst_13 = arith.constant 1.000000e+00 : f32
    %15 = vector.broadcast %cst_13 : f32 to vector<512x8xf32>
    %16 = arith.addf %15, %12 : vector<512x8xf32>
    %17 = arith.mulf %14, %16 : vector<512x8xf32>
    %cst_14 = arith.constant 1.000000e+00 : f32
    %18 = vector.broadcast %cst_14 : f32 to vector<512x8xf32>
    %19 = arith.subf %17, %18 : vector<512x8xf32>
    %cst_15 = arith.constant 1.000000e+00 : f32
    %20 = vector.broadcast %cst_15 : f32 to vector<512x8xf32>
    %21 = arith.addf %17, %20 : vector<512x8xf32>
    %22 = arith.divf %19, %21 : vector<512x8xf32>
    %23 = arith.mulf %9, %22 : vector<512x8xf32>
    %c0_16 = arith.constant 0 : index
    %c0_17 = arith.constant 0 : index
    %24 = vector.load %arg7[%c0_16, %c0_17] : memref<512x8xf32, #tpu.memory_space<vmem>>, vector<512x8xf32>
    tpu.vector_store %arg7[%c0_16, %c0_17], %23 {strides = array<i32>} : memref<512x8xf32, #tpu.memory_space<vmem>>, vector<512x8xf32>,
    return
  }
  func.func @transform_0(%arg0: i32) -> (i32, i32) {
    %c0_i32 = arith.constant 0 : i32
    %c0_i32_0 = arith.constant 0 : i32
    return %arg0, %c0_i32 : i32, i32
  }
  func.func @transform_1(%arg0: i32) -> (i32, i32) {
    %c0_i32 = arith.constant 0 : i32
    %c0_i32_0 = arith.constant 0 : i32
    return %arg0, %c0_i32 : i32, i32
  }
  func.func @transform_2(%arg0: i32) -> (i32, i32) {
    %c0_i32 = arith.constant 0 : i32
    %c0_i32_0 = arith.constant 0 : i32
    return %arg0, %c0_i32 : i32, i32
  }
  func.func @transform_3(%arg0: i32) -> (i32, i32) {
    %c0_i32 = arith.constant 0 : i32
    %c0_i32_0 = arith.constant 0 : i32
    return %arg0, %c0_i32 : i32, i32
  }
  func.func @transform_4(%arg0: i32) -> (i32, i32) {
    %c0_i32 = arith.constant 0 : i32
    %c0_i32_0 = arith.constant 0 : i32
    %c0_i32_1 = arith.constant 0 : i32
    return %c0_i32, %c0_i32_0 : i32, i32
  }
  func.func @transform_5(%arg0: i32) -> (i32, i32) {
    %c0_i32 = arith.constant 0 : i32
    %c0_i32_0 = arith.constant 0 : i32
    %c0_i32_1 = arith.constant 0 : i32
    return %c0_i32, %c0_i32_0 : i32, i32
  }
  func.func @transform_6(%arg0: i32) -> (i32, i32) {
    %c0_i32 = arith.constant 0 : i32
    %c0_i32_0 = arith.constant 0 : i32
    return %arg0, %c0_i32 : i32, i32
  }
}

</mosaic_0001>

<bundles_post_ra>
// kernel: assp_forward.5
= control target key start
LH: loop header
LB: loop body
LE: loop exit
PB: predicated region body
PF: predicated region fallthrough
CT: control target
= control target key end

     0   :  { %s2510_s12 = smov 0   ;;  %s3179_s0 = inlined_call_operand.vmem [shape: bf16[1024,4], index: 0, kind: input, shape index: {}]   ;;  %s3180_s1 = inlined_call_operand.vmem [shape: bf16[4,16], index: 1, kind: input, shape index: {}]   ;;  %s3181_s2 = inlined_call_operand.vmem [shape: f32[1,16], index: 2, kind: input, shape index: {}]   ;;  %s3182_s3 = inlined_call_operand.vmem [shape: bf16[1024,16], index: 3, kind: output, shape index: {}]  }
   0x1 LB: > { %s1814_s13 = sadd.s32 4294967295, %s2488_s12   ;;  %p1818_p0 = scmp.ge.s32.totalorder %s2488_s12, 1  ;;  %s2488_s12 = sphi %s2510_s12, %s13_s12  }
   0x2   : > { %p138_p1 = scmp.lt.s32.totalorder %s2488_s12, 3 }
   0x4   : > { %p139_p2 = pnand %p1818_p0, %p138_p1 }
   0x5   : > { %s1819_s16 = sshll.u32 (!%p139_p2), %s1814_s13, 6 }
   0x6   : > { %142 = sbr.rel (%p139_p2) target bundleno = 427 (0x1ab), region = 32  ;;  %p163_p3 = scmp.lt.s32.totalorder (!%p139_p2), %s1819_s16, 127 }
   0xb   : > { %v239_v0 = vld [vmem:[%s3180_s1] sm:$0x3]  ;;  %vm504_vm0 = vcmask 1041408   ;;  %s3184_s16 = smov (!%p163_p3, %s1819_s16), 127  ;;  %vm407_vm1 = vcmask 31744   ;;  %vm1693_vm2 = vcmask 125952  }
   0xc   : > { %2183 = vmatprep.subr.msk.bf16.mxu0 %vm504_vm0, %v239_v0  ;;  %2184 = vmatprep.subr.msk.bf16.mxu1 %vm504_vm0, %v239_v0  ;;  %v506_v1 = vsel %vm504_vm0, %v239_v0, 0  ;;  %s1820_s17 = sshll.u32 %s3184_s16, 2  ;;  %v2598_v34 = vld [vmem:[%s3181_s2] ss:$0 sm:$0xff] }
   0xd   : > { %2116 = vmatpush3.bf16.msra.mxu0 %v506_v1  ;;  %2182 = vmatpush3.bf16.msra.mxu1 %v506_v1  ;;  %s2529_s20 = scalar_lea.vmem %s3179_s0, %s1820_s17  ;;  %s2723_s25 = scalar_lea.vmem %s3182_s3, %s1820_s17 }
   0xe   : > { %v2193_v2 = vld [vmem:[%s2529_s20] sm:$0xff]   ;;  %v2195_v4 = vld [vmem:[%s2529_s20 + $0x8] sm:$0xff]   ;;  %v2197_v6 = vld [vmem:[%s2529_s20 + $0x10] sm:$0xff]  }
   0xf   : > { %v2194_v3 = vld [vmem:[%s2529_s20 + $0x80] sm:$0xff]   ;;  %2117 = vmatprep.mubr.msk.bf16.mxu0 %vm407_vm1, %v2193_v2  ;;  %v2196_v5 = vld [vmem:[%s2529_s20 + $0x88] sm:$0xff]   ;;  %v2198_v7 = vld [vmem:[%s2529_s20 + $0x90] sm:$0xff]  }
  0x10   : > { %2149 = vmatprep.mubr.msk.bf16.mxu1 %vm407_vm1, %v2194_v3  ;;  %2118 = vmatmul.mubr.msk.bf16.vlgmr.msra.gmra.mxu0 %vm407_vm1, %v2195_v4  ;;  %v2199_v8 = vld [vmem:[%s2529_s20 + $0x18] sm:$0xff]   ;;  %v2201_v10 = vld [vmem:[%s2529_s20 + $0x20] sm:$0xff]   ;;  %v2203_v12 = vld [vmem:[%s2529_s20 + $0x28] sm:$0xff]  }
  0x11   : > { %2150 = vmatmul.mubr.msk.bf16.vlgmr.msra.gmra.mxu1 %vm407_vm1, %v2196_v5  ;;  %2121 = vmatprep.mubr.msk.bf16.mxu0 %vm407_vm1, %v2197_v6  ;;  %v2200_v9 = vld [vmem:[%s2529_s20 + $0x98] sm:$0xff]   ;;  %v2202_v11 = vld [vmem:[%s2529_s20 + $0xa0] sm:$0xff]   ;;  %v2204_v13 = vld [vmem:[%s2529_s20 + $0xa8] sm:$0xff]  }
  0x12   : > { %2153 = vmatprep.mubr.msk.bf16.mxu1 %vm407_vm1, %v2198_v7  ;;  %v2205_v14 = vld [vmem:[%s2529_s20 + $0x30] sm:$0xff]   ;;  %v2207_v16 = vld [vmem:[%s2529_s20 + $0x38] sm:$0xff]   ;;  %v2209_v18 = vld [vmem:[%s2529_s20 + $0x40] sm:$0xff]  }
  0x13   : > { %v2206_v15 = vld [vmem:[%s2529_s20 + $0xb0] sm:$0xff]   ;;  %v2208_v17 = vld [vmem:[%s2529_s20 + $0xb8] sm:$0xff]   ;;  %v2210_v19 = vld [vmem:[%s2529_s20 + $0xc0] sm:$0xff]  }
  0x14   : > { %v2211_v20 = vld [vmem:[%s2529_s20 + $0x48] sm:$0xff]   ;;  %v2213_v22 = vld [vmem:[%s2529_s20 + $0x50] sm:$0xff]   ;;  %v2215_v24 = vld [vmem:[%s2529_s20 + $0x58] sm:$0xff]  }
  0x15   : > { %v2212_v21 = vld [vmem:[%s2529_s20 + $0xc8] sm:$0xff]   ;;  %v2214_v23 = vld [vmem:[%s2529_s20 + $0xd0] sm:$0xff]   ;;  %v2216_v25 = vld [vmem:[%s2529_s20 + $0xd8] sm:$0xff]  }
  0x16   : > { %v2217_v26 = vld [vmem:[%s2529_s20 + $0x60] sm:$0xff]   ;;  %v2219_v28 = vld [vmem:[%s2529_s20 + $0x68] sm:$0xff]   ;;  %v2221_v30 = vld [vmem:[%s2529_s20 + $0x70] sm:$0xff]  }
  0x17   : > { %v2218_v27 = vld [vmem:[%s2529_s20 + $0xe0] sm:$0xff]   ;;  %v2220_v29 = vld [vmem:[%s2529_s20 + $0xe8] sm:$0xff]   ;;  %v2222_v31 = vld [vmem:[%s2529_s20 + $0xf0] sm:$0xff]  }
  0x18   : > { %2122 = vmatmul.mubr.msk.bf16.gmra.mxu0 %vm407_vm1, %v2199_v8  ;;  %v2223_v32 = vld [vmem:[%s2529_s20 + $0x78] sm:$0xff]  }
  0x19   : > { %2154 = vmatmul.mubr.msk.bf16.gmra.mxu1 %vm407_vm1, %v2200_v9  ;;  %2125 = vmatprep.mubr.msk.bf16.mxu0 %vm407_vm1, %v2201_v10  ;;  %v2224_v33 = vld [vmem:[%s2529_s20 + $0xf8] sm:$0xff]  }
  0x1a   : > { %2157 = vmatprep.mubr.msk.bf16.mxu1 %vm407_vm1, %v2202_v11 }
  0x20   : > { %2126 = vmatmul.mubr.msk.bf16.gmra.mxu0 %vm407_vm1, %v2203_v12 }
  0x21   : > { %2158 = vmatmul.mubr.msk.bf16.gmra.mxu1 %vm407_vm1, %v2204_v13  ;;  %2129 = vmatprep.mubr.msk.bf16.mxu0 %vm407_vm1, %v2205_v14 }
  0x22   : > { %2161 = vmatprep.mubr.msk.bf16.mxu1 %vm407_vm1, %v2206_v15 }
  0x28   : > { %2130 = vmatmul.mubr.msk.bf16.gmra.mxu0 %vm407_vm1, %v2207_v16 }
  0x29   : > { %2162 = vmatmul.mubr.msk.bf16.gmra.mxu1 %vm407_vm1, %v2208_v17  ;;  %2133 = vmatprep.mubr.msk.bf16.mxu0 %vm407_vm1, %v2209_v18 }
  0x2a   : > { %2165 = vmatprep.mubr.msk.bf16.mxu1 %vm407_vm1, %v2210_v19 }
  0x30   : > { %2134 = vmatmul.mubr.msk.bf16.gmra.mxu0 %vm407_vm1, %v2211_v20 }
  0x31   : > { %2166 = vmatmul.mubr.msk.bf16.gmra.mxu1 %vm407_vm1, %v2212_v21  ;;  %2137 = vmatprep.mubr.msk.bf16.mxu0 %vm407_vm1, %v2213_v22 }
  0x32   : > { %2169 = vmatprep.mubr.msk.bf16.mxu1 %vm407_vm1, %v2214_v23 }
  0x38   : > { %2138 = vmatmul.mubr.msk.bf16.gmra.mxu0 %vm407_vm1, %v2215_v24 }
  0x39   : > { %2170 = vmatmul.mubr.msk.bf16.gmra.mxu1 %vm407_vm1, %v2216_v25  ;;  %2141 = vmatprep.mubr.msk.bf16.mxu0 %vm407_vm1, %v2217_v26 }
  0x3a   : > { %2173 = vmatprep.mubr.msk.bf16.mxu1 %vm407_vm1, %v2218_v27 }
  0x40   : > { %2142 = vmatmul.mubr.msk.bf16.gmra.mxu0 %vm407_vm1, %v2219_v28 }
  0x41   : > { %2174 = vmatmul.mubr.msk.bf16.gmra.mxu1 %vm407_vm1, %v2220_v29  ;;  %2145 = vmatprep.mubr.msk.bf16.mxu0 %vm407_vm1, %v2221_v30 }
  0x42   : > { %2177 = vmatprep.mubr.msk.bf16.mxu1 %vm407_vm1, %v2222_v31 }
  0x48   : > { %2146 = vmatmul.mubr.msk.bf16.gmra.mxu0 %vm407_vm1, %v2223_v32 }
  0x49   : > { %2178 = vmatmul.mubr.msk.bf16.gmra.mxu1 %vm407_vm1, %v2224_v33 }
  0xd0   : > { %v2119_v35 = vpop.f32.mrf.mxu0 }
  0xd1   : > { %v2601_v36 = vadd.f32 %v2119_v35, %v2598_v34  ;;  %v2151_v37 = vpop.f32.mrf.mxu1 }
  0xd2   : > { %v2604_v38 = vadd.f32 %v2151_v37, %v2598_v34  ;;  %v542_v39 = vpop.f32.mrf.mxu0 }
  0xd3   : > { %v799_v40 = vmin.f32 %v2601_v36, 20.0  ;;  %v2608_v41 = vadd.f32 %v2598_v34, %v542_v39  ;;  %v670_v42 = vpop.f32.mrf.mxu1 }
  0xd4   : > { %v831_v43 = vmin.f32 %v2604_v38, 20.0  ;;  %v2612_v44 = vadd.f32 %v2598_v34, %v670_v42  ;;  %v2120_v45 = vpop.f32.mrf.mxu0 }
  0xd5   : > { %v865_v46 = vmul.f32 1.442695, %v799_v40  ;;  %v797_v47 = vmin.f32 %v2608_v41, 20.0  ;;  %v2616_v48 = vadd.f32 %v2120_v45, %v2598_v34  ;;  %v2152_v49 = vpop.f32.mrf.mxu1 }
  0xd6   : > { %v929_v50 = vmul.f32 1.442695, %v831_v43  ;;  %v829_v51 = vmin.f32 %v2612_v44, 20.0  ;;  %v2620_v52 = vadd.f32 %v2152_v49, %v2598_v34  ;;  %v545_v53 = vpop.f32.mrf.mxu0 }
  0xd7   : > { %2225 = vpow2.f32 %v865_v46  ;;  %v861_v54 = vmul.f32 1.442695, %v797_v47  ;;  %v800_v55 = vmin.f32 %v2616_v48, 20.0  ;;  %v2624_v56 = vadd.f32 %v2598_v34, %v545_v53  ;;  %v673_v57 = vpop.f32.mrf.mxu1 }
  0xd8   : > { %2227 = vpow2.f32 %v929_v50  ;;  %v925_v58 = vmul.f32 1.442695, %v829_v51  ;;  %v832_v59 = vmin.f32 %v2620_v52, 20.0  ;;  %v2628_v60 = vadd.f32 %v2598_v34, %v673_v57  ;;  %v2123_v61 = vpop.f32.mrf.mxu0 }
  0xd9   : > { %2229 = vpow2.f32 %v861_v54  ;;  %v867_v62 = vmul.f32 1.442695, %v800_v55  ;;  %v798_v63 = vmin.f32 %v2624_v56, 20.0  ;;  %v2632_v0 = vadd.f32 %v2123_v61, %v2598_v34  ;;  %v2155_v1 = vpop.f32.mrf.mxu1 }
  0xda   : > { %2231 = vpow2.f32 %v925_v58  ;;  %v931_v2 = vmul.f32 1.442695, %v832_v59  ;;  %v830_v3 = vmin.f32 %v2628_v60, 20.0  ;;  %v2636_v4 = vadd.f32 %v2155_v1, %v2598_v34  ;;  %v558_v5 = vpop.f32.mrf.mxu0 }
  0xdb   : > { %2233 = vpow2.f32 %v867_v62  ;;  %v863_v6 = vmul.f32 1.442695, %v798_v63  ;;  %v803_v7 = vmin.f32 %v2632_v0, 20.0  ;;  %v2640_v8 = vadd.f32 %v2598_v34, %v558_v5  ;;  %v686_v9 = vpop.f32.mrf.mxu1 }
  0xdc   : > { %2235 = vpow2.f32 %v931_v2  ;;  %v927_v10 = vmul.f32 1.442695, %v830_v3  ;;  %v835_v11 = vmin.f32 %v2636_v4, 20.0  ;;  %v2644_v12 = vadd.f32 %v2598_v34, %v686_v9  ;;  %v2124_v13 = vpop.f32.mrf.mxu0 }
  0xdd   : > { %2237 = vpow2.f32 %v863_v6  ;;  %v873_v14 = vmul.f32 1.442695, %v803_v7  ;;  %v801_v15 = vmin.f32 %v2640_v8, 20.0  ;;  %v2648_v16 = vadd.f32 %v2124_v13, %v2598_v34  ;;  %v2156_v17 = vpop.f32.mrf.mxu1 }
  0xde   : > { %2239 = vpow2.f32 %v927_v10  ;;  %v937_v18 = vmul.f32 1.442695, %v835_v11  ;;  %v833_v19 = vmin.f32 %v2644_v12, 20.0  ;;  %v2652_v20 = vadd.f32 %v2156_v17, %v2598_v34  ;;  %v561_v21 = vpop.f32.mrf.mxu0 }
  0xdf   : > { %2241 = vpow2.f32 %v873_v14  ;;  %v869_v22 = vmul.f32 1.442695, %v801_v15  ;;  %v804_v23 = vmin.f32 %v2648_v16, 20.0  ;;  %v2656_v24 = vadd.f32 %v2598_v34, %v561_v21  ;;  %v689_v25 = vpop.f32.mrf.mxu1 }
  0xe0   : > { %2243 = vpow2.f32 %v937_v18  ;;  %v933_v26 = vmul.f32 1.442695, %v833_v19  ;;  %v836_v27 = vmin.f32 %v2652_v20, 20.0  ;;  %v2660_v28 = vadd.f32 %v2598_v34, %v689_v25  ;;  %v2127_v29 = vpop.f32.mrf.mxu0 }
  0xe1   : > { %2245 = vpow2.f32 %v869_v22  ;;  %v875_v30 = vmul.f32 1.442695, %v804_v23  ;;  %v802_v31 = vmin.f32 %v2656_v24, 20.0  ;;  %v2664_v32 = vadd.f32 %v2127_v29, %v2598_v34  ;;  %v2159_v33 = vpop.f32.mrf.mxu1 }
  0xe2   : > { %2247 = vpow2.f32 %v933_v26  ;;  %v939_v35 = vmul.f32 1.442695, %v836_v27  ;;  %v834_v37 = vmin.f32 %v2660_v28, 20.0  ;;  %v2668_v39 = vadd.f32 %v2159_v33, %v2598_v34  ;;  %v574_v40 = vpop.f32.mrf.mxu0 }
  0xe3   : > { %2249 = vpow2.f32 %v875_v30  ;;  %v871_v42 = vmul.f32 1.442695, %v802_v31  ;;  %v807_v43 = vmin.f32 %v2664_v32, 20.0  ;;  %v2672_v45 = vadd.f32 %v2598_v34, %v574_v40  ;;  %v702_v46 = vpop.f32.mrf.mxu1 }
  0xe4   : > { %v2226_v47 = vpop.eup %2225  ;;  %2251 = vpow2.f32 %v939_v35  ;;  %v935_v49 = vmul.f32 1.442695, %v834_v37  ;;  %v839_v50 = vmin.f32 %v2668_v39, 20.0  ;;  %v2676_v51 = vadd.f32 %v2598_v34, %v702_v46 }
  0xe5   : > { %v2228_v53 = vpop.eup %2227  ;;  %v991_v54 = vadd.f32 1.0, %v2226_v47  ;;  %2253 = vpow2.f32 %v871_v42  ;;  %v881_v55 = vmul.f32 1.442695, %v807_v43  ;;  %v805_v57 = vmin.f32 %v2672_v45, 20.0 }
  0xe6   : > { %v2230_v58 = vpop.eup %2229  ;;  %v1023_v59 = vadd.f32 1.0, %v2228_v53  ;;  %2255 = vpow2.f32 %v935_v49  ;;  %v945_v61 = vmul.f32 1.442695, %v839_v50  ;;  %v837_v62 = vmin.f32 %v2676_v51, 20.0 }
  0xe7   : > { %v2232_v63 = vpop.eup %2231  ;;  %v1055_v1 = vmul.f32 %v991_v54, %v991_v54  ;;  %v989_v2 = vadd.f32 1.0, %v2230_v58  ;;  %2257 = vpow2.f32 %v881_v55  ;;  %v2680_v3 = vmul.f32 1.442695, %v805_v57 }
  0xe8   : > { %v2234_v5 = vpop.eup %2233  ;;  %v1087_v6 = vmul.f32 %v1023_v59, %v1023_v59  ;;  %v1021_v7 = vadd.f32 1.0, %v2232_v63  ;;  %2259 = vpow2.f32 %v945_v61  ;;  %v2682_v9 = vmul.f32 1.442695, %v837_v62 }
  0xe9   : > { %v2236_v10 = vpop.eup %2235  ;;  %v2684_v11 = vadd.f32 -1.0, %v1055_v1  ;;  %v1183_v13 = vadd.f32 1.0, %v1055_v1  ;;  %v1053_v14 = vmul.f32 %v989_v2, %v989_v2  ;;  %v992_v15 = vadd.f32 1.0, %v2234_v5 }
  0xea   : > { %v2238_v17 = vpop.eup %2237  ;;  %v2686_v18 = vadd.f32 -1.0, %v1087_v6  ;;  %v1215_v19 = vadd.f32 1.0, %v1087_v6  ;;  %v1085_v21 = vmul.f32 %v1021_v7, %v1021_v7  ;;  %v1024_v22 = vadd.f32 1.0, %v2236_v10 }
  0xeb   : > { %v2240_v23 = vpop.eup %2239  ;;  %2261 = vrcp.f32 %v1183_v13  ;;  %v2688_v25 = vadd.f32 -1.0, %v1053_v14  ;;  %v1181_v26 = vadd.f32 1.0, %v1053_v14  ;;  %v1056_v27 = vmul.f32 %v992_v15, %v992_v15 }
  0xec   : > { %v2242_v29 = vpop.eup %2241  ;;  %2263 = vrcp.f32 %v1215_v19  ;;  %v2690_v30 = vadd.f32 -1.0, %v1085_v21  ;;  %v1213_v31 = vadd.f32 1.0, %v1085_v21  ;;  %v1088_v33 = vmul.f32 %v1024_v22, %v1024_v22 }
  0xed   : > { %v2244_v35 = vpop.eup %2243  ;;  %2265 = vrcp.f32 %v1181_v26  ;;  %v2692_v37 = vadd.f32 -1.0, %v1056_v27  ;;  %v1184_v40 = vadd.f32 1.0, %v1056_v27  ;;  %v990_v42 = vadd.f32 1.0, %v2238_v17 }
  0xee   : > { %v2246_v43 = vpop.eup %2245  ;;  %2267 = vrcp.f32 %v1213_v31  ;;  %v2694_v46 = vadd.f32 -1.0, %v1088_v33  ;;  %v1216_v47 = vadd.f32 1.0, %v1088_v33  ;;  %v1022_v49 = vadd.f32 1.0, %v2240_v23 }
  0xef   : > { %v2248_v50 = vpop.eup %2247  ;;  %2269 = vrcp.f32 %v1184_v40  ;;  %v1054_v53 = vmul.f32 %v990_v42, %v990_v42  ;;  %v995_v54 = vadd.f32 1.0, %v2242_v29  ;;  %v1027_v55 = vadd.f32 1.0, %v2244_v35 }
  0xf0   : > { %v2250_v57 = vpop.eup %2249  ;;  %2271 = vrcp.f32 %v1216_v47  ;;  %v1086_v58 = vmul.f32 %v1022_v49, %v1022_v49  ;;  %v993_v59 = vadd.f32 1.0, %v2246_v43  ;;  %v1025_v61 = vadd.f32 1.0, %v2248_v50 }
  0xf1   : > { %v2252_v62 = vpop.eup %2251  ;;  %v2696_v63 = vadd.f32 -1.0, %v1054_v53  ;;  %v1182_v1 = vadd.f32 1.0, %v1054_v53  ;;  %v1059_v2 = vmul.f32 %v995_v54, %v995_v54  ;;  %v1091_v5 = vmul.f32 %v1027_v55, %v1027_v55 }
  0xf2   : > { %v2254_v6 = vpop.eup %2253  ;;  %v2698_v7 = vadd.f32 -1.0, %v1086_v58  ;;  %v1214_v10 = vadd.f32 1.0, %v1086_v58  ;;  %v1057_v13 = vmul.f32 %v993_v59, %v993_v59  ;;  %v1089_v14 = vmul.f32 %v1025_v61, %v1025_v61 }
  0xf3   : > { %v2256_v15 = vpop.eup %2255  ;;  %2273 = vrcp.f32 %v1182_v1  ;;  %v2700_v17 = vadd.f32 -1.0, %v1059_v2  ;;  %v1187_v19 = vadd.f32 1.0, %v1059_v2  ;;  %v2702_v21 = vadd.f32 -1.0, %v1091_v5 }
  0xf4   : > { %v2258_v22 = vpop.eup %2257  ;;  %2275 = vrcp.f32 %v1214_v10  ;;  %v1219_v23 = vadd.f32 1.0, %v1091_v5  ;;  %v2704_v26 = vadd.f32 -1.0, %v1057_v13  ;;  %v1185_v27 = vadd.f32 1.0, %v1057_v13 }
  0xf5   : > { %v2260_v29 = vpop.eup %2259  ;;  %2277 = vrcp.f32 %v1187_v19  ;;  %v2706_v31 = vadd.f32 -1.0, %v1089_v14  ;;  %v1217_v33 = vadd.f32 1.0, %v1089_v14  ;;  %v996_v35 = vadd.f32 1.0, %v2250_v57 }
  0xf6   : > { %2279 = vrcp.f32 %v1219_v23  ;;  %v1028_v40 = vadd.f32 1.0, %v2252_v62  ;;  %v994_v42 = vadd.f32 1.0, %v2254_v6  ;;  %v1026_v43 = vadd.f32 1.0, %v2256_v15 }
  0xf7   : > { %2281 = vrcp.f32 %v1185_v27  ;;  %v1060_v47 = vmul.f32 %v996_v35, %v996_v35  ;;  %v999_v49 = vadd.f32 1.0, %v2258_v22  ;;  %v1031_v50 = vadd.f32 1.0, %v2260_v29  ;;  %v2128_v35 = vpop.f32.mrf.mxu0 }
  0xf8   : > { %v2262_v53 = vpop.eup %2261  ;;  %2283 = vrcp.f32 %v1217_v33  ;;  %v1092_v54 = vmul.f32 %v1028_v40, %v1028_v40  ;;  %v1058_v55 = vmul.f32 %v994_v42, %v994_v42  ;;  %v1090_v58 = vmul.f32 %v1026_v43, %v1026_v43 }
  0xf9   : > { %v2264_v59 = vpop.eup %2263  ;;  %v1250_v61 = vmul.f32 %v2262_v53, %v2684_v11  ;;  %v2709_v1 = vadd.f32 -1.0, %v1060_v47  ;;  %v1188_v57 = vadd.f32 1.0, %v1060_v47  ;;  %v1063_v2 = vmul.f32 %v999_v49, %v999_v49 }
  0xfa   : > { %v2266_v62 = vpop.eup %2265  ;;  %v1314_v5 = vmul.f32 %v2264_v59, %v2686_v18  ;;  %v2712_v6 = vadd.f32 -1.0, %v1092_v54  ;;  %v1220_v10 = vadd.f32 1.0, %v1092_v54  ;;  %v2714_v13 = vadd.f32 -1.0, %v1058_v55  ;;  %v2160_v59 = vpop.f32.mrf.mxu1 }
  0xfb   : > { %v2268_v14 = vpop.eup %2267  ;;  %v1375_v15 = vmul.f32 %v1250_v61, %v2601_v36  ;;  %v1246_v19 = vmul.f32 %v2266_v62, %v2688_v25  ;;  %2285 = vrcp.f32 %v1188_v57  ;;  %v1186_v22 = vadd.f32 1.0, %v1058_v55  ;;  %v577_v61 = vpop.f32.mrf.mxu0 }
  0xfc   : > { %v2270_v11 = vpop.eup %2269  ;;  %v1407_v18 = vmul.f32 %v1314_v5, %v2604_v38  ;;  %v1310_v23 = vmul.f32 %v2268_v14, %v2690_v30  ;;  %2287 = vrcp.f32 %v1220_v10  ;;  %v2727_v27 = vadd.f32 -1.0, %v1090_v58 }
  0xfd   : > { %v2272_v36 = vpop.eup %2271  ;;  %v2020_v25 = vpack.c.bf16 %v1375_v15, %v1375_v15  ;;  %v1373_v29 = vmul.f32 %v1246_v19, %v2608_v41  ;;  %v1252_v33 = vmul.f32 %v2270_v11, %v2692_v37  ;;  %2289 = vrcp.f32 %v1186_v22 }
  0xfe   : > { %v2052_v40 = vpack.c.bf16 %v1407_v18, %v1407_v18  ;;  %v1405_v42 = vmul.f32 %v1310_v23, %v2612_v44  ;;  %v1316_v38 = vmul.f32 %v2272_v36, %v2694_v46  ;;  %v1218_v43 = vadd.f32 1.0, %v1090_v58  ;;  %v705_v18 = vpop.f32.mrf.mxu1  ;;  %v2131_v23 = vpop.f32.mrf.mxu0 }
  0xff   : > { %1696 = vst.msk [vmem:[%s2723_s25 + $0x8] sm:$0xf] %vm1693_vm2, %v2020_v25  ;;  %v2018_v30 = vpack.c.bf16 %v1373_v29, %v1373_v29  ;;  %v1376_v47 = vmul.f32 %v1252_v33, %v2616_v48  ;;  %v2736_v49 = vadd.f32 -1.0, %v1063_v2  ;;  %v1191_v53 = vadd.f32 1.0, %v1063_v2 }
 0x100   : > { %v2274_v41 = vpop.eup %2273  ;;  %1728 = vst.msk [vmem:[%s2723_s25 + $0x88] sm:$0xf] %vm1693_vm2, %v2052_v40  ;;  %v2050_v37 = vpack.c.bf16 %v1405_v42, %v1405_v42  ;;  %v1408_v54 = vmul.f32 %v1316_v38, %v2620_v52  ;;  %2291 = vrcp.f32 %v1218_v43  ;;  %v1095_v44 = vmul.f32 %v1031_v50, %v1031_v50 }
 0x101   : > { %v2276_v46 = vpop.eup %2275  ;;  %1694 = vst.msk [vmem:[%s2723_s25] sm:$0xf] %vm1693_vm2, %v2018_v30  ;;  %v2021_v55 = vpack.c.bf16 %v1376_v47, %v1376_v47  ;;  %v1248_v58 = vmul.f32 %v2274_v41, %v2696_v63  ;;  %2293 = vrcp.f32 %v1191_v53  ;;  %v2745_v48 = vadd.f32 %v2128_v35, %v2598_v34  ;;  %v2163_v30 = vpop.f32.mrf.mxu1 }
 0x102   : > { %v2278_v57 = vpop.eup %2277  ;;  %1726 = vst.msk [vmem:[%s2723_s25 + $0x80] sm:$0xf] %vm1693_vm2, %v2050_v37  ;;  %v2053_v52 = vpack.c.bf16 %v1408_v54, %v1408_v54  ;;  %v1312_v50 = vmul.f32 %v2276_v46, %v2698_v7  ;;  %v2750_v2 = vadd.f32 -1.0, %v1095_v44  ;;  %v1223_v62 = vadd.f32 1.0, %v1095_v44  ;;  %v590_v47 = vpop.f32.mrf.mxu0 }
 0x103   : > { %v2280_v5 = vpop.eup %2279  ;;  %1697 = vst.msk [vmem:[%s2723_s25 + $0xc] sm:$0xf] %vm1693_vm2, %v2021_v55  ;;  %v1374_v63 = vmul.f32 %v1248_v58, %v2624_v56  ;;  %v1258_v10 = vmul.f32 %v2278_v57, %v2700_v17  ;;  %2295 = vpow2.f32 %v2680_v3  ;;  %v808_v14 = vmin.f32 %v2745_v48, 20.0 }
 0x104   : > { %v2282_v15 = vpop.eup %2281  ;;  %1729 = vst.msk [vmem:[%s2723_s25 + $0x8c] sm:$0xf] %vm1693_vm2, %v2053_v52  ;;  %v1406_v7 = vmul.f32 %v1312_v50, %v2628_v60  ;;  %v1322_v19 = vmul.f32 %v2280_v5, %v2702_v21  ;;  %2297 = vrcp.f32 %v1223_v62  ;;  %v2763_v22 = vadd.f32 %v2160_v59, %v2598_v34  ;;  %v2132_v50 = vpop.f32.mrf.mxu0 }
 0x105   : > { %v2284_v11 = vpop.eup %2283  ;;  %v2019_v56 = vpack.c.bf16 %v1374_v63, %v1374_v63  ;;  %v1379_v17 = vmul.f32 %v1258_v10, %v2632_v0  ;;  %v1254_v3 = vmul.f32 %v2282_v15, %v2704_v26  ;;  %2299 = vpow2.f32 %v2682_v9 }
 0x106   : > { %v2051_v36 = vpack.c.bf16 %v1406_v7, %v1406_v7  ;;  %v1411_v60 = vmul.f32 %v1322_v19, %v2636_v4  ;;  %v1318_v21 = vmul.f32 %v2284_v11, %v2706_v31  ;;  %v883_v25 = vmul.f32 1.442695, %v808_v14 }
 0x107   : > { %1695 = vst.msk [vmem:[%s2723_s25 + $0x4] sm:$0xf] %vm1693_vm2, %v2019_v56  ;;  %v2024_v29 = vpack.c.bf16 %v1379_v17, %v1379_v17  ;;  %v1377_v33 = vmul.f32 %v1254_v3, %v2640_v8  ;;  %v840_v0 = vmin.f32 %v2763_v22, 20.0  ;;  %v2775_v26 = vadd.f32 %v2598_v34, %v577_v61 }
 0x108   : > { %v2286_v9 = vpop.eup %2285  ;;  %1727 = vst.msk [vmem:[%s2723_s25 + $0x84] sm:$0xf] %vm1693_vm2, %v2051_v36  ;;  %v2056_v35 = vpack.c.bf16 %v1411_v60, %v1411_v60  ;;  %v1409_v4 = vmul.f32 %v1318_v21, %v2644_v12  ;;  %2301 = vpow2.f32 %v883_v25  ;;  %v2781_v31 = vadd.f32 %v2598_v34, %v705_v18 }
 0x109   : > { %v2288_v40 = vpop.eup %2287  ;;  %1700 = vst.msk [vmem:[%s2723_s25 + $0x18] sm:$0xf] %vm1693_vm2, %v2024_v29  ;;  %v2022_v8 = vpack.c.bf16 %v1377_v33, %v1377_v33  ;;  %v1260_v42 = vmul.f32 %v2286_v9, %v2709_v1  ;;  %v947_v38 = vmul.f32 1.442695, %v840_v0  ;;  %v806_v43 = vmin.f32 %v2775_v26, 20.0  ;;  %v593_v29 = vpop.f32.mrf.mxu0 }
 0x10a   : > { %v2290_v53 = vpop.eup %2289  ;;  %1732 = vst.msk [vmem:[%s2723_s25 + $0x98] sm:$0xf] %vm1693_vm2, %v2056_v35  ;;  %v2054_v12 = vpack.c.bf16 %v1409_v4, %v1409_v4  ;;  %v1324_v41 = vmul.f32 %v2288_v40, %v2712_v6  ;;  %v838_v37 = vmin.f32 %v2781_v31, 20.0  ;;  %v2792_v54 = vadd.f32 %v2131_v23, %v2598_v34 }
 0x10b   : > { %1698 = vst.msk [vmem:[%s2723_s25 + $0x10] sm:$0xf] %vm1693_vm2, %v2022_v8  ;;  %v1380_v1 = vmul.f32 %v1260_v42, %v2648_v16  ;;  %v1256_v44 = vmul.f32 %v2290_v53, %v2714_v13  ;;  %2303 = vpow2.f32 %v947_v38  ;;  %v879_v46 = vmul.f32 1.442695, %v806_v43  ;;  %v718_v13 = vpop.f32.mrf.mxu1 }
 0x10c   : > { %1730 = vst.msk [vmem:[%s2723_s25 + $0x90] sm:$0xf] %vm1693_vm2, %v2054_v12  ;;  %v1412_v55 = vmul.f32 %v1324_v41, %v2652_v20  ;;  %v943_v58 = vmul.f32 1.442695, %v838_v37  ;;  %v811_v6 = vmin.f32 %v2792_v54, 20.0  ;;  %v2803_v59 = vadd.f32 %v2163_v30, %v2598_v34 }
 0x10d   : > { %v2292_v61 = vpop.eup %2291  ;;  %v2025_v57 = vpack.c.bf16 %v1380_v1, %v1380_v1  ;;  %v1378_v52 = vmul.f32 %v1256_v44, %v2656_v24  ;;  %2305 = vpow2.f32 %v879_v46  ;;  %v2807_v16 = vadd.f32 %v2598_v34, %v590_v47  ;;  %v2164_v23 = vpop.f32.mrf.mxu1 }
 0x10e   : > { %v2294_v62 = vpop.eup %2293  ;;  %v2057_v20 = vpack.c.bf16 %v1412_v55, %v1412_v55  ;;  %v1320_v5 = vmul.f32 %v2292_v61, %v2727_v27  ;;  %2307 = vpow2.f32 %v943_v58  ;;  %v889_v63 = vmul.f32 1.442695, %v811_v6 }
 0x10f   : > { %1701 = vst.msk [vmem:[%s2723_s25 + $0x1c] sm:$0xf] %vm1693_vm2, %v2025_v57  ;;  %v2023_v10 = vpack.c.bf16 %v1378_v52, %v1378_v52  ;;  %v1266_v14 = vmul.f32 %v2294_v62, %v2736_v49  ;;  %v843_v24 = vmin.f32 %v2803_v59, 20.0  ;;  %v809_v15 = vmin.f32 %v2807_v16, 20.0  ;;  %v721_v38 = vpop.f32.mrf.mxu1 }
 0x110   : > { %v2296_v7 = vpop.eup %2295  ;;  %1733 = vst.msk [vmem:[%s2723_s25 + $0x9c] sm:$0xf] %vm1693_vm2, %v2057_v20  ;;  %v1410_v19 = vmul.f32 %v1320_v5, %v2660_v28  ;;  %2309 = vpow2.f32 %v889_v63  ;;  %v2819_v11 = vadd.f32 %v2598_v34, %v718_v13  ;;  %v2822_v27 = vadd.f32 %v2132_v50, %v2598_v34 }
 0x111   : > { %v2298_v56 = vpop.eup %2297  ;;  %1699 = vst.msk [vmem:[%s2723_s25 + $0x14] sm:$0xf] %vm1693_vm2, %v2023_v10  ;;  %v1383_v49 = vmul.f32 %v1266_v14, %v2664_v32  ;;  %v997_v17 = vadd.f32 1.0, %v2296_v7  ;;  %v953_v3 = vmul.f32 1.442695, %v843_v24  ;;  %v2836_v42 = vadd.f32 %v2164_v23, %v2598_v34  ;;  %v2167_v6 = vpop.f32.mrf.mxu1 }
 0x112   : > { %v885_v18 = vmul.f32 1.442695, %v809_v15  ;;  %v2300_v36 = vpop.eup %2299  ;;  %v2055_v28 = vpack.c.bf16 %v1410_v19, %v1410_v19  ;;  %v1330_v60 = vmul.f32 %v2298_v56, %v2750_v2  ;;  %v841_v21 = vmin.f32 %v2819_v11, 20.0 }
 0x113   : > { %v812_v25 = vmin.f32 %v2822_v27, 20.0  ;;  %v2028_v33 = vpack.c.bf16 %v1383_v49, %v1383_v49  ;;  %v1061_v0 = vmul.f32 %v997_v17, %v997_v17  ;;  %v1029_v9 = vadd.f32 1.0, %v2300_v36 }
 0x114   : > { %2311 = vpow2.f32 %v953_v3  ;;  %1731 = vst.msk [vmem:[%s2723_s25 + $0x94] sm:$0xf] %vm1693_vm2, %v2055_v28  ;;  %v1415_v32 = vmul.f32 %v1330_v60, %v2668_v39  ;;  %v949_v35 = vmul.f32 1.442695, %v841_v21  ;;  %v2839_v47 = vadd.f32 %v2598_v34, %v593_v29  ;;  %v2135_v39 = vpop.f32.mrf.mxu0 }
 0x115   : > { %2313 = vpow2.f32 %v885_v18  ;;  %v891_v4 = vmul.f32 1.442695, %v812_v25  ;;  %v2302_v40 = vpop.eup %2301  ;;  %1704 = vst.msk [vmem:[%s2723_s25 + $0x28] sm:$0xf] %vm1693_vm2, %v2028_v33  ;;  %v1189_v2 = vadd.f32 1.0, %v1061_v0  ;;  %v1093_v8 = vmul.f32 %v1029_v9, %v1029_v9  ;;  %v734_v33 = vpop.f32.mrf.mxu1 }
 0x116   : > { %v2060_v43 = vpack.c.bf16 %v1415_v32, %v1415_v32  ;;  %v1000_v30 = vadd.f32 1.0, %v2302_v40  ;;  %2315 = vpow2.f32 %v949_v35  ;;  %v844_v12 = vmin.f32 %v2836_v42, 20.0  ;;  %v606_v18 = vpop.f32.mrf.mxu0 }
 0x117   : > { %2317 = vrcp.f32 %v1189_v2  ;;  %v1221_v53 = vadd.f32 1.0, %v1093_v8  ;;  %v810_v1 = vmin.f32 %v2839_v47, 20.0  ;;  %v2846_v44 = vadd.f32 %v2598_v34, %v721_v38 }
 0x118   : > { %v2304_v41 = vpop.eup %2303  ;;  %1736 = vst.msk [vmem:[%s2723_s25 + $0xa8] sm:$0xf] %vm1693_vm2, %v2060_v43  ;;  %v1064_v37 = vmul.f32 %v1000_v30, %v1000_v30  ;;  %2319 = vpow2.f32 %v891_v4  ;;  %v955_v55 = vmul.f32 1.442695, %v844_v12  ;;  %v2849_v58 = vadd.f32 %v2135_v39, %v2598_v34  ;;  %v2136_v39 = vpop.f32.mrf.mxu0 }
 0x119   : > { %2321 = vrcp.f32 %v1221_v53  ;;  %v1032_v46 = vadd.f32 1.0, %v2304_v41  ;;  %v1896_v57 = vadd.f32 -1.0, %v1061_v0  ;;  %v887_v13 = vmul.f32 1.442695, %v810_v1 }
 0x11a   : > { %v2306_v61 = vpop.eup %2305  ;;  %v1192_v52 = vadd.f32 1.0, %v1064_v37  ;;  %v842_v50 = vmin.f32 %v2846_v44, 20.0  ;;  %2323 = vpow2.f32 %v955_v55  ;;  %v815_v63 = vmin.f32 %v2849_v58, 20.0 }
 0x11b   : > { %v2308_v62 = vpop.eup %2307  ;;  %v1096_v20 = vmul.f32 %v1032_v46, %v1032_v46  ;;  %v998_v5 = vadd.f32 1.0, %v2306_v61  ;;  %v2854_v24 = vadd.f32 %v2167_v6, %v2598_v34  ;;  %v1928_v7 = vadd.f32 -1.0, %v1093_v8 }
 0x11c   : > { %2325 = vrcp.f32 %v1192_v52  ;;  %v1030_v10 = vadd.f32 1.0, %v2308_v62  ;;  %v951_v14 = vmul.f32 1.442695, %v842_v50  ;;  %v897_v3 = vmul.f32 1.442695, %v815_v63 }
 0x11d   : > { %v2310_v15 = vpop.eup %2309  ;;  %v1224_v19 = vadd.f32 1.0, %v1096_v20  ;;  %v1062_v56 = vmul.f32 %v998_v5, %v998_v5  ;;  %2327 = vpow2.f32 %v887_v13  ;;  %v1899_v23 = vadd.f32 -1.0, %v1064_v37 }
 0x11e   : > { %v1094_v49 = vmul.f32 %v1030_v10, %v1030_v10  ;;  %v1003_v17 = vadd.f32 1.0, %v2310_v15  ;;  %2329 = vpow2.f32 %v951_v14  ;;  %v847_v28 = vmin.f32 %v2854_v24, 20.0 }
 0x11f   : > { %2331 = vrcp.f32 %v1224_v19  ;;  %v1190_v36 = vadd.f32 1.0, %v1062_v56  ;;  %v2857_v21 = vadd.f32 -1.0, %v1096_v20  ;;  %v2860_v35 = vadd.f32 %v2598_v34, %v606_v18 }
 0x120   : > { %v1222_v25 = vadd.f32 1.0, %v1094_v49  ;;  %v1067_v29 = vmul.f32 %v1003_v17, %v1003_v17  ;;  %2333 = vpow2.f32 %v897_v3  ;;  %v961_v32 = vmul.f32 1.442695, %v847_v28 }
 0x121   : > { %v2312_v60 = vpop.eup %2311  ;;  %2335 = vrcp.f32 %v1190_v36  ;;  %v2862_v4 = vadd.f32 -1.0, %v1062_v56  ;;  %v813_v43 = vmin.f32 %v2860_v35, 20.0  ;;  %v2866_v30 = vadd.f32 %v2598_v34, %v734_v33 }
 0x122   : > { %v2314_v0 = vpop.eup %2313  ;;  %v1035_v9 = vadd.f32 1.0, %v2312_v60  ;;  %2337 = vrcp.f32 %v1222_v25  ;;  %v1195_v40 = vadd.f32 1.0, %v1067_v29  ;;  %v1929_v12 = vadd.f32 -1.0, %v1094_v49 }
 0x123   : > { %v1001_v2 = vadd.f32 1.0, %v2314_v0  ;;  %v2316_v8 = vpop.eup %2315  ;;  %2339 = vpow2.f32 %v961_v32  ;;  %v2868_v55 = vadd.f32 -1.0, %v1067_v29  ;;  %v893_v61 = vmul.f32 1.442695, %v813_v43 }
 0x124   : > { %v1099_v38 = vmul.f32 %v1035_v9, %v1035_v9  ;;  %v2318_v53 = vpop.eup %2317  ;;  %2341 = vrcp.f32 %v1195_v40  ;;  %v1033_v37 = vadd.f32 1.0, %v2316_v8  ;;  %v2871_v20 = vadd.f32 %v2136_v39, %v2598_v34 }
 0x125   : > { %v1065_v41 = vmul.f32 %v1001_v2, %v1001_v2  ;;  %v2320_v1 = vpop.eup %2319  ;;  %v1262_v46 = vmul.f32 %v2318_v53, %v1896_v57  ;;  %v845_v10 = vmin.f32 %v2866_v30, 20.0 }
 0x126   : > { %v1227_v6 = vadd.f32 1.0, %v1099_v38  ;;  %v2322_v52 = vpop.eup %2321  ;;  %v1097_v50 = vmul.f32 %v1033_v37, %v1033_v37  ;;  %v1004_v62 = vadd.f32 1.0, %v2320_v1  ;;  %v2875_v57 = vadd.f32 -1.0, %v1099_v38 }
 0x127   : > { %v1193_v13 = vadd.f32 1.0, %v1065_v41  ;;  %v1381_v5 = vmul.f32 %v1262_v46, %v2672_v45  ;;  %v1326_v63 = vmul.f32 %v2322_v52, %v1928_v7  ;;  %v2324_v14 = vpop.eup %2323  ;;  %v2878_v45 = vadd.f32 -1.0, %v1065_v41 }
 0x128   : > { %2343 = vrcp.f32 %v1227_v6  ;;  %v1225_v15 = vadd.f32 1.0, %v1097_v50  ;;  %v1068_v19 = vmul.f32 %v1004_v62, %v1004_v62  ;;  %v1036_v3 = vadd.f32 1.0, %v2324_v14 }
 0x129   : > { %2345 = vrcp.f32 %v1193_v13  ;;  %v2326_v56 = vpop.eup %2325  ;;  %v2026_v49 = vpack.c.bf16 %v1381_v5, %v1381_v5  ;;  %v1413_v17 = vmul.f32 %v1326_v63, %v2676_v51  ;;  %v957_v29 = vmul.f32 1.442695, %v845_v10  ;;  %v2168_v13 = vpop.f32.mrf.mxu1 }
 0x12a   : > { %2347 = vpow2.f32 %v893_v61  ;;  %v2328_v34 = vpop.eup %2327  ;;  %v1268_v18 = vmul.f32 %v2326_v56, %v1899_v23  ;;  %v1196_v7 = vadd.f32 1.0, %v1068_v19  ;;  %v1100_v60 = vmul.f32 %v1036_v3, %v1036_v3 }
 0x12b   : > { %2349 = vrcp.f32 %v1225_v15  ;;  %v2330_v36 = vpop.eup %2329  ;;  %1702 = vst.msk [vmem:[%s2723_s25 + $0x20] sm:$0xf] %vm1693_vm2, %v2026_v49  ;;  %v2058_v28 = vpack.c.bf16 %v1413_v17, %v1413_v17  ;;  %v1002_v25 = vadd.f32 1.0, %v2328_v34  ;;  %v2883_v51 = vadd.f32 -1.0, %v1097_v50  ;;  %v609_v15 = vpop.f32.mrf.mxu0 }
 0x12c   : > { %v2332_v33 = vpop.eup %2331  ;;  %v1384_v0 = vmul.f32 %v1268_v18, %v2745_v48  ;;  %2351 = vrcp.f32 %v1196_v7  ;;  %v1034_v9 = vadd.f32 1.0, %v2330_v36  ;;  %v1228_v40 = vadd.f32 1.0, %v1100_v60  ;;  %v2911_v18 = vld [vmem:[%s3181_s2] ss:$0 sm:$0xff] }
 0x12d   : > { %v2334_v23 = vpop.eup %2333  ;;  %1734 = vst.msk [vmem:[%s2723_s25 + $0xa0] sm:$0xf] %vm1693_vm2, %v2058_v28  ;;  %v1332_v32 = vmul.f32 %v2332_v33, %v2857_v21  ;;  %v1066_v2 = vmul.f32 %v1002_v25, %v1002_v25  ;;  %v816_v8 = vmin.f32 %v2871_v20, 20.0  ;;  %2353 = vpow2.f32 %v957_v29  ;;  %v2139_v29 = vpop.f32.mrf.mxu0 }
 0x12e   : > { %v2336_v38 = vpop.eup %2335  ;;  %v2029_v43 = vpack.c.bf16 %v1384_v0, %v1384_v0  ;;  %v1098_v39 = vmul.f32 %v1034_v9, %v1034_v9  ;;  %v1007_v53 = vadd.f32 1.0, %v2334_v23  ;;  %v1903_v1 = vadd.f32 -1.0, %v1068_v19 }
 0x12f   : > { %v2338_v48 = vpop.eup %2337  ;;  %v1416_v41 = vmul.f32 %v1332_v32, %v2763_v22  ;;  %v1264_v37 = vmul.f32 %v2336_v38, %v2862_v4  ;;  %2355 = vrcp.f32 %v1228_v40  ;;  %v2893_v6 = vadd.f32 -1.0, %v1100_v60 }
 0x130   : > { %v2340_v46 = vpop.eup %2339  ;;  %1705 = vst.msk [vmem:[%s2723_s25 + $0x2c] sm:$0xf] %vm1693_vm2, %v2029_v43  ;;  %v1328_v21 = vmul.f32 %v2338_v48, %v1929_v12  ;;  %v1194_v61 = vadd.f32 1.0, %v1066_v2  ;;  %v1226_v52 = vadd.f32 1.0, %v1098_v39  ;;  %v1071_v63 = vmul.f32 %v1007_v53, %v1007_v53 }
 0x131   : > { %v2342_v50 = vpop.eup %2341  ;;  %v2061_v62 = vpack.c.bf16 %v1416_v41, %v1416_v41  ;;  %v1382_v5 = vmul.f32 %v1264_v37, %v2775_v26  ;;  %v1039_v22 = vadd.f32 1.0, %v2340_v46  ;;  %v899_v14 = vmul.f32 1.442695, %v816_v8  ;;  %v622_v46 = vpop.f32.mrf.mxu0 }
 0x132   : > { %v1414_v4 = vmul.f32 %v1328_v21, %v2781_v31  ;;  %v1274_v10 = vmul.f32 %v2342_v50, %v2868_v55  ;;  %2357 = vrcp.f32 %v1194_v61  ;;  %v2900_v19 = vadd.f32 -1.0, %v1066_v2  ;;  %v737_v31 = vpop.f32.mrf.mxu1 }
 0x133   : > { %1737 = vst.msk [vmem:[%s2723_s25 + $0xac] sm:$0xf] %vm1693_vm2, %v2061_v62  ;;  %v2027_v12 = vpack.c.bf16 %v1382_v5, %v1382_v5  ;;  %2359 = vrcp.f32 %v1226_v52  ;;  %v1199_v56 = vadd.f32 1.0, %v1071_v63  ;;  %v2903_v3 = vmul.f32 %v1039_v22, %v1039_v22 }
 0x134   : > { %v2059_v26 = vpack.c.bf16 %v1414_v4, %v1414_v4  ;;  %v1387_v17 = vmul.f32 %v1274_v10, %v2792_v54  ;;  %2361 = vpow2.f32 %v899_v14  ;;  %v2914_v7 = vadd.f32 %v2911_v18, %v2168_v13  ;;  %v2171_v8 = vpop.f32.mrf.mxu1 }
 0x135   : > { %v2344_v49 = vpop.eup %2343  ;;  %1703 = vst.msk [vmem:[%s2723_s25 + $0x24] sm:$0xf] %vm1693_vm2, %v2027_v12  ;;  %2363 = vrcp.f32 %v1199_v56  ;;  %v2917_v54 = vadd.f32 %v2911_v18, %v609_v15  ;;  %v1231_v25 = vadd.f32 1.0, %v2903_v3  ;;  %v1906_v21 = vadd.f32 -1.0, %v1071_v63  ;;  %v2140_v15 = vpop.f32.mrf.mxu0 }
 0x136   : > { %v2346_v55 = vpop.eup %2345  ;;  %v1338_v34 = vmul.f32 %v2344_v49, %v2875_v57  ;;  %1735 = vst.msk [vmem:[%s2723_s25 + $0xa4] sm:$0xf] %vm1693_vm2, %v2059_v26  ;;  %v2032_v28 = vpack.c.bf16 %v1387_v17, %v1387_v17  ;;  %v1933_v57 = vadd.f32 -1.0, %v1098_v39  ;;  %v848_v23 = vmin.f32 %v2914_v7, 20.0  ;;  %v750_v62 = vpop.f32.mrf.mxu1 }
 0x137   : > { %v2348_v36 = vpop.eup %2347  ;;  %v1270_v60 = vmul.f32 %v2346_v55, %v2878_v45  ;;  %v814_v32 = vmin.f32 %v2917_v54, 20.0  ;;  %2365 = vrcp.f32 %v1231_v25  ;;  %v2931_v45 = vadd.f32 %v2911_v18, %v737_v31 }
 0x138   : > { %v2350_v33 = vpop.eup %2349  ;;  %v1419_v0 = vmul.f32 %v1338_v34, %v2803_v59  ;;  %v1005_v9 = vadd.f32 1.0, %v2348_v36  ;;  %1708 = vst.msk [vmem:[%s2723_s25 + $0x38] sm:$0xf] %vm1693_vm2, %v2032_v28  ;;  %v963_v39 = vmul.f32 1.442695, %v848_v23  ;;  %v2941_v52 = vadd.f32 %v2911_v18, %v2139_v29  ;;  %v2172_v25 = vpop.f32.mrf.mxu1 }
 0x139   : > { %v1385_v40 = vmul.f32 %v1270_v60, %v2807_v16  ;;  %v1334_v2 = vmul.f32 %v2350_v33, %v2883_v51  ;;  %v2352_v38 = vpop.eup %2351  ;;  %v895_v53 = vmul.f32 1.442695, %v814_v32  ;;  %v846_v16 = vmin.f32 %v2931_v45, 20.0 }
 0x13a   : > { %v2064_v43 = vpack.c.bf16 %v1419_v0, %v1419_v0  ;;  %v2933_v59 = vmul.f32 %v1005_v9, %v1005_v9  ;;  %v1276_v37 = vmul.f32 %v2352_v38, %v1903_v1  ;;  %v2354_v51 = vpop.eup %2353  ;;  %2367 = vpow2.f32 %v963_v39  ;;  %v625_v9 = vpop.f32.mrf.mxu0 }
 0x13b   : > { %v2030_v48 = vpack.c.bf16 %v1385_v40, %v1385_v40  ;;  %v1417_v41 = vmul.f32 %v1334_v2, %v2819_v11  ;;  %v1037_v1 = vadd.f32 1.0, %v2354_v51  ;;  %2369 = vpow2.f32 %v895_v53  ;;  %v753_v53 = vpop.f32.mrf.mxu1 }
 0x13c   : > { %1740 = vst.msk [vmem:[%s2723_s25 + $0xb8] sm:$0xf] %vm1693_vm2, %v2064_v43  ;;  %v1197_v61 = vadd.f32 1.0, %v2933_v59  ;;  %v2356_v13 = vpop.eup %2355  ;;  %v1388_v11 = vmul.f32 %v1276_v37, %v2822_v27  ;;  %v959_v63 = vmul.f32 1.442695, %v846_v16  ;;  %v819_v22 = vmin.f32 %v2941_v52, 20.0  ;;  %v2143_v16 = vpop.f32.mrf.mxu0 }
 0x13d   : > { %1706 = vst.msk [vmem:[%s2723_s25 + $0x30] sm:$0xf] %vm1693_vm2, %v2030_v48  ;;  %v2062_v50 = vpack.c.bf16 %v1417_v41, %v1417_v41  ;;  %v1340_v5 = vmul.f32 %v2356_v13, %v2893_v6  ;;  %v2950_v10 = vmul.f32 %v1037_v1, %v1037_v1  ;;  %v2953_v14 = vadd.f32 %v2911_v18, %v2171_v8 }
 0x13e   : > { %2371 = vrcp.f32 %v1197_v61  ;;  %v2033_v4 = vpack.c.bf16 %v1388_v11, %v1388_v11  ;;  %v2956_v27 = vadd.f32 %v2911_v18, %v622_v46  ;;  %v905_v56 = vmul.f32 1.442695, %v819_v22 }
 0x13f   : > { %1738 = vst.msk [vmem:[%s2723_s25 + $0xb0] sm:$0xf] %vm1693_vm2, %v2062_v50  ;;  %v2358_v12 = vpop.eup %2357  ;;  %v1420_v6 = vmul.f32 %v1340_v5, %v2836_v42  ;;  %2373 = vpow2.f32 %v959_v63  ;;  %v2960_v49 = vadd.f32 %v2911_v18, %v750_v62  ;;  %v1938_v31 = vadd.f32 -1.0, %v2903_v3  ;;  %v2175_v63 = vpop.f32.mrf.mxu1 }
 0x140   : > { %v2360_v26 = vpop.eup %2359  ;;  %1709 = vst.msk [vmem:[%s2723_s25 + $0x3c] sm:$0xf] %vm1693_vm2, %v2033_v4  ;;  %v1272_v17 = vmul.f32 %v2358_v12, %v2900_v19  ;;  %v1229_v55 = vadd.f32 1.0, %v2950_v10  ;;  %v851_v34 = vmin.f32 %v2953_v14, 20.0  ;;  %2375 = vpow2.f32 %v905_v56 }
 0x141   : > { %v2362_v36 = vpop.eup %2361  ;;  %v2065_v28 = vpack.c.bf16 %v1420_v6, %v1420_v6  ;;  %v1336_v42 = vmul.f32 %v2360_v26, %v1933_v57  ;;  %v817_v60 = vmin.f32 %v2956_v27, 20.0  ;;  %v849_v57 = vmin.f32 %v2960_v49, 20.0 }
 0x142   : > { %v2364_v29 = vpop.eup %2363  ;;  %v1386_v33 = vmul.f32 %v1272_v17, %v2839_v47  ;;  %2377 = vrcp.f32 %v1229_v55  ;;  %v1008_v0 = vadd.f32 1.0, %v2362_v36  ;;  %v969_v19 = vmul.f32 1.442695, %v851_v34 }
 0x143   : > { %1741 = vst.msk [vmem:[%s2723_s25 + $0xbc] sm:$0xf] %vm1693_vm2, %v2065_v28  ;;  %v1418_v3 = vmul.f32 %v1336_v42, %v2846_v44  ;;  %v1282_v23 = vmul.f32 %v2364_v29, %v1906_v21  ;;  %v901_v32 = vmul.f32 1.442695, %v817_v60  ;;  %v2977_v47 = vadd.f32 %v2911_v18, %v2140_v15 }
 0x144   : > { %v2031_v40 = vpack.c.bf16 %v1386_v33, %v1386_v33  ;;  %v2974_v2 = vmul.f32 %v1008_v0, %v1008_v0  ;;  %2379 = vpow2.f32 %v969_v19  ;;  %v2366_v8 = vpop.eup %2365  ;;  %v965_v39 = vmul.f32 1.442695, %v849_v57 }
 0x145   : > { %v2063_v38 = vpack.c.bf16 %v1418_v3, %v1418_v3  ;;  %v1391_v43 = vmul.f32 %v1282_v23, %v2849_v58  ;;  %2381 = vpow2.f32 %v901_v32  ;;  %v1346_v44 = vmul.f32 %v2366_v8, %v1938_v31 }
 0x146   : > { %1707 = vst.msk [vmem:[%s2723_s25 + $0x34] sm:$0xf] %vm1693_vm2, %v2031_v40  ;;  %v1904_v48 = vadd.f32 -1.0, %v2933_v59  ;;  %v1200_v41 = vadd.f32 1.0, %v2974_v2  ;;  %v820_v37 = vmin.f32 %v2977_v47, 20.0  ;;  %2383 = vpow2.f32 %v965_v39 }
 0x147   : > { %1739 = vst.msk [vmem:[%s2723_s25 + $0xb4] sm:$0xf] %vm1693_vm2, %v2063_v38  ;;  %v2036_v46 = vpack.c.bf16 %v1391_v43, %v1391_v43  ;;  %v2988_v58 = vadd.f32 %v2911_v18, %v2172_v25  ;;  %v2991_v51 = vadd.f32 %v2911_v18, %v625_v9  ;;  %v2368_v21 = vpop.eup %2367  ;;  %v1423_v61 = vmul.f32 %v1346_v44, %v2854_v24  ;;  %v638_v25 = vpop.f32.mrf.mxu0 }
 0x148   : > { %2385 = vrcp.f32 %v1200_v41  ;;  %v907_v59 = vmul.f32 1.442695, %v820_v37  ;;  %v2995_v13 = vadd.f32 %v2911_v18, %v753_v53  ;;  %v2370_v50 = vpop.eup %2369  ;;  %v1040_v11 = vadd.f32 1.0, %v2368_v21  ;;  %v766_v41 = vpop.f32.mrf.mxu1 }
 0x149   : > { %1712 = vst.msk [vmem:[%s2723_s25 + $0x48] sm:$0xf] %vm1693_vm2, %v2036_v46  ;;  %v852_v1 = vmin.f32 %v2988_v58, 20.0  ;;  %v818_v62 = vmin.f32 %v2991_v51, 20.0  ;;  %v3002_v5 = vadd.f32 %v2911_v18, %v2143_v16  ;;  %v2068_v24 = vpack.c.bf16 %v1423_v61, %v1423_v61 }
 0x14a   : > { %v1006_v4 = vadd.f32 1.0, %v2370_v50  ;;  %2387 = vpow2.f32 %v907_v59  ;;  %v850_v15 = vmin.f32 %v2995_v13, 20.0  ;;  %v1104_v6 = vmul.f32 %v1040_v11, %v1040_v11 }
 0x14b   : > { %v2372_v22 = vpop.eup %2371  ;;  %v971_v56 = vmul.f32 1.442695, %v852_v1  ;;  %1744 = vst.msk [vmem:[%s2723_s25 + $0xc8] sm:$0xf] %vm1693_vm2, %v2068_v24  ;;  %v1936_v17 = vadd.f32 -1.0, %v2950_v10  ;;  %v823_v55 = vmin.f32 %v3002_v5, 20.0  ;;  %v3010_v34 = vadd.f32 %v2911_v18, %v2175_v63 }
 0x14c   : > { %v1278_v12 = vmul.f32 %v2372_v22, %v1904_v48  ;;  %v2374_v26 = vpop.eup %2373  ;;  %v1070_v31 = vmul.f32 %v1006_v4, %v1006_v4  ;;  %v1232_v28 = vadd.f32 1.0, %v1104_v6  ;;  %v903_v60 = vmul.f32 1.442695, %v818_v62  ;;  %v2144_v62 = vpop.f32.mrf.mxu0 }
 0x14d   : > { %v1038_v42 = vadd.f32 1.0, %v2374_v26  ;;  %v2376_v29 = vpop.eup %2375  ;;  %2389 = vpow2.f32 %v971_v56  ;;  %v967_v0 = vmul.f32 1.442695, %v850_v15  ;;  %v913_v19 = vmul.f32 1.442695, %v823_v55 }
 0x14e   : > { %v1389_v36 = vmul.f32 %v1278_v12, %v2860_v35  ;;  %v1198_v33 = vadd.f32 1.0, %v1070_v31  ;;  %2391 = vrcp.f32 %v1232_v28  ;;  %v1011_v23 = vadd.f32 1.0, %v2376_v29 }
 0x14f   : > { %v2378_v9 = vpop.eup %2377  ;;  %v1102_v3 = vmul.f32 %v1038_v42, %v1038_v42  ;;  %v855_v57 = vmin.f32 %v3010_v34, 20.0  ;;  %v3015_v35 = vadd.f32 %v2911_v18, %v638_v25  ;;  %v1907_v8 = vadd.f32 -1.0, %v2974_v2 }
 0x150   : > { %v2034_v10 = vpack.c.bf16 %v1389_v36, %v1389_v36  ;;  %v1342_v32 = vmul.f32 %v2378_v9, %v1936_v17  ;;  %2393 = vrcp.f32 %v1198_v33  ;;  %v1075_v43 = vmul.f32 %v1011_v23, %v1011_v23  ;;  %v2176_v36 = vpop.f32.mrf.mxu1 }
 0x151   : > { %v2380_v40 = vpop.eup %2379  ;;  %v1230_v38 = vadd.f32 1.0, %v1102_v3  ;;  %2395 = vpow2.f32 %v903_v60  ;;  %v977_v48 = vmul.f32 1.442695, %v855_v57  ;;  %v1939_v37 = vadd.f32 -1.0, %v1104_v6  ;;  %v641_v60 = vpop.f32.mrf.mxu0 }
 0x152   : > { %1710 = vst.msk [vmem:[%s2723_s25 + $0x40] sm:$0xf] %vm1693_vm2, %v2034_v10  ;;  %v2382_v39 = vpop.eup %2381  ;;  %v1421_v53 = vmul.f32 %v1342_v32, %v2866_v30  ;;  %v1043_v44 = vadd.f32 1.0, %v2380_v40  ;;  %2397 = vpow2.f32 %v967_v0  ;;  %v1203_v16 = vadd.f32 1.0, %v1075_v43 }
 0x153   : > { %2399 = vrcp.f32 %v1230_v38  ;;  %v1009_v46 = vadd.f32 1.0, %v2382_v39  ;;  %v2384_v21 = vpop.eup %2383  ;;  %v821_v2 = vmin.f32 %v3015_v35, 20.0  ;;  %v3023_v30 = vadd.f32 %v2911_v18, %v766_v41 }
 0x154   : > { %v2066_v61 = vpack.c.bf16 %v1421_v53, %v1421_v53  ;;  %v1107_v59 = vmul.f32 %v1043_v44, %v1043_v44  ;;  %2401 = vpow2.f32 %v913_v19  ;;  %v1041_v1 = vadd.f32 1.0, %v2384_v21 }
 0x155   : > { %v2386_v50 = vpop.eup %2385  ;;  %2403 = vrcp.f32 %v1203_v16  ;;  %v1073_v11 = vmul.f32 %v1009_v46, %v1009_v46  ;;  %v1905_v22 = vadd.f32 -1.0, %v1070_v31  ;;  %v1937_v15 = vadd.f32 -1.0, %v1102_v3 }
 0x156   : > { %1742 = vst.msk [vmem:[%s2723_s25 + $0xc0] sm:$0xf] %vm1693_vm2, %v2066_v61  ;;  %v1284_v63 = vmul.f32 %v2386_v50, %v1907_v8  ;;  %v1235_v24 = vadd.f32 1.0, %v1107_v59  ;;  %2405 = vpow2.f32 %v977_v48  ;;  %v1105_v6 = vmul.f32 %v1041_v1, %v1041_v1 }
 0x157   : > { %v2388_v4 = vpop.eup %2387  ;;  %v1201_v12 = vadd.f32 1.0, %v1073_v11  ;;  %v909_v56 = vmul.f32 1.442695, %v821_v2  ;;  %v853_v55 = vmin.f32 %v3023_v30, 20.0  ;;  %v1910_v28 = vadd.f32 -1.0, %v1075_v43 }
 0x158   : > { %v1392_v26 = vmul.f32 %v1284_v63, %v2871_v20  ;;  %2407 = vrcp.f32 %v1235_v24  ;;  %v1012_v17 = vadd.f32 1.0, %v2388_v4  ;;  %v1233_v42 = vadd.f32 1.0, %v1105_v6 }
 0x159   : > { %2409 = vrcp.f32 %v1201_v12  ;;  %v3030_v31 = vadd.f32 %v2911_v18, %v2144_v62  ;;  %v973_v33 = vmul.f32 1.442695, %v853_v55  ;;  %v1942_v19 = vadd.f32 -1.0, %v1107_v59 }
 0x15a   : > { %v2037_v25 = vpack.c.bf16 %v1392_v26, %v1392_v26  ;;  %v1076_v29 = vmul.f32 %v1012_v17, %v1012_v17  ;;  %2411 = vpow2.f32 %v909_v56  ;;  %v2390_v0 = vpop.eup %2389  ;;  %v3034_v9 = vadd.f32 %v2911_v18, %v2176_v36 }
 0x15b   : > { %2413 = vrcp.f32 %v1233_v42  ;;  %v824_v20 = vmin.f32 %v3030_v31, 20.0  ;;  %v2392_v10 = vpop.eup %2391  ;;  %v1044_v23 = vadd.f32 1.0, %v2390_v0  ;;  %v3039_v32 = vadd.f32 %v2911_v18, %v641_v60 }
 0x15c   : > { %1713 = vst.msk [vmem:[%s2723_s25 + $0x4c] sm:$0xf] %vm1693_vm2, %v2037_v25  ;;  %v1204_v3 = vadd.f32 1.0, %v1076_v29  ;;  %2415 = vpow2.f32 %v973_v33  ;;  %v1348_v40 = vmul.f32 %v2392_v10, %v1939_v37  ;;  %v1908_v8 = vadd.f32 -1.0, %v1073_v11 }
 0x15d   : > { %v2394_v57 = vpop.eup %2393  ;;  %v915_v38 = vmul.f32 1.442695, %v824_v20  ;;  %v856_v43 = vmin.f32 %v3034_v9, 20.0  ;;  %v1940_v44 = vadd.f32 -1.0, %v1105_v6  ;;  %v1108_v48 = vmul.f32 %v1044_v23, %v1044_v23 }
 0x15e   : > { %v2396_v39 = vpop.eup %2395  ;;  %v1280_v53 = vmul.f32 %v2394_v57, %v1905_v22  ;;  %2417 = vrcp.f32 %v1204_v3  ;;  %v1424_v16 = vmul.f32 %v1348_v40, %v2914_v7  ;;  %v822_v50 = vmin.f32 %v3039_v32, 20.0  ;;  %v769_v22 = vpop.f32.mrf.mxu1 }
 0x15f   : > { %v2398_v41 = vpop.eup %2397  ;;  %v1010_v46 = vadd.f32 1.0, %v2396_v39  ;;  %2419 = vpow2.f32 %v915_v38  ;;  %v979_v21 = vmul.f32 1.442695, %v856_v43  ;;  %v1236_v37 = vadd.f32 1.0, %v1108_v48  ;;  %v2147_v39 = vpop.f32.mrf.mxu0 }
 0x160   : > { %v2400_v61 = vpop.eup %2399  ;;  %v1390_v59 = vmul.f32 %v1280_v53, %v2917_v54  ;;  %v1042_v2 = vadd.f32 1.0, %v2398_v41  ;;  %v2069_v1 = vpack.c.bf16 %v1424_v16, %v1424_v16  ;;  %v1911_v26 = vadd.f32 -1.0, %v1076_v29 }
 0x161   : > { %v2402_v11 = vpop.eup %2401  ;;  %v1344_v62 = vmul.f32 %v2400_v61, %v1937_v15  ;;  %v1074_v63 = vmul.f32 %v1010_v46, %v1010_v46  ;;  %2421 = vpow2.f32 %v979_v21  ;;  %v3051_v42 = vadd.f32 %v2911_v18, %v769_v22 }
 0x162   : > { %v2404_v24 = vpop.eup %2403  ;;  %v2035_v7 = vpack.c.bf16 %v1390_v59, %v1390_v59  ;;  %2423 = vrcp.f32 %v1236_v37  ;;  %v1106_v4 = vmul.f32 %v1042_v2, %v1042_v2  ;;  %v1015_v12 = vadd.f32 1.0, %v2402_v11  ;;  %1745 = vst.msk [vmem:[%s2723_s25 + $0xcc] sm:$0xf] %vm1693_vm2, %v2069_v1 }
 0x163   : > { %v2406_v6 = vpop.eup %2405  ;;  %v1422_v54 = vmul.f32 %v1344_v62, %v2931_v45  ;;  %v1290_v56 = vmul.f32 %v2404_v24, %v1910_v28  ;;  %v1202_v17 = vadd.f32 1.0, %v1074_v63  ;;  %v911_v0 = vmul.f32 1.442695, %v822_v50  ;;  %v2179_v50 = vpop.f32.mrf.mxu1 }
 0x164   : > { %1711 = vst.msk [vmem:[%s2723_s25 + $0x44] sm:$0xf] %vm1693_vm2, %v2035_v7  ;;  %v1234_v15 = vadd.f32 1.0, %v1106_v4  ;;  %v1079_v55 = vmul.f32 %v1015_v12, %v1015_v12  ;;  %v1047_v36 = vadd.f32 1.0, %v2406_v6  ;;  %v1943_v28 = vadd.f32 -1.0, %v1108_v48  ;;  %v654_v24 = vpop.f32.mrf.mxu0 }
 0x165   : > { %v2408_v60 = vpop.eup %2407  ;;  %v2067_v25 = vpack.c.bf16 %v1422_v54, %v1422_v54  ;;  %v1395_v33 = vmul.f32 %v1290_v56, %v2941_v52  ;;  %2425 = vrcp.f32 %v1202_v17  ;;  %v854_v43 = vmin.f32 %v3051_v42, 20.0 }
 0x166   : > { %v2410_v20 = vpop.eup %2409  ;;  %v1354_v45 = vmul.f32 %v2408_v60, %v1942_v19  ;;  %2427 = vrcp.f32 %v1234_v15  ;;  %v1207_v29 = vadd.f32 1.0, %v1079_v55  ;;  %v1111_v57 = vmul.f32 %v1047_v36, %v1047_v36  ;;  %v782_v36 = vpop.f32.mrf.mxu1 }
 0x167   : > { %v2412_v10 = vpop.eup %2411  ;;  %1743 = vst.msk [vmem:[%s2723_s25 + $0xc4] sm:$0xf] %vm1693_vm2, %v2067_v25  ;;  %v2040_v3 = vpack.c.bf16 %v1395_v33, %v1395_v33  ;;  %v1286_v23 = vmul.f32 %v2410_v20, %v1908_v8  ;;  %2429 = vpow2.f32 %v911_v0  ;;  %v1909_v41 = vadd.f32 -1.0, %v1074_v63 }
 0x168   : > { %v2414_v40 = vpop.eup %2413  ;;  %v1427_v38 = vmul.f32 %v1354_v45, %v2953_v14  ;;  %2431 = vrcp.f32 %v1207_v29  ;;  %v1013_v52 = vadd.f32 1.0, %v2412_v10  ;;  %v1239_v16 = vadd.f32 1.0, %v1111_v57 }
 0x169   : > { %v2416_v19 = vpop.eup %2415  ;;  %1716 = vst.msk [vmem:[%s2723_s25 + $0x58] sm:$0xf] %vm1693_vm2, %v2040_v3  ;;  %v1393_v53 = vmul.f32 %v1286_v23, %v2956_v27  ;;  %v1350_v48 = vmul.f32 %v2414_v40, %v1940_v44  ;;  %v975_v61 = vmul.f32 1.442695, %v854_v43  ;;  %v3063_v2 = vadd.f32 %v2911_v18, %v2147_v39 }
 0x16a   : > { %v2072_v8 = vpack.c.bf16 %v1427_v38, %v1427_v38  ;;  %v1077_v46 = vmul.f32 %v1013_v52, %v1013_v52  ;;  %v1045_v21 = vadd.f32 1.0, %v2416_v19  ;;  %2433 = vrcp.f32 %v1239_v16  ;;  %v2148_v38 = vpop.f32.mrf.mxu0 }
 0x16b   : > { %v2418_v14 = vpop.eup %2417  ;;  %v2038_v59 = vpack.c.bf16 %v1393_v53, %v1393_v53  ;;  %v1425_v37 = vmul.f32 %v1350_v48, %v2960_v49  ;;  %v1941_v44 = vadd.f32 -1.0, %v1106_v4  ;;  %2435 = vpow2.f32 %v975_v61  ;;  %v2180_v53 = vpop.f32.mrf.mxu1 }
 0x16c   : > { %v2420_v11 = vpop.eup %2419  ;;  %1748 = vst.msk [vmem:[%s2723_s25 + $0xd8] sm:$0xf] %vm1693_vm2, %v2072_v8  ;;  %v1292_v27 = vmul.f32 %v2418_v14, %v1911_v26  ;;  %v1205_v1 = vadd.f32 1.0, %v1077_v46  ;;  %v3067_v62 = vmul.f32 %v1045_v21, %v1045_v21  ;;  %v827_v49 = vmin.f32 %v3063_v2, 20.0 }
 0x16d   : > { %1714 = vst.msk [vmem:[%s2723_s25 + $0x50] sm:$0xf] %vm1693_vm2, %v2038_v59  ;;  %v2070_v63 = vpack.c.bf16 %v1425_v37, %v1425_v37  ;;  %v1016_v22 = vadd.f32 1.0, %v2420_v11  ;;  %v1914_v6 = vadd.f32 -1.0, %v1079_v55  ;;  %v3079_v15 = vadd.f32 %v2911_v18, %v2179_v50  ;;  %v657_v37 = vpop.f32.mrf.mxu0 }
 0x16e   : > { %v2422_v7 = vpop.eup %2421  ;;  %v1396_v12 = vmul.f32 %v1292_v27, %v2977_v47  ;;  %2437 = vrcp.f32 %v1205_v1  ;;  %v1237_v54 = vadd.f32 1.0, %v3067_v62  ;;  %v921_v17 = vmul.f32 1.442695, %v827_v49  ;;  %v785_v1 = vpop.f32.mrf.mxu1 }
 0x16f   : > { %v2424_v56 = vpop.eup %2423  ;;  %1746 = vst.msk [vmem:[%s2723_s25 + $0xd0] sm:$0xf] %vm1693_vm2, %v2070_v63  ;;  %v3076_v4 = vmul.f32 %v1016_v22, %v1016_v22  ;;  %v1048_v26 = vadd.f32 1.0, %v2422_v7  ;;  %v3082_v47 = vadd.f32 %v2911_v18, %v654_v24  ;;  %v1946_v55 = vadd.f32 -1.0, %v1111_v57 }
 0x170   : > { %v2041_v60 = vpack.c.bf16 %v1396_v12, %v1396_v12  ;;  %v1356_v25 = vmul.f32 %v2424_v56, %v1943_v28  ;;  %2439 = vrcp.f32 %v1237_v54  ;;  %v859_v29 = vmin.f32 %v3079_v15, 20.0 }
 0x171   : > { %v1208_v33 = vadd.f32 1.0, %v3076_v4  ;;  %v3085_v0 = vmul.f32 %v1048_v26, %v1048_v26  ;;  %2441 = vpow2.f32 %v921_v17  ;;  %v825_v10 = vmin.f32 %v3082_v47, 20.0 }
 0x172   : > { %v2426_v20 = vpop.eup %2425  ;;  %1717 = vst.msk [vmem:[%s2723_s25 + $0x5c] sm:$0xf] %vm1693_vm2, %v2041_v60  ;;  %v1428_v45 = vmul.f32 %v1356_v25, %v2988_v58  ;;  %v3093_v28 = vadd.f32 %v2911_v18, %v782_v36  ;;  %v1912_v57 = vadd.f32 -1.0, %v1077_v46  ;;  %v985_v19 = vmul.f32 1.442695, %v859_v29 }
 0x173   : > { %v2428_v3 = vpop.eup %2427  ;;  %v1288_v23 = vmul.f32 %v2426_v20, %v1909_v41  ;;  %2443 = vrcp.f32 %v1208_v33  ;;  %v1240_v40 = vadd.f32 1.0, %v3085_v0  ;;  %v917_v58 = vmul.f32 1.442695, %v825_v10 }
 0x174   : > { %v2430_v52 = vpop.eup %2429  ;;  %v2073_v43 = vpack.c.bf16 %v1428_v45, %v1428_v45  ;;  %v1352_v39 = vmul.f32 %v2428_v3, %v1941_v44  ;;  %v857_v21 = vmin.f32 %v3093_v28, 20.0  ;;  %v3102_v61 = vadd.f32 %v2911_v18, %v2148_v38 }
 0x175   : > { %v2432_v48 = vpop.eup %2431  ;;  %v1394_v16 = vmul.f32 %v1288_v23, %v2991_v51  ;;  %2445 = vrcp.f32 %v1240_v40  ;;  %v1014_v8 = vadd.f32 1.0, %v2430_v52  ;;  %v1944_v22 = vadd.f32 -1.0, %v3067_v62 }
 0x176   : > { %1749 = vst.msk [vmem:[%s2723_s25 + $0xdc] sm:$0xf] %vm1693_vm2, %v2073_v43  ;;  %v1426_v41 = vmul.f32 %v1352_v39, %v2995_v13  ;;  %v1298_v46 = vmul.f32 %v2432_v48, %v1914_v6  ;;  %2447 = vpow2.f32 %v985_v19  ;;  %v981_v51 = vmul.f32 1.442695, %v857_v21 }
 0x177   : > { %v2039_v14 = vpack.c.bf16 %v1394_v16, %v1394_v16  ;;  %v3104_v59 = vmul.f32 %v1014_v8, %v1014_v8  ;;  %2449 = vpow2.f32 %v917_v58  ;;  %v2434_v50 = vpop.eup %2433  ;;  %v828_v44 = vmin.f32 %v3102_v61, 20.0 }
 0x178   : > { %v2071_v11 = vpack.c.bf16 %v1426_v41, %v1426_v41  ;;  %v1399_v27 = vmul.f32 %v1298_v46, %v3002_v5  ;;  %v3109_v13 = vadd.f32 %v2911_v18, %v2180_v53  ;;  %v1362_v63 = vmul.f32 %v2434_v50, %v1946_v55  ;;  %v2436_v24 = vpop.eup %2435 }
 0x179   : > { %1715 = vst.msk [vmem:[%s2723_s25 + $0x54] sm:$0xf] %vm1693_vm2, %v2039_v14  ;;  %v1206_v49 = vadd.f32 1.0, %v3104_v59  ;;  %2451 = vpow2.f32 %v981_v51  ;;  %v923_v5 = vmul.f32 1.442695, %v828_v44  ;;  %v3119_v6 = vadd.f32 %v2911_v18, %v657_v37 }
 0x17a   : > { %1747 = vst.msk [vmem:[%s2723_s25 + $0xd4] sm:$0xf] %vm1693_vm2, %v2071_v11  ;;  %v2044_v7 = vpack.c.bf16 %v1399_v27, %v1399_v27  ;;  %v860_v12 = vmin.f32 %v3109_v13, 20.0  ;;  %v1431_v56 = vmul.f32 %v1362_v63, %v3010_v34  ;;  %v1046_v26 = vadd.f32 1.0, %v2436_v24 }
 0x17b   : > { %v2438_v54 = vpop.eup %2437  ;;  %2453 = vrcp.f32 %v1206_v49  ;;  %v3123_v62 = vadd.f32 %v2911_v18, %v785_v1  ;;  %v826_v60 = vmin.f32 %v3119_v6, 20.0  ;;  %v1915_v10 = vadd.f32 -1.0, %v3076_v4 }
 0x17c   : > { %1720 = vst.msk [vmem:[%s2723_s25 + $0x68] sm:$0xf] %vm1693_vm2, %v2044_v7  ;;  %v1294_v17 = vmul.f32 %v2438_v54, %v1912_v57  ;;  %2455 = vpow2.f32 %v923_v5  ;;  %v987_v36 = vmul.f32 1.442695, %v860_v12  ;;  %v2076_v55 = vpack.c.bf16 %v1431_v56, %v1431_v56 }
 0x17d   : > { %v2440_v25 = vpop.eup %2439  ;;  %v1110_v33 = vmul.f32 %v1046_v26, %v1046_v26  ;;  %v858_v20 = vmin.f32 %v3123_v62, 20.0  ;;  %v919_v18 = vmul.f32 1.442695, %v826_v60  ;;  %v1913_v37 = vadd.f32 -1.0, %v3104_v59 }
 0x17e   : > { %v2442_v45 = vpop.eup %2441  ;;  %v1397_v34 = vmul.f32 %v1294_v17, %v3015_v35  ;;  %v1358_v29 = vmul.f32 %v2440_v25, %v1944_v22  ;;  %2457 = vpow2.f32 %v987_v36  ;;  %1752 = vst.msk [vmem:[%s2723_s25 + $0xe8] sm:$0xf] %vm1693_vm2, %v2076_v55  ;;  %v1947_v35 = vadd.f32 -1.0, %v3085_v0 }
 0x17f   : > { %v1238_v3 = vadd.f32 1.0, %v1110_v33  ;;  %v1019_v23 = vadd.f32 1.0, %v2442_v45  ;;  %v983_v57 = vmul.f32 1.442695, %v858_v20  ;;  %2459 = vpow2.f32 %v919_v18 }
 0x180   : > { %v2444_v40 = vpop.eup %2443  ;;  %v2042_v38 = vpack.c.bf16 %v1397_v34, %v1397_v34  ;;  %v1429_v52 = vmul.f32 %v1358_v29, %v3023_v30  ;;  %v1945_v56 = vadd.f32 -1.0, %v1110_v33 }
 0x181   : > { %v1300_v43 = vmul.f32 %v2444_v40, %v1915_v10  ;;  %2461 = vrcp.f32 %v1238_v3  ;;  %v1083_v39 = vmul.f32 %v1019_v23, %v1019_v23 }
 0x182   : > { %v2446_v19 = vpop.eup %2445  ;;  %1718 = vst.msk [vmem:[%s2723_s25 + $0x60] sm:$0xf] %vm1693_vm2, %v2042_v38  ;;  %v2074_v58 = vpack.c.bf16 %v1429_v52, %v1429_v52  ;;  %2463 = vpow2.f32 %v983_v57 }
 0x183   : > { %v2448_v4 = vpop.eup %2447  ;;  %v1400_v53 = vmul.f32 %v1300_v43, %v3030_v31  ;;  %v1364_v48 = vmul.f32 %v2446_v19, %v1947_v35  ;;  %v1211_v16 = vadd.f32 1.0, %v1083_v39  ;;  %v1918_v34 = vadd.f32 -1.0, %v1083_v39 }
 0x184   : > { %v2450_v8 = vpop.eup %2449  ;;  %1750 = vst.msk [vmem:[%s2723_s25 + $0xe0] sm:$0xf] %vm1693_vm2, %v2074_v58  ;;  %v1051_v30 = vadd.f32 1.0, %v2448_v4 }
 0x185   : > { %v2045_v21 = vpack.c.bf16 %v1400_v53, %v1400_v53  ;;  %v1432_v0 = vmul.f32 %v1364_v48, %v3034_v9  ;;  %2465 = vrcp.f32 %v1211_v16  ;;  %v1017_v41 = vadd.f32 1.0, %v2450_v8 }
 0x186   : > { %v2452_v46 = vpop.eup %2451  ;;  %v1115_v14 = vmul.f32 %v1051_v30, %v1051_v30 }
 0x187   : > { %1721 = vst.msk [vmem:[%s2723_s25 + $0x6c] sm:$0xf] %vm1693_vm2, %v2045_v21  ;;  %v2077_v51 = vpack.c.bf16 %v1432_v0, %v1432_v0  ;;  %v1081_v31 = vmul.f32 %v1017_v41, %v1017_v41  ;;  %v1049_v50 = vadd.f32 1.0, %v2452_v46 }
 0x188   : > { %v2454_v11 = vpop.eup %2453  ;;  %v1243_v27 = vadd.f32 1.0, %v1115_v14  ;;  %v1950_v38 = vadd.f32 -1.0, %v1115_v14 }
 0x189   : > { %v2456_v44 = vpop.eup %2455  ;;  %1753 = vst.msk [vmem:[%s2723_s25 + $0xec] sm:$0xf] %vm1693_vm2, %v2077_v51  ;;  %v1296_v1 = vmul.f32 %v2454_v11, %v1913_v37  ;;  %v1209_v63 = vadd.f32 1.0, %v1081_v31  ;;  %v1113_v22 = vmul.f32 %v1049_v50, %v1049_v50  ;;  %v1916_v35 = vadd.f32 -1.0, %v1081_v31 }
 0x18a   : > { %2467 = vrcp.f32 %v1243_v27  ;;  %v1020_v9 = vadd.f32 1.0, %v2456_v44 }
 0x18b   : > { %v2458_v49 = vpop.eup %2457  ;;  %v1398_v24 = vmul.f32 %v1296_v1, %v3039_v32  ;;  %2469 = vrcp.f32 %v1209_v63  ;;  %v1241_v7 = vadd.f32 1.0, %v1113_v22  ;;  %v1948_v58 = vadd.f32 -1.0, %v1113_v22 }
 0x18c   : > { %v1084_v5 = vmul.f32 %v1020_v9, %v1020_v9  ;;  %v1052_v59 = vadd.f32 1.0, %v2458_v49  ;;  %v2460_v12 = vpop.eup %2459 }
 0x18d   : > { %v2043_v54 = vpack.c.bf16 %v1398_v24, %v1398_v24  ;;  %2471 = vrcp.f32 %v1241_v7  ;;  %v1018_v60 = vadd.f32 1.0, %v2460_v12 }
 0x18e   : > { %v2462_v26 = vpop.eup %2461  ;;  %v1212_v17 = vadd.f32 1.0, %v1084_v5  ;;  %v1116_v36 = vmul.f32 %v1052_v59, %v1052_v59  ;;  %v1919_v8 = vadd.f32 -1.0, %v1084_v5 }
 0x18f   : > { %v2464_v25 = vpop.eup %2463  ;;  %1719 = vst.msk [vmem:[%s2723_s25 + $0x64] sm:$0xf] %vm1693_vm2, %v2043_v54  ;;  %v1360_v55 = vmul.f32 %v2462_v26, %v1945_v56  ;;  %v1082_v32 = vmul.f32 %v1018_v60, %v1018_v60 }
 0x190   : > { %2473 = vrcp.f32 %v1212_v17  ;;  %v1244_v20 = vadd.f32 1.0, %v1116_v36  ;;  %v1050_v29 = vadd.f32 1.0, %v2464_v25  ;;  %v1951_v46 = vadd.f32 -1.0, %v1116_v36 }
 0x191   : > { %v1430_v45 = vmul.f32 %v1360_v55, %v3051_v42  ;;  %v1210_v33 = vadd.f32 1.0, %v1082_v32  ;;  %v1917_v37 = vadd.f32 -1.0, %v1082_v32 }
 0x192   : > { %v2466_v18 = vpop.eup %2465  ;;  %2475 = vrcp.f32 %v1244_v20  ;;  %v1114_v23 = vmul.f32 %v1050_v29, %v1050_v29 }
 0x193   : > { %v2075_v10 = vpack.c.bf16 %v1430_v45, %v1430_v45  ;;  %v1306_v3 = vmul.f32 %v2466_v18, %v1918_v34  ;;  %2477 = vrcp.f32 %v1210_v33 }
 0x194   : > { %v1242_v40 = vadd.f32 1.0, %v1114_v23  ;;  %v1949_v27 = vadd.f32 -1.0, %v1114_v23 }
 0x195   : > { %1751 = vst.msk [vmem:[%s2723_s25 + $0xe4] sm:$0xf] %vm1693_vm2, %v2075_v10  ;;  %v1403_v57 = vmul.f32 %v1306_v3, %v3063_v2 }
 0x196   : > { %2479 = vrcp.f32 %v1242_v40 }
 0x197   : > { %v2468_v52 = vpop.eup %2467  ;;  %v2048_v43 = vpack.c.bf16 %v1403_v57, %v1403_v57 }
 0x198   : > { %v2470_v42 = vpop.eup %2469  ;;  %v1370_v39 = vmul.f32 %v2468_v52, %v1950_v38 }
 0x199   : > { %1724 = vst.msk [vmem:[%s2723_s25 + $0x78] sm:$0xf] %vm1693_vm2, %v2048_v43  ;;  %v1302_v19 = vmul.f32 %v2470_v42, %v1916_v35 }
 0x19a   : > { %v2472_v4 = vpop.eup %2471  ;;  %v1435_v53 = vmul.f32 %v1370_v39, %v3079_v15 }
 0x19b   : > { %v1401_v48 = vmul.f32 %v1302_v19, %v3082_v47  ;;  %v1366_v2 = vmul.f32 %v2472_v4, %v1948_v58 }
 0x19c   : > { %v2080_v16 = vpack.c.bf16 %v1435_v53, %v1435_v53 }
 0x19d   : > { %v2474_v30 = vpop.eup %2473  ;;  %v2046_v21 = vpack.c.bf16 %v1401_v48, %v1401_v48  ;;  %v1433_v0 = vmul.f32 %v1366_v2, %v3093_v28 }
 0x19e   : > { %1756 = vst.msk [vmem:[%s2723_s25 + $0xf8] sm:$0xf] %vm1693_vm2, %v2080_v16  ;;  %v1308_v41 = vmul.f32 %v2474_v30, %v1919_v8 }
 0x19f   : > { %v2476_v14 = vpop.eup %2475  ;;  %1722 = vst.msk [vmem:[%s2723_s25 + $0x70] sm:$0xf] %vm1693_vm2, %v2046_v21  ;;  %v2078_v15 = vpack.c.bf16 %v1433_v0, %v1433_v0 }
 0x1a0   : > { %v1404_v47 = vmul.f32 %v1308_v41, %v3102_v61  ;;  %v1372_v51 = vmul.f32 %v2476_v14, %v1951_v46  ;;  %v2478_v31 = vpop.eup %2477 }
 0x1a1   : > { %1754 = vst.msk [vmem:[%s2723_s25 + $0xf0] sm:$0xf] %vm1693_vm2, %v2078_v15  ;;  %v1304_v11 = vmul.f32 %v2478_v31, %v1917_v37 }
 0x1a2   : > { %v2049_v28 = vpack.c.bf16 %v1404_v47, %v1404_v47  ;;  %v1436_v50 = vmul.f32 %v1372_v51, %v3109_v13 }
 0x1a3   : > { %v2480_v44 = vpop.eup %2479  ;;  %v1402_v63 = vmul.f32 %v1304_v11, %v3119_v6 }
 0x1a4   : > { %1725 = vst.msk [vmem:[%s2723_s25 + $0x7c] sm:$0xf] %vm1693_vm2, %v2049_v28  ;;  %v2081_v1 = vpack.c.bf16 %v1436_v50, %v1436_v50  ;;  %v1368_v22 = vmul.f32 %v2480_v44, %v1949_v27 }
 0x1a5   : > { %v2047_v61 = vpack.c.bf16 %v1402_v63, %v1402_v63 }
 0x1a6   : > { %1757 = vst.msk [vmem:[%s2723_s25 + $0xfc] sm:$0xf] %vm1693_vm2, %v2081_v1  ;;  %v1434_v9 = vmul.f32 %v1368_v22, %v3123_v62 }
 0x1a7   : > { %1723 = vst.msk [vmem:[%s2723_s25 + $0x74] sm:$0xf] %vm1693_vm2, %v2047_v61 }
 0x1a8   : > { %v2079_v49 = vpack.c.bf16 %v1434_v9, %v1434_v9 }
 0x1aa   : > { %1755 = vst.msk [vmem:[%s2723_s25 + $0xf4] sm:$0xf] %vm1693_vm2, %v2079_v49 }
 0x1ab PF: > { %s13_s12 = sadd.s32 1, %s2488_s12  }
 0x1ac   : > { %p10_p4 = scmp.ge.s32.totalorder %s13_s12, 4  }
 0x1ae   :  { %12 = sbr.rel (!%p10_p4) target bundleno = 1 (0x1), region = 62 }

// kernel: assp_forward.8
= control target key start
LH: loop header
LB: loop body
LE: loop exit
PB: predicated region body
PF: predicated region fallthrough
CT: control target
= control target key end

     0   :  { %s2400_s12 = smov 0   ;;  %s2402_s13 = smov 0   ;;  %s2869_s0 = inlined_call_operand.vmem [shape: bf16[2,44,44,44,4], index: 0, kind: input, shape index: {}]   ;;  %s2870_s1 = inlined_call_operand.vmem [shape: bf16[3,36,8], index: 1, kind: input, shape index: {}]   ;;  %s2871_s2 = inlined_call_operand.vmem [shape: f32[1,8], index: 2, kind: input, shape index: {}]   ;;  %s2872_s3 = inlined_call_operand.vmem [shape: bf16[2,8,64,8], index: 3, kind: output, shape index: {}]  }
   0x1   :  { %s2404_s14 = smov 0   ;;  %s2406_s15 = smov 0  }
   0x2   :  { %s2408_s16 = smov 0   ;;  %s2410_s17 = smov 0  }
   0x3   :  { %s2412_s18 = smov 0  }
   0x4 LB: > { %s25_s19 = sadd.s32 1, %s2365_s15  ;;  %s28_s20 = sadd.s32 1, %s2369_s16  ;;  %s2377_s18 = sphi %s2412_s18, %s13_s18   ;;  %s2373_s17 = sphi %s2410_s17, %s2882_s17   ;;  %s2369_s16 = sphi %s2408_s16, %s2881_s16   ;;  %s2365_s15 = sphi %s2406_s15, %s2880_s15   ;;  %s2361_s14 = sphi %s2404_s14, %s2879_s14   ;;  %s2357_s13 = sphi %s2402_s13, %s2878_s13   ;;  %s2353_s12 = sphi %s2400_s12, %s2877_s12  }
   0x5   : > { %p26_p0 = scmp.ge.s32.totalorder %s25_s19, 3  ;;  %p1909_p1 = scmp.ge.s32.totalorder %s2377_s18, 1 }
   0x6   : > { %p182_p2 = scmp.lt.s32.totalorder %s2377_s18, 49  ;;  %s32_s21 = sadd.s32 1, %s2373_s17 }
   0x7   : > { %s2884_s19 = smov (%p26_p0, %s25_s19), 0  ;;  %s2886_s20 = smov (!%p26_p0, %s28_s20), %s2369_s16 }
   0x8   : > { %p183_p3 = pnand %p1909_p1, %p182_p2  ;;  %p30_p4 = scmp.ge.s32.totalorder %s2886_s20, 8 }
   0x9   : > { %s221_s22 = smul.u32 (!%p183_p3), 18, %s2353_s12  ;;  %p223_p6 = scmp.lt.s32.totalorder (!%p183_p3), %s2361_s14, 1 }
   0xa   : > { %s2888_s20 = smov (%p30_p4, %s2886_s20), 0  ;;  %s2890_s21 = smov (!%p30_p4, %s32_s21), %s2373_s17 }
   0xb   : > { %p34_p5 = scmp.ge.s32.totalorder %s2890_s21, 2  ;;  %186 = sbr.rel (%p183_p3) target bundleno = 367 (0x16f), region = 32 }
   0xc   : > { %s222_s23 = sadd.s32 (!%p183_p3), %s2357_s13, %s221_s22  ;;  %p234_p7 = scmp.lt.s32.totalorder (!%p183_p3), %s2353_s12, 2 }
   0xd   : > { %s2892_s21 = smov (%p34_p5, %s2890_s21), 0  ;;  %p225_p8 = scmp.lt.s32.totalorder (!%p183_p3), %s222_s23, 43 }
   0xe   : > { %p241_p9 = scmp.lt.s32.totalorder (!%p183_p3), %s2357_s13, 7  ;;  %p1915_p10 = scmp.ne.s32.totalorder (!%p183_p3), %s2353_s12, 0 }
  0x10   : > { %s2894_s14 = smov (!%p223_p6, %s2361_s14), 1  ;;  %s2896_s23 = smov (!%p225_p8, %s222_s23), 43 }
  0x11   : > { %s2216_s24 = smul.u32 11616, %s2894_s14  ;;  %s1913_s9 = sshll.u32 %s2894_s14, 6 }
  0x12   : > { %s235_s25 = scalar_select %p234_p7, %s2353_s12, 2 }
  0x13   : > { %s2215_s26 = smul.u32 264, %s2896_s23  ;;  %s2898_s13 = smov (!%p241_p9, %s2357_s13), 7 }
  0x14   : > { %s2217_s27 = smul.u32 20, %s235_s25  ;;  %s1912_s10 = sshll.u32 %s2898_s13, 3 }
  0x15   : > { %s229_s28 = sadd.s32 %s2216_s24, %s2215_s26  ;;  %s245_s11 = sadd.s32 %s1913_s9, %s1912_s10 }
  0x16   : > { %s1910_s29 = sshll.u32 %s229_s28, 2  ;;  %s2454_s5 = scalar_lea.vmem %s2870_s1, %s2217_s27 }
  0x17   : > { %s2459_s8 = scalar_lea.vmem %s2869_s0, %s1910_s29  ;;  %s1914_s22 = sshll.u32 %s245_s11, 2 }
  0x18   : > { %s2465_s24 = scalar_lea.vmem %s2872_s3, %s1914_s22  ;;  %252 = sbr.rel (%p1915_p10) target bundleno = 34 (0x22), region = 36 }
  0x1d   : > { %vm253_vm0 = vcmask 64512   ;;  %v2379_v0 = vmov 0.0  }
  0x1e   : > { %254 = vst.msk [vmem:[#allocation2] sm:$0xff] %vm253_vm0, %v2379_v0  ;;  %255 = vst.msk [vmem:[#allocation2 + $0x8] sm:$0xff] %vm253_vm0, %v2379_v0 }
  0x1f   : > { %256 = vst.msk [vmem:[#allocation2 + $0x10] sm:$0xff] %vm253_vm0, %v2379_v0  ;;  %257 = vst.msk [vmem:[#allocation2 + $0x18] sm:$0xff] %vm253_vm0, %v2379_v0 }
  0x20   : > { %258 = vst.msk [vmem:[#allocation2 + $0x20] sm:$0xff] %vm253_vm0, %v2379_v0  ;;  %259 = vst.msk [vmem:[#allocation2 + $0x28] sm:$0xff] %vm253_vm0, %v2379_v0 }
  0x21   : > { %260 = vst.msk [vmem:[#allocation2 + $0x30] sm:$0xff] %vm253_vm0, %v2379_v0  ;;  %261 = vst.msk [vmem:[#allocation2 + $0x38] sm:$0xff] %vm253_vm0, %v2379_v0 }
  0x22 PF: > { %v390_v1 = vld [vmem:[%s2454_s5] sm:$0x3]  ;;  %vm424_vm1 = vcmask 1041408   ;;  %vm411_vm2 = vcmask 31744   ;;  %vm517_vm3 = vcmask 1042432   ;;  %vm518_vm4 = vcmask 1046532  }
  0x23   : > { %2205 = vmatprep.subr.msk.bf16.mxu0 %vm424_vm1, %v390_v1  ;;  %2206 = vmatprep.subr.msk.bf16.mxu1 %vm424_vm1, %v390_v1  ;;  %v426_v2 = vsel %vm424_vm1, %v390_v1, 0  ;;  %v2275_v3 = vld [vmem:[%s2459_s8] ss:$24 sps:$4 sm:$0xff]   ;;  %v2277_v5 = vld [vmem:[%s2459_s8 + $0x30] ss:$24 sps:$4 sm:$0xff]   ;;  %vm2489_vm5 = vmor %vm517_vm3, %vm518_vm4  ;;  %vm674_vm6 = vcmask 1045508  }
  0x24   : > { %2114 = vmatpush3.bf16.msra.mxu0 %v426_v2  ;;  %2204 = vmatpush3.bf16.msra.mxu1 %v426_v2  ;;  %v2276_v4 = vld [vmem:[%s2459_s8 + $0x60] ss:$24 sps:$4 sm:$0xff]   ;;  %v2278_v6 = vld [vmem:[%s2459_s8 + $0x90] ss:$24 sps:$4 sm:$0xff]   ;;  %v708_v8 = vld [vmem:[%s2454_s5 + $0x4] sm:$0x3] }
  0x25   : > { %2115 = vmatprep.mubr.msk.bf16.mxu0 %vm411_vm2, %v2275_v3  ;;  %2119 = vmatprep.mubr.msk.bf16.mxu1 %vm411_vm2, %v2276_v4  ;;  %v2279_v7 = vld [vmem:[%s2454_s5] ss:$0 sps:$4 sm:$0xcc]   ;;  %v263_v9 = vld [vmem:[%s2459_s8 + $0x8] sm:$0xf]  ;;  %v734_v12 = vsel %vm424_vm1, %v708_v8, 0  ;;  %vm2504_vm7 = vmor %vm424_vm1, %vm674_vm6 }
  0x26   : > { %v264_v10 = vld [vmem:[%s2459_s8 + $0xc] sm:$0xf]  ;;  %v568_v11 = vrot.slane %v2279_v7, 2  ;;  %2208 = vmatprep.subr.msk.bf16.mxu0 %vm424_vm1, %v708_v8  ;;  %v268_v13 = vld [vmem:[%s2459_s8 + $0x20] sm:$0xf]  ;;  %v1924_v16 = vrot.slane %v263_v9, 9 }
  0x27   : > { %2116 = vmatmul.mubr.msk.bf16.vlgmr.msra.gmra.mxu0 %vm411_vm2, %v2277_v5  ;;  %2120 = vmatmul.mubr.msk.bf16.vlgmr.msra.gmra.mxu1 %vm411_vm2, %v2278_v6  ;;  %v269_v14 = vld [vmem:[%s2459_s8 + $0x24] sm:$0xf]  ;;  %v522_v17 = vrot.slane %v264_v10, 5  ;;  %v1925_v18 = vrot.slane %v268_v13, 9  ;;  %v265_v20 = vld [vmem:[%s2459_s8 + $0x10] sm:$0xf] }
  0x28   : > { %2134 = vmatpush3.bf16.msra.mxu0 %v734_v12  ;;  %v526_v19 = vrot.slane %v269_v14, 5  ;;  %2207 = vmatprep.subr.msk.bf16.mxu1 %vm424_vm1, %v568_v11  ;;  %v582_v21 = vsel %vm424_vm1, %v568_v11, 0  ;;  %v266_v22 = vld [vmem:[%s2459_s8 + $0x14] sm:$0x3]  ;;  %v270_v23 = vld [vmem:[%s2459_s8 + $0x28] sm:$0xf] }
  0x29   : > { %2124 = vmatpush3.bf16.msra.mxu1 %v582_v21  ;;  %v523_v24 = vsel %vm2489_vm5, %v1924_v16, %v522_v17  ;;  %v271_v26 = vld [vmem:[%s2459_s8 + $0x2c] sm:$0x3]  ;;  %v1941_v28 = vrot.slane %v265_v20, 10  ;;  %v678_v29 = vrot.slane %v266_v22, 6  ;;  %v273_v30 = vld [vmem:[%s2459_s8 + $0x38] sm:$0xf] }
  0x2a   : > { %v527_v25 = vsel %vm2489_vm5, %v1925_v18, %v526_v19  ;;  %v1942_v32 = vrot.slane %v270_v23, 10  ;;  %v682_v33 = vrot.slane %v271_v26, 6  ;;  %v274_v34 = vld [vmem:[%s2459_s8 + $0x3c] sm:$0xf]  ;;  %v278_v35 = vld [vmem:[%s2459_s8 + $0x50] sm:$0xf] }
  0x2b   : > { %v1932_v31 = vcombine.low %v523_v24, %v527_v25  ;;  %v679_v36 = vsel %vm2504_vm7, %v1941_v28, %v678_v29  ;;  %v279_v37 = vld [vmem:[%s2459_s8 + $0x54] sm:$0xf]  ;;  %v1926_v38 = vrot.slane %v273_v30, 9  ;;  %v530_v39 = vrot.slane %v274_v34, 5  ;;  %v275_v43 = vld [vmem:[%s2459_s8 + $0x40] sm:$0xf] }
  0x2c   : > { %v1927_v40 = vrot.slane %v278_v35, 9  ;;  %v683_v41 = vsel %vm2504_vm7, %v1942_v32, %v682_v33  ;;  %v534_v42 = vrot.slane %v279_v37, 5  ;;  %v276_v44 = vld [vmem:[%s2459_s8 + $0x44] sm:$0x3]  ;;  %v280_v47 = vld [vmem:[%s2459_s8 + $0x58] sm:$0xf] }
  0x2d   : > { %2125 = vmatprep.mubr.msk.bf16.mxu1 %vm411_vm2, %v1932_v31  ;;  %v1949_v45 = vcombine.low %v679_v36, %v683_v41  ;;  %v531_v46 = vsel %vm2489_vm5, %v1926_v38, %v530_v39  ;;  %v281_v48 = vld [vmem:[%s2459_s8 + $0x5c] sm:$0x3]  ;;  %v1943_v49 = vrot.slane %v275_v43, 10  ;;  %v686_v50 = vrot.slane %v276_v44, 6  ;;  %v970_v54 = vld [vmem:[%s2454_s5 + $0x8] sm:$0x3] }
  0x2e   : > { %v535_v51 = vsel %vm2489_vm5, %v1927_v40, %v534_v42  ;;  %v1944_v52 = vrot.slane %v280_v47, 10  ;;  %v690_v53 = vrot.slane %v281_v48, 6  ;;  %v2280_v57 = vld [vmem:[%s2454_s5 + $0x4] ss:$0 sps:$4 sm:$0xcc]   ;;  %2210 = vmatprep.subr.msk.bf16.mxu0 %vm424_vm1, %v970_v54  ;;  %v996_v58 = vsel %vm424_vm1, %v970_v54, 0 }
  0x2f   : > { %2135 = vmatprep.mubr.msk.bf16.mxu0 %vm411_vm2, %v1949_v45  ;;  %v1933_v55 = vcombine.low %v531_v46, %v535_v51  ;;  %v687_v56 = vsel %vm2504_vm7, %v1943_v49, %v686_v50  ;;  %v283_v59 = vld [vmem:[%s2459_s8 + $0x68] sm:$0xf]  ;;  %v284_v61 = vld [vmem:[%s2459_s8 + $0x6c] sm:$0xf]  ;;  %v288_v62 = vld [vmem:[%s2459_s8 + $0x80] sm:$0xf] }
  0x30   : > { %v691_v60 = vsel %vm2504_vm7, %v1944_v52, %v690_v53  ;;  %v289_v63 = vld [vmem:[%s2459_s8 + $0x84] sm:$0xf]  ;;  %v833_v1 = vrot.slane %v2280_v57, 2  ;;  %v1928_v2 = vrot.slane %v283_v59, 9  ;;  %v538_v3 = vrot.slane %v284_v61, 5  ;;  %p2040_p11 = scmp.ne.s32.totalorder %s2353_s12, 2 }
  0x31   : > { %2126 = vmatmul.mubr.msk.bf16.vlgmr.msra.gmra.mxu1 %vm411_vm2, %v1933_v55  ;;  %v1950_v0 = vcombine.low %v687_v56, %v691_v60  ;;  %v285_v4 = vld [vmem:[%s2459_s8 + $0x70] sm:$0xf]  ;;  %v1929_v5 = vrot.slane %v288_v62, 9  ;;  %v542_v6 = vrot.slane %v289_v63, 5  ;;  %v286_v7 = vld [vmem:[%s2459_s8 + $0x74] sm:$0x3] }
  0x32   : > { %v290_v8 = vld [vmem:[%s2459_s8 + $0x88] sm:$0xf]  ;;  %2209 = vmatprep.subr.msk.bf16.mxu1 %vm424_vm1, %v833_v1  ;;  %v847_v9 = vsel %vm424_vm1, %v833_v1, 0  ;;  %v539_v10 = vsel %vm2489_vm5, %v1928_v2, %v538_v3  ;;  %v291_v11 = vld [vmem:[%s2459_s8 + $0x8c] sm:$0x3]  ;;  %v1945_v12 = vrot.slane %v285_v4, 10 }
  0x33   : > { %2136 = vmatmul.mubr.msk.bf16.vlgmr.msra.gmra.mxu0 %vm411_vm2, %v1950_v0  ;;  %v694_v13 = vrot.slane %v286_v7, 6  ;;  %2144 = vmatpush3.bf16.msra.mxu1 %v847_v9  ;;  %v543_v14 = vsel %vm2489_vm5, %v1929_v5, %v542_v6  ;;  %v1946_v16 = vrot.slane %v290_v8, 10  ;;  %v698_v17 = vrot.slane %v291_v11, 6  ;;  %v293_v18 = vld [vmem:[%s2459_s8 + $0x98] sm:$0xf] }
  0x34   : > { %2154 = vmatpush3.bf16.msra.mxu0 %v996_v58  ;;  %v294_v19 = vld [vmem:[%s2459_s8 + $0x9c] sm:$0xf]  ;;  %v1934_v20 = vcombine.low %v539_v10, %v543_v14  ;;  %v298_v22 = vld [vmem:[%s2459_s8 + $0xb0] sm:$0xf]  ;;  %v299_v23 = vld [vmem:[%s2459_s8 + $0xb4] sm:$0xf] }
  0x35   : > { %v695_v21 = vsel %vm2504_vm7, %v1945_v12, %v694_v13  ;;  %v1930_v24 = vrot.slane %v293_v18, 9  ;;  %v546_v25 = vrot.slane %v294_v19, 5  ;;  %v699_v26 = vsel %vm2504_vm7, %v1946_v16, %v698_v17  ;;  %v295_v30 = vld [vmem:[%s2459_s8 + $0xa0] sm:$0xf]  ;;  %v296_v31 = vld [vmem:[%s2459_s8 + $0xa4] sm:$0x3] }
  0x36   : > { %v1931_v28 = vrot.slane %v298_v22, 9  ;;  %v550_v29 = vrot.slane %v299_v23, 5  ;;  %2129 = vmatprep.mubr.msk.bf16.mxu1 %vm411_vm2, %v1934_v20  ;;  %v1951_v32 = vcombine.low %v695_v21, %v699_v26  ;;  %v300_v34 = vld [vmem:[%s2459_s8 + $0xb8] sm:$0xf]  ;;  %v301_v35 = vld [vmem:[%s2459_s8 + $0xbc] sm:$0x3] }
  0x37   : > { %v547_v33 = vsel %vm2489_vm5, %v1930_v24, %v546_v25  ;;  %v1947_v36 = vrot.slane %v295_v30, 10  ;;  %v702_v37 = vrot.slane %v296_v31, 6  ;;  %v1948_v39 = vrot.slane %v300_v34, 10  ;;  %v2281_v43 = vld [vmem:[%s2459_s8 + $0x1b0] ss:$24 sps:$4 sm:$0xff]  }
  0x38   : > { %v551_v38 = vsel %vm2489_vm5, %v1931_v28, %v550_v29  ;;  %v706_v40 = vrot.slane %v301_v35, 6  ;;  %2139 = vmatprep.mubr.msk.bf16.mxu0 %vm411_vm2, %v1951_v32  ;;  %v303_v44 = vld [vmem:[%s2459_s8 + $0x1b8] sm:$0xf]  ;;  %v304_v45 = vld [vmem:[%s2459_s8 + $0x1bc] sm:$0xf]  ;;  %vm1635_vm8 = vcmask 64512  }
  0x39   : > { %v1935_v41 = vcombine.low %v547_v33, %v551_v38  ;;  %v703_v42 = vsel %vm2504_vm7, %v1947_v36, %v702_v37  ;;  %v308_v47 = vld [vmem:[%s2459_s8 + $0x1d0] sm:$0xf]  ;;  %v309_v48 = vld [vmem:[%s2459_s8 + $0x1d4] sm:$0xf]  ;;  %v1966_v49 = vrot.slane %v303_v44, 9  ;;  %v940_v50 = vrot.slane %v304_v45, 5 }
  0x3a   : > { %v707_v46 = vsel %vm2504_vm7, %v1948_v39, %v706_v40  ;;  %v1967_v52 = vrot.slane %v308_v47, 9  ;;  %v944_v53 = vrot.slane %v309_v48, 5  ;;  %v313_v55 = vld [vmem:[%s2459_s8 + $0x1e8] sm:$0xf]  ;;  %v314_v56 = vld [vmem:[%s2459_s8 + $0x1ec] sm:$0xf] }
  0x3b   : > { %2130 = vmatmul.mubr.msk.bf16.gmra.mxu1 %vm411_vm2, %v1935_v41  ;;  %v1952_v51 = vcombine.low %v703_v42, %v707_v46  ;;  %v941_v54 = vsel %vm2489_vm5, %v1966_v49, %v940_v50  ;;  %v2282_v58 = vld [vmem:[%s2459_s8 + $0x1e0] ss:$24 sps:$4 sm:$0xff]   ;;  %v319_v60 = vld [vmem:[%s2459_s8 + $0x204] sm:$0xf]  ;;  %v1968_v61 = vrot.slane %v313_v55, 9  ;;  %v948_v62 = vrot.slane %v314_v56, 5 }
  0x3c   : > { %2145 = vmatprep.mubr.msk.bf16.mxu1 %vm411_vm2, %v2281_v43  ;;  %v945_v57 = vsel %vm2489_vm5, %v1967_v52, %v944_v53  ;;  %v318_v59 = vld [vmem:[%s2459_s8 + $0x200] sm:$0xf]  ;;  %v952_v1 = vrot.slane %v319_v60, 5  ;;  %v1224_v2 = vld [vmem:[%s2454_s5 + $0xc] sm:$0x3] }
  0x3d   : > { %2140 = vmatmul.mubr.msk.bf16.gmra.mxu0 %vm411_vm2, %v1952_v51  ;;  %v1974_v63 = vcombine.low %v941_v54, %v945_v57  ;;  %v1969_v0 = vrot.slane %v318_v59, 9  ;;  %v949_v3 = vsel %vm2489_vm5, %v1968_v61, %v948_v62  ;;  %v2283_v4 = vld [vmem:[%s2454_s5 + $0x8] ss:$0 sps:$4 sm:$0xcc]   ;;  %2212 = vmatprep.subr.msk.bf16.mxu0 %vm424_vm1, %v1224_v2  ;;  %v323_v7 = vld [vmem:[%s2459_s8 + $0x218] sm:$0xf] }
  0x3e   : > { %v2284_v6 = vld [vmem:[%s2459_s8 + $0x210] ss:$24 sps:$4 sm:$0xff]   ;;  %v1135_v9 = vrot.slane %v2283_v4, 2  ;;  %v324_v10 = vld [vmem:[%s2459_s8 + $0x21c] sm:$0xf]  ;;  %v1970_v12 = vrot.slane %v323_v7, 9 }
  0x3f   : > { %2155 = vmatprep.mubr.msk.bf16.mxu0 %vm411_vm2, %v1974_v63  ;;  %v953_v5 = vsel %vm2489_vm5, %v1969_v0, %v952_v1  ;;  %v328_v11 = vld [vmem:[%s2459_s8 + $0x230] sm:$0xf]  ;;  %v329_v13 = vld [vmem:[%s2459_s8 + $0x234] sm:$0xf]  ;;  %v956_v14 = vrot.slane %v324_v10, 5  ;;  %v1258_v18 = vsel %vm424_vm1, %v1224_v2, 0 }
  0x40   : > { %v1975_v8 = vcombine.low %v949_v3, %v953_v5  ;;  %v1971_v16 = vrot.slane %v328_v11, 9  ;;  %2211 = vmatprep.subr.msk.bf16.mxu1 %vm424_vm1, %v1135_v9  ;;  %v1149_v17 = vsel %vm424_vm1, %v1135_v9, 0  ;;  %v960_v19 = vrot.slane %v329_v13, 5  ;;  %v333_v21 = vld [vmem:[%s2459_s8 + $0x248] sm:$0xf] }
  0x41   : > { %v957_v20 = vsel %vm2489_vm5, %v1970_v12, %v956_v14  ;;  %v334_v22 = vld [vmem:[%s2459_s8 + $0x24c] sm:$0xf]  ;;  %v338_v23 = vld [vmem:[%s2459_s8 + $0x260] sm:$0xf]  ;;  %v339_v26 = vld [vmem:[%s2459_s8 + $0x264] sm:$0xf] }
  0x42   : > { %v961_v24 = vsel %vm2489_vm5, %v1971_v16, %v960_v19  ;;  %v2285_v25 = vld [vmem:[%s2459_s8 + $0x240] ss:$24 sps:$4 sm:$0xff]   ;;  %v1972_v28 = vrot.slane %v333_v21, 9  ;;  %v964_v29 = vrot.slane %v334_v22, 5  ;;  %v1973_v30 = vrot.slane %v338_v23, 9 }
  0x43   : > { %2146 = vmatmul.mubr.msk.bf16.vlgmr.msra.gmra.mxu1 %vm411_vm2, %v2282_v58  ;;  %v1976_v31 = vcombine.low %v957_v20, %v961_v24  ;;  %v968_v32 = vrot.slane %v339_v26, 5  ;;  %v305_v33 = vld [vmem:[%s2459_s8 + $0x1c0] sm:$0xf]  ;;  %v306_v34 = vld [vmem:[%s2459_s8 + $0x1c4] sm:$0x3] }
  0x44   : > { %2164 = vmatpush3.bf16.msra.mxu1 %v1149_v17  ;;  %2149 = vmatprep.mubr.msk.bf16.mxu1 %vm411_vm2, %v2284_v6  ;;  %v965_v35 = vsel %vm2489_vm5, %v1972_v28, %v964_v29  ;;  %v310_v36 = vld [vmem:[%s2459_s8 + $0x1d8] sm:$0xf]  ;;  %v311_v37 = vld [vmem:[%s2459_s8 + $0x1dc] sm:$0x3]  ;;  %v1982_v38 = vrot.slane %v305_v33, 10  ;;  %v1089_v39 = vrot.slane %v306_v34, 6 }
  0x45   : > { %2156 = vmatmul.mubr.msk.bf16.vlgmr.msra.gmra.mxu0 %vm411_vm2, %v1975_v8  ;;  %v969_v40 = vsel %vm2489_vm5, %v1973_v30, %v968_v32  ;;  %v1983_v41 = vrot.slane %v310_v36, 10  ;;  %v1093_v42 = vrot.slane %v311_v37, 6  ;;  %v2286_v45 = vld [vmem:[%s2459_s8 + $0x360] ss:$24 sps:$4 sm:$0xff]   ;;  %v315_v46 = vld [vmem:[%s2459_s8 + $0x1f0] sm:$0xf] }
  0x46   : > { %2174 = vmatpush3.bf16.msra.mxu0 %v1258_v18  ;;  %2159 = vmatprep.mubr.msk.bf16.mxu0 %vm411_vm2, %v1976_v31  ;;  %v1977_v43 = vcombine.low %v965_v35, %v969_v40  ;;  %v1090_v44 = vsel %vm2504_vm7, %v1982_v38, %v1089_v39  ;;  %v316_v47 = vld [vmem:[%s2459_s8 + $0x1f4] sm:$0x3]  ;;  %v320_v49 = vld [vmem:[%s2459_s8 + $0x208] sm:$0xf]  ;;  %v321_v50 = vld [vmem:[%s2459_s8 + $0x20c] sm:$0x3] }
  0x47   : > { %v1094_v48 = vsel %vm2504_vm7, %v1983_v41, %v1093_v42  ;;  %v1984_v51 = vrot.slane %v315_v46, 10  ;;  %v1097_v52 = vrot.slane %v316_v47, 6  ;;  %v1985_v54 = vrot.slane %v320_v49, 10  ;;  %v1534_v57 = vld [vmem:[%s2454_s5 + $0x10] sm:$0x3] }
  0x48   : > { %v1990_v53 = vcombine.low %v1090_v44, %v1094_v48  ;;  %v1101_v55 = vrot.slane %v321_v50, 6  ;;  %v2288_v59 = vld [vmem:[%s2454_s5 + $0xc] ss:$0 sps:$4 sm:$0xcc]   ;;  %v325_v60 = vld [vmem:[%s2459_s8 + $0x220] sm:$0xf]  ;;  %2214 = vmatprep.subr.msk.bf16.mxu0 %vm424_vm1, %v1534_v57 }
  0x49   : > { %v1098_v56 = vsel %vm2504_vm7, %v1984_v51, %v1097_v52  ;;  %v326_v62 = vld [vmem:[%s2459_s8 + $0x224] sm:$0x3]  ;;  %v330_v63 = vld [vmem:[%s2459_s8 + $0x238] sm:$0xf]  ;;  %v331_v0 = vld [vmem:[%s2459_s8 + $0x23c] sm:$0x3] }
  0x4a   : > { %v1102_v58 = vsel %vm2504_vm7, %v1985_v54, %v1101_v55  ;;  %v2287_v1 = vld [vmem:[%s2459_s8 + $0x390] ss:$24 sps:$4 sm:$0xff]   ;;  %v1397_v2 = vrot.slane %v2288_v59, 2  ;;  %v1986_v3 = vrot.slane %v325_v60, 10  ;;  %v1105_v4 = vrot.slane %v326_v62, 6 }
  0x4b   : > { %2150 = vmatmul.mubr.msk.bf16.gmra.mxu1 %vm411_vm2, %v2285_v25  ;;  %v1991_v61 = vcombine.low %v1098_v56, %v1102_v58  ;;  %v1987_v5 = vrot.slane %v330_v63, 10  ;;  %v1109_v6 = vrot.slane %v331_v0, 6  ;;  %v2289_v7 = vld [vmem:[%s2459_s8 + $0x3c0] ss:$24 sps:$4 sm:$0xff]   ;;  %v1560_v9 = vsel %vm424_vm1, %v1534_v57, 0 }
  0x4c   : > { %2165 = vmatprep.mubr.msk.bf16.mxu1 %vm411_vm2, %v1990_v53  ;;  %2213 = vmatprep.subr.msk.bf16.mxu1 %vm424_vm1, %v1397_v2  ;;  %v1411_v8 = vsel %vm424_vm1, %v1397_v2, 0  ;;  %v1106_v10 = vsel %vm2504_vm7, %v1986_v3, %v1105_v4  ;;  %v335_v11 = vld [vmem:[%s2459_s8 + $0x250] sm:$0xf]  ;;  %v336_v12 = vld [vmem:[%s2459_s8 + $0x254] sm:$0x3] }
  0x4d   : > { %2160 = vmatmul.mubr.msk.bf16.gmra.mxu0 %vm411_vm2, %v1977_v43  ;;  %v1110_v13 = vsel %vm2504_vm7, %v1987_v5, %v1109_v6  ;;  %v340_v14 = vld [vmem:[%s2459_s8 + $0x268] sm:$0xf]  ;;  %v341_v16 = vld [vmem:[%s2459_s8 + $0x26c] sm:$0x3]  ;;  %v1988_v17 = vrot.slane %v335_v11, 10  ;;  %v1113_v18 = vrot.slane %v336_v12, 6 }
  0x4e   : > { %2175 = vmatprep.mubr.msk.bf16.mxu0 %vm411_vm2, %v2286_v45  ;;  %v1992_v19 = vcombine.low %v1106_v10, %v1110_v13  ;;  %v1989_v20 = vrot.slane %v340_v14, 10  ;;  %v1117_v21 = vrot.slane %v341_v16, 6  ;;  %v343_v23 = vld [vmem:[%s2459_s8 + $0x368] sm:$0xf]  ;;  %v344_v24 = vld [vmem:[%s2459_s8 + $0x36c] sm:$0xf] }
  0x4f   : > { %v1114_v22 = vsel %vm2504_vm7, %v1988_v17, %v1113_v18  ;;  %v348_v26 = vld [vmem:[%s2459_s8 + $0x380] sm:$0xf]  ;;  %v349_v28 = vld [vmem:[%s2459_s8 + $0x384] sm:$0xf]  ;;  %v2007_v29 = vrot.slane %v343_v23, 9  ;;  %v1351_v30 = vrot.slane %v344_v24, 5 }
  0x50   : > { %v1118_v25 = vsel %vm2504_vm7, %v1989_v20, %v1117_v21  ;;  %v2008_v31 = vrot.slane %v348_v26, 9  ;;  %v1355_v32 = vrot.slane %v349_v28, 5  ;;  %v345_v33 = vld [vmem:[%s2459_s8 + $0x370] sm:$0xf]  ;;  %v346_v34 = vld [vmem:[%s2459_s8 + $0x374] sm:$0x3] }
  0x51   : > { %v1993_v35 = vcombine.low %v1114_v22, %v1118_v25  ;;  %v2290_v36 = vld [vmem:[%s2459_s8 + $0x3f0] ss:$24 sps:$4 sm:$0xff]   ;;  %v1352_v37 = vsel %vm2489_vm5, %v2007_v29, %v1351_v30  ;;  %v351_v39 = vld [vmem:[%s2459_s8 + $0x38c] sm:$0x3]  ;;  %v2024_v40 = vrot.slane %v345_v33, 10  ;;  %v1504_v41 = vrot.slane %v346_v34, 6 }
  0x52   : > { %v350_v38 = vld [vmem:[%s2459_s8 + $0x388] sm:$0xf]  ;;  %v1356_v42 = vsel %vm2489_vm5, %v2008_v31, %v1355_v32  ;;  %v1508_v44 = vrot.slane %v351_v39, 6  ;;  %v353_v45 = vld [vmem:[%s2459_s8 + $0x398] sm:$0xf] }
  0x53   : > { %2166 = vmatmul.mubr.msk.bf16.vlgmr.msra.gmra.mxu1 %vm411_vm2, %v1991_v61  ;;  %v2025_v43 = vrot.slane %v350_v38, 10  ;;  %v354_v46 = vld [vmem:[%s2459_s8 + $0x39c] sm:$0xf]  ;;  %v2015_v47 = vcombine.low %v1352_v37, %v1356_v42  ;;  %v1505_v48 = vsel %vm2504_vm7, %v2024_v40, %v1504_v41  ;;  %v358_v49 = vld [vmem:[%s2459_s8 + $0x3b0] sm:$0xf]  ;;  %v2009_v51 = vrot.slane %v353_v45, 9 }
  0x54   : > { %2184 = vmatpush3.bf16.msra.mxu1 %v1411_v8  ;;  %2169 = vmatprep.mubr.msk.bf16.mxu1 %vm411_vm2, %v1992_v19  ;;  %v359_v50 = vld [vmem:[%s2459_s8 + $0x3b4] sm:$0xf]  ;;  %v1359_v52 = vrot.slane %v354_v46, 5  ;;  %v2010_v54 = vrot.slane %v358_v49, 9  ;;  %v355_v56 = vld [vmem:[%s2459_s8 + $0x3a0] sm:$0xf] }
  0x55   : > { %2176 = vmatmul.mubr.msk.bf16.vlgmr.msra.gmra.mxu0 %vm411_vm2, %v2287_v1  ;;  %v1509_v53 = vsel %vm2504_vm7, %v2025_v43, %v1508_v44  ;;  %v1363_v55 = vrot.slane %v359_v50, 5  ;;  %v356_v57 = vld [vmem:[%s2459_s8 + $0x3a4] sm:$0x3]  ;;  %v360_v59 = vld [vmem:[%s2459_s8 + $0x3b8] sm:$0xf]  ;;  %v2026_v61 = vrot.slane %v355_v56, 10 }
  0x56   : > { %2194 = vmatpush3.bf16.msra.mxu0 %v1560_v9  ;;  %2179 = vmatprep.mubr.msk.bf16.mxu0 %vm411_vm2, %v2289_v7  ;;  %v2032_v58 = vcombine.low %v1505_v48, %v1509_v53  ;;  %v361_v60 = vld [vmem:[%s2459_s8 + $0x3bc] sm:$0x3]  ;;  %v1512_v62 = vrot.slane %v356_v57, 6  ;;  %v1360_v63 = vsel %vm2489_vm5, %v2009_v51, %v1359_v52  ;;  %v2027_v1 = vrot.slane %v360_v59, 10  ;;  %v363_v3 = vld [vmem:[%s2459_s8 + $0x3c8] sm:$0xf] }
  0x57   : > { %v1364_v0 = vsel %vm2489_vm5, %v2010_v54, %v1363_v55  ;;  %v1516_v2 = vrot.slane %v361_v60, 6  ;;  %v364_v4 = vld [vmem:[%s2459_s8 + $0x3cc] sm:$0xf]  ;;  %v368_v6 = vld [vmem:[%s2459_s8 + $0x3e0] sm:$0xf]  ;;  %v2011_v8 = vrot.slane %v363_v3, 9 }
  0x58   : > { %v1513_v5 = vsel %vm2504_vm7, %v2026_v61, %v1512_v62  ;;  %v369_v7 = vld [vmem:[%s2459_s8 + $0x3e4] sm:$0xf]  ;;  %v1367_v9 = vrot.slane %v364_v4, 5  ;;  %v2012_v11 = vrot.slane %v368_v6, 9  ;;  %v365_v13 = vld [vmem:[%s2459_s8 + $0x3d0] sm:$0xf]  ;;  %v2016_v16 = vcombine.low %v1360_v63, %v1364_v0 }
  0x59   : > { %v1517_v10 = vsel %vm2504_vm7, %v2027_v1, %v1516_v2  ;;  %v1371_v12 = vrot.slane %v369_v7, 5  ;;  %v366_v14 = vld [vmem:[%s2459_s8 + $0x3d4] sm:$0x3]  ;;  %v370_v18 = vld [vmem:[%s2459_s8 + $0x3e8] sm:$0xf]  ;;  %v2028_v20 = vrot.slane %v365_v13, 10 }
  0x5a   : > { %v1368_v17 = vsel %vm2489_vm5, %v2011_v8, %v1367_v9  ;;  %v371_v19 = vld [vmem:[%s2459_s8 + $0x3ec] sm:$0x3]  ;;  %v1520_v21 = vrot.slane %v366_v14, 6  ;;  %v2033_v22 = vcombine.low %v1513_v5, %v1517_v10  ;;  %v2029_v24 = vrot.slane %v370_v18, 10  ;;  %v373_v26 = vld [vmem:[%s2459_s8 + $0x3f8] sm:$0xf] }
  0x5b   : > { %2170 = vmatmul.mubr.msk.bf16.gmra.mxu1 %vm411_vm2, %v1993_v35  ;;  %v1372_v23 = vsel %vm2489_vm5, %v2012_v11, %v1371_v12  ;;  %v1524_v25 = vrot.slane %v371_v19, 6  ;;  %v374_v28 = vld [vmem:[%s2459_s8 + $0x3fc] sm:$0xf]  ;;  %v378_v31 = vld [vmem:[%s2459_s8 + $0x410] sm:$0xf]  ;;  %v2013_v33 = vrot.slane %v373_v26, 9 }
  0x5c   : > { %2185 = vmatprep.mubr.msk.bf16.mxu1 %vm411_vm2, %v2015_v47  ;;  %v2017_v29 = vcombine.low %v1368_v17, %v1372_v23  ;;  %v1521_v30 = vsel %vm2504_vm7, %v2028_v20, %v1520_v21  ;;  %v379_v32 = vld [vmem:[%s2459_s8 + $0x414] sm:$0xf]  ;;  %v1375_v34 = vrot.slane %v374_v28, 5  ;;  %v375_v38 = vld [vmem:[%s2459_s8 + $0x400] sm:$0xf] }
  0x5d   : > { %2180 = vmatmul.mubr.msk.bf16.gmra.mxu0 %vm411_vm2, %v2290_v36  ;;  %v1525_v35 = vsel %vm2504_vm7, %v2029_v24, %v1524_v25  ;;  %v2014_v36 = vrot.slane %v378_v31, 9  ;;  %v1379_v37 = vrot.slane %v379_v32, 5  ;;  %v376_v39 = vld [vmem:[%s2459_s8 + $0x404] sm:$0x3]  ;;  %v380_v41 = vld [vmem:[%s2459_s8 + $0x418] sm:$0xf] }
  0x5e   : > { %2195 = vmatprep.mubr.msk.bf16.mxu0 %vm411_vm2, %v2032_v58  ;;  %v2034_v40 = vcombine.low %v1521_v30, %v1525_v35  ;;  %v381_v42 = vld [vmem:[%s2459_s8 + $0x41c] sm:$0x3]  ;;  %v2030_v43 = vrot.slane %v375_v38, 10  ;;  %v1528_v44 = vrot.slane %v376_v39, 6  ;;  %v1376_v45 = vsel %vm2489_vm5, %v2013_v33, %v1375_v34  ;;  %v384_v21 = vld [vmem:[#allocation2 + $0x10] sm:$0xff]  ;;  %v382_v24 = vld [vmem:[#allocation2] sm:$0xff] }
  0x5f   : > { %v1380_v46 = vsel %vm2489_vm5, %v2014_v36, %v1379_v37  ;;  %v2031_v47 = vrot.slane %v380_v41, 10  ;;  %v1532_v48 = vrot.slane %v381_v42, 6  ;;  %v383_v34 = vld [vmem:[#allocation2 + $0x8] sm:$0xff]  ;;  %v388_v39 = vld [vmem:[#allocation2 + $0x30] sm:$0xff]  ;;  %v386_v42 = vld [vmem:[#allocation2 + $0x20] sm:$0xff] }
  0x60   : > { %v1529_v49 = vsel %vm2504_vm7, %v2030_v43, %v1528_v44  ;;  %v2018_v51 = vcombine.low %v1376_v45, %v1380_v46 }
  0x61   : > { %v1533_v50 = vsel %vm2504_vm7, %v2031_v47, %v1532_v48 }
  0x62   : > { %v2035_v52 = vcombine.low %v1529_v49, %v1533_v50  ;;  %v389_v49 = vld [vmem:[#allocation2 + $0x38] sm:$0xff] }
  0x63   : > { %2186 = vmatmul.mubr.msk.bf16.vlgmr.msra.gmra.mxu1 %vm411_vm2, %v2016_v16 }
  0x64   : > { %2189 = vmatprep.mubr.msk.bf16.mxu1 %vm411_vm2, %v2017_v29  ;;  %v385_v29 = vld [vmem:[#allocation2 + $0x18] sm:$0xff] }
  0x65   : > { %2196 = vmatmul.mubr.msk.bf16.vlgmr.msra.gmra.mxu0 %vm411_vm2, %v2033_v22 }
  0x66   : > { %2199 = vmatprep.mubr.msk.bf16.mxu0 %vm411_vm2, %v2034_v40 }
  0x6b   : > { %2190 = vmatmul.mubr.msk.bf16.gmra.mxu1 %vm411_vm2, %v2018_v51 }
  0x6d   : > { %2200 = vmatmul.mubr.msk.bf16.gmra.mxu0 %vm411_vm2, %v2035_v52 }
  0xe7   : > { %v2117_v15 = vpop.f32.mrf.mxu0  ;;  %v2121_v53 = vpop.f32.mrf.mxu1 }
  0xe8   : > { %v495_v28 = vadd.f32 %v2117_v15, %v384_v21  ;;  %v499_v48 = vadd.f32 %v2121_v53, %v388_v39  ;;  %v387_v21 = vld [vmem:[#allocation2 + $0x28] sm:$0xff] }
  0xe9   : > { %v462_v54 = vpop.f32.mrf.mxu0  ;;  %v478_v55 = vpop.f32.mrf.mxu1 }
  0xea   : > { %v493_v32 = vadd.f32 %v462_v54, %v382_v24  ;;  %v497_v15 = vadd.f32 %v478_v55, %v386_v42 }
  0xeb   : > { %v2746_v56 = vpop.f32.mrf.mxu1  ;;  %v2118_v57 = vpop.f32.mrf.mxu0 }
  0xec   : > { %v496_v37 = vadd.f32 %v2118_v57, %v385_v29 }
  0xed   : > { %v2748_v58 = vpop.f32.mrf.mxu1  ;;  %v465_v59 = vpop.f32.mrf.mxu0 }
  0xee   : > { %v494_v43 = vadd.f32 %v465_v59, %v383_v34  ;;  %v498_v53 = vadd.f32 %v2748_v58, %v387_v21 }
  0xf1   : > { %v2127_v60 = vpop.f32.mrf.mxu1 }
  0xf2   : > { %v651_v33 = vadd.f32 %v2127_v60, %v495_v28  ;;  %v500_v28 = vadd.f32 %v2746_v56, %v389_v49 }
  0xf3   : > { %v2137_v61 = vpop.f32.mrf.mxu0  ;;  %v618_v27 = vpop.f32.mrf.mxu1 }
  0xf4   : > { %v649_v38 = vadd.f32 %v618_v27, %v493_v32  ;;  %v803_v44 = vadd.f32 %v2137_v61, %v651_v33 }
  0xf5   : > { %v770_v62 = vpop.f32.mrf.mxu0  ;;  %v2128_v63 = vpop.f32.mrf.mxu1 }
  0xf6   : > { %v652_v45 = vadd.f32 %v2128_v63, %v496_v37  ;;  %v801_v50 = vadd.f32 %v770_v62, %v649_v38 }
  0xf7   : > { %v2138_v0 = vpop.f32.mrf.mxu0  ;;  %v621_v1 = vpop.f32.mrf.mxu1 }
  0xf8   : > { %v650_v51 = vadd.f32 %v621_v1, %v494_v43  ;;  %v804_v57 = vadd.f32 %v2138_v0, %v652_v45 }
  0xf9   : > { %v773_v2 = vpop.f32.mrf.mxu0 }
  0xfa   : > { %v802_v63 = vadd.f32 %v773_v2, %v650_v51 }
  0xfb   : > { %v2131_v3 = vpop.f32.mrf.mxu1 }
  0xfc   : > { %v655_v27 = vadd.f32 %v2131_v3, %v499_v48 }
  0xfd   : > { %v2750_v4 = vpop.f32.mrf.mxu0  ;;  %v634_v5 = vpop.f32.mrf.mxu1 }
  0xfe   : > { %v653_v29 = vadd.f32 %v634_v5, %v497_v15  ;;  %v807_v55 = vadd.f32 %v2750_v4, %v655_v27 }
  0xff   : > { %v2752_v6 = vpop.f32.mrf.mxu0  ;;  %v2132_v7 = vpop.f32.mrf.mxu1 }
 0x100   : > { %v656_v62 = vadd.f32 %v2132_v7, %v500_v28  ;;  %v805_v3 = vadd.f32 %v2752_v6, %v653_v29 }
 0x101   : > { %v2754_v8 = vpop.f32.mrf.mxu0  ;;  %v2756_v9 = vpop.f32.mrf.mxu1 }
 0x102   : > { %v654_v56 = vadd.f32 %v2756_v9, %v498_v53 }
 0x103   : > { %v2758_v10 = vpop.f32.mrf.mxu0  ;;  %v2147_v11 = vpop.f32.mrf.mxu1 }
 0x104   : > { %v916_v52 = vadd.f32 %v2147_v11, %v803_v44 }
 0x105   : > { %v2157_v12 = vpop.f32.mrf.mxu0  ;;  %v883_v13 = vpop.f32.mrf.mxu1 }
 0x106   : > { %v914_v24 = vadd.f32 %v883_v13, %v801_v50  ;;  %v1065_v32 = vadd.f32 %v2157_v12, %v916_v52 }
 0x107   : > { %v1032_v14 = vpop.f32.mrf.mxu0  ;;  %v2148_v16 = vpop.f32.mrf.mxu1 }
 0x108   : > { %v917_v33 = vadd.f32 %v2148_v16, %v804_v57  ;;  %v1063_v34 = vadd.f32 %v1032_v14, %v914_v24  ;;  %v808_v16 = vadd.f32 %v2754_v8, %v656_v62 }
 0x109   : > { %v2158_v17 = vpop.f32.mrf.mxu0  ;;  %v886_v18 = vpop.f32.mrf.mxu1 }
 0x10a   : > { %v915_v37 = vadd.f32 %v886_v18, %v802_v63  ;;  %v1066_v38 = vadd.f32 %v2158_v17, %v917_v33  ;;  %v806_v18 = vadd.f32 %v2758_v10, %v654_v56 }
 0x10b   : > { %v2760_v19 = vpop.f32.mrf.mxu0  ;;  %v2151_v20 = vpop.f32.mrf.mxu1 }
 0x10c   : > { %v920_v2 = vadd.f32 %v2151_v20, %v807_v55  ;;  %v1064_v42 = vadd.f32 %v2760_v19, %v915_v37 }
 0x10d   : > { %v2762_v22 = vpop.f32.mrf.mxu0  ;;  %v899_v23 = vpop.f32.mrf.mxu1 }
 0x10e   : > { %v918_v58 = vadd.f32 %v899_v23, %v805_v3  ;;  %v1069_v43 = vadd.f32 %v2762_v22, %v920_v2 }
 0x10f   : > { %v2764_v25 = vpop.f32.mrf.mxu0  ;;  %v2766_v26 = vpop.f32.mrf.mxu1 }
 0x110   : > { %v921_v6 = vadd.f32 %v2766_v26, %v808_v16  ;;  %v1067_v8 = vadd.f32 %v2764_v25, %v918_v58 }
 0x111   : > { %v2768_v30 = vpop.f32.mrf.mxu0  ;;  %v2770_v31 = vpop.f32.mrf.mxu1 }
 0x112   : > { %v919_v23 = vadd.f32 %v2770_v31, %v806_v18  ;;  %v1070_v26 = vadd.f32 %v2768_v30, %v921_v6 }
 0x113   : > { %v2772_v35 = vpop.f32.mrf.mxu0  ;;  %v2167_v36 = vpop.f32.mrf.mxu1 }
 0x114   : > { %v1218_v0 = vadd.f32 %v2167_v36, %v1065_v32  ;;  %v1068_v25 = vadd.f32 %v2772_v35, %v919_v23 }
 0x115   : > { %v2177_v40 = vpop.f32.mrf.mxu0  ;;  %v1185_v41 = vpop.f32.mrf.mxu1 }
 0x116   : > { %v1216_v12 = vadd.f32 %v1185_v41, %v1063_v34  ;;  %v1327_v4 = vadd.f32 %v2177_v40, %v1218_v0 }
 0x117   : > { %v1294_v46 = vpop.f32.mrf.mxu0  ;;  %v2168_v47 = vpop.f32.mrf.mxu1 }
 0x118   : > { %v1219_v14 = vadd.f32 %v2168_v47, %v1066_v38  ;;  %v1325_v17 = vadd.f32 %v1294_v46, %v1216_v12 }
 0x119   : > { %v2178_v54 = vpop.f32.mrf.mxu0  ;;  %v1188_v60 = vpop.f32.mrf.mxu1 }
 0x11a   : > { %v1217_v20 = vadd.f32 %v1188_v60, %v1064_v42  ;;  %v1328_v40 = vadd.f32 %v2178_v54, %v1219_v14 }
 0x11b   : > { %v1297_v59 = vpop.f32.mrf.mxu0  ;;  %v2171_v61 = vpop.f32.mrf.mxu1 }
 0x11c   : > { %v1222_v45 = vadd.f32 %v2171_v61, %v1069_v43  ;;  %v1326_v50 = vadd.f32 %v1297_v59, %v1217_v20 }
 0x11d   : > { %v2181_v1 = vpop.f32.mrf.mxu0  ;;  %v1201_v11 = vpop.f32.mrf.mxu1 }
 0x11e   : > { %v1220_v22 = vadd.f32 %v1201_v11, %v1067_v8  ;;  %v1331_v15 = vadd.f32 %v2181_v1, %v1222_v45 }
 0x11f   : > { %v1310_v5 = vpop.f32.mrf.mxu0  ;;  %v2172_v13 = vpop.f32.mrf.mxu1 }
 0x120   : > { %v1223_v60 = vadd.f32 %v2172_v13, %v1070_v26  ;;  %v1329_v27 = vadd.f32 %v1310_v5, %v1220_v22 }
 0x121   : > { %v2182_v7 = vpop.f32.mrf.mxu0  ;;  %v1204_v39 = vpop.f32.mrf.mxu1 }
 0x122   : > { %v1221_v24 = vadd.f32 %v1204_v39, %v1068_v25  ;;  %v1332_v63 = vadd.f32 %v2182_v7, %v1223_v60 }
 0x123   : > { %v1313_v36 = vpop.f32.mrf.mxu0  ;;  %v2187_v9 = vpop.f32.mrf.mxu1 }
 0x124   : > { %v1480_v41 = vadd.f32 %v2187_v9, %v1327_v4  ;;  %v1330_v62 = vadd.f32 %v1313_v36, %v1221_v24 }
 0x125   : > { %v2197_v44 = vpop.f32.mrf.mxu0  ;;  %v1447_v19 = vpop.f32.mrf.mxu1 }
 0x126   : > { %v1629_v47 = vadd.f32 %v2197_v44, %v1480_v41  ;;  %v1478_v10 = vadd.f32 %v1447_v19, %v1325_v17 }
 0x127   : > { %v1596_v48 = vpop.f32.mrf.mxu0  ;;  %v2188_v49 = vpop.f32.mrf.mxu1 }
 0x128   : > { %1638 = vst.msk [vmem:[#allocation2 + $0x10] sm:$0xff] %vm1635_vm8, %v1629_v47  ;;  %v1627_v46 = vadd.f32 %v1596_v48, %v1478_v10  ;;  %v1481_v51 = vadd.f32 %v2188_v49, %v1328_v40 }
 0x129   : > { %v2198_v31 = vpop.f32.mrf.mxu0  ;;  %v1450_v52 = vpop.f32.mrf.mxu1 }
 0x12a   : > { %1636 = vst.msk [vmem:[#allocation2] sm:$0xff] %vm1635_vm8, %v1627_v46  ;;  %v1630_v54 = vadd.f32 %v2198_v31, %v1481_v51  ;;  %v1479_v21 = vadd.f32 %v1450_v52, %v1326_v50 }
 0x12b   : > { %v1599_v57 = vpop.f32.mrf.mxu0  ;;  %v2191_v30 = vpop.f32.mrf.mxu1 }
 0x12c   : > { %1639 = vst.msk [vmem:[#allocation2 + $0x18] sm:$0xff] %vm1635_vm8, %v1630_v54  ;;  %v1628_v28 = vadd.f32 %v1599_v57, %v1479_v21  ;;  %v1484_v29 = vadd.f32 %v2191_v30, %v1331_v15 }
 0x12d   : > { %v2201_v59 = vpop.f32.mrf.mxu0  ;;  %v1463_v61 = vpop.f32.mrf.mxu1 }
 0x12e   : > { %1637 = vst.msk [vmem:[#allocation2 + $0x8] sm:$0xff] %vm1635_vm8, %v1628_v28  ;;  %v1633_v35 = vadd.f32 %v2201_v59, %v1484_v29  ;;  %v1482_v32 = vadd.f32 %v1463_v61, %v1329_v27 }
 0x12f   : > { %v1612_v33 = vpop.f32.mrf.mxu0  ;;  %v2192_v53 = vpop.f32.mrf.mxu1 }
 0x130   : > { %1642 = vst.msk [vmem:[#allocation2 + $0x30] sm:$0xff] %vm1635_vm8, %v1633_v35  ;;  %v1631_v1 = vadd.f32 %v1612_v33, %v1482_v32  ;;  %v1485_v11 = vadd.f32 %v2192_v53, %v1332_v63 }
 0x131   : > { %v2202_v55 = vpop.f32.mrf.mxu0  ;;  %v1466_v34 = vpop.f32.mrf.mxu1 }
 0x132   : > { %1640 = vst.msk [vmem:[#allocation2 + $0x20] sm:$0xff] %vm1635_vm8, %v1631_v1  ;;  %v1634_v37 = vadd.f32 %v2202_v55, %v1485_v11  ;;  %v1483_v0 = vadd.f32 %v1466_v34, %v1330_v62  ;;  %1647 = sbr.rel (%p2040_p11) target bundleno = 367 (0x16f), region = 40 }
 0x133   : > { %v1615_v3 = vpop.f32.mrf.mxu0 }
 0x134   : > { %1643 = vst.msk [vmem:[#allocation2 + $0x38] sm:$0xff] %vm1635_vm8, %v1634_v37  ;;  %v1632_v56 = vadd.f32 %v1615_v3, %v1483_v0 }
 0x136   : > { %1641 = vst.msk [vmem:[#allocation2 + $0x28] sm:$0xff] %vm1635_vm8, %v1632_v56 }
 0x137   : > { %v1648_v5 = vld [vmem:[#allocation2] sm:$0xff]  ;;  %v1649_v38 = vld [vmem:[#allocation2 + $0x8] sm:$0xff]  ;;  %v1650_v16 = vld [vmem:[#allocation2 + $0x10] sm:$0xff]  ;;  %vm1783_vm9 = vcmask 60416  }
 0x138   : > { %v2041_v13 = vld [vmem:[%s2871_s2] ss:$0 sm:$0xff]  ;;  %v1651_v58 = vld [vmem:[#allocation2 + $0x18] sm:$0xff]  ;;  %v1654_v18 = vld [vmem:[#allocation2 + $0x30] sm:$0xff] }
 0x139   : > { %v2800_v2 = vadd.f32 %v2041_v13, %v1648_v5  ;;  %v2802_v12 = vadd.f32 %v2041_v13, %v1649_v38  ;;  %v1652_v7 = vld [vmem:[#allocation2 + $0x20] sm:$0xff]  ;;  %v2804_v39 = vadd.f32 %v2041_v13, %v1650_v16  ;;  %v2806_v42 = vadd.f32 %v2041_v13, %v1651_v58 }
 0x13a   : > { %v2808_v4 = vadd.f32 %v2041_v13, %v1652_v7  ;;  %v2814_v17 = vadd.f32 %v2041_v13, %v1654_v18 }
 0x13b   : > { %v1655_v6 = vld [vmem:[#allocation2 + $0x38] sm:$0xff]  ;;  %v1671_v36 = vmin.f32 %v2800_v2, 20.0  ;;  %v1672_v9 = vmin.f32 %v2802_v12, 20.0  ;;  %v1673_v20 = vmin.f32 %v2804_v39, 20.0  ;;  %v1674_v41 = vmin.f32 %v2806_v42, 20.0 }
 0x13c   : > { %v1675_v8 = vmin.f32 %v2808_v4, 20.0  ;;  %v2819_v23 = vadd.f32 %v2041_v13, %v1655_v6  ;;  %v1677_v45 = vmin.f32 %v2814_v17, 20.0 }
 0x13d   : > { %v1653_v14 = vld [vmem:[#allocation2 + $0x28] sm:$0xff]  ;;  %v1679_v44 = vmul.f32 1.442695, %v1671_v36  ;;  %v1681_v19 = vmul.f32 1.442695, %v1672_v9 }
 0x13e   : > { %v2812_v43 = vadd.f32 %v2041_v13, %v1653_v14  ;;  %v1683_v47 = vmul.f32 1.442695, %v1673_v20  ;;  %v1685_v10 = vmul.f32 1.442695, %v1674_v41  ;;  %v1687_v26 = vmul.f32 1.442695, %v1675_v8 }
 0x13f   : > { %2291 = vpow2.f32 %v1679_v44  ;;  %v1678_v48 = vmin.f32 %v2819_v23, 20.0  ;;  %v1691_v50 = vmul.f32 1.442695, %v1677_v45 }
 0x140   : > { %v1676_v40 = vmin.f32 %v2812_v43, 20.0  ;;  %2293 = vpow2.f32 %v1681_v19 }
 0x141   : > { %2295 = vpow2.f32 %v1683_v47  ;;  %v1693_v22 = vmul.f32 1.442695, %v1678_v48 }
 0x142   : > { %v1689_v49 = vmul.f32 1.442695, %v1676_v40  ;;  %2297 = vpow2.f32 %v1685_v10 }
 0x143   : > { %2299 = vpow2.f32 %v1687_v26 }
 0x144   : > { %2301 = vpow2.f32 %v1689_v49 }
 0x145   : > { %2303 = vpow2.f32 %v1691_v50 }
 0x146   : > { %2305 = vpow2.f32 %v1693_v22 }
 0x14c   : > { %v2292_v46 = vpop.eup %2291 }
 0x14d   : > { %v2294_v51 = vpop.eup %2293  ;;  %v1695_v25 = vadd.f32 1.0, %v2292_v46 }
 0x14e   : > { %v2296_v31 = vpop.eup %2295  ;;  %v1696_v52 = vadd.f32 1.0, %v2294_v51 }
 0x14f   : > { %v2298_v15 = vpop.eup %2297  ;;  %v1703_v60 = vmul.f32 %v1695_v25, %v1695_v25  ;;  %v1697_v54 = vadd.f32 1.0, %v2296_v31 }
 0x150   : > { %v2300_v21 = vpop.eup %2299  ;;  %v1704_v57 = vmul.f32 %v1696_v52, %v1696_v52  ;;  %v1698_v30 = vadd.f32 1.0, %v2298_v15 }
 0x151   : > { %v2302_v27 = vpop.eup %2301  ;;  %v1719_v24 = vadd.f32 1.0, %v1703_v60  ;;  %v1705_v28 = vmul.f32 %v1697_v54, %v1697_v54  ;;  %v1699_v29 = vadd.f32 1.0, %v2300_v21  ;;  %v2042_v13 = vadd.f32 -1.0, %v1703_v60 }
 0x152   : > { %v2304_v59 = vpop.eup %2303  ;;  %v1720_v61 = vadd.f32 1.0, %v1704_v57  ;;  %v1706_v63 = vmul.f32 %v1698_v30, %v1698_v30  ;;  %v1700_v35 = vadd.f32 1.0, %v2302_v27  ;;  %v2043_v38 = vadd.f32 -1.0, %v1704_v57 }
 0x153   : > { %v2306_v32 = vpop.eup %2305  ;;  %2307 = vrcp.f32 %v1719_v24  ;;  %v1721_v33 = vadd.f32 1.0, %v1705_v28  ;;  %v1707_v53 = vmul.f32 %v1699_v29, %v1699_v29  ;;  %v1701_v55 = vadd.f32 1.0, %v2304_v59 }
 0x154   : > { %2309 = vrcp.f32 %v1720_v61  ;;  %v1722_v62 = vadd.f32 1.0, %v1706_v63  ;;  %v1708_v1 = vmul.f32 %v1700_v35, %v1700_v35  ;;  %v1702_v37 = vadd.f32 1.0, %v2306_v32 }
 0x155   : > { %2311 = vrcp.f32 %v1721_v33  ;;  %v1723_v11 = vadd.f32 1.0, %v1707_v53  ;;  %v1709_v0 = vmul.f32 %v1701_v55, %v1701_v55  ;;  %v2044_v16 = vadd.f32 -1.0, %v1705_v28 }
 0x156   : > { %2313 = vrcp.f32 %v1722_v62  ;;  %v1724_v34 = vadd.f32 1.0, %v1708_v1  ;;  %v1710_v3 = vmul.f32 %v1702_v37, %v1702_v37  ;;  %v2045_v7 = vadd.f32 -1.0, %v1706_v63 }
 0x157   : > { %2315 = vrcp.f32 %v1723_v11  ;;  %v1725_v56 = vadd.f32 1.0, %v1709_v0  ;;  %v2046_v6 = vadd.f32 -1.0, %v1707_v53  ;;  %v2047_v20 = vadd.f32 -1.0, %v1708_v1 }
 0x158   : > { %2317 = vrcp.f32 %v1724_v34  ;;  %v1726_v5 = vadd.f32 1.0, %v1710_v3  ;;  %v2048_v49 = vadd.f32 -1.0, %v1709_v0 }
 0x159   : > { %2319 = vrcp.f32 %v1725_v56 }
 0x15a   : > { %2321 = vrcp.f32 %v1726_v5 }
 0x160   : > { %v2308_v58 = vpop.eup %2307 }
 0x161   : > { %v2310_v14 = vpop.eup %2309  ;;  %v1728_v18 = vmul.f32 %v2308_v58, %v2042_v13 }
 0x162   : > { %v2312_v36 = vpop.eup %2311  ;;  %v1730_v9 = vmul.f32 %v2310_v14, %v2043_v38 }
 0x163   : > { %v2314_v41 = vpop.eup %2313  ;;  %v1743_v8 = vmul.f32 %v1728_v18, %v2800_v2  ;;  %v1732_v44 = vmul.f32 %v2312_v36, %v2044_v16  ;;  %v2049_v2 = vadd.f32 -1.0, %v1710_v3 }
 0x164   : > { %v2316_v19 = vpop.eup %2315  ;;  %v1744_v40 = vmul.f32 %v1730_v9, %v2802_v12  ;;  %v1734_v45 = vmul.f32 %v2314_v41, %v2045_v7 }
 0x165   : > { %v2318_v47 = vpop.eup %2317  ;;  %v2060_v10 = vpack.c.bf16 %v1743_v8, %v1743_v8  ;;  %v1745_v26 = vmul.f32 %v1732_v44, %v2804_v39  ;;  %v1736_v48 = vmul.f32 %v2316_v19, %v2046_v6 }
 0x166   : > { %v2061_v50 = vpack.c.bf16 %v1744_v40, %v1744_v40  ;;  %v1746_v22 = vmul.f32 %v1734_v45, %v2806_v42  ;;  %v1738_v46 = vmul.f32 %v2318_v47, %v2047_v20  ;;  %v2320_v25 = vpop.eup %2319 }
 0x167   : > { %1784 = vst.msk [vmem:[%s2465_s24] sm:$0xf] %vm1783_vm9, %v2060_v10  ;;  %v2062_v51 = vpack.c.bf16 %v1745_v26, %v1745_v26  ;;  %v1747_v12 = vmul.f32 %v1736_v48, %v2808_v4  ;;  %v2322_v52 = vpop.eup %2321  ;;  %v1740_v15 = vmul.f32 %v2320_v25, %v2048_v49 }
 0x168   : > { %1785 = vst.msk [vmem:[%s2465_s24 + $0x4] sm:$0xf] %vm1783_vm9, %v2061_v50  ;;  %v2063_v39 = vpack.c.bf16 %v1746_v22, %v1746_v22  ;;  %v1748_v31 = vmul.f32 %v1738_v46, %v2812_v43  ;;  %v1742_v54 = vmul.f32 %v2322_v52, %v2049_v2 }
 0x169   : > { %1786 = vst.msk [vmem:[%s2465_s24 + $0x8] sm:$0xf] %vm1783_vm9, %v2062_v51  ;;  %v2064_v42 = vpack.c.bf16 %v1747_v12, %v1747_v12  ;;  %v1749_v4 = vmul.f32 %v1740_v15, %v2814_v17 }
 0x16a   : > { %1787 = vst.msk [vmem:[%s2465_s24 + $0xc] sm:$0xf] %vm1783_vm9, %v2063_v39  ;;  %v2065_v60 = vpack.c.bf16 %v1748_v31, %v1748_v31  ;;  %v1750_v21 = vmul.f32 %v1742_v54, %v2819_v23 }
 0x16b   : > { %1788 = vst.msk [vmem:[%s2465_s24 + $0x10] sm:$0xf] %vm1783_vm9, %v2064_v42  ;;  %v2066_v57 = vpack.c.bf16 %v1749_v4, %v1749_v4 }
 0x16c   : > { %1789 = vst.msk [vmem:[%s2465_s24 + $0x14] sm:$0xf] %vm1783_vm9, %v2065_v60  ;;  %v2067_v30 = vpack.c.bf16 %v1750_v21, %v1750_v21 }
 0x16d   : > { %1790 = vst.msk [vmem:[%s2465_s24 + $0x18] sm:$0xf] %vm1783_vm9, %v2066_v57 }
 0x16e   : > { %1791 = vst.msk [vmem:[%s2465_s24 + $0x1c] sm:$0xf] %vm1783_vm9, %v2067_v30 }
 0x16f PF: > { %s13_s18 = sadd.s32 1, %s2377_s18   ;;  %s2877_s12 = smov %s2365_s15 }
 0x170   : > { %p10_p12 = scmp.ge.s32.totalorder %s13_s18, 50   ;;  %s2878_s13 = smov %s2369_s16 }
 0x171   : > { %s2879_s14 = smov %s2373_s17  ;;  %s2880_s15 = smov %s2884_s19 }
 0x172   : > { %s2881_s16 = smov %s2888_s20  ;;  %s2882_s17 = smov %s2892_s21 }
 0x173   :  { %12 = sbr.rel (!%p10_p12) target bundleno = 4 (0x4), region = 73 }

// kernel: assp_forward.7
= control target key start
LH: loop header
LB: loop body
LE: loop exit
PB: predicated region body
PF: predicated region fallthrough
CT: control target
= control target key end

     0   :  { %s2241_s12 = smov 0   ;;  %s2243_s13 = smov 0   ;;  %s2628_s0 = inlined_call_operand.vmem [shape: bf16[2,32,32,32,4], index: 0, kind: input, shape index: {}]   ;;  %s2629_s1 = inlined_call_operand.vmem [shape: bf16[3,36,8], index: 1, kind: input, shape index: {}]   ;;  %s2630_s2 = inlined_call_operand.vmem [shape: f32[1,8], index: 2, kind: input, shape index: {}]   ;;  %s2631_s3 = inlined_call_operand.vmem [shape: bf16[2,8,64,8], index: 3, kind: output, shape index: {}]  }
   0x1   :  { %s2245_s14 = smov 0   ;;  %s2247_s15 = smov 0  }
   0x2   :  { %s2249_s16 = smov 0   ;;  %s2251_s17 = smov 0  }
   0x3   :  { %s2253_s18 = smov 0  }
   0x4 LB: > { %s25_s19 = sadd.s32 1, %s2206_s15  ;;  %s28_s20 = sadd.s32 1, %s2210_s16  ;;  %s2218_s18 = sphi %s2253_s18, %s13_s18   ;;  %s2214_s17 = sphi %s2251_s17, %s2641_s17   ;;  %s2210_s16 = sphi %s2249_s16, %s2640_s16   ;;  %s2206_s15 = sphi %s2247_s15, %s2639_s15   ;;  %s2202_s14 = sphi %s2245_s14, %s2638_s14   ;;  %s2198_s13 = sphi %s2243_s13, %s2637_s13   ;;  %s2194_s12 = sphi %s2241_s12, %s2636_s12  }
   0x5   : > { %p26_p0 = scmp.ge.s32.totalorder %s25_s19, 3  ;;  %p1762_p1 = scmp.ge.s32.totalorder %s2218_s18, 1 }
   0x6   : > { %p182_p2 = scmp.lt.s32.totalorder %s2218_s18, 49  ;;  %s32_s21 = sadd.s32 1, %s2214_s17 }
   0x7   : > { %s2643_s19 = smov (%p26_p0, %s25_s19), 0  ;;  %s2645_s20 = smov (!%p26_p0, %s28_s20), %s2210_s16 }
   0x8   : > { %p183_p3 = pnand %p1762_p1, %p182_p2  ;;  %p30_p4 = scmp.ge.s32.totalorder %s2645_s20, 8 }
   0x9   : > { %s221_s22 = smul.u32 (!%p183_p3), 12, %s2194_s12  ;;  %p223_p6 = scmp.lt.s32.totalorder (!%p183_p3), %s2202_s14, 1 }
   0xa   : > { %s2647_s20 = smov (%p30_p4, %s2645_s20), 0  ;;  %s2649_s21 = smov (!%p30_p4, %s32_s21), %s2214_s17 }
   0xb   : > { %p34_p5 = scmp.ge.s32.totalorder %s2649_s21, 2  ;;  %186 = sbr.rel (%p183_p3) target bundleno = 362 (0x16a), region = 32 }
   0xc   : > { %s222_s23 = sadd.s32 (!%p183_p3), %s2198_s13, %s221_s22  ;;  %p234_p7 = scmp.lt.s32.totalorder (!%p183_p3), %s2194_s12, 2 }
   0xd   : > { %s2651_s21 = smov (%p34_p5, %s2649_s21), 0  ;;  %p225_p8 = scmp.lt.s32.totalorder (!%p183_p3), %s222_s23, 31 }
   0xe   : > { %2632 = sst [smem:[#allocation3_spill]] %s2651_s21  ;;  %p241_p9 = scmp.lt.s32.totalorder (!%p183_p3), %s2198_s13, 7 }
   0xf   : > { %p1770_p10 = scmp.ne.s32.totalorder (!%p183_p3), %s2194_s12, 0 }
  0x10   : > { %s2653_s14 = smov (!%p223_p6, %s2202_s14), 1  ;;  %s2655_s23 = smov (!%p225_p8, %s222_s23), 31 }
  0x11   : > { %s1764_s24 = sshll.u32 %s2653_s14, 12  ;;  %s1763_s26 = sshll.u32 %s2655_s23, 7 }
  0x12   : > { %s235_s25 = scalar_select %p234_p7, %s2194_s12, 2 }
  0x13   : > { %s229_s27 = sadd.s32 %s1764_s24, %s1763_s26  ;;  %s1768_s30 = sshll.u32 %s2653_s14, 6 }
  0x14   : > { %s2046_s28 = smul.u32 20, %s235_s25  ;;  %s1765_s29 = sshll.u32 %s229_s27, 2 }
  0x15   : > { %s2295_s6 = scalar_lea.vmem %s2628_s0, %s1765_s29  ;;  %s2657_s13 = smov (!%p241_p9, %s2198_s13), 7 }
  0x16   : > { %s2300_s9 = scalar_lea.vmem %s2629_s1, %s2046_s28  ;;  %s1767_s10 = sshll.u32 %s2657_s13, 3 }
  0x17   : > { %s245_s11 = sadd.s32 %s1768_s30, %s1767_s10  ;;  %252 = sbr.rel (%p1770_p10) target bundleno = 33 (0x21), region = 36 }
  0x18   : > { %s1769_s22 = sshll.u32 %s245_s11, 2 }
  0x19   : > { %s2306_s24 = scalar_lea.vmem %s2631_s3, %s1769_s22 }
  0x1c   : > { %vm253_vm0 = vcmask 64512   ;;  %v2220_v0 = vmov 0.0  }
  0x1d   : > { %254 = vst.msk [vmem:[#allocation2] sm:$0xff] %vm253_vm0, %v2220_v0  ;;  %255 = vst.msk [vmem:[#allocation2 + $0x8] sm:$0xff] %vm253_vm0, %v2220_v0 }
  0x1e   : > { %256 = vst.msk [vmem:[#allocation2 + $0x10] sm:$0xff] %vm253_vm0, %v2220_v0  ;;  %257 = vst.msk [vmem:[#allocation2 + $0x18] sm:$0xff] %vm253_vm0, %v2220_v0 }
  0x1f   : > { %258 = vst.msk [vmem:[#allocation2 + $0x20] sm:$0xff] %vm253_vm0, %v2220_v0  ;;  %259 = vst.msk [vmem:[#allocation2 + $0x28] sm:$0xff] %vm253_vm0, %v2220_v0 }
  0x20   : > { %260 = vst.msk [vmem:[#allocation2 + $0x30] sm:$0xff] %vm253_vm0, %v2220_v0  ;;  %261 = vst.msk [vmem:[#allocation2 + $0x38] sm:$0xff] %vm253_vm0, %v2220_v0 }
  0x21 PF: > { %v366_v1 = vld [vmem:[%s2300_s9] sm:$0x3]  ;;  %vm400_vm1 = vcmask 1041408   ;;  %vm387_vm2 = vcmask 31744   ;;  %vm494_vm3 = vcmask 1045508   ;;  %vm1488_vm5 = vcmask 64512  }
  0x22   : > { %2036 = vmatprep.subr.msk.bf16.mxu0 %vm400_vm1, %v366_v1  ;;  %2037 = vmatprep.subr.msk.bf16.mxu1 %vm400_vm1, %v366_v1  ;;  %v402_v2 = vsel %vm400_vm1, %v366_v1, 0  ;;  %v2104_v3 = vld [vmem:[%s2295_s6] ss:$16 sps:$4 sm:$0xff]   ;;  %v633_v8 = vld [vmem:[%s2300_s9 + $0x4] sm:$0x3]  ;;  %vm2331_vm4 = vmor %vm400_vm1, %vm494_vm3  ;;  %p1871_p11 = scmp.ne.s32.totalorder %s2194_s12, 2 }
  0x23   : > { %1945 = vmatpush3.bf16.msra.mxu0 %v402_v2  ;;  %2035 = vmatpush3.bf16.msra.mxu1 %v402_v2  ;;  %v2105_v4 = vld [vmem:[%s2295_s6 + $0x40] ss:$16 sps:$4 sm:$0xff]   ;;  %v263_v9 = vld [vmem:[%s2295_s6 + $0x4] sm:$0xf]  ;;  %v264_v10 = vld [vmem:[%s2295_s6 + $0x8] sm:$0xf] }
  0x24   : > { %1946 = vmatprep.mubr.msk.bf16.mxu0 %vm387_vm2, %v2104_v3  ;;  %v2106_v5 = vld [vmem:[%s2295_s6 + $0x20] ss:$16 sps:$4 sm:$0xff]   ;;  %1950 = vmatprep.mubr.msk.bf16.mxu1 %vm387_vm2, %v2105_v4  ;;  %v667_v12 = vsel %vm400_vm1, %v633_v8, 0  ;;  %v267_v13 = vld [vmem:[%s2295_s6 + $0x14] sm:$0xf]  ;;  %v1779_v16 = vrot.slane %v263_v9, 10 }
  0x25   : > { %v2107_v6 = vld [vmem:[%s2295_s6 + $0x60] ss:$16 sps:$4 sm:$0xff]   ;;  %2039 = vmatprep.subr.msk.bf16.mxu0 %vm400_vm1, %v633_v8  ;;  %v268_v14 = vld [vmem:[%s2295_s6 + $0x18] sm:$0xf]  ;;  %v498_v17 = vrot.slane %v264_v10, 6  ;;  %v1780_v18 = vrot.slane %v267_v13, 10 }
  0x26   : > { %1947 = vmatmul.mubr.msk.bf16.vlgmr.msra.gmra.mxu0 %vm387_vm2, %v2106_v5  ;;  %v2108_v7 = vld [vmem:[%s2300_s9] ss:$0 sps:$4 sm:$0xcc]   ;;  %1951 = vmatmul.mubr.msk.bf16.vlgmr.msra.gmra.mxu1 %vm387_vm2, %v2107_v6  ;;  %v502_v19 = vrot.slane %v268_v14, 6  ;;  %v2109_v21 = vld [vmem:[%s2295_s6 + $0xc] ss:$16 sps:$4 sm:$0xff]  }
  0x27   : > { %v544_v11 = vrot.slane %v2108_v7, 2  ;;  %1965 = vmatpush3.bf16.msra.mxu0 %v667_v12  ;;  %v499_v22 = vsel %vm2331_vm4, %v1779_v16, %v498_v17  ;;  %v271_v24 = vld [vmem:[%s2295_s6 + $0x24] sm:$0xf]  ;;  %v272_v25 = vld [vmem:[%s2295_s6 + $0x28] sm:$0xf]  ;;  %1966 = vmatprep.mubr.msk.bf16.mxu0 %vm387_vm2, %v2109_v21 }
  0x28   : > { %v503_v23 = vsel %vm2331_vm4, %v1780_v18, %v502_v19  ;;  %v275_v26 = vld [vmem:[%s2295_s6 + $0x34] sm:$0xf]  ;;  %v276_v28 = vld [vmem:[%s2295_s6 + $0x38] sm:$0xf]  ;;  %v1781_v29 = vrot.slane %v271_v24, 10  ;;  %v506_v30 = vrot.slane %v272_v25, 6 }
  0x29   : > { %2038 = vmatprep.subr.msk.bf16.mxu1 %vm400_vm1, %v544_v11  ;;  %v558_v20 = vsel %vm400_vm1, %v544_v11, 0  ;;  %v1787_v27 = vcombine.low %v499_v22, %v503_v23  ;;  %v1782_v31 = vrot.slane %v275_v26, 10  ;;  %v510_v32 = vrot.slane %v276_v28, 6  ;;  %v2110_v34 = vld [vmem:[%s2295_s6 + $0x2c] ss:$16 sps:$4 sm:$0xff]  }
  0x2a   : > { %1955 = vmatpush3.bf16.msra.mxu1 %v558_v20  ;;  %v507_v33 = vsel %vm2331_vm4, %v1781_v29, %v506_v30  ;;  %v903_v35 = vld [vmem:[%s2300_s9 + $0x8] sm:$0x3]  ;;  %v2111_v37 = vld [vmem:[%s2300_s9 + $0x4] ss:$0 sps:$4 sm:$0xcc]  }
  0x2b   : > { %1956 = vmatprep.mubr.msk.bf16.mxu1 %vm387_vm2, %v1787_v27  ;;  %v511_v36 = vsel %vm2331_vm4, %v1782_v31, %v510_v32  ;;  %2041 = vmatprep.subr.msk.bf16.mxu0 %vm400_vm1, %v903_v35  ;;  %v929_v38 = vsel %vm400_vm1, %v903_v35, 0  ;;  %v279_v39 = vld [vmem:[%s2295_s6 + $0x44] sm:$0xf]  ;;  %v280_v41 = vld [vmem:[%s2295_s6 + $0x48] sm:$0xf]  ;;  %v766_v44 = vrot.slane %v2111_v37, 2 }
  0x2c   : > { %v1788_v40 = vcombine.low %v507_v33, %v511_v36  ;;  %v283_v42 = vld [vmem:[%s2295_s6 + $0x54] sm:$0xf]  ;;  %v284_v43 = vld [vmem:[%s2295_s6 + $0x58] sm:$0xf]  ;;  %v1783_v45 = vrot.slane %v279_v39, 10  ;;  %v514_v46 = vrot.slane %v280_v41, 6 }
  0x2d   : > { %v1784_v47 = vrot.slane %v283_v42, 10  ;;  %v518_v48 = vrot.slane %v284_v43, 6  ;;  %v2112_v49 = vld [vmem:[%s2295_s6 + $0x4c] ss:$16 sps:$4 sm:$0xff]   ;;  %2040 = vmatprep.subr.msk.bf16.mxu1 %vm400_vm1, %v766_v44  ;;  %v780_v50 = vsel %vm400_vm1, %v766_v44, 0 }
  0x2e   : > { %1967 = vmatmul.mubr.msk.bf16.vlgmr.msra.gmra.mxu0 %vm387_vm2, %v2110_v34  ;;  %1957 = vmatmul.mubr.msk.bf16.vlgmr.msra.gmra.mxu1 %vm387_vm2, %v1788_v40  ;;  %v515_v51 = vsel %vm2331_vm4, %v1783_v45, %v514_v46  ;;  %v287_v52 = vld [vmem:[%s2295_s6 + $0x64] sm:$0xf]  ;;  %v288_v53 = vld [vmem:[%s2295_s6 + $0x68] sm:$0xf]  ;;  %v291_v55 = vld [vmem:[%s2295_s6 + $0x74] sm:$0xf] }
  0x2f   : > { %1985 = vmatpush3.bf16.msra.mxu0 %v929_v38  ;;  %1975 = vmatpush3.bf16.msra.mxu1 %v780_v50  ;;  %v519_v54 = vsel %vm2331_vm4, %v1784_v47, %v518_v48  ;;  %v292_v56 = vld [vmem:[%s2295_s6 + $0x78] sm:$0xf]  ;;  %v1785_v57 = vrot.slane %v287_v52, 10  ;;  %v522_v58 = vrot.slane %v288_v53, 6  ;;  %v1786_v60 = vrot.slane %v291_v55, 10 }
  0x30   : > { %1970 = vmatprep.mubr.msk.bf16.mxu0 %vm387_vm2, %v2112_v49  ;;  %v1789_v59 = vcombine.low %v515_v51, %v519_v54  ;;  %v526_v61 = vrot.slane %v292_v56, 6  ;;  %v2113_v63 = vld [vmem:[%s2295_s6 + $0x6c] ss:$16 sps:$4 sm:$0xff]   ;;  %v2114_v1 = vld [vmem:[%s2295_s6 + $0xc0] ss:$16 sps:$4 sm:$0xff]  }
  0x31   : > { %v523_v62 = vsel %vm2331_vm4, %v1785_v57, %v522_v58  ;;  %v295_v2 = vld [vmem:[%s2295_s6 + $0xc4] sm:$0xf]  ;;  %v296_v3 = vld [vmem:[%s2295_s6 + $0xc8] sm:$0xf]  ;;  %v299_v5 = vld [vmem:[%s2295_s6 + $0xd4] sm:$0xf] }
  0x32   : > { %1960 = vmatprep.mubr.msk.bf16.mxu1 %vm387_vm2, %v1789_v59  ;;  %v527_v0 = vsel %vm2331_vm4, %v1786_v60, %v526_v61  ;;  %v300_v6 = vld [vmem:[%s2295_s6 + $0xd8] sm:$0xf]  ;;  %v1813_v7 = vrot.slane %v295_v2, 10  ;;  %v873_v8 = vrot.slane %v296_v3, 6  ;;  %v1814_v9 = vrot.slane %v299_v5, 10 }
  0x33   : > { %v1790_v4 = vcombine.low %v523_v62, %v527_v0  ;;  %v877_v10 = vrot.slane %v300_v6, 6  ;;  %v303_v12 = vld [vmem:[%s2295_s6 + $0xe4] sm:$0xf]  ;;  %v304_v13 = vld [vmem:[%s2295_s6 + $0xe8] sm:$0xf] }
  0x34   : > { %v874_v11 = vsel %vm2331_vm4, %v1813_v7, %v873_v8  ;;  %v307_v16 = vld [vmem:[%s2295_s6 + $0xf4] sm:$0xf]  ;;  %v308_v17 = vld [vmem:[%s2295_s6 + $0xf8] sm:$0xf]  ;;  %v1815_v18 = vrot.slane %v303_v12, 10  ;;  %v881_v19 = vrot.slane %v304_v13, 6 }
  0x35   : > { %v878_v14 = vsel %vm2331_vm4, %v1814_v9, %v877_v10  ;;  %v2115_v21 = vld [vmem:[%s2295_s6 + $0xe0] ss:$16 sps:$4 sm:$0xff]   ;;  %v1816_v22 = vrot.slane %v307_v16, 10  ;;  %v885_v23 = vrot.slane %v308_v17, 6  ;;  %v1117_v24 = vld [vmem:[%s2300_s9 + $0xc] sm:$0x3] }
  0x36   : > { %1971 = vmatmul.mubr.msk.bf16.gmra.mxu0 %vm387_vm2, %v2113_v63  ;;  %1961 = vmatmul.mubr.msk.bf16.gmra.mxu1 %vm387_vm2, %v1790_v4  ;;  %v1821_v20 = vcombine.low %v874_v11, %v878_v14  ;;  %v882_v25 = vsel %vm2331_vm4, %v1815_v18, %v881_v19  ;;  %v2116_v26 = vld [vmem:[%s2300_s9 + $0x8] ss:$0 sps:$4 sm:$0xcc]   ;;  %v1151_v27 = vsel %vm400_vm1, %v1117_v24, 0  ;;  %v2117_v29 = vld [vmem:[%s2295_s6 + $0x100] ss:$16 sps:$4 sm:$0xff]  }
  0x37   : > { %1976 = vmatprep.mubr.msk.bf16.mxu1 %vm387_vm2, %v2114_v1  ;;  %2043 = vmatprep.subr.msk.bf16.mxu0 %vm400_vm1, %v1117_v24  ;;  %v886_v28 = vsel %vm2331_vm4, %v1816_v22, %v885_v23  ;;  %v311_v30 = vld [vmem:[%s2295_s6 + $0x104] sm:$0xf]  ;;  %v1028_v32 = vrot.slane %v2116_v26, 2  ;;  %v312_v33 = vld [vmem:[%s2295_s6 + $0x108] sm:$0xf] }
  0x38   : > { %1986 = vmatprep.mubr.msk.bf16.mxu0 %vm387_vm2, %v1821_v20  ;;  %v1822_v31 = vcombine.low %v882_v25, %v886_v28  ;;  %v315_v34 = vld [vmem:[%s2295_s6 + $0x114] sm:$0xf]  ;;  %v1817_v35 = vrot.slane %v311_v30, 10  ;;  %v316_v36 = vld [vmem:[%s2295_s6 + $0x118] sm:$0xf]  ;;  %v889_v37 = vrot.slane %v312_v33, 6 }
  0x39   : > { %v1818_v38 = vrot.slane %v315_v34, 10  ;;  %2042 = vmatprep.subr.msk.bf16.mxu1 %vm400_vm1, %v1028_v32  ;;  %v1042_v39 = vsel %vm400_vm1, %v1028_v32, 0  ;;  %v893_v40 = vrot.slane %v316_v36, 6  ;;  %v319_v42 = vld [vmem:[%s2295_s6 + $0x124] sm:$0xf] }
  0x3a   : > { %v890_v41 = vsel %vm2331_vm4, %v1817_v35, %v889_v37  ;;  %v320_v43 = vld [vmem:[%s2295_s6 + $0x128] sm:$0xf]  ;;  %v323_v44 = vld [vmem:[%s2295_s6 + $0x134] sm:$0xf]  ;;  %v324_v46 = vld [vmem:[%s2295_s6 + $0x138] sm:$0xf] }
  0x3b   : > { %v894_v45 = vsel %vm2331_vm4, %v1818_v38, %v893_v40  ;;  %v1819_v47 = vrot.slane %v319_v42, 10  ;;  %v897_v48 = vrot.slane %v320_v43, 6  ;;  %v1820_v49 = vrot.slane %v323_v44, 10  ;;  %v2118_v52 = vld [vmem:[%s2295_s6 + $0x120] ss:$16 sps:$4 sm:$0xff]  }
  0x3c   : > { %v1823_v50 = vcombine.low %v890_v41, %v894_v45  ;;  %v901_v51 = vrot.slane %v324_v46, 6  ;;  %v2120_v55 = vld [vmem:[%s2295_s6 + $0x180] ss:$16 sps:$4 sm:$0xff]   ;;  %v2119_v57 = vld [vmem:[%s2295_s6 + $0xcc] ss:$16 sps:$4 sm:$0xff]  }
  0x3d   : > { %v898_v53 = vsel %vm2331_vm4, %v1819_v47, %v897_v48  ;;  %v1379_v58 = vld [vmem:[%s2300_s9 + $0x10] sm:$0x3]  ;;  %v2123_v59 = vld [vmem:[%s2300_s9 + $0xc] ss:$0 sps:$4 sm:$0xcc]  }
  0x3e   : > { %1987 = vmatmul.mubr.msk.bf16.vlgmr.msra.gmra.mxu0 %vm387_vm2, %v1822_v31  ;;  %1977 = vmatmul.mubr.msk.bf16.vlgmr.msra.gmra.mxu1 %vm387_vm2, %v2115_v21  ;;  %v902_v54 = vsel %vm2331_vm4, %v1820_v49, %v901_v51  ;;  %v1290_v60 = vrot.slane %v2123_v59, 2  ;;  %v2121_v61 = vld [vmem:[%s2295_s6 + $0xec] ss:$16 sps:$4 sm:$0xff]   ;;  %v2122_v62 = vld [vmem:[%s2295_s6 + $0x1a0] ss:$16 sps:$4 sm:$0xff]   ;;  %v1413_v1 = vsel %vm400_vm1, %v1379_v58, 0 }
  0x3f   : > { %2005 = vmatpush3.bf16.msra.mxu0 %v1151_v27  ;;  %1995 = vmatpush3.bf16.msra.mxu1 %v1042_v39  ;;  %v1824_v56 = vcombine.low %v898_v53, %v902_v54  ;;  %v2124_v63 = vld [vmem:[%s2295_s6 + $0x10c] ss:$16 sps:$4 sm:$0xff]   ;;  %v2125_v2 = vld [vmem:[%s2295_s6 + $0x1c0] ss:$16 sps:$4 sm:$0xff]   ;;  %v327_v3 = vld [vmem:[%s2295_s6 + $0x184] sm:$0xf] }
  0x40   : > { %1980 = vmatprep.mubr.msk.bf16.mxu1 %vm387_vm2, %v2117_v29  ;;  %1990 = vmatprep.mubr.msk.bf16.mxu0 %vm387_vm2, %v1823_v50  ;;  %v1304_v0 = vsel %vm400_vm1, %v1290_v60, 0  ;;  %v328_v4 = vld [vmem:[%s2295_s6 + $0x188] sm:$0xf]  ;;  %v331_v5 = vld [vmem:[%s2295_s6 + $0x194] sm:$0xf]  ;;  %v1846_v7 = vrot.slane %v327_v3, 10 }
  0x41   : > { %2045 = vmatprep.subr.msk.bf16.mxu0 %vm400_vm1, %v1379_v58  ;;  %2044 = vmatprep.subr.msk.bf16.mxu1 %vm400_vm1, %v1290_v60  ;;  %v332_v6 = vld [vmem:[%s2295_s6 + $0x198] sm:$0xf]  ;;  %v1244_v8 = vrot.slane %v328_v4, 6  ;;  %v1847_v9 = vrot.slane %v331_v5, 10  ;;  %v335_v11 = vld [vmem:[%s2295_s6 + $0x1a4] sm:$0xf] }
  0x42   : > { %v1248_v10 = vrot.slane %v332_v6, 6  ;;  %v2127_v12 = vld [vmem:[%s2295_s6 + $0x1e0] ss:$16 sps:$4 sm:$0xff]   ;;  %v336_v13 = vld [vmem:[%s2295_s6 + $0x1a8] sm:$0xf]  ;;  %v1848_v25 = vrot.slane %v335_v11, 10 }
  0x43   : > { %v2126_v14 = vld [vmem:[%s2295_s6 + $0x12c] ss:$16 sps:$4 sm:$0xff]   ;;  %v1245_v16 = vsel %vm2331_vm4, %v1846_v7, %v1244_v8  ;;  %v339_v19 = vld [vmem:[%s2295_s6 + $0x1b4] sm:$0xf]  ;;  %v340_v20 = vld [vmem:[%s2295_s6 + $0x1b8] sm:$0xf] }
  0x44   : > { %v1249_v17 = vsel %vm2331_vm4, %v1847_v9, %v1248_v10  ;;  %v2128_v18 = vld [vmem:[%s2295_s6 + $0x18c] ss:$16 sps:$4 sm:$0xff]   ;;  %v343_v21 = vld [vmem:[%s2295_s6 + $0x1c4] sm:$0xf]  ;;  %v344_v22 = vld [vmem:[%s2295_s6 + $0x1c8] sm:$0xf] }
  0x45   : > { %v347_v23 = vld [vmem:[%s2295_s6 + $0x1d4] sm:$0xf]  ;;  %v348_v24 = vld [vmem:[%s2295_s6 + $0x1d8] sm:$0xf]  ;;  %v1854_v26 = vcombine.low %v1245_v16, %v1249_v17  ;;  %v1252_v27 = vrot.slane %v336_v13, 6  ;;  %v1849_v28 = vrot.slane %v339_v19, 10 }
  0x46   : > { %1991 = vmatmul.mubr.msk.bf16.gmra.mxu0 %vm387_vm2, %v1824_v56  ;;  %1981 = vmatmul.mubr.msk.bf16.gmra.mxu1 %vm387_vm2, %v2118_v52  ;;  %v1256_v29 = vrot.slane %v340_v20, 6  ;;  %v1850_v30 = vrot.slane %v343_v21, 10  ;;  %v1260_v31 = vrot.slane %v344_v22, 6  ;;  %v1851_v32 = vrot.slane %v347_v23, 10  ;;  %v351_v36 = vld [vmem:[%s2295_s6 + $0x1e4] sm:$0xf] }
  0x47   : > { %2006 = vmatprep.mubr.msk.bf16.mxu0 %vm387_vm2, %v2120_v55  ;;  %1996 = vmatprep.mubr.msk.bf16.mxu1 %vm387_vm2, %v2119_v57  ;;  %v1264_v33 = vrot.slane %v348_v24, 6  ;;  %v1253_v34 = vsel %vm2331_vm4, %v1848_v25, %v1252_v27  ;;  %v352_v39 = vld [vmem:[%s2295_s6 + $0x1e8] sm:$0xf]  ;;  %v355_v40 = vld [vmem:[%s2295_s6 + $0x1f4] sm:$0xf]  ;;  %v1852_v45 = vrot.slane %v351_v36, 10 }
  0x48   : > { %v1257_v35 = vsel %vm2331_vm4, %v1849_v28, %v1256_v29  ;;  %v1261_v37 = vsel %vm2331_vm4, %v1850_v30, %v1260_v31  ;;  %v356_v41 = vld [vmem:[%s2295_s6 + $0x1f8] sm:$0xf]  ;;  %v2129_v42 = vld [vmem:[%s2295_s6 + $0x1ac] ss:$16 sps:$4 sm:$0xff]   ;;  %v1268_v47 = vrot.slane %v352_v39, 6  ;;  %v1853_v48 = vrot.slane %v355_v40, 10 }
  0x49   : > { %v1265_v38 = vsel %vm2331_vm4, %v1851_v32, %v1264_v33  ;;  %v1855_v43 = vcombine.low %v1253_v34, %v1257_v35  ;;  %v2130_v44 = vld [vmem:[%s2295_s6 + $0x1cc] ss:$16 sps:$4 sm:$0xff]   ;;  %v1272_v49 = vrot.slane %v356_v41, 6  ;;  %v360_v25 = vld [vmem:[#allocation2 + $0x10] sm:$0xff]  ;;  %v358_v28 = vld [vmem:[#allocation2] sm:$0xff] }
  0x4a   : > { %v1856_v46 = vcombine.low %v1261_v37, %v1265_v38  ;;  %v1269_v50 = vsel %vm2331_vm4, %v1852_v45, %v1268_v47  ;;  %v2131_v52 = vld [vmem:[%s2295_s6 + $0x1ec] ss:$16 sps:$4 sm:$0xff]  }
  0x4b   : > { %v1273_v51 = vsel %vm2331_vm4, %v1853_v48, %v1272_v49  ;;  %v361_v32 = vld [vmem:[#allocation2 + $0x18] sm:$0xff]  ;;  %v359_v37 = vld [vmem:[#allocation2 + $0x8] sm:$0xff] }
  0x4c   : > { %v1857_v53 = vcombine.low %v1269_v50, %v1273_v51  ;;  %v365_v51 = vld [vmem:[#allocation2 + $0x38] sm:$0xff] }
  0x4e   : > { %2007 = vmatmul.mubr.msk.bf16.vlgmr.msra.gmra.mxu0 %vm387_vm2, %v2122_v62  ;;  %1997 = vmatmul.mubr.msk.bf16.vlgmr.msra.gmra.mxu1 %vm387_vm2, %v2121_v61 }
  0x4f   : > { %2025 = vmatpush3.bf16.msra.mxu0 %v1413_v1  ;;  %2015 = vmatpush3.bf16.msra.mxu1 %v1304_v0 }
  0x50   : > { %2000 = vmatprep.mubr.msk.bf16.mxu1 %vm387_vm2, %v2124_v63  ;;  %2010 = vmatprep.mubr.msk.bf16.mxu0 %vm387_vm2, %v2125_v2 }
  0x56   : > { %2011 = vmatmul.mubr.msk.bf16.gmra.mxu0 %vm387_vm2, %v2127_v12  ;;  %2001 = vmatmul.mubr.msk.bf16.gmra.mxu1 %vm387_vm2, %v2126_v14 }
  0x57   : > { %2026 = vmatprep.mubr.msk.bf16.mxu0 %vm387_vm2, %v2128_v18  ;;  %2016 = vmatprep.mubr.msk.bf16.mxu1 %vm387_vm2, %v1854_v26 }
  0x5e   : > { %2027 = vmatmul.mubr.msk.bf16.vlgmr.msra.gmra.mxu0 %vm387_vm2, %v2129_v42  ;;  %2017 = vmatmul.mubr.msk.bf16.vlgmr.msra.gmra.mxu1 %vm387_vm2, %v1855_v43  ;;  %v364_v42 = vld [vmem:[#allocation2 + $0x30] sm:$0xff] }
  0x5f   : > { %2030 = vmatprep.mubr.msk.bf16.mxu0 %vm387_vm2, %v2130_v44  ;;  %2020 = vmatprep.mubr.msk.bf16.mxu1 %vm387_vm2, %v1856_v46  ;;  %v362_v44 = vld [vmem:[#allocation2 + $0x20] sm:$0xff] }
  0x66   : > { %2031 = vmatmul.mubr.msk.bf16.gmra.mxu0 %vm387_vm2, %v2131_v52  ;;  %2021 = vmatmul.mubr.msk.bf16.gmra.mxu1 %vm387_vm2, %v1857_v53 }
  0xe6   : > { %v1948_v54 = vpop.f32.mrf.mxu0  ;;  %v1952_v55 = vpop.f32.mrf.mxu1 }
  0xe7   : > { %v471_v30 = vadd.f32 %v1948_v54, %v360_v25  ;;  %v475_v50 = vadd.f32 %v1952_v55, %v364_v42 }
  0xe8   : > { %v438_v56 = vpop.f32.mrf.mxu0  ;;  %v2499_v57 = vpop.f32.mrf.mxu1 }
  0xe9   : > { %v469_v34 = vadd.f32 %v438_v56, %v358_v28 }
  0xea   : > { %v1949_v58 = vpop.f32.mrf.mxu0  ;;  %v2501_v59 = vpop.f32.mrf.mxu1 }
  0xeb   : > { %v472_v39 = vadd.f32 %v1949_v58, %v361_v32  ;;  %v363_v58 = vld [vmem:[#allocation2 + $0x28] sm:$0xff] }
  0xec   : > { %v441_v60 = vpop.f32.mrf.mxu0  ;;  %v2503_v61 = vpop.f32.mrf.mxu1 }
  0xed   : > { %v470_v45 = vadd.f32 %v441_v60, %v359_v37  ;;  %v476_v60 = vadd.f32 %v2501_v59, %v365_v51 }
  0xee   : > { %v1968_v62 = vpop.f32.mrf.mxu0  ;;  %v1958_v15 = vpop.f32.mrf.mxu1 }
  0xef   : > { %v627_v35 = vadd.f32 %v1958_v15, %v471_v30  ;;  %v473_v15 = vadd.f32 %v2499_v57, %v362_v44 }
  0xf0   : > { %v703_v63 = vpop.f32.mrf.mxu0  ;;  %v594_v0 = vpop.f32.mrf.mxu1 }
  0xf1   : > { %v625_v40 = vadd.f32 %v594_v0, %v469_v34  ;;  %v736_v46 = vadd.f32 %v1968_v62, %v627_v35 }
  0xf2   : > { %v1969_v1 = vpop.f32.mrf.mxu0  ;;  %v1959_v2 = vpop.f32.mrf.mxu1 }
  0xf3   : > { %v628_v47 = vadd.f32 %v1959_v2, %v472_v39  ;;  %v734_v52 = vadd.f32 %v703_v63, %v625_v40  ;;  %v474_v63 = vadd.f32 %v2503_v61, %v363_v58 }
  0xf4   : > { %v706_v3 = vpop.f32.mrf.mxu0  ;;  %v597_v4 = vpop.f32.mrf.mxu1 }
  0xf5   : > { %v626_v53 = vadd.f32 %v597_v4, %v470_v45  ;;  %v737_v0 = vadd.f32 %v1969_v1, %v628_v47 }
  0xf6   : > { %v2505_v5 = vpop.f32.mrf.mxu0  ;;  %v1962_v6 = vpop.f32.mrf.mxu1 }
  0xf7   : > { %v631_v28 = vadd.f32 %v1962_v6, %v475_v50  ;;  %v735_v34 = vadd.f32 %v706_v3, %v626_v53 }
  0xf8   : > { %v2507_v7 = vpop.f32.mrf.mxu0  ;;  %v610_v8 = vpop.f32.mrf.mxu1 }
  0xf9   : > { %v629_v62 = vadd.f32 %v610_v8, %v473_v15  ;;  %v740_v57 = vadd.f32 %v2505_v5, %v631_v28 }
  0xfa   : > { %v2509_v9 = vpop.f32.mrf.mxu0  ;;  %v1963_v10 = vpop.f32.mrf.mxu1 }
  0xfb   : > { %v632_v4 = vadd.f32 %v1963_v10, %v476_v60 }
  0xfc   : > { %v2511_v11 = vpop.f32.mrf.mxu0  ;;  %v2513_v12 = vpop.f32.mrf.mxu1 }
  0xfd   : > { %v630_v59 = vadd.f32 %v2513_v12, %v474_v63  ;;  %v741_v61 = vadd.f32 %v2509_v9, %v632_v4 }
  0xfe   : > { %v1988_v13 = vpop.f32.mrf.mxu0  ;;  %v1978_v14 = vpop.f32.mrf.mxu1 }
  0xff   : > { %v849_v54 = vadd.f32 %v1978_v14, %v736_v46  ;;  %v739_v45 = vadd.f32 %v2511_v11, %v630_v59 }
 0x100   : > { %v965_v16 = vpop.f32.mrf.mxu0  ;;  %v816_v17 = vpop.f32.mrf.mxu1 }
 0x101   : > { %v847_v30 = vadd.f32 %v816_v17, %v734_v52  ;;  %v998_v35 = vadd.f32 %v1988_v13, %v849_v54  ;;  %v738_v17 = vadd.f32 %v2507_v7, %v629_v62 }
 0x102   : > { %v2515_v18 = vpop.f32.mrf.mxu0  ;;  %v1979_v19 = vpop.f32.mrf.mxu1 }
 0x103   : > { %v850_v55 = vadd.f32 %v1979_v19, %v737_v0  ;;  %v996_v39 = vadd.f32 %v965_v16, %v847_v30 }
 0x104   : > { %v2517_v20 = vpop.f32.mrf.mxu0  ;;  %v819_v21 = vpop.f32.mrf.mxu1 }
 0x105   : > { %v848_v40 = vadd.f32 %v819_v21, %v735_v34  ;;  %v999_v3 = vadd.f32 %v2515_v18, %v850_v55 }
 0x106   : > { %v2519_v22 = vpop.f32.mrf.mxu0  ;;  %v1982_v23 = vpop.f32.mrf.mxu1 }
 0x107   : > { %v853_v13 = vadd.f32 %v1982_v23, %v740_v57  ;;  %v997_v5 = vadd.f32 %v2517_v20, %v848_v40 }
 0x108   : > { %v2521_v24 = vpop.f32.mrf.mxu0  ;;  %v832_v26 = vpop.f32.mrf.mxu1 }
 0x109   : > { %v851_v10 = vadd.f32 %v832_v26, %v738_v17  ;;  %v1002_v46 = vadd.f32 %v2519_v22, %v853_v13 }
 0x10a   : > { %v2523_v27 = vpop.f32.mrf.mxu0  ;;  %v2525_v29 = vpop.f32.mrf.mxu1 }
 0x10b   : > { %v854_v7 = vadd.f32 %v2525_v29, %v741_v61  ;;  %v1000_v9 = vadd.f32 %v2521_v24, %v851_v10 }
 0x10c   : > { %v2527_v31 = vpop.f32.mrf.mxu0  ;;  %v2529_v33 = vpop.f32.mrf.mxu1 }
 0x10d   : > { %v852_v26 = vadd.f32 %v2529_v33, %v739_v45  ;;  %v1003_v29 = vadd.f32 %v2523_v27, %v854_v7 }
 0x10e   : > { %v2008_v36 = vpop.f32.mrf.mxu0  ;;  %v1998_v38 = vpop.f32.mrf.mxu1 }
 0x10f   : > { %v1111_v1 = vadd.f32 %v1998_v38, %v998_v35  ;;  %v1001_v24 = vadd.f32 %v2527_v31, %v852_v26 }
 0x110   : > { %v1187_v41 = vpop.f32.mrf.mxu0  ;;  %v1078_v43 = vpop.f32.mrf.mxu1 }
 0x111   : > { %v1109_v19 = vadd.f32 %v1078_v43, %v996_v39  ;;  %v1220_v16 = vadd.f32 %v2008_v36, %v1111_v1 }
 0x112   : > { %v2009_v48 = vpop.f32.mrf.mxu0  ;;  %v1999_v49 = vpop.f32.mrf.mxu1 }
 0x113   : > { %v1112_v21 = vadd.f32 %v1999_v49, %v999_v3  ;;  %v1218_v18 = vadd.f32 %v1187_v41, %v1109_v19 }
 0x114   : > { %v1190_v56 = vpop.f32.mrf.mxu0  ;;  %v1081_v25 = vpop.f32.mrf.mxu1 }
 0x115   : > { %v1110_v23 = vadd.f32 %v1081_v25, %v997_v5  ;;  %v1221_v36 = vadd.f32 %v2009_v48, %v1112_v21 }
 0x116   : > { %v2012_v32 = vpop.f32.mrf.mxu0  ;;  %v2002_v2 = vpop.f32.mrf.mxu1 }
 0x117   : > { %v1115_v49 = vadd.f32 %v2002_v2, %v1002_v46  ;;  %v1219_v53 = vadd.f32 %v1190_v56, %v1110_v23 }
 0x118   : > { %v1203_v37 = vpop.f32.mrf.mxu0  ;;  %v1094_v14 = vpop.f32.mrf.mxu1 }
 0x119   : > { %v1113_v22 = vadd.f32 %v1094_v14, %v1000_v9  ;;  %v1224_v25 = vadd.f32 %v2012_v32, %v1115_v49 }
 0x11a   : > { %v2013_v6 = vpop.f32.mrf.mxu0  ;;  %v2003_v8 = vpop.f32.mrf.mxu1 }
 0x11b   : > { %v1116_v58 = vadd.f32 %v2003_v8, %v1003_v29  ;;  %v1222_v27 = vadd.f32 %v1203_v37, %v1113_v22 }
 0x11c   : > { %v1206_v42 = vpop.f32.mrf.mxu0  ;;  %v1097_v44 = vpop.f32.mrf.mxu1 }
 0x11d   : > { %v1114_v60 = vadd.f32 %v1097_v44, %v1001_v24  ;;  %v1225_v35 = vadd.f32 %v2013_v6, %v1116_v58 }
 0x11e   : > { %v2028_v38 = vpop.f32.mrf.mxu0  ;;  %v2018_v12 = vpop.f32.mrf.mxu1 }
 0x11f   : > { %v1373_v43 = vadd.f32 %v2018_v12, %v1220_v16  ;;  %v1223_v4 = vadd.f32 %v1206_v42, %v1114_v60 }
 0x120   : > { %v1449_v47 = vpop.f32.mrf.mxu0  ;;  %v1340_v20 = vpop.f32.mrf.mxu1 }
 0x121   : > { %v1482_v50 = vadd.f32 %v2028_v38, %v1373_v43  ;;  %v1371_v51 = vadd.f32 %v1340_v20, %v1218_v18 }
 0x122   : > { %v2029_v11 = vpop.f32.mrf.mxu0  ;;  %v2019_v52 = vpop.f32.mrf.mxu1 }
 0x123   : > { %1491 = vst.msk [vmem:[#allocation2 + $0x10] sm:$0xff] %vm1488_vm5, %v1482_v50  ;;  %v1480_v41 = vadd.f32 %v1449_v47, %v1371_v51  ;;  %v1374_v54 = vadd.f32 %v2019_v52, %v1221_v36 }
 0x124   : > { %v1452_v15 = vpop.f32.mrf.mxu0  ;;  %v1343_v33 = vpop.f32.mrf.mxu1 }
 0x125   : > { %1489 = vst.msk [vmem:[#allocation2] sm:$0xff] %vm1488_vm5, %v1480_v41  ;;  %v1483_v48 = vadd.f32 %v2029_v11, %v1374_v54  ;;  %v1372_v0 = vadd.f32 %v1343_v33, %v1219_v53 }
 0x126   : > { %v2032_v28 = vpop.f32.mrf.mxu0  ;;  %v2022_v30 = vpop.f32.mrf.mxu1 }
 0x127   : > { %1492 = vst.msk [vmem:[#allocation2 + $0x18] sm:$0xff] %vm1488_vm5, %v1483_v48  ;;  %v1481_v56 = vadd.f32 %v1452_v15, %v1372_v0  ;;  %v1377_v62 = vadd.f32 %v2022_v30, %v1224_v25 }
 0x128   : > { %v1465_v2 = vpop.f32.mrf.mxu0  ;;  %v1356_v34 = vpop.f32.mrf.mxu1 }
 0x129   : > { %1490 = vst.msk [vmem:[#allocation2 + $0x8] sm:$0xff] %vm1488_vm5, %v1481_v56  ;;  %v1486_v31 = vadd.f32 %v2032_v28, %v1377_v62  ;;  %v1375_v32 = vadd.f32 %v1356_v34, %v1222_v27 }
 0x12a   : > { %v2023_v55 = vpop.f32.mrf.mxu1  ;;  %v2033_v63 = vpop.f32.mrf.mxu0 }
 0x12b   : > { %1495 = vst.msk [vmem:[#allocation2 + $0x30] sm:$0xff] %vm1488_vm5, %v1486_v31  ;;  %v1484_v14 = vadd.f32 %v1465_v2, %v1375_v32  ;;  %v1378_v57 = vadd.f32 %v2023_v55, %v1225_v35 }
 0x12c   : > { %v1359_v37 = vpop.f32.mrf.mxu1  ;;  %v1468_v1 = vpop.f32.mrf.mxu0 }
 0x12d   : > { %1493 = vst.msk [vmem:[#allocation2 + $0x20] sm:$0xff] %vm1488_vm5, %v1484_v14  ;;  %v1487_v39 = vadd.f32 %v2033_v63, %v1378_v57  ;;  %v1376_v40 = vadd.f32 %v1359_v37, %v1223_v4  ;;  %1500 = sbr.rel (%p1871_p11) target bundleno = 362 (0x16a), region = 40 }
 0x12f   : > { %1496 = vst.msk [vmem:[#allocation2 + $0x38] sm:$0xff] %vm1488_vm5, %v1487_v39  ;;  %v1485_v6 = vadd.f32 %v1468_v1, %v1376_v40 }
 0x131   : > { %1494 = vst.msk [vmem:[#allocation2 + $0x28] sm:$0xff] %vm1488_vm5, %v1485_v6 }
 0x132   : > { %v1501_v17 = vld [vmem:[#allocation2] sm:$0xff]  ;;  %v1502_v8 = vld [vmem:[#allocation2 + $0x8] sm:$0xff]  ;;  %v1503_v19 = vld [vmem:[#allocation2 + $0x10] sm:$0xff]  ;;  %vm1636_vm6 = vcmask 60416  }
 0x133   : > { %v1872_v59 = vld [vmem:[%s2630_s2] ss:$0 sm:$0xff]  ;;  %v1504_v42 = vld [vmem:[#allocation2 + $0x18] sm:$0xff]  ;;  %v1507_v21 = vld [vmem:[#allocation2 + $0x30] sm:$0xff] }
 0x134   : > { %v2559_v3 = vadd.f32 %v1872_v59, %v1501_v17  ;;  %v2561_v13 = vadd.f32 %v1872_v59, %v1502_v8  ;;  %v1505_v61 = vld [vmem:[#allocation2 + $0x20] sm:$0xff]  ;;  %v2563_v10 = vadd.f32 %v1872_v59, %v1503_v19  ;;  %v2565_v44 = vadd.f32 %v1872_v59, %v1504_v42 }
 0x135   : > { %v2567_v5 = vadd.f32 %v1872_v59, %v1505_v61  ;;  %v2573_v46 = vadd.f32 %v1872_v59, %v1507_v21 }
 0x136   : > { %v1508_v38 = vld [vmem:[#allocation2 + $0x38] sm:$0xff]  ;;  %v1524_v45 = vmin.f32 %v2559_v3, 20.0  ;;  %v1525_v7 = vmin.f32 %v2561_v13, 20.0  ;;  %v1526_v18 = vmin.f32 %v2563_v10, 20.0  ;;  %v1527_v23 = vmin.f32 %v2565_v44, 20.0 }
 0x137   : > { %v1528_v43 = vmin.f32 %v2567_v5, 20.0  ;;  %v2578_v47 = vadd.f32 %v1872_v59, %v1508_v38  ;;  %v1530_v36 = vmin.f32 %v2573_v46, 20.0 }
 0x138   : > { %v1506_v16 = vld [vmem:[#allocation2 + $0x28] sm:$0xff]  ;;  %v1532_v9 = vmul.f32 1.442695, %v1524_v45  ;;  %v1534_v26 = vmul.f32 1.442695, %v1525_v7 }
 0x139   : > { %v2571_v12 = vadd.f32 %v1872_v59, %v1506_v16  ;;  %v1536_v49 = vmul.f32 1.442695, %v1526_v18  ;;  %v1538_v50 = vmul.f32 1.442695, %v1527_v23  ;;  %v1540_v51 = vmul.f32 1.442695, %v1528_v43 }
 0x13a   : > { %2132 = vpow2.f32 %v1532_v9  ;;  %v1531_v11 = vmin.f32 %v2578_v47, 20.0  ;;  %v1544_v52 = vmul.f32 1.442695, %v1530_v36 }
 0x13b   : > { %v1529_v20 = vmin.f32 %v2571_v12, 20.0  ;;  %2134 = vpow2.f32 %v1534_v26 }
 0x13c   : > { %2136 = vpow2.f32 %v1536_v49  ;;  %v1546_v53 = vmul.f32 1.442695, %v1531_v11 }
 0x13d   : > { %v1542_v29 = vmul.f32 1.442695, %v1529_v20  ;;  %2138 = vpow2.f32 %v1538_v50 }
 0x13e   : > { %2140 = vpow2.f32 %v1540_v51 }
 0x13f   : > { %2142 = vpow2.f32 %v1542_v29 }
 0x140   : > { %2144 = vpow2.f32 %v1544_v52 }
 0x141   : > { %2146 = vpow2.f32 %v1546_v53 }
 0x147   : > { %v2133_v22 = vpop.eup %2132 }
 0x148   : > { %v2135_v41 = vpop.eup %2134  ;;  %v1548_v54 = vadd.f32 1.0, %v2133_v22 }
 0x149   : > { %v2137_v15 = vpop.eup %2136  ;;  %v1549_v24 = vadd.f32 1.0, %v2135_v41 }
 0x14a   : > { %v2139_v33 = vpop.eup %2138  ;;  %v1556_v25 = vmul.f32 %v1548_v54, %v1548_v54  ;;  %v1550_v58 = vadd.f32 1.0, %v2137_v15 }
 0x14b   : > { %v2141_v48 = vpop.eup %2140  ;;  %v1557_v0 = vmul.f32 %v1549_v24, %v1549_v24  ;;  %v1551_v28 = vadd.f32 1.0, %v2139_v33 }
 0x14c   : > { %v2143_v30 = vpop.eup %2142  ;;  %v1572_v27 = vadd.f32 1.0, %v1556_v25  ;;  %v1558_v60 = vmul.f32 %v1550_v58, %v1550_v58  ;;  %v1552_v56 = vadd.f32 1.0, %v2141_v48  ;;  %v1873_v59 = vadd.f32 -1.0, %v1556_v25 }
 0x14d   : > { %v2145_v62 = vpop.eup %2144  ;;  %v1573_v2 = vadd.f32 1.0, %v1557_v0  ;;  %v1559_v34 = vmul.f32 %v1551_v28, %v1551_v28  ;;  %v1553_v35 = vadd.f32 1.0, %v2143_v30  ;;  %v1874_v8 = vadd.f32 -1.0, %v1557_v0 }
 0x14e   : > { %v2147_v31 = vpop.eup %2146  ;;  %2148 = vrcp.f32 %v1572_v27  ;;  %v1574_v32 = vadd.f32 1.0, %v1558_v60  ;;  %v1560_v55 = vmul.f32 %v1552_v56, %v1552_v56  ;;  %v1554_v57 = vadd.f32 1.0, %v2145_v62 }
 0x14f   : > { %2150 = vrcp.f32 %v1573_v2  ;;  %v1575_v63 = vadd.f32 1.0, %v1559_v34  ;;  %v1561_v4 = vmul.f32 %v1553_v35, %v1553_v35  ;;  %v1555_v39 = vadd.f32 1.0, %v2147_v31 }
 0x150   : > { %2152 = vrcp.f32 %v1574_v32  ;;  %v1576_v14 = vadd.f32 1.0, %v1560_v55  ;;  %v1562_v40 = vmul.f32 %v1554_v57, %v1554_v57  ;;  %v1875_v19 = vadd.f32 -1.0, %v1558_v60 }
 0x151   : > { %2154 = vrcp.f32 %v1575_v63  ;;  %v1577_v37 = vadd.f32 1.0, %v1561_v4  ;;  %v1563_v1 = vmul.f32 %v1555_v39, %v1555_v39  ;;  %v1876_v61 = vadd.f32 -1.0, %v1559_v34 }
 0x152   : > { %2156 = vrcp.f32 %v1576_v14  ;;  %v1578_v6 = vadd.f32 1.0, %v1562_v40  ;;  %v1877_v38 = vadd.f32 -1.0, %v1560_v55  ;;  %v1878_v18 = vadd.f32 -1.0, %v1561_v4 }
 0x153   : > { %2158 = vrcp.f32 %v1577_v37  ;;  %v1579_v17 = vadd.f32 1.0, %v1563_v1  ;;  %v1879_v29 = vadd.f32 -1.0, %v1562_v40 }
 0x154   : > { %2160 = vrcp.f32 %v1578_v6 }
 0x155   : > { %2162 = vrcp.f32 %v1579_v17 }
 0x15b   : > { %v2149_v42 = vpop.eup %2148 }
 0x15c   : > { %v2151_v16 = vpop.eup %2150  ;;  %v1581_v21 = vmul.f32 %v2149_v42, %v1873_v59 }
 0x15d   : > { %v2153_v45 = vpop.eup %2152  ;;  %v1583_v7 = vmul.f32 %v2151_v16, %v1874_v8 }
 0x15e   : > { %v2155_v23 = vpop.eup %2154  ;;  %v1596_v43 = vmul.f32 %v1581_v21, %v2559_v3  ;;  %v1585_v9 = vmul.f32 %v2153_v45, %v1875_v19  ;;  %v1880_v3 = vadd.f32 -1.0, %v1563_v1 }
 0x15f   : > { %v2157_v26 = vpop.eup %2156  ;;  %v1597_v20 = vmul.f32 %v1583_v7, %v2561_v13  ;;  %v1587_v36 = vmul.f32 %v2155_v23, %v1876_v61 }
 0x160   : > { %v2159_v49 = vpop.eup %2158  ;;  %v1891_v50 = vpack.c.bf16 %v1596_v43, %v1596_v43  ;;  %v1598_v51 = vmul.f32 %v1585_v9, %v2563_v10  ;;  %v1589_v11 = vmul.f32 %v2157_v26, %v1877_v38 }
 0x161   : > { %v1892_v52 = vpack.c.bf16 %v1597_v20, %v1597_v20  ;;  %v1599_v53 = vmul.f32 %v1587_v36, %v2565_v44  ;;  %v1591_v22 = vmul.f32 %v2159_v49, %v1878_v18  ;;  %v2161_v54 = vpop.eup %2160 }
 0x162   : > { %1637 = vst.msk [vmem:[%s2306_s24] sm:$0xf] %vm1636_vm6, %v1891_v50  ;;  %v1893_v41 = vpack.c.bf16 %v1598_v51, %v1598_v51  ;;  %v1600_v13 = vmul.f32 %v1589_v11, %v2567_v5  ;;  %v2163_v24 = vpop.eup %2162  ;;  %v1593_v33 = vmul.f32 %v2161_v54, %v1879_v29 }
 0x163   : > { %1638 = vst.msk [vmem:[%s2306_s24 + $0x4] sm:$0xf] %vm1636_vm6, %v1892_v52  ;;  %v1894_v10 = vpack.c.bf16 %v1599_v53, %v1599_v53  ;;  %v1601_v15 = vmul.f32 %v1591_v22, %v2571_v12  ;;  %v1595_v58 = vmul.f32 %v2163_v24, %v1880_v3 }
 0x164   : > { %1639 = vst.msk [vmem:[%s2306_s24 + $0x8] sm:$0xf] %vm1636_vm6, %v1893_v41  ;;  %v1895_v44 = vpack.c.bf16 %v1600_v13, %v1600_v13  ;;  %v1602_v5 = vmul.f32 %v1593_v33, %v2573_v46 }
 0x165   : > { %1640 = vst.msk [vmem:[%s2306_s24 + $0xc] sm:$0xf] %vm1636_vm6, %v1894_v10  ;;  %v1896_v25 = vpack.c.bf16 %v1601_v15, %v1601_v15  ;;  %v1603_v48 = vmul.f32 %v1595_v58, %v2578_v47 }
 0x166   : > { %1641 = vst.msk [vmem:[%s2306_s24 + $0x10] sm:$0xf] %vm1636_vm6, %v1895_v44  ;;  %v1897_v0 = vpack.c.bf16 %v1602_v5, %v1602_v5 }
 0x167   : > { %1642 = vst.msk [vmem:[%s2306_s24 + $0x14] sm:$0xf] %vm1636_vm6, %v1896_v25  ;;  %v1898_v28 = vpack.c.bf16 %v1603_v48, %v1603_v48 }
 0x168   : > { %1643 = vst.msk [vmem:[%s2306_s24 + $0x18] sm:$0xf] %vm1636_vm6, %v1897_v0 }
 0x169   : > { %1644 = vst.msk [vmem:[%s2306_s24 + $0x1c] sm:$0xf] %vm1636_vm6, %v1898_v28 }
 0x16a PF: > { %s13_s18 = sadd.s32 1, %s2218_s18   ;;  %s2635_s21 = sld [smem:[#allocation3_spill]] }
 0x16b   : > { %p10_p12 = scmp.ge.s32.totalorder %s13_s18, 50   ;;  %s2636_s12 = smov %s2206_s15 }
 0x16c   : > { %s2637_s13 = smov %s2210_s16  ;;  %s2638_s14 = smov %s2214_s17 }
 0x16d   : > { %s2639_s15 = smov %s2643_s19  ;;  %s2640_s16 = smov %s2647_s20 }
 0x16e   :  { %12 = sbr.rel (!%p10_p12) target bundleno = 4 (0x4), region = 73 }
 0x170   : > { %s2641_s17 = smov %s2635_s21 }

// kernel: assp_forward.6
= control target key start
LH: loop header
LB: loop body
LE: loop exit
PB: predicated region body
PF: predicated region fallthrough
CT: control target
= control target key end

     0   :  { %s2196_s12 = smov 0   ;;  %s2198_s13 = smov 0   ;;  %s2662_s0 = inlined_call_operand.vmem [shape: bf16[2,20,20,20,4], index: 0, kind: input, shape index: {}]   ;;  %s2663_s1 = inlined_call_operand.vmem [shape: bf16[3,36,8], index: 1, kind: input, shape index: {}]   ;;  %s2664_s2 = inlined_call_operand.vmem [shape: f32[1,8], index: 2, kind: input, shape index: {}]   ;;  %s2665_s3 = inlined_call_operand.vmem [shape: bf16[2,8,64,8], index: 3, kind: output, shape index: {}]  }
   0x1   :  { %s2200_s14 = smov 0   ;;  %s2202_s15 = smov 0  }
   0x2   :  { %s2204_s16 = smov 0   ;;  %s2206_s17 = smov 0  }
   0x3   :  { %s2208_s18 = smov 0  }
   0x4 LB: > { %s25_s19 = sadd.s32 1, %s2161_s15  ;;  %s28_s20 = sadd.s32 1, %s2165_s16  ;;  %s2173_s18 = sphi %s2208_s18, %s13_s18   ;;  %s2169_s17 = sphi %s2206_s17, %s2675_s17   ;;  %s2165_s16 = sphi %s2204_s16, %s2674_s16   ;;  %s2161_s15 = sphi %s2202_s15, %s2673_s15   ;;  %s2157_s14 = sphi %s2200_s14, %s2672_s14   ;;  %s2153_s13 = sphi %s2198_s13, %s2671_s13   ;;  %s2149_s12 = sphi %s2196_s12, %s2670_s12  }
   0x5   : > { %p26_p0 = scmp.ge.s32.totalorder %s25_s19, 3  ;;  %p1721_p1 = scmp.ge.s32.totalorder %s2173_s18, 1 }
   0x6   : > { %p182_p2 = scmp.lt.s32.totalorder %s2173_s18, 49  ;;  %s32_s21 = sadd.s32 1, %s2169_s17 }
   0x7   : > { %s2677_s19 = smov (%p26_p0, %s25_s19), 0  ;;  %s2679_s20 = smov (!%p26_p0, %s28_s20), %s2165_s16 }
   0x8   : > { %p183_p3 = pnand %p1721_p1, %p182_p2  ;;  %p30_p4 = scmp.ge.s32.totalorder %s2679_s20, 8 }
   0x9   : > { %s221_s22 = smul.u32 (!%p183_p3), 6, %s2149_s12  ;;  %p223_p6 = scmp.lt.s32.totalorder (!%p183_p3), %s2157_s14, 1 }
   0xa   : > { %s2681_s20 = smov (%p30_p4, %s2679_s20), 0  ;;  %s2683_s21 = smov (!%p30_p4, %s32_s21), %s2169_s17 }
   0xb   : > { %p34_p5 = scmp.ge.s32.totalorder %s2683_s21, 2  ;;  %186 = sbr.rel (%p183_p3) target bundleno = 367 (0x16f), region = 32 }
   0xc   : > { %s222_s23 = sadd.s32 (!%p183_p3), %s2153_s13, %s221_s22  ;;  %p234_p7 = scmp.lt.s32.totalorder (!%p183_p3), %s2149_s12, 2 }
   0xd   : > { %s2685_s21 = smov (%p34_p5, %s2683_s21), 0  ;;  %p225_p8 = scmp.lt.s32.totalorder (!%p183_p3), %s222_s23, 19 }
   0xe   : > { %p241_p9 = scmp.lt.s32.totalorder (!%p183_p3), %s2153_s13, 7  ;;  %p1727_p10 = scmp.ne.s32.totalorder (!%p183_p3), %s2149_s12, 0 }
  0x10   : > { %s2687_s14 = smov (!%p223_p6, %s2157_s14), 1  ;;  %s2689_s23 = smov (!%p225_p8, %s222_s23), 19 }
  0x11   : > { %s2014_s24 = smul.u32 1200, %s2687_s14  ;;  %s1725_s9 = sshll.u32 %s2687_s14, 6 }
  0x12   : > { %s235_s25 = scalar_select %p234_p7, %s2149_s12, 2 }
  0x13   : > { %s2013_s26 = smul.u32 60, %s2689_s23  ;;  %s2691_s13 = smov (!%p241_p9, %s2153_s13), 7 }
  0x14   : > { %s2015_s27 = smul.u32 20, %s235_s25  ;;  %s1724_s10 = sshll.u32 %s2691_s13, 3 }
  0x15   : > { %s229_s28 = sadd.s32 %s2014_s24, %s2013_s26  ;;  %s245_s11 = sadd.s32 %s1725_s9, %s1724_s10 }
  0x16   : > { %s1722_s29 = sshll.u32 %s229_s28, 2  ;;  %s2250_s5 = scalar_lea.vmem %s2663_s1, %s2015_s27 }
  0x17   : > { %s2255_s8 = scalar_lea.vmem %s2662_s0, %s1722_s29  ;;  %s1726_s22 = sshll.u32 %s245_s11, 2 }
  0x18   : > { %s2261_s24 = scalar_lea.vmem %s2665_s3, %s1726_s22  ;;  %252 = sbr.rel (%p1727_p10) target bundleno = 34 (0x22), region = 36 }
  0x1d   : > { %vm253_vm0 = vcmask 64512   ;;  %v2175_v0 = vmov 0.0  }
  0x1e   : > { %254 = vst.msk [vmem:[#allocation2] sm:$0xff] %vm253_vm0, %v2175_v0  ;;  %255 = vst.msk [vmem:[#allocation2 + $0x8] sm:$0xff] %vm253_vm0, %v2175_v0 }
  0x1f   : > { %256 = vst.msk [vmem:[#allocation2 + $0x10] sm:$0xff] %vm253_vm0, %v2175_v0  ;;  %257 = vst.msk [vmem:[#allocation2 + $0x18] sm:$0xff] %vm253_vm0, %v2175_v0 }
  0x20   : > { %258 = vst.msk [vmem:[#allocation2 + $0x20] sm:$0xff] %vm253_vm0, %v2175_v0  ;;  %259 = vst.msk [vmem:[#allocation2 + $0x28] sm:$0xff] %vm253_vm0, %v2175_v0 }
  0x21   : > { %260 = vst.msk [vmem:[#allocation2 + $0x30] sm:$0xff] %vm253_vm0, %v2175_v0  ;;  %261 = vst.msk [vmem:[#allocation2 + $0x38] sm:$0xff] %vm253_vm0, %v2175_v0 }
  0x22 PF: > { %v330_v1 = vld [vmem:[%s2250_s5] sm:$0x3]  ;;  %vm364_vm1 = vcmask 1041408   ;;  %vm351_vm2 = vcmask 31744   ;;  %v263_v4 = vld [vmem:[%s2255_s8 + $0x4] sm:$0xf] }
  0x23   : > { %v262_v2 = vld [vmem:[%s2255_s8] sm:$0xf]  ;;  %2003 = vmatprep.subr.msk.bf16.mxu0 %vm364_vm1, %v330_v1  ;;  %2004 = vmatprep.subr.msk.bf16.mxu1 %vm364_vm1, %v330_v1  ;;  %v366_v3 = vsel %vm364_vm1, %v330_v1, 0  ;;  %v265_v5 = vld [vmem:[%s2255_s8 + $0xc] sm:$0xf]  ;;  %vm449_vm3 = vcmask 1040384  }
  0x24   : > { %1912 = vmatpush3.bf16.msra.mxu0 %v366_v3  ;;  %2002 = vmatpush3.bf16.msra.mxu1 %v366_v3  ;;  %v2272_v6 = vld [vmem:[%s2255_s8 + $0x10] sm:$0xf]  ;;  %v1728_v7 = vcombine.low %v262_v2, %v265_v5  ;;  %vm450_vm4 = vcmask 1044484   ;;  %v1736_v8 = vrot.slane %v262_v2, 11  ;;  %v454_v9 = vrot.slane %v263_v4, 7  ;;  %p1838_p11 = scmp.ne.s32.totalorder %s2149_s12, 2 }
  0x25   : > { %vm2274_vm5 = vmor %vm449_vm3, %vm450_vm4  ;;  %v1737_v11 = vrot.slane %v265_v5, 11  ;;  %v458_v12 = vrot.slane %v2272_v6, 7  ;;  %v274_v13 = vld [vmem:[%s2255_s8 + $0x30] sm:$0xf]  ;;  %v2281_v14 = vld [vmem:[%s2255_s8 + $0x34] sm:$0xf] }
  0x26   : > { %1913 = vmatprep.mubr.msk.bf16.mxu0 %vm351_vm2, %v1728_v7  ;;  %v455_v15 = vsel %vm2274_vm5, %v1736_v8, %v454_v9  ;;  %v277_v16 = vld [vmem:[%s2255_s8 + $0x3c] sm:$0xf]  ;;  %v2288_v17 = vld [vmem:[%s2255_s8 + $0x40] sm:$0xf]  ;;  %v1740_v18 = vrot.slane %v274_v13, 11  ;;  %v470_v19 = vrot.slane %v2281_v14, 7 }
  0x27   : > { %v459_v20 = vsel %vm2274_vm5, %v1737_v11, %v458_v12  ;;  %v1730_v21 = vcombine.low %v274_v13, %v277_v16  ;;  %v1741_v22 = vrot.slane %v277_v16, 11  ;;  %v474_v23 = vrot.slane %v2288_v17, 7  ;;  %v268_v24 = vld [vmem:[%s2255_s8 + $0x18] sm:$0xf]  ;;  %v271_v25 = vld [vmem:[%s2255_s8 + $0x24] sm:$0xf] }
  0x28   : > { %v1729_v26 = vcombine.low %v268_v24, %v271_v25  ;;  %v1738_v27 = vrot.slane %v268_v24, 11  ;;  %v1739_v28 = vrot.slane %v271_v25, 11  ;;  %v2297_v29 = vld [vmem:[%s2255_s8 + $0x48] sm:$0xf]  ;;  %v2300_v30 = vld [vmem:[%s2255_s8 + $0x54] sm:$0xf]  ;;  %v2312_v35 = vsel %vm2274_vm5, %v1740_v18, %v470_v19 }
  0x29   : > { %1917 = vmatprep.mubr.msk.bf16.mxu1 %vm351_vm2, %v1730_v21  ;;  %v2305_v31 = vcombine.low %v2297_v29, %v2300_v30  ;;  %v1742_v32 = vrot.slane %v2297_v29, 11  ;;  %v1743_v33 = vrot.slane %v2300_v30, 11  ;;  %v632_v34 = vld [vmem:[%s2250_s5 + $0x4] sm:$0x3]  ;;  %v2316_v36 = vsel %vm2274_vm5, %v1741_v22, %v474_v23  ;;  %v264_v40 = vld [vmem:[%s2255_s8 + $0x8] sm:$0x3] }
  0x2a   : > { %1914 = vmatmul.mubr.msk.bf16.vlgmr.msra.gmra.mxu0 %vm351_vm2, %v1729_v26  ;;  %v2077_v37 = vld [vmem:[%s2250_s5] ss:$0 sps:$4 sm:$0xcc]   ;;  %2006 = vmatprep.subr.msk.bf16.mxu0 %vm364_vm1, %v632_v34  ;;  %v658_v38 = vsel %vm364_vm1, %v632_v34, 0  ;;  %v1744_v39 = vcombine.low %v455_v15, %v459_v20  ;;  %v267_v41 = vld [vmem:[%s2255_s8 + $0x14] sm:$0x3]  ;;  %v1746_v55 = vcombine.low %v2312_v35, %v2316_v36 }
  0x2b   : > { %1918 = vmatmul.mubr.msk.bf16.vlgmr.msra.gmra.mxu1 %vm351_vm2, %v2305_v31  ;;  %1932 = vmatpush3.bf16.msra.mxu0 %v658_v38  ;;  %vm598_vm6 = vcmask 1045508   ;;  %v1753_v42 = vrot.slane %v263_v4, 10  ;;  %v602_v43 = vrot.slane %v264_v40, 6  ;;  %v1754_v44 = vrot.slane %v2272_v6, 10  ;;  %v269_v48 = vld [vmem:[%s2255_s8 + $0x1c] sm:$0xf] }
  0x2c   : > { %v500_v45 = vrot.slane %v2077_v37, 2  ;;  %1923 = vmatprep.mubr.msk.bf16.mxu1 %vm351_vm2, %v1744_v39  ;;  %vm2329_vm7 = vmor %vm364_vm1, %vm598_vm6  ;;  %v606_v47 = vrot.slane %v267_v41, 6  ;;  %v272_v49 = vld [vmem:[%s2255_s8 + $0x28] sm:$0xf]  ;;  %v462_v51 = vrot.slane %v269_v48, 7  ;;  %v1755_v58 = vrot.slane %v269_v48, 10 }
  0x2d   : > { %v603_v50 = vsel %vm2329_vm7, %v1753_v42, %v602_v43  ;;  %v466_v52 = vrot.slane %v272_v49, 7  ;;  %v270_v53 = vld [vmem:[%s2255_s8 + $0x20] sm:$0x3]  ;;  %v273_v54 = vld [vmem:[%s2255_s8 + $0x2c] sm:$0x3]  ;;  %v1756_v63 = vrot.slane %v272_v49, 10 }
  0x2e   : > { %2005 = vmatprep.subr.msk.bf16.mxu1 %vm364_vm1, %v500_v45  ;;  %v514_v56 = vsel %vm364_vm1, %v500_v45, 0  ;;  %v607_v57 = vsel %vm2329_vm7, %v1754_v44, %v606_v47  ;;  %v610_v59 = vrot.slane %v270_v53, 6  ;;  %v463_v61 = vsel %vm2274_vm5, %v1738_v27, %v462_v51  ;;  %v2078_v0 = vld [vmem:[%s2250_s5 + $0x4] ss:$0 sps:$4 sm:$0xcc]  }
  0x2f   : > { %1922 = vmatpush3.bf16.msra.mxu1 %v514_v56  ;;  %v1761_v60 = vcombine.low %v603_v50, %v607_v57  ;;  %v467_v62 = vsel %vm2274_vm5, %v1739_v28, %v466_v52  ;;  %v868_v1 = vld [vmem:[%s2250_s5 + $0x8] sm:$0x3]  ;;  %v614_v4 = vrot.slane %v273_v54, 6  ;;  %v276_v6 = vld [vmem:[%s2255_s8 + $0x38] sm:$0x3]  ;;  %v752_v8 = vrot.slane %v2078_v0, 2 }
  0x30   : > { %v1745_v2 = vcombine.low %v463_v61, %v467_v62  ;;  %v611_v3 = vsel %vm2329_vm7, %v1755_v58, %v610_v59  ;;  %2008 = vmatprep.subr.msk.bf16.mxu0 %vm364_vm1, %v868_v1  ;;  %v888_v5 = vsel %vm364_vm1, %v868_v1, 0  ;;  %v279_v7 = vld [vmem:[%s2255_s8 + $0x44] sm:$0x3]  ;;  %v1757_v9 = vrot.slane %v2281_v14, 10  ;;  %v281_v13 = vld [vmem:[%s2255_s8 + $0x4c] sm:$0xf] }
  0x31   : > { %1933 = vmatprep.mubr.msk.bf16.mxu0 %vm351_vm2, %v1761_v60  ;;  %v618_v11 = vrot.slane %v276_v6, 6  ;;  %v1758_v12 = vrot.slane %v2288_v17, 10  ;;  %v615_v15 = vsel %vm2329_vm7, %v1756_v63, %v614_v4  ;;  %v622_v16 = vrot.slane %v279_v7, 6  ;;  %v284_v18 = vld [vmem:[%s2255_s8 + $0x58] sm:$0xf]  ;;  %2007 = vmatprep.subr.msk.bf16.mxu1 %vm364_vm1, %v752_v8 }
  0x32   : > { %v478_v19 = vrot.slane %v281_v13, 7  ;;  %v282_v20 = vld [vmem:[%s2255_s8 + $0x50] sm:$0x3]  ;;  %v1762_v21 = vcombine.low %v611_v3, %v615_v15  ;;  %v763_v14 = vsel %vm364_vm1, %v752_v8, 0  ;;  %v482_v22 = vrot.slane %v284_v18, 7 }
  0x33   : > { %1924 = vmatmul.mubr.msk.bf16.vlgmr.msra.gmra.mxu1 %vm351_vm2, %v1745_v2  ;;  %v619_v17 = vsel %vm2329_vm7, %v1757_v9, %v618_v11  ;;  %v285_v23 = vld [vmem:[%s2255_s8 + $0x5c] sm:$0x3]  ;;  %v286_v24 = vld [vmem:[%s2255_s8 + $0x60] sm:$0xf]  ;;  %v623_v25 = vsel %vm2329_vm7, %v1758_v12, %v622_v16  ;;  %v1759_v27 = vrot.slane %v281_v13, 10  ;;  %v626_v28 = vrot.slane %v282_v20, 6 }
  0x34   : > { %1942 = vmatpush3.bf16.msra.mxu1 %v763_v14  ;;  %1927 = vmatprep.mubr.msk.bf16.mxu1 %vm351_vm2, %v1746_v55  ;;  %v479_v26 = vsel %vm2274_vm5, %v1742_v32, %v478_v19  ;;  %v289_v34 = vld [vmem:[%s2255_s8 + $0x6c] sm:$0xf]  ;;  %v2381_v35 = vld [vmem:[%s2255_s8 + $0x64] sm:$0xf]  ;;  %v1763_v36 = vcombine.low %v619_v17, %v623_v25  ;;  %v483_v37 = vsel %vm2274_vm5, %v1743_v33, %v482_v22  ;;  %v1760_v38 = vrot.slane %v284_v18, 10 }
  0x35   : > { %1934 = vmatmul.mubr.msk.bf16.vlgmr.msra.gmra.mxu0 %vm351_vm2, %v1762_v21  ;;  %v630_v29 = vrot.slane %v285_v23, 6  ;;  %v2389_v39 = vld [vmem:[%s2255_s8 + $0x70] sm:$0xf]  ;;  %v627_v32 = vsel %vm2329_vm7, %v1759_v27, %v626_v28  ;;  %v2080_v40 = vld [vmem:[%s2250_s5 + $0x8] ss:$0 sps:$4 sm:$0xcc]   ;;  %v1747_v30 = vcombine.low %v479_v26, %v483_v37  ;;  %v1769_v63 = vcombine.low %v286_v24, %v289_v34 }
  0x36   : > { %1952 = vmatpush3.bf16.msra.mxu0 %v888_v5  ;;  %v1092_v41 = vld [vmem:[%s2250_s5 + $0xc] sm:$0x3]  ;;  %1937 = vmatprep.mubr.msk.bf16.mxu0 %vm351_vm2, %v1763_v36  ;;  %v1777_v33 = vrot.slane %v286_v24, 11  ;;  %v1778_v43 = vrot.slane %v289_v34, 11  ;;  %v1006_v44 = vrot.slane %v2080_v40, 2  ;;  %v846_v49 = vrot.slane %v2381_v35, 7 }
  0x37   : > { %v631_v42 = vsel %vm2329_vm7, %v1760_v38, %v630_v29  ;;  %2010 = vmatprep.subr.msk.bf16.mxu0 %vm364_vm1, %v1092_v41  ;;  %v292_v45 = vld [vmem:[%s2255_s8 + $0x78] sm:$0xf]  ;;  %v295_v47 = vld [vmem:[%s2255_s8 + $0x84] sm:$0xf]  ;;  %v850_v50 = vrot.slane %v2389_v39, 7  ;;  %v1118_v12 = vsel %vm364_vm1, %v1092_v41, 0 }
  0x38   : > { %v1764_v48 = vcombine.low %v627_v32, %v631_v42  ;;  %v2404_v51 = vld [vmem:[%s2255_s8 + $0x7c] sm:$0xf]  ;;  %v2407_v52 = vld [vmem:[%s2255_s8 + $0x88] sm:$0xf]  ;;  %2009 = vmatprep.subr.msk.bf16.mxu1 %vm364_vm1, %v1006_v44  ;;  %v1779_v53 = vrot.slane %v292_v45, 11  ;;  %v1780_v54 = vrot.slane %v295_v47, 11  ;;  %v847_v57 = vsel %vm2274_vm5, %v1777_v33, %v846_v49 }
  0x39   : > { %v854_v55 = vrot.slane %v2404_v51, 7  ;;  %v858_v56 = vrot.slane %v2407_v52, 7  ;;  %v851_v58 = vsel %vm2274_vm5, %v1778_v43, %v850_v50  ;;  %v298_v59 = vld [vmem:[%s2255_s8 + $0x90] sm:$0xf]  ;;  %v301_v60 = vld [vmem:[%s2255_s8 + $0x9c] sm:$0xf]  ;;  %v1770_v4 = vcombine.low %v292_v45, %v295_v47 }
  0x3a   : > { %v2424_v61 = vld [vmem:[%s2255_s8 + $0x94] sm:$0xf]  ;;  %v2427_v62 = vld [vmem:[%s2255_s8 + $0xa0] sm:$0xf]  ;;  %v1783_v2 = vcombine.low %v847_v57, %v851_v58  ;;  %v1017_v3 = vsel %vm364_vm1, %v1006_v44, 0  ;;  %v1781_v5 = vrot.slane %v298_v59, 11  ;;  %v1771_v14 = vcombine.low %v298_v59, %v301_v60 }
  0x3b   : > { %1928 = vmatmul.mubr.msk.bf16.gmra.mxu1 %vm351_vm2, %v1747_v30  ;;  %v859_v0 = vsel %vm2274_vm5, %v1780_v54, %v858_v56  ;;  %v2084_v1 = vld [vmem:[%s2250_s5 + $0xc] ss:$0 sps:$4 sm:$0xcc]   ;;  %v1782_v6 = vrot.slane %v301_v60, 11  ;;  %v862_v7 = vrot.slane %v2424_v61, 7  ;;  %v866_v8 = vrot.slane %v2427_v62, 7 }
  0x3c   : > { %1943 = vmatprep.mubr.msk.bf16.mxu1 %vm351_vm2, %v2305_v31  ;;  %v855_v31 = vsel %vm2274_vm5, %v1779_v53, %v854_v55  ;;  %v1236_v9 = vrot.slane %v2084_v1, 2  ;;  %v1352_v13 = vld [vmem:[%s2250_s5 + $0x10] sm:$0x3]  ;;  %v288_v18 = vld [vmem:[%s2255_s8 + $0x68] sm:$0x3]  ;;  %v1790_v17 = vrot.slane %v2381_v35, 10 }
  0x3d   : > { %1938 = vmatmul.mubr.msk.bf16.gmra.mxu0 %vm351_vm2, %v1764_v48  ;;  %v1784_v11 = vcombine.low %v855_v31, %v859_v0  ;;  %v863_v15 = vsel %vm2274_vm5, %v1781_v5, %v862_v7  ;;  %v867_v16 = vsel %vm2274_vm5, %v1782_v6, %v866_v8  ;;  %v291_v19 = vld [vmem:[%s2255_s8 + $0x74] sm:$0x3]  ;;  %v294_v20 = vld [vmem:[%s2255_s8 + $0x80] sm:$0x3]  ;;  %v297_v21 = vld [vmem:[%s2255_s8 + $0x8c] sm:$0x3] }
  0x3e   : > { %1953 = vmatprep.mubr.msk.bf16.mxu0 %vm351_vm2, %v1747_v30  ;;  %v2454_v22 = vcombine.low %v863_v15, %v867_v16  ;;  %v971_v23 = vrot.slane %v288_v18, 6  ;;  %v1791_v24 = vrot.slane %v2389_v39, 10  ;;  %v975_v25 = vrot.slane %v291_v19, 6  ;;  %v300_v29 = vld [vmem:[%s2255_s8 + $0x98] sm:$0x3] }
  0x3f   : > { %v1792_v26 = vrot.slane %v2404_v51, 10  ;;  %v979_v27 = vrot.slane %v294_v20, 6  ;;  %v1793_v28 = vrot.slane %v2407_v52, 10  ;;  %v983_v34 = vrot.slane %v297_v21, 6  ;;  %v303_v39 = vld [vmem:[%s2255_s8 + $0xa4] sm:$0x3] }
  0x40   : > { %v972_v35 = vsel %vm2329_vm7, %v1790_v17, %v971_v23  ;;  %v976_v36 = vsel %vm2329_vm7, %v1791_v24, %v975_v25  ;;  %v304_v32 = vld [vmem:[%s2255_s8 + $0xa8] sm:$0xf]  ;;  %v307_v40 = vld [vmem:[%s2255_s8 + $0xb4] sm:$0xf]  ;;  %v310_v30 = vld [vmem:[%s2255_s8 + $0xc0] sm:$0xf] }
  0x41   : > { %v980_v37 = vsel %vm2329_vm7, %v1792_v26, %v979_v27  ;;  %v984_v38 = vsel %vm2329_vm7, %v1793_v28, %v983_v34  ;;  %v1796_v41 = vcombine.low %v972_v35, %v976_v36  ;;  %v313_v42 = vld [vmem:[%s2255_s8 + $0xcc] sm:$0xf]  ;;  %v1794_v33 = vrot.slane %v2424_v61, 10  ;;  %v316_v55 = vld [vmem:[%s2255_s8 + $0xd8] sm:$0xf] }
  0x42   : > { %v1797_v43 = vcombine.low %v980_v37, %v984_v38  ;;  %v987_v44 = vrot.slane %v300_v29, 6  ;;  %v1795_v45 = vrot.slane %v2427_v62, 10  ;;  %v991_v47 = vrot.slane %v303_v39, 6  ;;  %v305_v56 = vld [vmem:[%s2255_s8 + $0xac] sm:$0xf] }
  0x43   : > { %1944 = vmatmul.mubr.msk.bf16.vlgmr.msra.gmra.mxu1 %vm351_vm2, %v1769_v63  ;;  %v1247_v49 = vsel %vm364_vm1, %v1236_v9, 0  ;;  %v1805_v50 = vcombine.low %v310_v30, %v313_v42  ;;  %v1372_v51 = vsel %vm364_vm1, %v1352_v13, 0  ;;  %v1811_v52 = vrot.slane %v304_v32, 11  ;;  %v308_v57 = vld [vmem:[%s2255_s8 + $0xb8] sm:$0xf] }
  0x44   : > { %1962 = vmatpush3.bf16.msra.mxu1 %v1017_v3  ;;  %1947 = vmatprep.mubr.msk.bf16.mxu1 %vm351_vm2, %v1770_v4  ;;  %v988_v53 = vsel %vm2329_vm7, %v1794_v33, %v987_v44  ;;  %v992_v54 = vsel %vm2329_vm7, %v1795_v45, %v991_v47  ;;  %v319_v58 = vld [vmem:[%s2255_s8 + $0xe4] sm:$0xf]  ;;  %v314_v60 = vld [vmem:[%s2255_s8 + $0xd0] sm:$0xf]  ;;  %v1812_v61 = vrot.slane %v307_v40, 11  ;;  %v1813_v62 = vrot.slane %v310_v30, 11 }
  0x45   : > { %1954 = vmatmul.mubr.msk.bf16.vlgmr.msra.gmra.mxu0 %vm351_vm2, %v1783_v2  ;;  %2011 = vmatprep.subr.msk.bf16.mxu1 %vm364_vm1, %v1236_v9  ;;  %v311_v59 = vld [vmem:[%s2255_s8 + $0xc4] sm:$0xf]  ;;  %v1798_v63 = vcombine.low %v988_v53, %v992_v54  ;;  %v306_v31 = vld [vmem:[%s2255_s8 + $0xb0] sm:$0x3]  ;;  %v309_v0 = vld [vmem:[%s2255_s8 + $0xbc] sm:$0x3]  ;;  %v1806_v6 = vcombine.low %v316_v55, %v319_v58 }
  0x46   : > { %1972 = vmatpush3.bf16.msra.mxu0 %v1118_v12  ;;  %1957 = vmatprep.mubr.msk.bf16.mxu0 %vm351_vm2, %v1784_v11  ;;  %v1201_v1 = vrot.slane %v305_v56, 7  ;;  %v1205_v2 = vrot.slane %v308_v57, 7  ;;  %v312_v3 = vld [vmem:[%s2255_s8 + $0xc8] sm:$0x3]  ;;  %v315_v4 = vld [vmem:[%s2255_s8 + $0xd4] sm:$0x3] }
  0x47   : > { %2012 = vmatprep.subr.msk.bf16.mxu0 %vm364_vm1, %v1352_v13  ;;  %v1814_v5 = vrot.slane %v313_v42, 11  ;;  %v1209_v7 = vrot.slane %v311_v59, 7  ;;  %v1213_v8 = vrot.slane %v314_v60, 7  ;;  %v1825_v9 = vrot.slane %v305_v56, 10  ;;  %v317_v23 = vld [vmem:[%s2255_s8 + $0xdc] sm:$0xf] }
  0x48   : > { %v1330_v11 = vrot.slane %v306_v31, 6  ;;  %v1826_v12 = vrot.slane %v308_v57, 10  ;;  %v1334_v13 = vrot.slane %v309_v0, 6  ;;  %v1827_v15 = vrot.slane %v311_v59, 10  ;;  %v320_v24 = vld [vmem:[%s2255_s8 + $0xe8] sm:$0xf] }
  0x49   : > { %v1338_v16 = vrot.slane %v312_v3, 6  ;;  %v1828_v18 = vrot.slane %v314_v60, 10  ;;  %v1342_v19 = vrot.slane %v315_v4, 6  ;;  %v1202_v20 = vsel %vm2274_vm5, %v1811_v52, %v1201_v1  ;;  %v318_v35 = vld [vmem:[%s2255_s8 + $0xe0] sm:$0x3] }
  0x4a   : > { %v1206_v21 = vsel %vm2274_vm5, %v1812_v61, %v1205_v2  ;;  %v1214_v17 = vsel %vm2274_vm5, %v1814_v5, %v1213_v8  ;;  %v1335_v25 = vsel %vm2329_vm7, %v1826_v12, %v1334_v13  ;;  %v1815_v26 = vrot.slane %v316_v55, 11  ;;  %v321_v36 = vld [vmem:[%s2255_s8 + $0xec] sm:$0x3] }
  0x4b   : > { %1948 = vmatmul.mubr.msk.bf16.gmra.mxu1 %vm351_vm2, %v1771_v14  ;;  %v1817_v27 = vcombine.low %v1202_v20, %v1206_v21  ;;  %v1339_v28 = vsel %vm2329_vm7, %v1827_v15, %v1338_v16  ;;  %v1343_v34 = vsel %vm2329_vm7, %v1828_v18, %v1342_v19  ;;  %v1816_v37 = vrot.slane %v319_v58, 11  ;;  %v324_v19 = vld [vmem:[#allocation2 + $0x10] sm:$0xff] }
  0x4c   : > { %1963 = vmatprep.mubr.msk.bf16.mxu1 %vm351_vm2, %v1764_v48  ;;  %v1804_v48 = vcombine.low %v304_v32, %v307_v40  ;;  %v1217_v29 = vrot.slane %v317_v23, 7  ;;  %v1221_v39 = vrot.slane %v320_v24, 7  ;;  %v1829_v40 = vrot.slane %v317_v23, 10 }
  0x4d   : > { %1958 = vmatmul.mubr.msk.bf16.gmra.mxu0 %vm351_vm2, %v2454_v22  ;;  %v1346_v30 = vrot.slane %v318_v35, 6  ;;  %v1830_v42 = vrot.slane %v320_v24, 10  ;;  %v1350_v33 = vrot.slane %v321_v36, 6  ;;  %vm1447_vm8 = vcmask 64512  }
  0x4e   : > { %1973 = vmatprep.mubr.msk.bf16.mxu0 %vm351_vm2, %v1771_v14  ;;  %v1210_v14 = vsel %vm2274_vm5, %v1813_v62, %v1209_v7  ;;  %v1222_v44 = vsel %vm2274_vm5, %v1816_v37, %v1221_v39 }
  0x4f   : > { %v1818_v38 = vcombine.low %v1210_v14, %v1214_v17  ;;  %v1347_v45 = vsel %vm2329_vm7, %v1829_v40, %v1346_v30  ;;  %v1351_v47 = vsel %vm2329_vm7, %v1830_v42, %v1350_v33  ;;  %v322_v14 = vld [vmem:[#allocation2] sm:$0xff] }
  0x50   : > { %v326_v40 = vld [vmem:[#allocation2 + $0x20] sm:$0xff] }
  0x53   : > { %1964 = vmatmul.mubr.msk.bf16.vlgmr.msra.gmra.mxu1 %vm351_vm2, %v1796_v41  ;;  %v1832_v41 = vcombine.low %v1339_v28, %v1343_v34  ;;  %v323_v34 = vld [vmem:[#allocation2 + $0x8] sm:$0xff] }
  0x54   : > { %1982 = vmatpush3.bf16.msra.mxu1 %v1247_v49  ;;  %1967 = vmatprep.mubr.msk.bf16.mxu1 %vm351_vm2, %v1797_v43  ;;  %v1218_v43 = vsel %vm2274_vm5, %v1815_v26, %v1217_v29  ;;  %v1833_v49 = vcombine.low %v1347_v45, %v1351_v47  ;;  %v328_v29 = vld [vmem:[#allocation2 + $0x30] sm:$0xff]  ;;  %v329_v45 = vld [vmem:[#allocation2 + $0x38] sm:$0xff] }
  0x55   : > { %1974 = vmatmul.mubr.msk.bf16.vlgmr.msra.gmra.mxu0 %vm351_vm2, %v1804_v48  ;;  %v1819_v48 = vcombine.low %v1218_v43, %v1222_v44 }
  0x56   : > { %1992 = vmatpush3.bf16.msra.mxu0 %v1372_v51  ;;  %1977 = vmatprep.mubr.msk.bf16.mxu0 %vm351_vm2, %v1805_v50 }
  0x5b   : > { %1968 = vmatmul.mubr.msk.bf16.gmra.mxu1 %vm351_vm2, %v1798_v63 }
  0x5c   : > { %1983 = vmatprep.mubr.msk.bf16.mxu1 %vm351_vm2, %v2454_v22  ;;  %v1331_v22 = vsel %vm2329_vm7, %v1825_v9, %v1330_v11 }
  0x5d   : > { %1978 = vmatmul.mubr.msk.bf16.gmra.mxu0 %vm351_vm2, %v1806_v6  ;;  %v1831_v32 = vcombine.low %v1331_v22, %v1335_v25  ;;  %v325_v22 = vld [vmem:[#allocation2 + $0x18] sm:$0xff] }
  0x5e   : > { %1993 = vmatprep.mubr.msk.bf16.mxu0 %vm351_vm2, %v1798_v63 }
  0x63   : > { %1984 = vmatmul.mubr.msk.bf16.vlgmr.msra.gmra.mxu1 %vm351_vm2, %v1817_v27 }
  0x64   : > { %1987 = vmatprep.mubr.msk.bf16.mxu1 %vm351_vm2, %v1818_v38 }
  0x65   : > { %1994 = vmatmul.mubr.msk.bf16.vlgmr.msra.gmra.mxu0 %vm351_vm2, %v1831_v32 }
  0x66   : > { %1997 = vmatprep.mubr.msk.bf16.mxu0 %vm351_vm2, %v1832_v41 }
  0x6b   : > { %1988 = vmatmul.mubr.msk.bf16.gmra.mxu1 %vm351_vm2, %v1819_v48 }
  0x6d   : > { %1998 = vmatmul.mubr.msk.bf16.gmra.mxu0 %vm351_vm2, %v1833_v49 }
  0xea   : > { %v1915_v50 = vpop.f32.mrf.mxu0 }
  0xeb   : > { %v1919_v51 = vpop.f32.mrf.mxu1  ;;  %v435_v24 = vadd.f32 %v1915_v50, %v324_v19  ;;  %v327_v19 = vld [vmem:[#allocation2 + $0x28] sm:$0xff] }
  0xec   : > { %v402_v10 = vpop.f32.mrf.mxu0  ;;  %v439_v44 = vadd.f32 %v1919_v51, %v328_v29 }
  0xed   : > { %v418_v52 = vpop.f32.mrf.mxu1  ;;  %v433_v27 = vadd.f32 %v402_v10, %v322_v14 }
  0xee   : > { %v1916_v53 = vpop.f32.mrf.mxu0  ;;  %v437_v50 = vadd.f32 %v418_v52, %v326_v40 }
  0xef   : > { %v2539_v54 = vpop.f32.mrf.mxu1  ;;  %v436_v37 = vadd.f32 %v1916_v53, %v325_v22 }
  0xf0   : > { %v405_v55 = vpop.f32.mrf.mxu0 }
  0xf1   : > { %v2541_v56 = vpop.f32.mrf.mxu1  ;;  %v434_v41 = vadd.f32 %v405_v55, %v323_v34 }
  0xf2   : > { %v438_v51 = vadd.f32 %v2541_v56, %v327_v19 }
  0xf3   : > { %v1925_v57 = vpop.f32.mrf.mxu1 }
  0xf4   : > { %v583_v28 = vadd.f32 %v1925_v57, %v435_v24  ;;  %v440_v24 = vadd.f32 %v2539_v54, %v329_v45 }
  0xf5   : > { %v1935_v58 = vpop.f32.mrf.mxu0  ;;  %v550_v46 = vpop.f32.mrf.mxu1 }
  0xf6   : > { %v581_v38 = vadd.f32 %v550_v46, %v433_v27  ;;  %v727_v30 = vadd.f32 %v1935_v58, %v583_v28 }
  0xf7   : > { %v694_v59 = vpop.f32.mrf.mxu0  ;;  %v1926_v60 = vpop.f32.mrf.mxu1 }
  0xf8   : > { %v584_v42 = vadd.f32 %v1926_v60, %v436_v37  ;;  %v725_v47 = vadd.f32 %v694_v59, %v581_v38 }
  0xf9   : > { %v1936_v61 = vpop.f32.mrf.mxu0  ;;  %v553_v62 = vpop.f32.mrf.mxu1 }
  0xfa   : > { %v582_v48 = vadd.f32 %v553_v62, %v434_v41  ;;  %v728_v53 = vadd.f32 %v1936_v61, %v584_v42 }
  0xfb   : > { %v697_v63 = vpop.f32.mrf.mxu0  ;;  %v1929_v31 = vpop.f32.mrf.mxu1 }
  0xfc   : > { %v587_v46 = vadd.f32 %v1929_v31, %v439_v44  ;;  %v726_v60 = vadd.f32 %v697_v63, %v582_v48 }
  0xfd   : > { %v2543_v0 = vpop.f32.mrf.mxu0  ;;  %v566_v1 = vpop.f32.mrf.mxu1 }
  0xfe   : > { %v585_v22 = vadd.f32 %v566_v1, %v437_v50  ;;  %v731_v52 = vadd.f32 %v2543_v0, %v587_v46 }
  0xff   : > { %v2545_v2 = vpop.f32.mrf.mxu0  ;;  %v1930_v3 = vpop.f32.mrf.mxu1 }
 0x100   : > { %v588_v59 = vadd.f32 %v1930_v3, %v440_v24  ;;  %v729_v31 = vadd.f32 %v2545_v2, %v585_v22 }
 0x101   : > { %v2547_v4 = vpop.f32.mrf.mxu0  ;;  %v2549_v5 = vpop.f32.mrf.mxu1 }
 0x102   : > { %v586_v54 = vadd.f32 %v2549_v5, %v438_v51 }
 0x103   : > { %v2551_v6 = vpop.f32.mrf.mxu0  ;;  %v1945_v7 = vpop.f32.mrf.mxu1 }
 0x104   : > { %v832_v49 = vadd.f32 %v1945_v7, %v727_v30 }
 0x105   : > { %v1955_v8 = vpop.f32.mrf.mxu0  ;;  %v799_v9 = vpop.f32.mrf.mxu1 }
 0x106   : > { %v830_v14 = vadd.f32 %v799_v9, %v725_v47  ;;  %v957_v27 = vadd.f32 %v1955_v8, %v832_v49 }
 0x107   : > { %v924_v11 = vpop.f32.mrf.mxu0  ;;  %v1946_v12 = vpop.f32.mrf.mxu1 }
 0x108   : > { %v833_v28 = vadd.f32 %v1946_v12, %v728_v53  ;;  %v955_v34 = vadd.f32 %v924_v11, %v830_v14  ;;  %v732_v12 = vadd.f32 %v2547_v4, %v588_v59 }
 0x109   : > { %v1956_v13 = vpop.f32.mrf.mxu0  ;;  %v802_v15 = vpop.f32.mrf.mxu1 }
 0x10a   : > { %v831_v37 = vadd.f32 %v802_v15, %v726_v60  ;;  %v958_v38 = vadd.f32 %v1956_v13, %v833_v28  ;;  %v730_v15 = vadd.f32 %v2551_v6, %v586_v54 }
 0x10b   : > { %v2553_v16 = vpop.f32.mrf.mxu0  ;;  %v1949_v18 = vpop.f32.mrf.mxu1 }
 0x10c   : > { %v836_v63 = vadd.f32 %v1949_v18, %v731_v52  ;;  %v956_v40 = vadd.f32 %v2553_v16, %v831_v37 }
 0x10d   : > { %v2555_v20 = vpop.f32.mrf.mxu0  ;;  %v815_v21 = vpop.f32.mrf.mxu1 }
 0x10e   : > { %v834_v56 = vadd.f32 %v815_v21, %v729_v31  ;;  %v961_v41 = vadd.f32 %v2555_v20, %v836_v63 }
 0x10f   : > { %v2557_v17 = vpop.f32.mrf.mxu0  ;;  %v2559_v23 = vpop.f32.mrf.mxu1 }
 0x110   : > { %v837_v2 = vadd.f32 %v2559_v23, %v732_v12  ;;  %v959_v4 = vadd.f32 %v2557_v17, %v834_v56 }
 0x111   : > { %v2561_v25 = vpop.f32.mrf.mxu0  ;;  %v2563_v26 = vpop.f32.mrf.mxu1 }
 0x112   : > { %v835_v21 = vadd.f32 %v2563_v26, %v730_v15  ;;  %v962_v23 = vadd.f32 %v2561_v25, %v837_v2 }
 0x113   : > { %v2565_v35 = vpop.f32.mrf.mxu0  ;;  %v1965_v36 = vpop.f32.mrf.mxu1 }
 0x114   : > { %v1086_v61 = vadd.f32 %v1965_v36, %v957_v27  ;;  %v960_v17 = vadd.f32 %v2565_v35, %v835_v21 }
 0x115   : > { %v1975_v39 = vpop.f32.mrf.mxu0  ;;  %v1053_v32 = vpop.f32.mrf.mxu1 }
 0x116   : > { %v1084_v8 = vadd.f32 %v1053_v32, %v955_v34  ;;  %v1187_v0 = vadd.f32 %v1975_v39, %v1086_v61 }
 0x117   : > { %v1154_v33 = vpop.f32.mrf.mxu0  ;;  %v1966_v43 = vpop.f32.mrf.mxu1 }
 0x118   : > { %v1087_v11 = vadd.f32 %v1966_v43, %v958_v38  ;;  %v1185_v13 = vadd.f32 %v1154_v33, %v1084_v8 }
 0x119   : > { %v1976_v10 = vpop.f32.mrf.mxu0  ;;  %v1056_v57 = vpop.f32.mrf.mxu1 }
 0x11a   : > { %v1085_v18 = vadd.f32 %v1056_v57, %v956_v40  ;;  %v1188_v39 = vadd.f32 %v1976_v10, %v1087_v11 }
 0x11b   : > { %v1157_v55 = vpop.f32.mrf.mxu0  ;;  %v1969_v58 = vpop.f32.mrf.mxu1 }
 0x11c   : > { %v1090_v42 = vadd.f32 %v1969_v58, %v961_v41  ;;  %v1186_v47 = vadd.f32 %v1157_v55, %v1085_v18 }
 0x11d   : > { %v1979_v62 = vpop.f32.mrf.mxu0  ;;  %v1069_v7 = vpop.f32.mrf.mxu1 }
 0x11e   : > { %v1088_v20 = vadd.f32 %v1069_v7, %v959_v4  ;;  %v1191_v50 = vadd.f32 %v1979_v62, %v1090_v42 }
 0x11f   : > { %v1170_v1 = vpop.f32.mrf.mxu0  ;;  %v1970_v9 = vpop.f32.mrf.mxu1 }
 0x120   : > { %v1091_v57 = vadd.f32 %v1970_v9, %v962_v23  ;;  %v1189_v46 = vadd.f32 %v1170_v1, %v1088_v20 }
 0x121   : > { %v1980_v3 = vpop.f32.mrf.mxu0  ;;  %v1072_v29 = vpop.f32.mrf.mxu1 }
 0x122   : > { %v1089_v14 = vadd.f32 %v1072_v29, %v960_v17  ;;  %v1192_v60 = vadd.f32 %v1980_v3, %v1091_v57 }
 0x123   : > { %v1173_v36 = vpop.f32.mrf.mxu0  ;;  %v1985_v5 = vpop.f32.mrf.mxu1 }
 0x124   : > { %v1316_v32 = vadd.f32 %v1985_v5, %v1187_v0  ;;  %v1190_v59 = vadd.f32 %v1173_v36, %v1089_v14 }
 0x125   : > { %v1995_v30 = vpop.f32.mrf.mxu0  ;;  %v1283_v16 = vpop.f32.mrf.mxu1 }
 0x126   : > { %v1441_v43 = vadd.f32 %v1995_v30, %v1316_v32  ;;  %v1314_v6 = vadd.f32 %v1283_v16, %v1185_v13 }
 0x127   : > { %v1408_v44 = vpop.f32.mrf.mxu0  ;;  %v1986_v45 = vpop.f32.mrf.mxu1 }
 0x128   : > { %1450 = vst.msk [vmem:[#allocation2 + $0x10] sm:$0xff] %vm1447_vm8, %v1441_v43  ;;  %v1439_v33 = vadd.f32 %v1408_v44, %v1314_v6  ;;  %v1317_v48 = vadd.f32 %v1986_v45, %v1188_v39 }
 0x129   : > { %v1996_v26 = vpop.f32.mrf.mxu0  ;;  %v1286_v49 = vpop.f32.mrf.mxu1 }
 0x12a   : > { %1448 = vst.msk [vmem:[#allocation2] sm:$0xff] %vm1447_vm8, %v1439_v33  ;;  %v1442_v10 = vadd.f32 %v1996_v26, %v1317_v48  ;;  %v1315_v19 = vadd.f32 %v1286_v49, %v1186_v47 }
 0x12b   : > { %v1411_v53 = vpop.f32.mrf.mxu0  ;;  %v1989_v25 = vpop.f32.mrf.mxu1 }
 0x12c   : > { %1451 = vst.msk [vmem:[#allocation2 + $0x18] sm:$0xff] %vm1447_vm8, %v1442_v10  ;;  %v1440_v24 = vadd.f32 %v1411_v53, %v1315_v19  ;;  %v1320_v22 = vadd.f32 %v1989_v25, %v1191_v50 }
 0x12d   : > { %v1999_v55 = vpop.f32.mrf.mxu0  ;;  %v1299_v58 = vpop.f32.mrf.mxu1 }
 0x12e   : > { %1449 = vst.msk [vmem:[#allocation2 + $0x8] sm:$0xff] %vm1447_vm8, %v1440_v24  ;;  %v1445_v35 = vadd.f32 %v1999_v55, %v1320_v22  ;;  %v1318_v27 = vadd.f32 %v1299_v58, %v1189_v46 }
 0x12f   : > { %v1424_v28 = vpop.f32.mrf.mxu0  ;;  %v1990_v51 = vpop.f32.mrf.mxu1 }
 0x130   : > { %1454 = vst.msk [vmem:[#allocation2 + $0x30] sm:$0xff] %vm1447_vm8, %v1445_v35  ;;  %v1443_v62 = vadd.f32 %v1424_v28, %v1318_v27  ;;  %v1321_v7 = vadd.f32 %v1990_v51, %v1192_v60 }
 0x131   : > { %v2000_v52 = vpop.f32.mrf.mxu0  ;;  %v1302_v34 = vpop.f32.mrf.mxu1 }
 0x132   : > { %1452 = vst.msk [vmem:[#allocation2 + $0x20] sm:$0xff] %vm1447_vm8, %v1443_v62  ;;  %v1446_v37 = vadd.f32 %v2000_v52, %v1321_v7  ;;  %v1319_v61 = vadd.f32 %v1302_v34, %v1190_v59  ;;  %1459 = sbr.rel (%p1838_p11) target bundleno = 367 (0x16f), region = 40 }
 0x133   : > { %v1427_v31 = vpop.f32.mrf.mxu0 }
 0x134   : > { %1455 = vst.msk [vmem:[#allocation2 + $0x38] sm:$0xff] %vm1447_vm8, %v1446_v37  ;;  %v1444_v54 = vadd.f32 %v1427_v31, %v1319_v61 }
 0x136   : > { %1453 = vst.msk [vmem:[#allocation2 + $0x28] sm:$0xff] %vm1447_vm8, %v1444_v54 }
 0x137   : > { %v1460_v1 = vld [vmem:[#allocation2] sm:$0xff]  ;;  %v1461_v38 = vld [vmem:[#allocation2 + $0x8] sm:$0xff]  ;;  %v1462_v12 = vld [vmem:[#allocation2 + $0x10] sm:$0xff]  ;;  %vm1595_vm9 = vcmask 60416  }
 0x138   : > { %v1839_v9 = vld [vmem:[%s2664_s2] ss:$0 sm:$0xff]  ;;  %v1463_v56 = vld [vmem:[#allocation2 + $0x18] sm:$0xff]  ;;  %v1466_v15 = vld [vmem:[#allocation2 + $0x30] sm:$0xff] }
 0x139   : > { %v2593_v63 = vadd.f32 %v1839_v9, %v1460_v1  ;;  %v2595_v8 = vadd.f32 %v1839_v9, %v1461_v38  ;;  %v1464_v3 = vld [vmem:[#allocation2 + $0x20] sm:$0xff]  ;;  %v2597_v29 = vadd.f32 %v1839_v9, %v1462_v12  ;;  %v2599_v40 = vadd.f32 %v1839_v9, %v1463_v56 }
 0x13a   : > { %v2601_v0 = vadd.f32 %v1839_v9, %v1464_v3  ;;  %v2607_v13 = vadd.f32 %v1839_v9, %v1466_v15 }
 0x13b   : > { %v1467_v2 = vld [vmem:[#allocation2 + $0x38] sm:$0xff]  ;;  %v1483_v36 = vmin.f32 %v2593_v63, 20.0  ;;  %v1484_v5 = vmin.f32 %v2595_v8, 20.0  ;;  %v1485_v18 = vmin.f32 %v2597_v29, 20.0  ;;  %v1486_v32 = vmin.f32 %v2599_v40, 20.0 }
 0x13c   : > { %v1487_v4 = vmin.f32 %v2601_v0, 20.0  ;;  %v2612_v21 = vadd.f32 %v1839_v9, %v1467_v2  ;;  %v1489_v42 = vmin.f32 %v2607_v13, 20.0 }
 0x13d   : > { %v1465_v11 = vld [vmem:[#allocation2 + $0x28] sm:$0xff]  ;;  %v1491_v30 = vmul.f32 1.442695, %v1483_v36  ;;  %v1493_v16 = vmul.f32 1.442695, %v1484_v5 }
 0x13e   : > { %v2605_v41 = vadd.f32 %v1839_v9, %v1465_v11  ;;  %v1495_v43 = vmul.f32 1.442695, %v1485_v18  ;;  %v1497_v6 = vmul.f32 1.442695, %v1486_v32  ;;  %v1499_v23 = vmul.f32 1.442695, %v1487_v4 }
 0x13f   : > { %2087 = vpow2.f32 %v1491_v30  ;;  %v1490_v44 = vmin.f32 %v2612_v21, 20.0  ;;  %v1503_v47 = vmul.f32 1.442695, %v1489_v42 }
 0x140   : > { %v1488_v39 = vmin.f32 %v2605_v41, 20.0  ;;  %2089 = vpow2.f32 %v1493_v16 }
 0x141   : > { %2091 = vpow2.f32 %v1495_v43  ;;  %v1505_v20 = vmul.f32 1.442695, %v1490_v44 }
 0x142   : > { %v1501_v45 = vmul.f32 1.442695, %v1488_v39  ;;  %2093 = vpow2.f32 %v1497_v6 }
 0x143   : > { %2095 = vpow2.f32 %v1499_v23 }
 0x144   : > { %2097 = vpow2.f32 %v1501_v45 }
 0x145   : > { %2099 = vpow2.f32 %v1503_v47 }
 0x146   : > { %2101 = vpow2.f32 %v1505_v20 }
 0x14c   : > { %v2088_v33 = vpop.eup %2087 }
 0x14d   : > { %v2090_v48 = vpop.eup %2089  ;;  %v1507_v17 = vadd.f32 1.0, %v2088_v33 }
 0x14e   : > { %v2092_v26 = vpop.eup %2091  ;;  %v1508_v49 = vadd.f32 1.0, %v2090_v48 }
 0x14f   : > { %v2094_v50 = vpop.eup %2093  ;;  %v1515_v57 = vmul.f32 %v1507_v17, %v1507_v17  ;;  %v1509_v10 = vadd.f32 1.0, %v2092_v26 }
 0x150   : > { %v2096_v19 = vpop.eup %2095  ;;  %v1516_v53 = vmul.f32 %v1508_v49, %v1508_v49  ;;  %v1510_v25 = vadd.f32 1.0, %v2094_v50 }
 0x151   : > { %v2098_v46 = vpop.eup %2097  ;;  %v1531_v14 = vadd.f32 1.0, %v1515_v57  ;;  %v1517_v24 = vmul.f32 %v1509_v10, %v1509_v10  ;;  %v1511_v22 = vadd.f32 1.0, %v2096_v19  ;;  %v1840_v9 = vadd.f32 -1.0, %v1515_v57 }
 0x152   : > { %v2100_v55 = vpop.eup %2099  ;;  %v1532_v58 = vadd.f32 1.0, %v1516_v53  ;;  %v1518_v60 = vmul.f32 %v1510_v25, %v1510_v25  ;;  %v1512_v35 = vadd.f32 1.0, %v2098_v46  ;;  %v1841_v38 = vadd.f32 -1.0, %v1516_v53 }
 0x153   : > { %v2102_v27 = vpop.eup %2101  ;;  %2103 = vrcp.f32 %v1531_v14  ;;  %v1533_v28 = vadd.f32 1.0, %v1517_v24  ;;  %v1519_v51 = vmul.f32 %v1511_v22, %v1511_v22  ;;  %v1513_v52 = vadd.f32 1.0, %v2100_v55 }
 0x154   : > { %2105 = vrcp.f32 %v1532_v58  ;;  %v1534_v59 = vadd.f32 1.0, %v1518_v60  ;;  %v1520_v62 = vmul.f32 %v1512_v35, %v1512_v35  ;;  %v1514_v37 = vadd.f32 1.0, %v2102_v27 }
 0x155   : > { %2107 = vrcp.f32 %v1533_v28  ;;  %v1535_v7 = vadd.f32 1.0, %v1519_v51  ;;  %v1521_v61 = vmul.f32 %v1513_v52, %v1513_v52  ;;  %v1842_v12 = vadd.f32 -1.0, %v1517_v24 }
 0x156   : > { %2109 = vrcp.f32 %v1534_v59  ;;  %v1536_v34 = vadd.f32 1.0, %v1520_v62  ;;  %v1522_v31 = vmul.f32 %v1514_v37, %v1514_v37  ;;  %v1843_v3 = vadd.f32 -1.0, %v1518_v60 }
 0x157   : > { %2111 = vrcp.f32 %v1535_v7  ;;  %v1537_v54 = vadd.f32 1.0, %v1521_v61  ;;  %v1844_v2 = vadd.f32 -1.0, %v1519_v51  ;;  %v1845_v18 = vadd.f32 -1.0, %v1520_v62 }
 0x158   : > { %2113 = vrcp.f32 %v1536_v34  ;;  %v1538_v1 = vadd.f32 1.0, %v1522_v31  ;;  %v1846_v45 = vadd.f32 -1.0, %v1521_v61 }
 0x159   : > { %2115 = vrcp.f32 %v1537_v54 }
 0x15a   : > { %2117 = vrcp.f32 %v1538_v1 }
 0x160   : > { %v2104_v56 = vpop.eup %2103 }
 0x161   : > { %v2106_v11 = vpop.eup %2105  ;;  %v1540_v15 = vmul.f32 %v2104_v56, %v1840_v9 }
 0x162   : > { %v2108_v36 = vpop.eup %2107  ;;  %v1542_v5 = vmul.f32 %v2106_v11, %v1841_v38 }
 0x163   : > { %v2110_v32 = vpop.eup %2109  ;;  %v1555_v4 = vmul.f32 %v1540_v15, %v2593_v63  ;;  %v1544_v30 = vmul.f32 %v2108_v36, %v1842_v12  ;;  %v1847_v63 = vadd.f32 -1.0, %v1522_v31 }
 0x164   : > { %v2112_v16 = vpop.eup %2111  ;;  %v1556_v39 = vmul.f32 %v1542_v5, %v2595_v8  ;;  %v1546_v42 = vmul.f32 %v2110_v32, %v1843_v3 }
 0x165   : > { %v2114_v43 = vpop.eup %2113  ;;  %v1858_v6 = vpack.c.bf16 %v1555_v4, %v1555_v4  ;;  %v1557_v23 = vmul.f32 %v1544_v30, %v2597_v29  ;;  %v1548_v44 = vmul.f32 %v2112_v16, %v1844_v2 }
 0x166   : > { %v1859_v47 = vpack.c.bf16 %v1556_v39, %v1556_v39  ;;  %v1558_v20 = vmul.f32 %v1546_v42, %v2599_v40  ;;  %v1550_v33 = vmul.f32 %v2114_v43, %v1845_v18  ;;  %v2116_v17 = vpop.eup %2115 }
 0x167   : > { %1596 = vst.msk [vmem:[%s2261_s24] sm:$0xf] %vm1595_vm9, %v1858_v6  ;;  %v1860_v48 = vpack.c.bf16 %v1557_v23, %v1557_v23  ;;  %v1559_v8 = vmul.f32 %v1548_v44, %v2601_v0  ;;  %v2118_v49 = vpop.eup %2117  ;;  %v1552_v50 = vmul.f32 %v2116_v17, %v1846_v45 }
 0x168   : > { %1597 = vst.msk [vmem:[%s2261_s24 + $0x4] sm:$0xf] %vm1595_vm9, %v1859_v47  ;;  %v1861_v29 = vpack.c.bf16 %v1558_v20, %v1558_v20  ;;  %v1560_v26 = vmul.f32 %v1550_v33, %v2605_v41  ;;  %v1554_v10 = vmul.f32 %v2118_v49, %v1847_v63 }
 0x169   : > { %1598 = vst.msk [vmem:[%s2261_s24 + $0x8] sm:$0xf] %vm1595_vm9, %v1860_v48  ;;  %v1862_v40 = vpack.c.bf16 %v1559_v8, %v1559_v8  ;;  %v1561_v0 = vmul.f32 %v1552_v50, %v2607_v13 }
 0x16a   : > { %1599 = vst.msk [vmem:[%s2261_s24 + $0xc] sm:$0xf] %vm1595_vm9, %v1861_v29  ;;  %v1863_v57 = vpack.c.bf16 %v1560_v26, %v1560_v26  ;;  %v1562_v19 = vmul.f32 %v1554_v10, %v2612_v21 }
 0x16b   : > { %1600 = vst.msk [vmem:[%s2261_s24 + $0x10] sm:$0xf] %vm1595_vm9, %v1862_v40  ;;  %v1864_v53 = vpack.c.bf16 %v1561_v0, %v1561_v0 }
 0x16c   : > { %1601 = vst.msk [vmem:[%s2261_s24 + $0x14] sm:$0xf] %vm1595_vm9, %v1863_v57  ;;  %v1865_v25 = vpack.c.bf16 %v1562_v19, %v1562_v19 }
 0x16d   : > { %1602 = vst.msk [vmem:[%s2261_s24 + $0x18] sm:$0xf] %vm1595_vm9, %v1864_v53 }
 0x16e   : > { %1603 = vst.msk [vmem:[%s2261_s24 + $0x1c] sm:$0xf] %vm1595_vm9, %v1865_v25 }
 0x16f PF: > { %s13_s18 = sadd.s32 1, %s2173_s18   ;;  %s2670_s12 = smov %s2161_s15 }
 0x170   : > { %p10_p12 = scmp.ge.s32.totalorder %s13_s18, 50   ;;  %s2671_s13 = smov %s2165_s16 }
 0x171   : > { %s2672_s14 = smov %s2169_s17  ;;  %s2673_s15 = smov %s2677_s19 }
 0x172   : > { %s2674_s16 = smov %s2681_s20  ;;  %s2675_s17 = smov %s2685_s21 }
 0x173   :  { %12 = sbr.rel (!%p10_p12) target bundleno = 4 (0x4), region = 73 }

// kernel: assp_forward.9
= control target key start
LH: loop header
LB: loop body
LE: loop exit
PB: predicated region body
PF: predicated region fallthrough
CT: control target
= control target key end

     0   :  { %s3622_s21 = smov 0   ;;  %s4605_s0 = inlined_call_operand.vmem [shape: bf16[1024,16], index: 0, kind: input, shape index: {}]   ;;  %s4606_s1 = inlined_call_operand.vmem [shape: bf16[1024,8], index: 1, kind: input, shape index: {}]   ;;  %s4607_s2 = inlined_call_operand.vmem [shape: bf16[1024,8], index: 2, kind: input, shape index: {}]   ;;  %s4608_s3 = inlined_call_operand.vmem [shape: bf16[1024,8], index: 3, kind: input, shape index: {}]   ;;  %s4609_s4 = inlined_call_operand.vmem [shape: bf16[40,8], index: 4, kind: input, shape index: {}]   ;;  %s4610_s5 = inlined_call_operand.vmem [shape: f32[1,8], index: 5, kind: input, shape index: {}]   ;;  %s4611_s6 = inlined_call_operand.vmem [shape: f32[1024,8], index: 6, kind: output, shape index: {}]  }
   0x1 LB: > { %s2819_s22 = sadd.s32 4294967295, %s3582_s21   ;;  %p2823_p0 = scmp.ge.s32.totalorder %s3582_s21, 1  ;;  %s3582_s21 = sphi %s3622_s21, %s16_s21  }
   0x2   : > { %p246_p1 = scmp.lt.s32.totalorder %s3582_s21, 3 }
   0x4   : > { %p247_p2 = pnand %p2823_p0, %p246_p1 }
   0x5   : > { %s2824_s23 = sshll.u32 (!%p247_p2), %s2819_s22, 6  ;;  %s3584_s30 = smov (!%p247_p2), 16  }
   0x6   : > { %250 = sbr.rel (%p247_p2) target bundleno = 574 (0x23e), region = 44  ;;  %p292_p3 = scmp.lt.s32.totalorder (!%p247_p2), %s2824_s23, 127 }
   0x7   : > { %s3585_s13 = smov (!%p247_p2), 24   ;;  %s3586_s14 = smov (!%p247_p2), 32  }
   0xb   : > { %s4613_s23 = smov (!%p292_p3, %s2824_s23), 127  ;;  %v3254_v0 = vld [vmem:[%s4609_s4 + $0x10] ss:$0 sps:$4 sm:$0xff]   ;;  %vm1729_vm0 = vcmask 1043456   ;;  %v3257_v38 = vld [vmem:[%s4609_s4 + $0x8] sm:$0xff]   ;;  %v3260_v40 = vld [vmem:[%s4609_s4] sm:$0xff]  }
   0xc   : > { %s3636_s26 = sshll.u32 %s4613_s23, 2  ;;  %3175 = vmatprep.subr.msk.bf16.mxu0 %vm1729_vm0, %v3254_v0  ;;  %3176 = vmatprep.subr.msk.bf16.mxu1 %vm1729_vm0, %v3254_v0  ;;  %v1731_v1 = vsel %vm1729_vm0, %v3254_v0, 0  ;;  %vm1410_vm1 = vcmask 130048   ;;  %vm1507_vm2 = vcmask 195584   ;;  %vm1572_vm3 = vcmask 261120  }
   0xd   : > { %s3642_s29 = scalar_lea.vmem %s4606_s1, %s3636_s26  ;;  %3100 = vmatpush3.bf16.msra.mxu0 %v1731_v1  ;;  %3172 = vmatpush3.bf16.msra.mxu1 %v1731_v1  ;;  %s3654_s9 = scalar_lea.vmem %s4607_s2, %s3636_s26  ;;  %vm1664_vm4 = vcmask 326656   ;;  %vm2662_vm5 = vcmask 64512  }
   0xe   : > { %v3188_v2 = vld [vmem:[%s3642_s29 + $0x8] sm:$0xff]   ;;  %v3189_v3 = vld [vmem:[%s3642_s29] sm:$0xff]   ;;  %s3664_s12 = scalar_lea.vmem %s4608_s3, %s3636_s26  ;;  %v3200_v14 = vld [vmem:[%s3642_s29 + $0x90] sm:$0xff]   ;;  %s3718_s17 = scalar_lea.vmem %s4605_s0, %s3636_s26  ;;  %3101 = vmatprep.subr.bf16.mxu0 %v3257_v38  ;;  %3170 = vmatprep.subr.bf16.mxu1 %v3257_v38 }
   0xf   : > { %900 = vrot.lane.b32.xlu1 %v3188_v2, %s3584_s30  ;;  %v3190_v4 = vld [vmem:[%s3642_s29 + $0x88] sm:$0xff]   ;;  %898 = vrot.lane.b32.xlu0 %v3189_v3, %s3584_s30  ;;  %v3191_v5 = vld [vmem:[%s3642_s29 + $0x80] sm:$0xff]   ;;  %s2833_s26 = sshll.u32 %s4613_s23, 3 }
  0x10   : > { %v3192_v6 = vld [vmem:[%s3654_s9 + $0x80] sm:$0xff]   ;;  %v3194_v8 = vld [vmem:[%s3654_s9 + $0x88] sm:$0xff]   ;;  %v3201_v15 = vld [vmem:[%s3642_s29 + $0x10] sm:$0xff]   ;;  %s4112_s28 = scalar_lea.vmem %s4611_s6, %s2833_s26 }
  0x11   : > { %v3193_v7 = vld [vmem:[%s3654_s9] sm:$0xff]   ;;  %v3195_v9 = vld [vmem:[%s3654_s9 + $0x8] sm:$0xff]   ;;  %v3202_v16 = vld [vmem:[%s3642_s29 + $0x98] sm:$0xff]   ;;  %3102 = vmatpush3.bf16.msra.mxu0 %v3257_v38  ;;  %3173 = vmatpush3.bf16.msra.mxu1 %v3257_v38 }
  0x12   : > { %v3196_v10 = vld [vmem:[%s3664_s12 + $0x80] sm:$0xff]   ;;  %v3198_v12 = vld [vmem:[%s3664_s12 + $0x88] sm:$0xff]   ;;  %v3203_v17 = vld [vmem:[%s3642_s29 + $0x18] sm:$0xff]   ;;  %3103 = vmatprep.subr.bf16.mxu0 %v3260_v40  ;;  %3171 = vmatprep.subr.bf16.mxu1 %v3260_v40 }
  0x13   : > { %932 = vrot.lane.b32.xlu1 %v3190_v4, %s3584_s30  ;;  %930 = vrot.lane.b32.xlu0 %v3191_v5, %s3584_s30  ;;  %v3197_v11 = vld [vmem:[%s3664_s12] sm:$0xff]   ;;  %v3199_v13 = vld [vmem:[%s3664_s12 + $0x8] sm:$0xff]  }
  0x14   : > { %v3204_v18 = vld [vmem:[%s3654_s9 + $0x90] sm:$0xff]   ;;  %v3206_v20 = vld [vmem:[%s3654_s9 + $0x98] sm:$0xff]   ;;  %v3212_v26 = vld [vmem:[%s3642_s29 + $0xa0] sm:$0xff]  }
  0x15   : > { %v3205_v19 = vld [vmem:[%s3654_s9 + $0x10] sm:$0xff]   ;;  %v3207_v21 = vld [vmem:[%s3654_s9 + $0x18] sm:$0xff]   ;;  %v3213_v27 = vld [vmem:[%s3642_s29 + $0x20] sm:$0xff]   ;;  %3104 = vmatpush3.bf16.msra.mxu0 %v3260_v40  ;;  %3174 = vmatpush3.bf16.msra.mxu1 %v3260_v40 }
  0x16   : > { %v3208_v22 = vld [vmem:[%s3664_s12 + $0x90] sm:$0xff]   ;;  %v3210_v24 = vld [vmem:[%s3664_s12 + $0x98] sm:$0xff]   ;;  %v3214_v28 = vld [vmem:[%s3642_s29 + $0xa8] sm:$0xff]  }
  0x17   : > { %1154 = vrot.lane.b32.xlu1 %v3192_v6, %s3585_s13  ;;  %1122 = vrot.lane.b32.xlu0 %v3193_v7, %s3585_s13  ;;  %v3209_v23 = vld [vmem:[%s3664_s12 + $0x10] sm:$0xff]   ;;  %v3211_v25 = vld [vmem:[%s3664_s12 + $0x18] sm:$0xff]  }
  0x18   : > { %v3215_v29 = vld [vmem:[%s3642_s29 + $0x28] sm:$0xff]   ;;  %v3216_v30 = vld [vmem:[%s3654_s9 + $0xa0] sm:$0xff]   ;;  %v3224_v39 = vld [vmem:[%s3642_s29 + $0xb0] sm:$0xff]  }
  0x19   : > { %v3217_v31 = vld [vmem:[%s3654_s9 + $0x20] sm:$0xff]   ;;  %v3218_v32 = vld [vmem:[%s3654_s9 + $0xa8] sm:$0xff]   ;;  %v3225_v41 = vld [vmem:[%s3642_s29 + $0x30] sm:$0xff]  }
  0x1a   : > { %v3219_v33 = vld [vmem:[%s3654_s9 + $0x28] sm:$0xff]   ;;  %v3220_v34 = vld [vmem:[%s3664_s12 + $0xa0] sm:$0xff]   ;;  %v3226_v42 = vld [vmem:[%s3642_s29 + $0xb8] sm:$0xff]  }
  0x1b   : > { %1156 = vrot.lane.b32.xlu1 %v3194_v8, %s3585_s13  ;;  %1124 = vrot.lane.b32.xlu0 %v3195_v9, %s3585_s13  ;;  %v3221_v35 = vld [vmem:[%s3664_s12 + $0x20] sm:$0xff]   ;;  %v3222_v36 = vld [vmem:[%s3664_s12 + $0xa8] sm:$0xff]  }
  0x1c   : > { %v3223_v37 = vld [vmem:[%s3664_s12 + $0x28] sm:$0xff]   ;;  %v3227_v43 = vld [vmem:[%s3642_s29 + $0x38] sm:$0xff]   ;;  %v3228_v44 = vld [vmem:[%s3654_s9 + $0xb0] sm:$0xff]  }
  0x1d   : > { %v3229_v45 = vld [vmem:[%s3654_s9 + $0x30] sm:$0xff]   ;;  %v3230_v46 = vld [vmem:[%s3654_s9 + $0xb8] sm:$0xff]   ;;  %v3236_v52 = vld [vmem:[%s3642_s29 + $0xc0] sm:$0xff]  }
  0x1e   : > { %v3231_v47 = vld [vmem:[%s3654_s9 + $0x38] sm:$0xff]   ;;  %v3232_v48 = vld [vmem:[%s3664_s12 + $0xb0] sm:$0xff]   ;;  %v3237_v53 = vld [vmem:[%s3642_s29 + $0x40] sm:$0xff]  }
  0x1f   : > { %1378 = vrot.lane.b32.xlu1 %v3196_v10, %s3586_s14  ;;  %1346 = vrot.lane.b32.xlu0 %v3197_v11, %s3586_s14  ;;  %v3233_v49 = vld [vmem:[%s3664_s12 + $0x30] sm:$0xff]   ;;  %v3234_v50 = vld [vmem:[%s3664_s12 + $0xb8] sm:$0xff]  }
  0x20   : > { %v3235_v51 = vld [vmem:[%s3664_s12 + $0x38] sm:$0xff]   ;;  %v3238_v54 = vld [vmem:[%s3642_s29 + $0xc8] sm:$0xff]   ;;  %v3240_v56 = vld [vmem:[%s3654_s9 + $0xc0] sm:$0xff]  }
  0x21   : > { %v3239_v55 = vld [vmem:[%s3642_s29 + $0x48] sm:$0xff]   ;;  %v3241_v57 = vld [vmem:[%s3654_s9 + $0x40] sm:$0xff]   ;;  %v3252_v2 = vld [vmem:[%s3642_s29 + $0xd0] sm:$0xff]  }
  0x22   : > { %v3242_v58 = vld [vmem:[%s3654_s9 + $0xc8] sm:$0xff]   ;;  %v3244_v60 = vld [vmem:[%s3664_s12 + $0xc0] sm:$0xff]   ;;  %v3253_v3 = vld [vmem:[%s3642_s29 + $0x50] sm:$0xff]  }
  0x23   : > { %1380 = vrot.lane.b32.xlu1 %v3198_v12, %s3586_s14  ;;  %1348 = vrot.lane.b32.xlu0 %v3199_v13, %s3586_s14  ;;  %v3243_v59 = vld [vmem:[%s3654_s9 + $0x48] sm:$0xff]   ;;  %v3245_v61 = vld [vmem:[%s3664_s12 + $0x40] sm:$0xff]  }
  0x24   : > { %v3248_v62 = vld [vmem:[%s3664_s12 + $0xc8] sm:$0xff]   ;;  %v3255_v5 = vld [vmem:[%s3642_s29 + $0xd8] sm:$0xff]   ;;  %v3258_v10 = vld [vmem:[%s3654_s9 + $0xd0] sm:$0xff]  }
  0x25   : > { %v3249_v63 = vld [vmem:[%s3664_s12 + $0x48] sm:$0xff]   ;;  %v3256_v7 = vld [vmem:[%s3642_s29 + $0x58] sm:$0xff]   ;;  %v3251_v11 = vld [vmem:[%s3718_s17 + $0x80] sm:$0xff]  }
  0x26   : > { %v3259_v12 = vld [vmem:[%s3654_s9 + $0x50] sm:$0xff]   ;;  %v3247_v13 = vld [vmem:[%s3718_s17] sm:$0xff]   ;;  %v3267_v38 = vld [vmem:[%s3664_s12 + $0xd8] sm:$0xff]  }
  0x27   : > { %934 = vrot.lane.b32.xlu1 %v3200_v14, %s3584_s30  ;;  %902 = vrot.lane.b32.xlu0 %v3201_v15, %s3584_s30 }
  0x2b   : > { %936 = vrot.lane.b32.xlu1 %v3202_v16, %s3584_s30  ;;  %904 = vrot.lane.b32.xlu0 %v3203_v17, %s3584_s30  ;;  %v3261_v16 = vld [vmem:[%s3654_s9 + $0xd8] sm:$0xff]   ;;  %v3250_v17 = vld [vmem:[%s3718_s17 + $0x88] sm:$0xff]  }
  0x2f   : > { %1158 = vrot.lane.b32.xlu1 %v3204_v18, %s3585_s13  ;;  %1126 = vrot.lane.b32.xlu0 %v3205_v19, %s3585_s13  ;;  %v3262_v19 = vld [vmem:[%s3654_s9 + $0x58] sm:$0xff]  }
  0x33   : > { %1160 = vrot.lane.b32.xlu1 %v3206_v20, %s3585_s13  ;;  %1128 = vrot.lane.b32.xlu0 %v3207_v21, %s3585_s13  ;;  %v3246_v20 = vld [vmem:[%s3718_s17 + $0x8] sm:$0xff]  }
  0x37   : > { %1382 = vrot.lane.b32.xlu1 %v3208_v22, %s3586_s14  ;;  %1350 = vrot.lane.b32.xlu0 %v3209_v23, %s3586_s14 }
  0x3b   : > { %1384 = vrot.lane.b32.xlu1 %v3210_v24, %s3586_s14  ;;  %1352 = vrot.lane.b32.xlu0 %v3211_v25, %s3586_s14 }
  0x3f   : > { %938 = vrot.lane.b32.xlu1 %v3212_v26, %s3584_s30  ;;  %906 = vrot.lane.b32.xlu0 %v3213_v27, %s3584_s30 }
  0x43   : > { %940 = vrot.lane.b32.xlu1 %v3214_v28, %s3584_s30  ;;  %908 = vrot.lane.b32.xlu0 %v3215_v29, %s3584_s30  ;;  %v3263_v28 = vld [vmem:[%s3664_s12 + $0xd0] sm:$0xff]  }
  0x47   : > { %1162 = vrot.lane.b32.xlu1 %v3216_v30, %s3585_s13  ;;  %1130 = vrot.lane.b32.xlu0 %v3217_v31, %s3585_s13  ;;  %v3264_v30 = vld [vmem:[%s3664_s12 + $0x50] sm:$0xff]  }
  0x4b   : > { %1164 = vrot.lane.b32.xlu1 %v3218_v32, %s3585_s13  ;;  %1132 = vrot.lane.b32.xlu0 %v3219_v33, %s3585_s13 }
  0x4f   : > { %1386 = vrot.lane.b32.xlu1 %v3220_v34, %s3586_s14  ;;  %1354 = vrot.lane.b32.xlu0 %v3221_v35, %s3586_s14 }
  0x53   : > { %1388 = vrot.lane.b32.xlu1 %v3222_v36, %s3586_s14  ;;  %1356 = vrot.lane.b32.xlu0 %v3223_v37, %s3586_s14 }
  0x57   : > { %942 = vrot.lane.b32.xlu1 %v3224_v39, %s3584_s30  ;;  %910 = vrot.lane.b32.xlu0 %v3225_v41, %s3584_s30  ;;  %v3268_v39 = vld [vmem:[%s3664_s12 + $0x58] sm:$0xff]  }
  0x5b   : > { %944 = vrot.lane.b32.xlu1 %v3226_v42, %s3584_s30  ;;  %912 = vrot.lane.b32.xlu0 %v3227_v43, %s3584_s30  ;;  %v3271_v42 = vld [vmem:[%s3642_s29 + $0xe0] sm:$0xff]  }
  0x5c   : > { %v3272_v43 = vld [vmem:[%s3642_s29 + $0x60] sm:$0xff]  }
  0x5f   : > { %1166 = vrot.lane.b32.xlu1 %v3228_v44, %s3585_s13  ;;  %1134 = vrot.lane.b32.xlu0 %v3229_v45, %s3585_s13 }
  0x63   : > { %1168 = vrot.lane.b32.xlu1 %v3230_v46, %s3585_s13  ;;  %1136 = vrot.lane.b32.xlu0 %v3231_v47, %s3585_s13  ;;  %v3273_v46 = vld [vmem:[%s3642_s29 + $0xe8] sm:$0xff]  }
  0x64   : > { %v3274_v47 = vld [vmem:[%s3642_s29 + $0x68] sm:$0xff]  }
  0x67   : > { %1390 = vrot.lane.b32.xlu1 %v3232_v48, %s3586_s14  ;;  %1358 = vrot.lane.b32.xlu0 %v3233_v49, %s3586_s14 }
  0x6b   : > { %1392 = vrot.lane.b32.xlu1 %v3234_v50, %s3586_s14  ;;  %1360 = vrot.lane.b32.xlu0 %v3235_v51, %s3586_s14  ;;  %v3275_v50 = vld [vmem:[%s3654_s9 + $0xe0] sm:$0xff]   ;;  %v3265_v51 = vld [vmem:[%s3718_s17 + $0x90] sm:$0xff]  }
  0x6f   : > { %946 = vrot.lane.b32.xlu1 %v3236_v52, %s3584_s30  ;;  %914 = vrot.lane.b32.xlu0 %v3237_v53, %s3584_s30  ;;  %v3276_v52 = vld [vmem:[%s3654_s9 + $0x60] sm:$0xff]   ;;  %v3266_v53 = vld [vmem:[%s3718_s17 + $0x10] sm:$0xff]  }
  0x73   : > { %948 = vrot.lane.b32.xlu1 %v3238_v54, %s3584_s30  ;;  %916 = vrot.lane.b32.xlu0 %v3239_v55, %s3584_s30 }
  0x77   : > { %1170 = vrot.lane.b32.xlu1 %v3240_v56, %s3585_s13  ;;  %1138 = vrot.lane.b32.xlu0 %v3241_v57, %s3585_s13  ;;  %v3277_v56 = vld [vmem:[%s3654_s9 + $0xe8] sm:$0xff]  }
  0x7b   : > { %1172 = vrot.lane.b32.xlu1 %v3242_v58, %s3585_s13  ;;  %1140 = vrot.lane.b32.xlu0 %v3243_v59, %s3585_s13  ;;  %v3269_v58 = vld [vmem:[%s3718_s17 + $0x98] sm:$0xff]   ;;  %v3278_v59 = vld [vmem:[%s3654_s9 + $0x68] sm:$0xff]  }
  0x7f   : > { %1394 = vrot.lane.b32.xlu1 %v3244_v60, %s3586_s14  ;;  %1362 = vrot.lane.b32.xlu0 %v3245_v61, %s3586_s14  ;;  %v3270_v61 = vld [vmem:[%s3718_s17 + $0x18] sm:$0xff]  }
  0x81   : > { %v901_v0 = vpop.permute.xlu1 %900  ;;  %v899_v1 = vpop.permute.xlu0 %898 }
  0x82   : > { %v1413_v21 = vsel %vm1410_vm1, %v3247_v13, %v899_v1  ;;  %v1416_v31 = vsel %vm1410_vm1, %v3246_v20, %v901_v0 }
  0x83   : > { %1396 = vrot.lane.b32.xlu1 %v3248_v62, %s3586_s14  ;;  %1364 = vrot.lane.b32.xlu0 %v3249_v63, %s3586_s14 }
  0x85   : > { %v933_v4 = vpop.permute.xlu1 %932  ;;  %v931_v6 = vpop.permute.xlu0 %930 }
  0x86   : > { %v1461_v18 = vsel %vm1410_vm1, %v3251_v11, %v931_v6  ;;  %v1464_v29 = vsel %vm1410_vm1, %v3250_v17, %v933_v4  ;;  %v3279_v4 = vld [vmem:[%s3664_s12 + $0xe0] sm:$0xff]  }
  0x87   : > { %950 = vrot.lane.b32.xlu1 %v3252_v2, %s3584_s30  ;;  %918 = vrot.lane.b32.xlu0 %v3253_v3, %s3584_s30  ;;  %v3280_v6 = vld [vmem:[%s3664_s12 + $0x60] sm:$0xff]  }
  0x89   : > { %v1155_v8 = vpop.permute.xlu1 %1154  ;;  %v1123_v9 = vpop.permute.xlu0 %1122 }
  0x8a   : > { %v1541_v22 = vsel %vm1507_vm2, %v1461_v18, %v1155_v8  ;;  %v1509_v24 = vsel %vm1507_vm2, %v1413_v21, %v1123_v9  ;;  %v3287_v18 = vld [vmem:[%s3642_s29 + $0xf0] sm:$0xff]  }
  0x8b   : > { %952 = vrot.lane.b32.xlu1 %v3255_v5, %s3584_s30  ;;  %920 = vrot.lane.b32.xlu0 %v3256_v7, %s3584_s30 }
  0x8d   : > { %v1157_v14 = vpop.permute.xlu1 %1156  ;;  %v1125_v15 = vpop.permute.xlu0 %1124 }
  0x8e   : > { %v1543_v32 = vsel %vm1507_vm2, %v1464_v29, %v1157_v14  ;;  %v1511_v34 = vsel %vm1507_vm2, %v1416_v31, %v1125_v15  ;;  %v3283_v14 = vld [vmem:[%s3664_s12 + $0xe8] sm:$0xff]   ;;  %v3282_v29 = vld [vmem:[%s3718_s17 + $0x20] sm:$0xff]  }
  0x8f   : > { %1174 = vrot.lane.b32.xlu1 %v3258_v10, %s3585_s13  ;;  %1142 = vrot.lane.b32.xlu0 %v3259_v12, %s3585_s13  ;;  %v3284_v15 = vld [vmem:[%s3664_s12 + $0x68] sm:$0xff]  }
  0x91   : > { %v1379_v23 = vpop.permute.xlu1 %1378  ;;  %v1347_v25 = vpop.permute.xlu0 %1346 }
  0x92   : > { %v1606_v26 = vsel %vm1572_vm3, %v1541_v22, %v1379_v23  ;;  %v1574_v27 = vsel %vm1572_vm3, %v1509_v24, %v1347_v25  ;;  %v3289_v22 = vld [vmem:[%s3642_s29 + $0xf8] sm:$0xff]  }
  0x93   : > { %1176 = vrot.lane.b32.xlu1 %v3261_v16, %s3585_s13  ;;  %3137 = vmatprep.mubr.msk.bf16.mxu1 %vm1664_vm4, %v1606_v26  ;;  %v3290_v23 = vld [vmem:[%s3642_s29 + $0x78] sm:$0xff]   ;;  %v3291_v26 = vld [vmem:[%s3654_s9 + $0xf0] sm:$0xff]  }
  0x94   : > { %1144 = vrot.lane.b32.xlu0 %v3262_v19, %s3585_s13  ;;  %3105 = vmatprep.mubr.msk.bf16.mxu0 %vm1664_vm4, %v1574_v27  ;;  %v3288_v19 = vld [vmem:[%s3642_s29 + $0x70] sm:$0xff]   ;;  %v3281_v27 = vld [vmem:[%s3718_s17 + $0xa0] sm:$0xff]  }
  0x95   : > { %v1381_v33 = vpop.permute.xlu1 %1380  ;;  %v1349_v36 = vpop.permute.xlu0 %1348 }
  0x96   : > { %v1608_v35 = vsel %vm1572_vm3, %v1543_v32, %v1381_v33  ;;  %v1576_v37 = vsel %vm1572_vm3, %v1511_v34, %v1349_v36  ;;  %v3293_v32 = vld [vmem:[%s3654_s9 + $0xf8] sm:$0xff]   ;;  %v3285_v34 = vld [vmem:[%s3718_s17 + $0xa8] sm:$0xff]  }
  0x97   : > { %1398 = vrot.lane.b32.xlu1 %v3263_v28, %s3586_s14  ;;  %3138 = vmatmul.mubr.msk.bf16.vlgmr.msra.gmra.mxu1 %vm1664_vm4, %v1608_v35  ;;  %v3292_v28 = vld [vmem:[%s3654_s9 + $0x70] sm:$0xff]   ;;  %v3294_v35 = vld [vmem:[%s3654_s9 + $0x78] sm:$0xff]  }
  0x98   : > { %1366 = vrot.lane.b32.xlu0 %v3264_v30, %s3586_s14  ;;  %3106 = vmatmul.mubr.msk.bf16.vlgmr.msra.gmra.mxu0 %vm1664_vm4, %v1576_v37  ;;  %v3286_v37 = vld [vmem:[%s3718_s17 + $0x28] sm:$0xff]  }
  0x99   : > { %v935_v40 = vpop.permute.xlu1 %934  ;;  %v903_v41 = vpop.permute.xlu0 %902 }
  0x9a   : > { %v1467_v57 = vsel %vm1410_vm1, %v3265_v51, %v935_v40  ;;  %v1419_v60 = vsel %vm1410_vm1, %v3266_v53, %v903_v41 }
  0x9b   : > { %1400 = vrot.lane.b32.xlu1 %v3267_v38, %s3586_s14 }
  0x9c   : > { %1368 = vrot.lane.b32.xlu0 %v3268_v39, %s3586_s14 }
  0x9d   : > { %v937_v44 = vpop.permute.xlu1 %936  ;;  %v905_v45 = vpop.permute.xlu0 %904 }
  0x9e   : > { %v1470_v5 = vsel %vm1410_vm1, %v3269_v58, %v937_v44  ;;  %v1422_v7 = vsel %vm1410_vm1, %v3270_v61, %v905_v45  ;;  %v3295_v44 = vld [vmem:[%s3664_s12 + $0xf0] sm:$0xff]  }
  0x9f   : > { %954 = vrot.lane.b32.xlu1 %v3271_v42, %s3584_s30 }
  0xa0   : > { %922 = vrot.lane.b32.xlu0 %v3272_v43, %s3584_s30 }
  0xa1   : > { %v1159_v48 = vpop.permute.xlu1 %1158  ;;  %v1127_v49 = vpop.permute.xlu0 %1126 }
  0xa2   : > { %v1545_v62 = vsel %vm1507_vm2, %v1467_v57, %v1159_v48  ;;  %v1513_v0 = vsel %vm1507_vm2, %v1419_v60, %v1127_v49 }
  0xa3   : > { %956 = vrot.lane.b32.xlu1 %v3273_v46, %s3584_s30  ;;  %v3296_v46 = vld [vmem:[%s3664_s12 + $0x70] sm:$0xff]  }
  0xa4   : > { %924 = vrot.lane.b32.xlu0 %v3274_v47, %s3584_s30 }
  0xa5   : > { %v1161_v54 = vpop.permute.xlu1 %1160  ;;  %v1129_v55 = vpop.permute.xlu0 %1128 }
  0xa6   : > { %v1547_v8 = vsel %vm1507_vm2, %v1470_v5, %v1161_v54  ;;  %v1515_v10 = vsel %vm1507_vm2, %v1422_v7, %v1129_v55  ;;  %v3299_v54 = vld [vmem:[%s3664_s12 + $0xf8] sm:$0xff]  }
  0xa7   : > { %1178 = vrot.lane.b32.xlu1 %v3275_v50, %s3585_s13  ;;  %v3300_v55 = vld [vmem:[%s3664_s12 + $0x78] sm:$0xff]  }
  0xa8   : > { %1146 = vrot.lane.b32.xlu0 %v3276_v52, %s3585_s13  ;;  %v3302_v5 = vld [vmem:[%s3718_s17 + $0x38] sm:$0xff]  }
  0xa9   : > { %v1383_v63 = vpop.permute.xlu1 %1382  ;;  %v1351_v2 = vpop.permute.xlu0 %1350 }
  0xaa   : > { %v1610_v1 = vsel %vm1572_vm3, %v1545_v62, %v1383_v63  ;;  %v1578_v3 = vsel %vm1572_vm3, %v1513_v0, %v1351_v2  ;;  %v3297_v62 = vld [vmem:[%s3718_s17 + $0xb0] sm:$0xff]  }
  0xab   : > { %1180 = vrot.lane.b32.xlu1 %v3277_v56, %s3585_s13  ;;  %3141 = vmatprep.mubr.msk.bf16.mxu1 %vm1664_vm4, %v1610_v1  ;;  %v3298_v63 = vld [vmem:[%s3718_s17 + $0x30] sm:$0xff]  }
  0xac   : > { %1148 = vrot.lane.b32.xlu0 %v3278_v59, %s3585_s13  ;;  %3109 = vmatprep.mubr.msk.bf16.mxu0 %vm1664_vm4, %v1578_v3  ;;  %v3301_v3 = vld [vmem:[%s3718_s17 + $0xb8] sm:$0xff]  }
  0xad   : > { %v1385_v9 = vpop.permute.xlu1 %1384  ;;  %v1353_v12 = vpop.permute.xlu0 %1352 }
  0xae   : > { %v1612_v11 = vsel %vm1572_vm3, %v1547_v8, %v1385_v9  ;;  %v1580_v13 = vsel %vm1572_vm3, %v1515_v10, %v1353_v12 }
  0xaf   : > { %1402 = vrot.lane.b32.xlu1 %v3279_v4, %s3586_s14  ;;  %3142 = vmatmul.mubr.msk.bf16.gmra.mxu1 %vm1664_vm4, %v1612_v11 }
  0xb0   : > { %1370 = vrot.lane.b32.xlu0 %v3280_v6, %s3586_s14  ;;  %3110 = vmatmul.mubr.msk.bf16.gmra.mxu0 %vm1664_vm4, %v1580_v13 }
  0xb1   : > { %v939_v16 = vpop.permute.xlu1 %938  ;;  %v907_v17 = vpop.permute.xlu0 %906 }
  0xb2   : > { %v1473_v33 = vsel %vm1410_vm1, %v3281_v27, %v939_v16  ;;  %v1425_v36 = vsel %vm1410_vm1, %v3282_v29, %v907_v17  ;;  %v3304_v27 = vld [vmem:[%s3718_s17 + $0x40] sm:$0xff]  }
  0xb3   : > { %1404 = vrot.lane.b32.xlu1 %v3283_v14, %s3586_s14 }
  0xb4   : > { %1372 = vrot.lane.b32.xlu0 %v3284_v15, %s3586_s14 }
  0xb5   : > { %v941_v20 = vpop.permute.xlu1 %940  ;;  %v909_v21 = vpop.permute.xlu0 %908 }
  0xb6   : > { %v1476_v45 = vsel %vm1410_vm1, %v3285_v34, %v941_v20  ;;  %v1428_v47 = vsel %vm1410_vm1, %v3286_v37, %v909_v21 }
  0xb7   : > { %958 = vrot.lane.b32.xlu1 %v3287_v18, %s3584_s30 }
  0xb8   : > { %926 = vrot.lane.b32.xlu0 %v3288_v19, %s3584_s30 }
  0xb9   : > { %v1163_v24 = vpop.permute.xlu1 %1162  ;;  %v1131_v25 = vpop.permute.xlu0 %1130 }
  0xba   : > { %v1549_v38 = vsel %vm1507_vm2, %v1473_v33, %v1163_v24  ;;  %v1517_v40 = vsel %vm1507_vm2, %v1425_v36, %v1131_v25  ;;  %v3306_v33 = vld [vmem:[%s3718_s17 + $0x48] sm:$0xff]  }
  0xbb   : > { %960 = vrot.lane.b32.xlu1 %v3289_v22, %s3584_s30 }
  0xbc   : > { %928 = vrot.lane.b32.xlu0 %v3290_v23, %s3584_s30 }
  0xbd   : > { %v1165_v30 = vpop.permute.xlu1 %1164  ;;  %v1133_v31 = vpop.permute.xlu0 %1132 }
  0xbe   : > { %v1551_v48 = vsel %vm1507_vm2, %v1476_v45, %v1165_v30  ;;  %v1519_v50 = vsel %vm1507_vm2, %v1428_v47, %v1133_v31  ;;  %v3305_v31 = vld [vmem:[%s3718_s17 + $0xc8] sm:$0xff]  }
  0xbf   : > { %1182 = vrot.lane.b32.xlu1 %v3291_v26, %s3585_s13  ;;  %v3303_v26 = vld [vmem:[%s3718_s17 + $0xc0] sm:$0xff]  }
  0xc0   : > { %1150 = vrot.lane.b32.xlu0 %v3292_v28, %s3585_s13 }
  0xc1   : > { %v1387_v39 = vpop.permute.xlu1 %1386  ;;  %v1355_v42 = vpop.permute.xlu0 %1354 }
  0xc2   : > { %v1614_v41 = vsel %vm1572_vm3, %v1549_v38, %v1387_v39  ;;  %v1582_v43 = vsel %vm1572_vm3, %v1517_v40, %v1355_v42 }
  0xc3   : > { %1184 = vrot.lane.b32.xlu1 %v3293_v32, %s3585_s13  ;;  %3145 = vmatprep.mubr.msk.bf16.mxu1 %vm1664_vm4, %v1614_v41 }
  0xc4   : > { %1152 = vrot.lane.b32.xlu0 %v3294_v35, %s3585_s13  ;;  %3113 = vmatprep.mubr.msk.bf16.mxu0 %vm1664_vm4, %v1582_v43 }
  0xc5   : > { %v1389_v49 = vpop.permute.xlu1 %1388  ;;  %v1357_v52 = vpop.permute.xlu0 %1356 }
  0xc6   : > { %v1616_v51 = vsel %vm1572_vm3, %v1551_v48, %v1389_v49  ;;  %v1584_v53 = vsel %vm1572_vm3, %v1519_v50, %v1357_v52 }
  0xc7   : > { %1406 = vrot.lane.b32.xlu1 %v3295_v44, %s3586_s14  ;;  %3146 = vmatmul.mubr.msk.bf16.gmra.mxu1 %vm1664_vm4, %v1616_v51 }
  0xc8   : > { %1374 = vrot.lane.b32.xlu0 %v3296_v46, %s3586_s14  ;;  %3114 = vmatmul.mubr.msk.bf16.gmra.mxu0 %vm1664_vm4, %v1584_v53 }
  0xc9   : > { %v943_v56 = vpop.permute.xlu1 %942  ;;  %v911_v57 = vpop.permute.xlu0 %910 }
  0xca   : > { %v1479_v2 = vsel %vm1410_vm1, %v3297_v62, %v943_v56  ;;  %v1431_v4 = vsel %vm1410_vm1, %v3298_v63, %v911_v57 }
  0xcb   : > { %1408 = vrot.lane.b32.xlu1 %v3299_v54, %s3586_s14  ;;  %v3307_v54 = vld [vmem:[%s3718_s17 + $0xd0] sm:$0xff]  }
  0xcc   : > { %1376 = vrot.lane.b32.xlu0 %v3300_v55, %s3586_s14  ;;  %v3308_v55 = vld [vmem:[%s3718_s17 + $0x50] sm:$0xff]  }
  0xcd   : > { %v945_v58 = vpop.permute.xlu1 %944  ;;  %v913_v59 = vpop.permute.xlu0 %912 }
  0xce   : > { %v1482_v12 = vsel %vm1410_vm1, %v3301_v3, %v945_v58  ;;  %v1434_v13 = vsel %vm1410_vm1, %v3302_v5, %v913_v59  ;;  %v3309_v59 = vld [vmem:[%s3718_s17 + $0xd8] sm:$0xff]  }
  0xd1   : > { %v1167_v60 = vpop.permute.xlu1 %1166  ;;  %v1135_v61 = vpop.permute.xlu0 %1134 }
  0xd2   : > { %v1553_v6 = vsel %vm1507_vm2, %v1479_v2, %v1167_v60  ;;  %v1521_v8 = vsel %vm1507_vm2, %v1431_v4, %v1135_v61  ;;  %v3310_v61 = vld [vmem:[%s3718_s17 + $0x58] sm:$0xff]  }
  0xd5   : > { %v1169_v0 = vpop.permute.xlu1 %1168  ;;  %v1137_v1 = vpop.permute.xlu0 %1136 }
  0xd6   : > { %v1555_v14 = vsel %vm1507_vm2, %v1482_v12, %v1169_v0  ;;  %v1523_v16 = vsel %vm1507_vm2, %v1434_v13, %v1137_v1 }
  0xd9   : > { %v1391_v7 = vpop.permute.xlu1 %1390  ;;  %v1359_v10 = vpop.permute.xlu0 %1358 }
  0xda   : > { %v1618_v9 = vsel %vm1572_vm3, %v1553_v6, %v1391_v7  ;;  %v1586_v11 = vsel %vm1572_vm3, %v1521_v8, %v1359_v10 }
  0xdb   : > { %3149 = vmatprep.mubr.msk.bf16.mxu1 %vm1664_vm4, %v1618_v9  ;;  %3117 = vmatprep.mubr.msk.bf16.mxu0 %vm1664_vm4, %v1586_v11 }
  0xdd   : > { %v1393_v15 = vpop.permute.xlu1 %1392  ;;  %v1361_v18 = vpop.permute.xlu0 %1360 }
  0xde   : > { %v1620_v17 = vsel %vm1572_vm3, %v1555_v14, %v1393_v15  ;;  %v1588_v19 = vsel %vm1572_vm3, %v1523_v16, %v1361_v18  ;;  %v3311_v18 = vld [vmem:[%s3718_s17 + $0xe0] sm:$0xff]  }
  0xdf   : > { %3150 = vmatmul.mubr.msk.bf16.gmra.mxu1 %vm1664_vm4, %v1620_v17  ;;  %3118 = vmatmul.mubr.msk.bf16.gmra.mxu0 %vm1664_vm4, %v1588_v19  ;;  %v3312_v19 = vld [vmem:[%s3718_s17 + $0x60] sm:$0xff]  }
  0xe1   : > { %v947_v20 = vpop.permute.xlu1 %946  ;;  %v915_v21 = vpop.permute.xlu0 %914 }
  0xe2   : > { %v1485_v30 = vsel %vm1410_vm1, %v3303_v26, %v947_v20  ;;  %v1437_v32 = vsel %vm1410_vm1, %v3304_v27, %v915_v21 }
  0xe5   : > { %v949_v22 = vpop.permute.xlu1 %948  ;;  %v917_v23 = vpop.permute.xlu0 %916 }
  0xe6   : > { %v1488_v40 = vsel %vm1410_vm1, %v3305_v31, %v949_v22  ;;  %v1440_v41 = vsel %vm1410_vm1, %v3306_v33, %v917_v23  ;;  %v3313_v23 = vld [vmem:[%s3718_s17 + $0xe8] sm:$0xff]  }
  0xe9   : > { %v1171_v24 = vpop.permute.xlu1 %1170  ;;  %v1139_v25 = vpop.permute.xlu0 %1138 }
  0xea   : > { %v1557_v34 = vsel %vm1507_vm2, %v1485_v30, %v1171_v24  ;;  %v1525_v36 = vsel %vm1507_vm2, %v1437_v32, %v1139_v25  ;;  %v3314_v25 = vld [vmem:[%s3718_s17 + $0x68] sm:$0xff]  }
  0xed   : > { %v1173_v28 = vpop.permute.xlu1 %1172  ;;  %v1141_v29 = vpop.permute.xlu0 %1140 }
  0xee   : > { %v1559_v42 = vsel %vm1507_vm2, %v1488_v40, %v1173_v28  ;;  %v1527_v44 = vsel %vm1507_vm2, %v1440_v41, %v1141_v29 }
  0xf1   : > { %v1395_v35 = vpop.permute.xlu1 %1394  ;;  %v1363_v38 = vpop.permute.xlu0 %1362 }
  0xf2   : > { %v1622_v37 = vsel %vm1572_vm3, %v1557_v34, %v1395_v35  ;;  %v1590_v39 = vsel %vm1572_vm3, %v1525_v36, %v1363_v38 }
  0xf3   : > { %3153 = vmatprep.mubr.msk.bf16.mxu1 %vm1664_vm4, %v1622_v37  ;;  %3121 = vmatprep.mubr.msk.bf16.mxu0 %vm1664_vm4, %v1590_v39 }
  0xf5   : > { %v1397_v43 = vpop.permute.xlu1 %1396  ;;  %v1365_v46 = vpop.permute.xlu0 %1364 }
  0xf6   : > { %v1624_v45 = vsel %vm1572_vm3, %v1559_v42, %v1397_v43  ;;  %v1592_v47 = vsel %vm1572_vm3, %v1527_v44, %v1365_v46  ;;  %v3315_v46 = vld [vmem:[%s3718_s17 + $0xf0] sm:$0xff]  }
  0xf7   : > { %3154 = vmatmul.mubr.msk.bf16.gmra.mxu1 %vm1664_vm4, %v1624_v45  ;;  %3122 = vmatmul.mubr.msk.bf16.gmra.mxu0 %vm1664_vm4, %v1592_v47  ;;  %v3316_v47 = vld [vmem:[%s3718_s17 + $0x70] sm:$0xff]  }
  0xf9   : > { %v951_v48 = vpop.permute.xlu1 %950  ;;  %v919_v49 = vpop.permute.xlu0 %918 }
  0xfa   : > { %v1491_v58 = vsel %vm1410_vm1, %v3307_v54, %v951_v48  ;;  %v1443_v60 = vsel %vm1410_vm1, %v3308_v55, %v919_v49 }
  0xfd   : > { %v953_v50 = vpop.permute.xlu1 %952  ;;  %v921_v51 = vpop.permute.xlu0 %920 }
  0xfe   : > { %v1494_v4 = vsel %vm1410_vm1, %v3309_v59, %v953_v50  ;;  %v1446_v5 = vsel %vm1410_vm1, %v3310_v61, %v921_v51  ;;  %v3317_v51 = vld [vmem:[%s3718_s17 + $0xf8] sm:$0xff]  }
 0x101   : > { %v1175_v52 = vpop.permute.xlu1 %1174  ;;  %v1143_v53 = vpop.permute.xlu0 %1142 }
 0x102   : > { %v1561_v62 = vsel %vm1507_vm2, %v1491_v58, %v1175_v52  ;;  %v1529_v0 = vsel %vm1507_vm2, %v1443_v60, %v1143_v53  ;;  %v3318_v53 = vld [vmem:[%s3718_s17 + $0x78] sm:$0xff]  }
 0x105   : > { %v1177_v56 = vpop.permute.xlu1 %1176 }
 0x106   : > { %v1145_v57 = vpop.permute.xlu0 %1144  ;;  %v1563_v6 = vsel %vm1507_vm2, %v1494_v4, %v1177_v56  ;;  %v4023_v4 = vld [vmem:[%s4610_s5] ss:$0 sm:$0xff] }
 0x107   : > { %v1531_v8 = vsel %vm1507_vm2, %v1446_v5, %v1145_v57 }
 0x109   : > { %v1399_v63 = vpop.permute.xlu1 %1398 }
 0x10a   : > { %v1626_v1 = vsel %vm1572_vm3, %v1561_v62, %v1399_v63  ;;  %v1367_v2 = vpop.permute.xlu0 %1366 }
 0x10b   : > { %v1594_v3 = vsel %vm1572_vm3, %v1529_v0, %v1367_v2  ;;  %3157 = vmatprep.mubr.msk.bf16.mxu1 %vm1664_vm4, %v1626_v1 }
 0x10c   : > { %3125 = vmatprep.mubr.msk.bf16.mxu0 %vm1664_vm4, %v1594_v3 }
 0x10d   : > { %v1401_v7 = vpop.permute.xlu1 %1400 }
 0x10e   : > { %v1628_v9 = vsel %vm1572_vm3, %v1563_v6, %v1401_v7  ;;  %v1369_v10 = vpop.permute.xlu0 %1368 }
 0x10f   : > { %v1596_v11 = vsel %vm1572_vm3, %v1531_v8, %v1369_v10  ;;  %3158 = vmatmul.mubr.msk.bf16.gmra.mxu1 %vm1664_vm4, %v1628_v9 }
 0x110   : > { %3126 = vmatmul.mubr.msk.bf16.gmra.mxu0 %vm1664_vm4, %v1596_v11 }
 0x111   : > { %v955_v12 = vpop.permute.xlu1 %954 }
 0x112   : > { %v923_v13 = vpop.permute.xlu0 %922  ;;  %v1497_v22 = vsel %vm1410_vm1, %v3311_v18, %v955_v12 }
 0x113   : > { %v1449_v24 = vsel %vm1410_vm1, %v3312_v19, %v923_v13 }
 0x115   : > { %v957_v14 = vpop.permute.xlu1 %956 }
 0x116   : > { %v925_v15 = vpop.permute.xlu0 %924  ;;  %v1500_v32 = vsel %vm1410_vm1, %v3313_v23, %v957_v14 }
 0x117   : > { %v1452_v33 = vsel %vm1410_vm1, %v3314_v25, %v925_v15 }
 0x119   : > { %v1179_v16 = vpop.permute.xlu1 %1178 }
 0x11a   : > { %v1147_v17 = vpop.permute.xlu0 %1146  ;;  %v1565_v26 = vsel %vm1507_vm2, %v1497_v22, %v1179_v16 }
 0x11b   : > { %v1533_v28 = vsel %vm1507_vm2, %v1449_v24, %v1147_v17 }
 0x11d   : > { %v1181_v20 = vpop.permute.xlu1 %1180 }
 0x11e   : > { %v1149_v21 = vpop.permute.xlu0 %1148  ;;  %v1567_v34 = vsel %vm1507_vm2, %v1500_v32, %v1181_v20 }
 0x11f   : > { %v1535_v36 = vsel %vm1507_vm2, %v1452_v33, %v1149_v21 }
 0x121   : > { %v1403_v27 = vpop.permute.xlu1 %1402 }
 0x122   : > { %v1630_v29 = vsel %vm1572_vm3, %v1565_v26, %v1403_v27  ;;  %v1371_v30 = vpop.permute.xlu0 %1370 }
 0x123   : > { %v1598_v31 = vsel %vm1572_vm3, %v1533_v28, %v1371_v30  ;;  %3161 = vmatprep.mubr.msk.bf16.mxu1 %vm1664_vm4, %v1630_v29 }
 0x124   : > { %3129 = vmatprep.mubr.msk.bf16.mxu0 %vm1664_vm4, %v1598_v31 }
 0x125   : > { %v1405_v35 = vpop.permute.xlu1 %1404 }
 0x126   : > { %v1632_v37 = vsel %vm1572_vm3, %v1567_v34, %v1405_v35  ;;  %v1373_v38 = vpop.permute.xlu0 %1372 }
 0x127   : > { %v1600_v39 = vsel %vm1572_vm3, %v1535_v36, %v1373_v38  ;;  %3162 = vmatmul.mubr.msk.bf16.gmra.mxu1 %vm1664_vm4, %v1632_v37 }
 0x128   : > { %3130 = vmatmul.mubr.msk.bf16.gmra.mxu0 %vm1664_vm4, %v1600_v39 }
 0x129   : > { %v959_v40 = vpop.permute.xlu1 %958 }
 0x12a   : > { %v927_v41 = vpop.permute.xlu0 %926  ;;  %v1503_v50 = vsel %vm1410_vm1, %v3315_v46, %v959_v40 }
 0x12b   : > { %v1455_v52 = vsel %vm1410_vm1, %v3316_v47, %v927_v41 }
 0x12d   : > { %v961_v42 = vpop.permute.xlu1 %960 }
 0x12e   : > { %v929_v43 = vpop.permute.xlu0 %928  ;;  %v1506_v60 = vsel %vm1410_vm1, %v3317_v51, %v961_v42 }
 0x12f   : > { %v1458_v61 = vsel %vm1410_vm1, %v3318_v53, %v929_v43 }
 0x131   : > { %v1183_v44 = vpop.permute.xlu1 %1182 }
 0x132   : > { %v1151_v45 = vpop.permute.xlu0 %1150  ;;  %v1569_v54 = vsel %vm1507_vm2, %v1503_v50, %v1183_v44 }
 0x133   : > { %v1537_v56 = vsel %vm1507_vm2, %v1455_v52, %v1151_v45 }
 0x135   : > { %v1185_v48 = vpop.permute.xlu1 %1184 }
 0x136   : > { %v1153_v49 = vpop.permute.xlu0 %1152  ;;  %v1571_v62 = vsel %vm1507_vm2, %v1506_v60, %v1185_v48 }
 0x137   : > { %v1539_v0 = vsel %vm1507_vm2, %v1458_v61, %v1153_v49 }
 0x139   : > { %v1407_v55 = vpop.permute.xlu1 %1406 }
 0x13a   : > { %v1634_v57 = vsel %vm1572_vm3, %v1569_v54, %v1407_v55  ;;  %v1375_v58 = vpop.permute.xlu0 %1374 }
 0x13b   : > { %v1602_v59 = vsel %vm1572_vm3, %v1537_v56, %v1375_v58  ;;  %3165 = vmatprep.mubr.msk.bf16.mxu1 %vm1664_vm4, %v1634_v57 }
 0x13c   : > { %3133 = vmatprep.mubr.msk.bf16.mxu0 %vm1664_vm4, %v1602_v59 }
 0x13d   : > { %v1409_v63 = vpop.permute.xlu1 %1408 }
 0x13e   : > { %v1636_v1 = vsel %vm1572_vm3, %v1571_v62, %v1409_v63  ;;  %v1377_v2 = vpop.permute.xlu0 %1376 }
 0x13f   : > { %v1604_v3 = vsel %vm1572_vm3, %v1539_v0, %v1377_v2  ;;  %3166 = vmatmul.mubr.msk.bf16.gmra.mxu1 %vm1664_vm4, %v1636_v1 }
 0x140   : > { %3134 = vmatmul.mubr.msk.bf16.gmra.mxu0 %vm1664_vm4, %v1604_v3 }
 0x157   : > { %v3139_v5 = vpop.f32.mrf.mxu1 }
 0x158   : > { %v3107_v6 = vpop.f32.mrf.mxu0  ;;  %v4026_v7 = vadd.f32 %v3139_v5, %v4023_v4 }
 0x159   : > { %v4029_v8 = vadd.f32 %v3107_v6, %v4023_v4  ;;  %v1895_v9 = vpop.f32.mrf.mxu1 }
 0x15a   : > { %v2056_v10 = vmin.f32 %v4026_v7, 20.0  ;;  %v1767_v11 = vpop.f32.mrf.mxu0  ;;  %v4033_v12 = vadd.f32 %v4023_v4, %v1895_v9 }
 0x15b   : > { %v2024_v13 = vmin.f32 %v4029_v8, 20.0  ;;  %v4037_v14 = vadd.f32 %v4023_v4, %v1767_v11  ;;  %v3140_v15 = vpop.f32.mrf.mxu1 }
 0x15c   : > { %v2154_v16 = vmul.f32 1.442695, %v2056_v10  ;;  %v2054_v17 = vmin.f32 %v4033_v12, 20.0  ;;  %v3108_v18 = vpop.f32.mrf.mxu0  ;;  %v4041_v19 = vadd.f32 %v3140_v15, %v4023_v4 }
 0x15d   : > { %v2090_v20 = vmul.f32 1.442695, %v2024_v13  ;;  %v2022_v21 = vmin.f32 %v4037_v14, 20.0  ;;  %v4045_v22 = vadd.f32 %v3108_v18, %v4023_v4  ;;  %v1898_v23 = vpop.f32.mrf.mxu1 }
 0x15e   : > { %3319 = vpow2.f32 %v2154_v16  ;;  %v2150_v24 = vmul.f32 1.442695, %v2054_v17  ;;  %v2057_v25 = vmin.f32 %v4041_v19, 20.0  ;;  %v1770_v26 = vpop.f32.mrf.mxu0  ;;  %v4049_v27 = vadd.f32 %v4023_v4, %v1898_v23 }
 0x15f   : > { %3321 = vpow2.f32 %v2090_v20  ;;  %v2086_v28 = vmul.f32 1.442695, %v2022_v21  ;;  %v2025_v29 = vmin.f32 %v4045_v22, 20.0  ;;  %v4053_v30 = vadd.f32 %v4023_v4, %v1770_v26 }
 0x160   : > { %3323 = vpow2.f32 %v2150_v24  ;;  %v2156_v31 = vmul.f32 1.442695, %v2057_v25  ;;  %v2055_v32 = vmin.f32 %v4049_v27, 20.0 }
 0x161   : > { %3325 = vpow2.f32 %v2086_v28  ;;  %v2092_v33 = vmul.f32 1.442695, %v2025_v29  ;;  %v2023_v34 = vmin.f32 %v4053_v30, 20.0 }
 0x162   : > { %3327 = vpow2.f32 %v2156_v31  ;;  %v2152_v35 = vmul.f32 1.442695, %v2055_v32 }
 0x163   : > { %3329 = vpow2.f32 %v2092_v33  ;;  %v2088_v36 = vmul.f32 1.442695, %v2023_v34 }
 0x164   : > { %3331 = vpow2.f32 %v2152_v35 }
 0x165   : > { %3333 = vpow2.f32 %v2088_v36 }
 0x16b   : > { %v3320_v37 = vpop.eup %3319 }
 0x16c   : > { %v3322_v38 = vpop.eup %3321  ;;  %v2248_v39 = vadd.f32 1.0, %v3320_v37 }
 0x16d   : > { %v3324_v40 = vpop.eup %3323  ;;  %v2216_v41 = vadd.f32 1.0, %v3322_v38 }
 0x16e   : > { %v3326_v42 = vpop.eup %3325  ;;  %v2312_v43 = vmul.f32 %v2248_v39, %v2248_v39  ;;  %v2246_v44 = vadd.f32 1.0, %v3324_v40 }
 0x16f   : > { %v3328_v45 = vpop.eup %3327  ;;  %v4057_v46 = vmul.f32 %v2216_v41, %v2216_v41  ;;  %v2214_v47 = vadd.f32 1.0, %v3326_v42  ;;  %v3143_v48 = vpop.f32.mrf.mxu1 }
 0x170   : > { %v3330_v49 = vpop.eup %3329  ;;  %v2440_v50 = vadd.f32 1.0, %v2312_v43  ;;  %v2310_v51 = vmul.f32 %v2246_v44, %v2246_v44  ;;  %v2249_v52 = vadd.f32 1.0, %v3328_v45  ;;  %v3111_v53 = vpop.f32.mrf.mxu0  ;;  %v4075_v13 = vadd.f32 %v3143_v48, %v4023_v4 }
 0x171   : > { %v3332_v54 = vpop.eup %3331  ;;  %v2408_v55 = vadd.f32 1.0, %v4057_v46  ;;  %v4060_v56 = vmul.f32 %v2214_v47, %v2214_v47  ;;  %v2217_v57 = vadd.f32 1.0, %v3330_v49  ;;  %v1911_v58 = vpop.f32.mrf.mxu1  ;;  %v4072_v11 = vadd.f32 %v3111_v53, %v4023_v4 }
 0x172   : > { %v3334_v59 = vpop.eup %3333  ;;  %3335 = vrcp.f32 %v2440_v50  ;;  %v2438_v60 = vadd.f32 1.0, %v2310_v51  ;;  %v4062_v61 = vmul.f32 %v2249_v52, %v2249_v52  ;;  %v1783_v62 = vpop.f32.mrf.mxu0  ;;  %v2247_v5 = vadd.f32 1.0, %v3332_v54 }
 0x173   : > { %3337 = vrcp.f32 %v2408_v55  ;;  %v2406_v63 = vadd.f32 1.0, %v4060_v56  ;;  %v4065_v0 = vmul.f32 %v2217_v57, %v2217_v57  ;;  %v2215_v2 = vadd.f32 1.0, %v3334_v59  ;;  %v3144_v9 = vpop.f32.mrf.mxu1 }
 0x174   : > { %3339 = vrcp.f32 %v2438_v60  ;;  %v2441_v1 = vadd.f32 1.0, %v4062_v61  ;;  %v3112_v6 = vpop.f32.mrf.mxu0  ;;  %v4077_v15 = vmul.f32 %v2247_v5, %v2247_v5  ;;  %v4080_v16 = vadd.f32 %v4023_v4, %v1783_v62 }
 0x175   : > { %3341 = vrcp.f32 %v2406_v63  ;;  %v2409_v3 = vadd.f32 1.0, %v4065_v0  ;;  %v4069_v10 = vmul.f32 %v2215_v2, %v2215_v2  ;;  %v4083_v17 = vadd.f32 %v4023_v4, %v1911_v58  ;;  %v1914_v28 = vpop.f32.mrf.mxu1 }
 0x176   : > { %3343 = vrcp.f32 %v2441_v1  ;;  %v2028_v20 = vmin.f32 %v4072_v11, 20.0  ;;  %v2060_v21 = vmin.f32 %v4075_v13, 20.0  ;;  %v2439_v23 = vadd.f32 1.0, %v4077_v15  ;;  %v1786_v26 = vpop.f32.mrf.mxu0 }
 0x177   : > { %3345 = vrcp.f32 %v2409_v3  ;;  %v2407_v18 = vadd.f32 1.0, %v4069_v10  ;;  %v2026_v24 = vmin.f32 %v4080_v16, 20.0  ;;  %v2058_v25 = vmin.f32 %v4083_v17, 20.0 }
 0x178   : > { %v2098_v29 = vmul.f32 1.442695, %v2028_v20  ;;  %v2162_v31 = vmul.f32 1.442695, %v2060_v21  ;;  %v4092_v32 = vadd.f32 %v3112_v6, %v4023_v4  ;;  %v4095_v35 = vadd.f32 %v3144_v9, %v4023_v4 }
 0x179   : > { %3347 = vrcp.f32 %v2407_v18  ;;  %v2094_v33 = vmul.f32 1.442695, %v2026_v24  ;;  %v2158_v34 = vmul.f32 1.442695, %v2058_v25  ;;  %v4099_v37 = vadd.f32 %v4023_v4, %v1786_v26 }
 0x17a   : > { %3349 = vrcp.f32 %v2439_v23  ;;  %v2029_v36 = vmin.f32 %v4092_v32, 20.0  ;;  %v4102_v38 = vadd.f32 %v4023_v4, %v1914_v28  ;;  %v3032_v39 = vadd.f32 -1.0, %v2312_v43 }
 0x17b   : > { %3351 = vpow2.f32 %v2098_v29  ;;  %v2061_v40 = vmin.f32 %v4095_v35, 20.0  ;;  %v2027_v42 = vmin.f32 %v4099_v37, 20.0  ;;  %v3000_v47 = vadd.f32 -1.0, %v4057_v46 }
 0x17c   : > { %3353 = vpow2.f32 %v2162_v31  ;;  %v2100_v41 = vmul.f32 1.442695, %v2029_v36  ;;  %v2059_v44 = vmin.f32 %v4102_v38, 20.0  ;;  %v3030_v48 = vadd.f32 -1.0, %v2310_v51 }
 0x17d   : > { %3355 = vpow2.f32 %v2094_v33  ;;  %v2164_v49 = vmul.f32 1.442695, %v2061_v40  ;;  %v2096_v43 = vmul.f32 1.442695, %v2027_v42  ;;  %v2998_v57 = vadd.f32 -1.0, %v4060_v56 }
 0x17e   : > { %3357 = vpow2.f32 %v2158_v34  ;;  %v2160_v53 = vmul.f32 1.442695, %v2059_v44  ;;  %v3033_v59 = vadd.f32 -1.0, %v4062_v61  ;;  %v3001_v1 = vadd.f32 -1.0, %v4065_v0 }
 0x17f   : > { %v3336_v45 = vpop.eup %3335  ;;  %3359 = vpow2.f32 %v2100_v41  ;;  %v2999_v0 = vadd.f32 -1.0, %v4069_v10 }
 0x180   : > { %v3338_v50 = vpop.eup %3337  ;;  %v2539_v52 = vmul.f32 %v3336_v45, %v3032_v39  ;;  %3361 = vpow2.f32 %v2164_v49 }
 0x181   : > { %v3340_v54 = vpop.eup %3339  ;;  %v2475_v55 = vmul.f32 %v3338_v50, %v3000_v47  ;;  %3363 = vpow2.f32 %v2096_v43 }
 0x182   : > { %v3342_v46 = vpop.eup %3341  ;;  %v2632_v51 = vmul.f32 %v2539_v52, %v4026_v7  ;;  %v2535_v58 = vmul.f32 %v3340_v54, %v3030_v48  ;;  %3365 = vpow2.f32 %v2160_v53 }
 0x183   : > { %v3344_v60 = vpop.eup %3343  ;;  %v2600_v62 = vmul.f32 %v2475_v55, %v4029_v8  ;;  %v2471_v63 = vmul.f32 %v3342_v46, %v2998_v57 }
 0x184   : > { %v3346_v2 = vpop.eup %3345  ;;  %2697 = vst.msk [vmem:[%s4112_s28 + $0x110] sm:$0xff] %vm2662_vm5, %v2632_v51  ;;  %v2630_v56 = vmul.f32 %v2535_v58, %v4033_v12  ;;  %v2541_v7 = vmul.f32 %v3344_v60, %v3033_v59  ;;  %v3031_v12 = vadd.f32 -1.0, %v4077_v15 }
 0x185   : > { %2665 = vst.msk [vmem:[%s4112_s28 + $0x10] sm:$0xff] %vm2662_vm5, %v2600_v62  ;;  %v2598_v61 = vmul.f32 %v2471_v63, %v4037_v14  ;;  %v2477_v3 = vmul.f32 %v3346_v2, %v3001_v1 }
 0x186   : > { %2695 = vst.msk [vmem:[%s4112_s28 + $0x100] sm:$0xff] %vm2662_vm5, %v2630_v56  ;;  %v2633_v8 = vmul.f32 %v2541_v7, %v4041_v19  ;;  %v3348_v5 = vpop.eup %3347 }
 0x187   : > { %2663 = vst.msk [vmem:[%s4112_s28] sm:$0xff] %vm2662_vm5, %v2598_v61  ;;  %v2601_v6 = vmul.f32 %v2477_v3, %v4045_v22  ;;  %v3147_v9 = vpop.f32.mrf.mxu1  ;;  %v3350_v18 = vpop.eup %3349  ;;  %v2473_v14 = vmul.f32 %v3348_v5, %v2999_v0 }
 0x188   : > { %2698 = vst.msk [vmem:[%s4112_s28 + $0x118] sm:$0xff] %vm2662_vm5, %v2633_v8  ;;  %v3115_v20 = vpop.f32.mrf.mxu0  ;;  %v4136_v21 = vadd.f32 %v3147_v9, %v4023_v4  ;;  %v3352_v19 = vpop.eup %3351  ;;  %v2537_v10 = vmul.f32 %v3350_v18, %v3031_v12 }
 0x189   : > { %2666 = vst.msk [vmem:[%s4112_s28 + $0x18] sm:$0xff] %vm2662_vm5, %v2601_v6  ;;  %v4141_v23 = vadd.f32 %v3115_v20, %v4023_v4  ;;  %v3354_v22 = vpop.eup %3353  ;;  %v2599_v15 = vmul.f32 %v2473_v14, %v4053_v30  ;;  %v2220_v24 = vadd.f32 1.0, %v3352_v19  ;;  %v1927_v39 = vpop.f32.mrf.mxu1 }
 0x18a   : > { %v3356_v25 = vpop.eup %3355  ;;  %v2631_v26 = vmul.f32 %v2537_v10, %v4049_v27  ;;  %v2252_v28 = vadd.f32 1.0, %v3354_v22  ;;  %v1799_v29 = vpop.f32.mrf.mxu0  ;;  %v2064_v36 = vmin.f32 %v4136_v21, 20.0  ;;  %v4158_v53 = vadd.f32 %v4023_v4, %v1927_v39 }
 0x18b   : > { %v3358_v31 = vpop.eup %3357  ;;  %2664 = vst.msk [vmem:[%s4112_s28 + $0x8] sm:$0xff] %vm2662_vm5, %v2599_v15  ;;  %v4147_v33 = vmul.f32 %v2220_v24, %v2220_v24  ;;  %v2218_v34 = vadd.f32 1.0, %v3356_v25  ;;  %v2032_v42 = vmin.f32 %v4141_v23, 20.0  ;;  %v4155_v48 = vadd.f32 %v4023_v4, %v1799_v29  ;;  %v3148_v62 = vpop.f32.mrf.mxu1 }
 0x18c   : > { %v3360_v40 = vpop.eup %3359  ;;  %2696 = vst.msk [vmem:[%s4112_s28 + $0x108] sm:$0xff] %vm2662_vm5, %v2631_v26  ;;  %v2316_v41 = vmul.f32 %v2252_v28, %v2252_v28  ;;  %v2250_v30 = vadd.f32 1.0, %v3358_v31  ;;  %v3116_v54 = vpop.f32.mrf.mxu0  ;;  %v2170_v51 = vmul.f32 1.442695, %v2064_v36  ;;  %v2062_v61 = vmin.f32 %v4158_v53, 20.0 }
 0x18d   : > { %v3362_v44 = vpop.eup %3361  ;;  %v2412_v27 = vadd.f32 1.0, %v4147_v33  ;;  %v2282_v45 = vmul.f32 %v2218_v34, %v2218_v34  ;;  %v2221_v47 = vadd.f32 1.0, %v3360_v40  ;;  %v2106_v60 = vmul.f32 1.442695, %v2032_v42  ;;  %v1930_v12 = vpop.f32.mrf.mxu1 }
 0x18e   : > { %v3364_v49 = vpop.eup %3363  ;;  %v2444_v50 = vadd.f32 1.0, %v2316_v41  ;;  %v2314_v52 = vmul.f32 %v2250_v30, %v2250_v30  ;;  %v2253_v43 = vadd.f32 1.0, %v3362_v44  ;;  %v2030_v2 = vmin.f32 %v4155_v48, 20.0  ;;  %v1802_v3 = vpop.f32.mrf.mxu0 }
 0x18f   : > { %v3366_v55 = vpop.eup %3365  ;;  %3367 = vrcp.f32 %v2412_v27  ;;  %v2410_v57 = vadd.f32 1.0, %v2282_v45  ;;  %v2285_v46 = vmul.f32 %v2221_v47, %v2221_v47  ;;  %v2219_v1 = vadd.f32 1.0, %v3364_v49 }
 0x190   : > { %3369 = vrcp.f32 %v2444_v50  ;;  %v2442_v58 = vadd.f32 1.0, %v2314_v52  ;;  %v2317_v59 = vmul.f32 %v2253_v43, %v2253_v43  ;;  %v2251_v7 = vadd.f32 1.0, %v3366_v55 }
 0x191   : > { %3371 = vrcp.f32 %v2410_v57  ;;  %v2413_v63 = vadd.f32 1.0, %v2285_v46  ;;  %v4162_v8 = vmul.f32 %v2219_v1, %v2219_v1  ;;  %v4167_v5 = vadd.f32 %v3116_v54, %v4023_v4 }
 0x192   : > { %3373 = vrcp.f32 %v2442_v58  ;;  %v2445_v56 = vadd.f32 1.0, %v2317_v59  ;;  %v4164_v0 = vmul.f32 %v2251_v7, %v2251_v7  ;;  %v4170_v6 = vadd.f32 %v3148_v62, %v4023_v4 }
 0x193   : > { %3375 = vrcp.f32 %v2413_v63  ;;  %v2411_v9 = vadd.f32 1.0, %v4162_v8  ;;  %v2102_v18 = vmul.f32 1.442695, %v2030_v2  ;;  %v4174_v14 = vadd.f32 %v4023_v4, %v1802_v3 }
 0x194   : > { %3377 = vrcp.f32 %v2445_v56  ;;  %v2443_v20 = vadd.f32 1.0, %v4164_v0  ;;  %v2166_v19 = vmul.f32 1.442695, %v2062_v61  ;;  %v2033_v10 = vmin.f32 %v4167_v5, 20.0 }
 0x195   : > { %3379 = vpow2.f32 %v2106_v60  ;;  %v2065_v22 = vmin.f32 %v4170_v6, 20.0  ;;  %v2031_v15 = vmin.f32 %v4174_v14, 20.0  ;;  %v4181_v24 = vadd.f32 %v4023_v4, %v1930_v12 }
 0x196   : > { %3381 = vpow2.f32 %v2170_v51  ;;  %v2108_v25 = vmul.f32 1.442695, %v2033_v10  ;;  %v3004_v31 = vadd.f32 -1.0, %v4147_v33  ;;  %v3036_v39 = vadd.f32 -1.0, %v2316_v41 }
 0x197   : > { %3383 = vrcp.f32 %v2411_v9  ;;  %v2172_v26 = vmul.f32 1.442695, %v2065_v22  ;;  %v2104_v28 = vmul.f32 1.442695, %v2031_v15  ;;  %v2063_v29 = vmin.f32 %v4181_v24, 20.0 }
 0x198   : > { %3385 = vrcp.f32 %v2443_v20  ;;  %v3002_v42 = vadd.f32 -1.0, %v2282_v45  ;;  %v3034_v47 = vadd.f32 -1.0, %v2314_v52  ;;  %v3005_v54 = vadd.f32 -1.0, %v2285_v46 }
 0x199   : > { %3387 = vpow2.f32 %v2102_v18  ;;  %v2168_v34 = vmul.f32 1.442695, %v2063_v29  ;;  %v3037_v58 = vadd.f32 -1.0, %v2317_v59  ;;  %v3035_v18 = vadd.f32 -1.0, %v4164_v0 }
 0x19a   : > { %3389 = vpow2.f32 %v2166_v19 }
 0x19b   : > { %3391 = vpow2.f32 %v2108_v25 }
 0x19c   : > { %v3368_v36 = vpop.eup %3367  ;;  %3393 = vpow2.f32 %v2172_v26 }
 0x19d   : > { %v3370_v40 = vpop.eup %3369  ;;  %v2483_v30 = vmul.f32 %v3368_v36, %v3004_v31  ;;  %3395 = vpow2.f32 %v2104_v28 }
 0x19e   : > { %v3372_v44 = vpop.eup %3371  ;;  %v2547_v27 = vmul.f32 %v3370_v40, %v3036_v39  ;;  %3397 = vpow2.f32 %v2168_v34 }
 0x19f   : > { %v3151_v49 = vpop.f32.mrf.mxu1  ;;  %v3374_v50 = vpop.eup %3373  ;;  %v2604_v43 = vmul.f32 %v2483_v30, %v4072_v11  ;;  %v2479_v33 = vmul.f32 %v3372_v44, %v3002_v42 }
 0x1a0   : > { %v3119_v55 = vpop.f32.mrf.mxu0  ;;  %v4187_v41 = vadd.f32 %v3151_v49, %v4023_v4  ;;  %v3376_v57 = vpop.eup %3375  ;;  %v2636_v45 = vmul.f32 %v2547_v27, %v4075_v13  ;;  %v2543_v51 = vmul.f32 %v3374_v50, %v3034_v47 }
 0x1a1   : > { %v4191_v52 = vadd.f32 %v3119_v55, %v4023_v4  ;;  %v3378_v60 = vpop.eup %3377  ;;  %2669 = vst.msk [vmem:[%s4112_s28 + $0x30] sm:$0xff] %vm2662_vm5, %v2604_v43  ;;  %v2602_v11 = vmul.f32 %v2479_v33, %v4080_v16  ;;  %v2485_v62 = vmul.f32 %v3376_v57, %v3005_v54  ;;  %v1943_v2 = vpop.f32.mrf.mxu1  ;;  %v3003_v16 = vadd.f32 -1.0, %v4162_v8 }
 0x1a2   : > { %v2068_v46 = vmin.f32 %v4187_v41, 20.0  ;;  %v3380_v63 = vpop.eup %3379  ;;  %2701 = vst.msk [vmem:[%s4112_s28 + $0x130] sm:$0xff] %vm2662_vm5, %v2636_v45  ;;  %v2634_v13 = vmul.f32 %v2543_v51, %v4083_v17  ;;  %v2549_v1 = vmul.f32 %v3378_v60, %v3037_v58  ;;  %v1815_v12 = vpop.f32.mrf.mxu0  ;;  %v4212_v8 = vadd.f32 %v4023_v4, %v1943_v2 }
 0x1a3   : > { %v2036_v59 = vmin.f32 %v4191_v52, 20.0  ;;  %v3382_v56 = vpop.eup %3381  ;;  %2667 = vst.msk [vmem:[%s4112_s28 + $0x20] sm:$0xff] %vm2662_vm5, %v2602_v11  ;;  %v2605_v7 = vmul.f32 %v2485_v62, %v4092_v32  ;;  %v2224_v61 = vadd.f32 1.0, %v3380_v63  ;;  %v3152_v49 = vpop.f32.mrf.mxu1 }
 0x1a4   : > { %v2178_v3 = vmul.f32 1.442695, %v2068_v46  ;;  %v3384_v9 = vpop.eup %3383  ;;  %2699 = vst.msk [vmem:[%s4112_s28 + $0x120] sm:$0xff] %vm2662_vm5, %v2634_v13  ;;  %v2637_v17 = vmul.f32 %v2549_v1, %v4095_v35  ;;  %v2256_v20 = vadd.f32 1.0, %v3382_v56  ;;  %v4217_v35 = vadd.f32 %v4023_v4, %v1815_v12  ;;  %v3120_v30 = vpop.f32.mrf.mxu0 }
 0x1a5   : > { %v2114_v19 = vmul.f32 1.442695, %v2036_v59  ;;  %v3386_v10 = vpop.eup %3385  ;;  %2670 = vst.msk [vmem:[%s4112_s28 + $0x38] sm:$0xff] %vm2662_vm5, %v2605_v7  ;;  %v2481_v22 = vmul.f32 %v3384_v9, %v3003_v16  ;;  %v2288_v32 = vmul.f32 %v2224_v61, %v2224_v61  ;;  %v2066_v47 = vmin.f32 %v4212_v8, 20.0  ;;  %v1946_v59 = vpop.f32.mrf.mxu1 }
 0x1a6   : > { %3399 = vpow2.f32 %v2178_v3  ;;  %v3388_v15 = vpop.eup %3387  ;;  %2702 = vst.msk [vmem:[%s4112_s28 + $0x138] sm:$0xff] %vm2662_vm5, %v2637_v17  ;;  %v2545_v25 = vmul.f32 %v3386_v10, %v3035_v18  ;;  %v2320_v26 = vmul.f32 %v2256_v20, %v2256_v20  ;;  %v4228_v45 = vadd.f32 %v3120_v30, %v4023_v4  ;;  %v1818_v1 = vpop.f32.mrf.mxu0 }
 0x1a7   : > { %3401 = vpow2.f32 %v2114_v19  ;;  %v3390_v0 = vpop.eup %3389  ;;  %v2603_v28 = vmul.f32 %v2481_v22, %v4099_v37  ;;  %v2416_v29 = vadd.f32 1.0, %v2288_v32  ;;  %v2222_v31 = vadd.f32 1.0, %v3388_v15 }
 0x1a8   : > { %v3392_v34 = vpop.eup %3391  ;;  %v2635_v36 = vmul.f32 %v2545_v25, %v4102_v38  ;;  %v2448_v39 = vadd.f32 1.0, %v2320_v26  ;;  %v2254_v40 = vadd.f32 1.0, %v3390_v0  ;;  %v2034_v38 = vmin.f32 %v4217_v35, 20.0 }
 0x1a9   : > { %v3394_v42 = vpop.eup %3393  ;;  %2668 = vst.msk [vmem:[%s4112_s28 + $0x28] sm:$0xff] %vm2662_vm5, %v2603_v28  ;;  %3403 = vrcp.f32 %v2416_v29  ;;  %v2286_v44 = vmul.f32 %v2222_v31, %v2222_v31  ;;  %v2225_v27 = vadd.f32 1.0, %v3392_v34  ;;  %v4231_v11 = vadd.f32 %v3152_v49, %v4023_v4 }
 0x1aa   : > { %v3396_v50 = vpop.eup %3395  ;;  %2700 = vst.msk [vmem:[%s4112_s28 + $0x128] sm:$0xff] %vm2662_vm5, %v2635_v36  ;;  %3405 = vrcp.f32 %v2448_v39  ;;  %v2318_v37 = vmul.f32 %v2254_v40, %v2254_v40  ;;  %v2257_v43 = vadd.f32 1.0, %v3394_v42  ;;  %v2110_v56 = vmul.f32 1.442695, %v2034_v38 }
 0x1ab   : > { %v3398_v33 = vpop.eup %3397  ;;  %v2414_v54 = vadd.f32 1.0, %v2286_v44  ;;  %v2289_v55 = vmul.f32 %v2225_v27, %v2225_v27  ;;  %v2223_v57 = vadd.f32 1.0, %v3396_v50  ;;  %v2037_v7 = vmin.f32 %v4228_v45, 20.0 }
 0x1ac   : > { %v2446_v51 = vadd.f32 1.0, %v2318_v37  ;;  %v2321_v58 = vmul.f32 %v2257_v43, %v2257_v43  ;;  %v2255_v60 = vadd.f32 1.0, %v3398_v33  ;;  %v2174_v61 = vmul.f32 1.442695, %v2066_v47 }
 0x1ad   : > { %3407 = vrcp.f32 %v2414_v54  ;;  %v2417_v62 = vadd.f32 1.0, %v2289_v55  ;;  %v2287_v46 = vmul.f32 %v2223_v57, %v2223_v57  ;;  %v2069_v3 = vmin.f32 %v4231_v11, 20.0 }
 0x1ae   : > { %3409 = vrcp.f32 %v2446_v51  ;;  %v2449_v63 = vadd.f32 1.0, %v2321_v58  ;;  %v2319_v13 = vmul.f32 %v2255_v60, %v2255_v60  ;;  %v2116_v12 = vmul.f32 1.442695, %v2037_v7 }
 0x1af   : > { %3411 = vrcp.f32 %v2417_v62  ;;  %v2415_v2 = vadd.f32 1.0, %v2287_v46  ;;  %v4236_v9 = vadd.f32 %v4023_v4, %v1818_v1  ;;  %v4239_v17 = vadd.f32 %v4023_v4, %v1946_v59 }
 0x1b0   : > { %3413 = vrcp.f32 %v2449_v63  ;;  %v2447_v16 = vadd.f32 1.0, %v2319_v13  ;;  %v3008_v20 = vadd.f32 -1.0, %v2288_v32  ;;  %v3040_v19 = vadd.f32 -1.0, %v2320_v26 }
 0x1b1   : > { %3415 = vrcp.f32 %v2415_v2  ;;  %v2180_v10 = vmul.f32 1.442695, %v2069_v3  ;;  %v2035_v25 = vmin.f32 %v4236_v9, 20.0  ;;  %v2067_v0 = vmin.f32 %v4239_v17, 20.0 }
 0x1b2   : > { %3417 = vrcp.f32 %v2447_v16  ;;  %v3006_v28 = vadd.f32 -1.0, %v2286_v44  ;;  %v3038_v29 = vadd.f32 -1.0, %v2318_v37  ;;  %v3009_v26 = vadd.f32 -1.0, %v2289_v55 }
 0x1b3   : > { %v3400_v18 = vpop.eup %3399  ;;  %3419 = vpow2.f32 %v2110_v56  ;;  %v2112_v36 = vmul.f32 1.442695, %v2035_v25  ;;  %v2176_v39 = vmul.f32 1.442695, %v2067_v0  ;;  %v3041_v40 = vadd.f32 -1.0, %v2321_v58 }
 0x1b4   : > { %v3402_v22 = vpop.eup %3401  ;;  %v2260_v15 = vadd.f32 1.0, %v3400_v18  ;;  %3421 = vpow2.f32 %v2174_v61  ;;  %v3007_v49 = vadd.f32 -1.0, %v2287_v46  ;;  %v3039_v43 = vadd.f32 -1.0, %v2319_v13 }
 0x1b5   : > { %v2228_v31 = vadd.f32 1.0, %v3402_v22  ;;  %3423 = vpow2.f32 %v2116_v12 }
 0x1b6   : > { %v4243_v34 = vmul.f32 %v2260_v15, %v2260_v15  ;;  %v3404_v32 = vpop.eup %3403  ;;  %3425 = vpow2.f32 %v2180_v10 }
 0x1b7   : > { %v4245_v30 = vmul.f32 %v2228_v31, %v2228_v31  ;;  %v3155_v42 = vpop.f32.mrf.mxu1  ;;  %v3406_v27 = vpop.eup %3405  ;;  %v2491_v47 = vmul.f32 %v3404_v32, %v3008_v20  ;;  %3427 = vpow2.f32 %v2112_v36 }
 0x1b8   : > { %v2452_v44 = vadd.f32 1.0, %v4243_v34  ;;  %v3123_v50 = vpop.f32.mrf.mxu0  ;;  %v2555_v37 = vmul.f32 %v3406_v27, %v3040_v19  ;;  %3429 = vpow2.f32 %v2176_v39  ;;  %v4254_v57 = vadd.f32 %v3155_v42, %v4023_v4 }
 0x1b9   : > { %v2420_v38 = vadd.f32 1.0, %v4245_v30  ;;  %v1959_v33 = vpop.f32.mrf.mxu1  ;;  %v2608_v54 = vmul.f32 %v2491_v47, %v4141_v23  ;;  %v4251_v55 = vadd.f32 %v3123_v50, %v4023_v4 }
 0x1ba   : > { %3431 = vrcp.f32 %v2452_v44  ;;  %v1831_v51 = vpop.f32.mrf.mxu0  ;;  %v3408_v58 = vpop.eup %3407  ;;  %v2640_v60 = vmul.f32 %v2555_v37, %v4136_v21  ;;  %v4261_v46 = vadd.f32 %v4023_v4, %v1959_v33  ;;  %v2072_v59 = vmin.f32 %v4254_v57, 20.0 }
 0x1bb   : > { %3433 = vrcp.f32 %v2420_v38  ;;  %v4258_v62 = vadd.f32 %v4023_v4, %v1831_v51  ;;  %v3156_v23 = vpop.f32.mrf.mxu1  ;;  %v3410_v63 = vpop.eup %3409  ;;  %2673 = vst.msk [vmem:[%s4112_s28 + $0x50] sm:$0xff] %vm2662_vm5, %v2608_v54  ;;  %v2487_v13 = vmul.f32 %v3408_v58, %v3006_v28  ;;  %v2040_v1 = vmin.f32 %v4251_v55, 20.0 }
 0x1bc   : > { %v3124_v2 = vpop.f32.mrf.mxu0  ;;  %v4268_v56 = vadd.f32 %v3156_v23, %v4023_v4  ;;  %v3412_v21 = vpop.eup %3411  ;;  %2705 = vst.msk [vmem:[%s4112_s28 + $0x150] sm:$0xff] %vm2662_vm5, %v2640_v60  ;;  %v2551_v7 = vmul.f32 %v3410_v63, %v3038_v29  ;;  %v2070_v61 = vmin.f32 %v4261_v46, 20.0  ;;  %v2186_v10 = vmul.f32 1.442695, %v2072_v59 }
 0x1bd   : > { %v2038_v16 = vmin.f32 %v4258_v62, 20.0  ;;  %v4275_v3 = vadd.f32 %v3124_v2, %v4023_v4  ;;  %v3414_v12 = vpop.eup %3413  ;;  %v2606_v18 = vmul.f32 %v2487_v13, %v4155_v48  ;;  %v2493_v20 = vmul.f32 %v3412_v21, %v3009_v26  ;;  %v1962_v33 = vpop.f32.mrf.mxu1 }
 0x1be   : > { %v2122_v19 = vmul.f32 1.442695, %v2040_v1  ;;  %v3416_v22 = vpop.eup %3415  ;;  %v2638_v15 = vmul.f32 %v2551_v7, %v4158_v53  ;;  %v2557_v25 = vmul.f32 %v3414_v12, %v3041_v40  ;;  %v2182_v28 = vmul.f32 1.442695, %v2070_v61  ;;  %v1834_v50 = vpop.f32.mrf.mxu0 }
 0x1bf   : > { %v2118_v0 = vmul.f32 1.442695, %v2038_v16  ;;  %v3418_v29 = vpop.eup %3417  ;;  %2671 = vst.msk [vmem:[%s4112_s28 + $0x40] sm:$0xff] %vm2662_vm5, %v2606_v18  ;;  %v2609_v31 = vmul.f32 %v2493_v20, %v4167_v5  ;;  %v2489_v36 = vmul.f32 %v3416_v22, %v3007_v49  ;;  %v2041_v48 = vmin.f32 %v4275_v3, 20.0 }
 0x1c0   : > { %3435 = vpow2.f32 %v2122_v19  ;;  %v3420_v39 = vpop.eup %3419  ;;  %2703 = vst.msk [vmem:[%s4112_s28 + $0x140] sm:$0xff] %vm2662_vm5, %v2638_v15  ;;  %v2641_v32 = vmul.f32 %v2557_v25, %v4170_v6  ;;  %v2553_v53 = vmul.f32 %v3418_v29, %v3039_v43  ;;  %v2073_v26 = vmin.f32 %v4268_v56, 20.0 }
 0x1c1   : > { %3437 = vpow2.f32 %v2186_v10  ;;  %v3422_v40 = vpop.eup %3421  ;;  %2674 = vst.msk [vmem:[%s4112_s28 + $0x58] sm:$0xff] %vm2662_vm5, %v2609_v31  ;;  %v2607_v5 = vmul.f32 %v2489_v36, %v4174_v14  ;;  %v2226_v42 = vadd.f32 1.0, %v3420_v39  ;;  %v2124_v27 = vmul.f32 1.442695, %v2041_v48 }
 0x1c2   : > { %3439 = vpow2.f32 %v2118_v0  ;;  %v3424_v47 = vpop.eup %3423  ;;  %2706 = vst.msk [vmem:[%s4112_s28 + $0x158] sm:$0xff] %vm2662_vm5, %v2641_v32  ;;  %v2639_v49 = vmul.f32 %v2553_v53, %v4181_v24  ;;  %v2258_v6 = vadd.f32 1.0, %v3422_v40  ;;  %v2188_v44 = vmul.f32 1.442695, %v2073_v26 }
 0x1c3   : > { %3441 = vpow2.f32 %v2182_v28  ;;  %v3426_v37 = vpop.eup %3425  ;;  %2672 = vst.msk [vmem:[%s4112_s28 + $0x48] sm:$0xff] %vm2662_vm5, %v2607_v5  ;;  %v3044_v43 = vadd.f32 -1.0, %v4243_v34  ;;  %v2290_v38 = vmul.f32 %v2226_v42, %v2226_v42  ;;  %v2229_v14 = vadd.f32 1.0, %v3424_v47 }
 0x1c4   : > { %3443 = vpow2.f32 %v2124_v27  ;;  %v3428_v54 = vpop.eup %3427  ;;  %2704 = vst.msk [vmem:[%s4112_s28 + $0x148] sm:$0xff] %vm2662_vm5, %v2639_v49  ;;  %v3012_v51 = vadd.f32 -1.0, %v4245_v30  ;;  %v2322_v58 = vmul.f32 %v2258_v6, %v2258_v6  ;;  %v2261_v24 = vadd.f32 1.0, %v3426_v37 }
 0x1c5   : > { %3445 = vpow2.f32 %v2188_v44  ;;  %v3430_v60 = vpop.eup %3429  ;;  %v2418_v23 = vadd.f32 1.0, %v2290_v38  ;;  %v2293_v63 = vmul.f32 %v2229_v14, %v2229_v14  ;;  %v2227_v13 = vadd.f32 1.0, %v3428_v54 }
 0x1c6   : > { %v4300_v1 = vadd.f32 %v4023_v4, %v1834_v50  ;;  %v2450_v59 = vadd.f32 1.0, %v2322_v58  ;;  %v2325_v2 = vmul.f32 %v2261_v24, %v2261_v24  ;;  %v2259_v21 = vadd.f32 1.0, %v3430_v60 }
 0x1c7   : > { %v3432_v34 = vpop.eup %3431  ;;  %v4303_v7 = vadd.f32 %v4023_v4, %v1962_v33  ;;  %3447 = vrcp.f32 %v2418_v23  ;;  %v2421_v61 = vadd.f32 1.0, %v2293_v63  ;;  %v2291_v19 = vmul.f32 %v2227_v13, %v2227_v13  ;;  %v4323_v23 = vld [vmem:[%s4610_s5] ss:$0 sm:$0xff] }
 0x1c8   : > { %v3434_v16 = vpop.eup %3433  ;;  %v2563_v30 = vmul.f32 %v3432_v34, %v3044_v43  ;;  %3449 = vrcp.f32 %v2450_v59  ;;  %v2453_v18 = vadd.f32 1.0, %v2325_v2  ;;  %v2323_v10 = vmul.f32 %v2259_v21, %v2259_v21 }
 0x1c9   : > { %v2499_v12 = vmul.f32 %v3434_v16, %v3012_v51  ;;  %3451 = vrcp.f32 %v2421_v61  ;;  %v2039_v4 = vmin.f32 %v4300_v1, 20.0  ;;  %v2071_v15 = vmin.f32 %v4303_v7, 20.0 }
 0x1ca   : > { %v2644_v20 = vmul.f32 %v2563_v30, %v4187_v41  ;;  %3453 = vrcp.f32 %v2453_v18  ;;  %v2419_v25 = vadd.f32 1.0, %v2291_v19  ;;  %v2451_v0 = vadd.f32 1.0, %v2323_v10 }
 0x1cb   : > { %v2612_v22 = vmul.f32 %v2499_v12, %v4191_v52  ;;  %v2120_v29 = vmul.f32 1.442695, %v2039_v4  ;;  %v2184_v31 = vmul.f32 1.442695, %v2071_v15  ;;  %v3010_v39 = vadd.f32 -1.0, %v2290_v38 }
 0x1cc   : > { %2709 = vst.msk [vmem:[%s4112_s28 + $0x170] sm:$0xff] %vm2662_vm5, %v2644_v20  ;;  %3455 = vrcp.f32 %v2419_v25  ;;  %v3042_v52 = vadd.f32 -1.0, %v2322_v58  ;;  %v3013_v26 = vadd.f32 -1.0, %v2293_v63  ;;  %v3045_v49 = vadd.f32 -1.0, %v2325_v2 }
 0x1cd   : > { %v3436_v28 = vpop.eup %3435  ;;  %2677 = vst.msk [vmem:[%s4112_s28 + $0x70] sm:$0xff] %vm2662_vm5, %v2612_v22  ;;  %3457 = vrcp.f32 %v2451_v0  ;;  %v3011_v37 = vadd.f32 -1.0, %v2291_v19  ;;  %v3043_v33 = vadd.f32 -1.0, %v2323_v10 }
 0x1ce   : > { %v3438_v41 = vpop.eup %3437  ;;  %v2232_v36 = vadd.f32 1.0, %v3436_v28  ;;  %3459 = vpow2.f32 %v2120_v29 }
 0x1cf   : > { %v3440_v48 = vpop.eup %3439  ;;  %v2264_v32 = vadd.f32 1.0, %v3438_v41  ;;  %v3159_v27 = vpop.f32.mrf.mxu1  ;;  %3461 = vpow2.f32 %v2184_v31 }
 0x1d0   : > { %v3442_v53 = vpop.eup %3441  ;;  %v2296_v40 = vmul.f32 %v2232_v36, %v2232_v36  ;;  %v2230_v5 = vadd.f32 1.0, %v3440_v48  ;;  %v3127_v42 = vpop.f32.mrf.mxu0  ;;  %v4332_v16 = vadd.f32 %v4323_v23, %v3159_v27 }
 0x1d1   : > { %v3444_v47 = vpop.eup %3443  ;;  %v2328_v6 = vmul.f32 %v2264_v32, %v2264_v32  ;;  %v2262_v44 = vadd.f32 1.0, %v3442_v53  ;;  %v4326_v63 = vadd.f32 %v4323_v23, %v3127_v42  ;;  %v1975_v34 = vpop.f32.mrf.mxu1 }
 0x1d2   : > { %v3446_v50 = vpop.eup %3445  ;;  %v2424_v43 = vadd.f32 1.0, %v2296_v40  ;;  %v4313_v14 = vmul.f32 %v2230_v5, %v2230_v5  ;;  %v2233_v38 = vadd.f32 1.0, %v3444_v47  ;;  %v1847_v13 = vpop.f32.mrf.mxu0  ;;  %v4334_v12 = vadd.f32 -1.0, %v2296_v40 }
 0x1d3   : > { %v2456_v54 = vadd.f32 1.0, %v2328_v6  ;;  %v4315_v51 = vmul.f32 %v2262_v44, %v2262_v44  ;;  %v2265_v58 = vadd.f32 1.0, %v3446_v50  ;;  %v4337_v10 = vadd.f32 -1.0, %v2328_v6  ;;  %v3160_v29 = vpop.f32.mrf.mxu1 }
 0x1d4   : > { %3463 = vrcp.f32 %v2424_v43  ;;  %v2422_v24 = vadd.f32 1.0, %v4313_v14  ;;  %v4318_v60 = vmul.f32 %v2233_v38, %v2233_v38  ;;  %v3448_v59 = vpop.eup %3447  ;;  %v2044_v0 = vmin.f32 %v4326_v63, 20.0  ;;  %v3128_v28 = vpop.f32.mrf.mxu0 }
 0x1d5   : > { %3465 = vrcp.f32 %v2456_v54  ;;  %v2454_v2 = vadd.f32 1.0, %v4315_v51  ;;  %v4329_v21 = vmul.f32 %v2265_v58, %v2265_v58  ;;  %v3450_v30 = vpop.eup %3449  ;;  %v2495_v61 = vmul.f32 %v3448_v59, %v3010_v39  ;;  %v1978_v58 = vpop.f32.mrf.mxu1 }
 0x1d6   : > { %3467 = vrcp.f32 %v2422_v24  ;;  %v2425_v18 = vadd.f32 1.0, %v4318_v60  ;;  %v3452_v20 = vpop.eup %3451  ;;  %v2559_v19 = vmul.f32 %v3450_v30, %v3042_v52  ;;  %v2076_v36 = vmin.f32 %v4332_v16, 20.0  ;;  %v1850_v44 = vpop.f32.mrf.mxu0 }
 0x1d7   : > { %3469 = vrcp.f32 %v2454_v2  ;;  %v2457_v22 = vadd.f32 1.0, %v4329_v21  ;;  %v3454_v4 = vpop.eup %3453  ;;  %v2610_v15 = vmul.f32 %v2495_v61, %v4217_v35  ;;  %v2501_v25 = vmul.f32 %v3452_v20, %v3013_v26 }
 0x1d8   : > { %3471 = vrcp.f32 %v2425_v18  ;;  %v2642_v31 = vmul.f32 %v2559_v19, %v4212_v8  ;;  %v2565_v41 = vmul.f32 %v3454_v4, %v3045_v49  ;;  %v2130_v39 = vmul.f32 1.442695, %v2044_v0 }
 0x1d9   : > { %3473 = vrcp.f32 %v2457_v22  ;;  %2675 = vst.msk [vmem:[%s4112_s28 + $0x60] sm:$0xff] %vm2662_vm5, %v2610_v15  ;;  %v2613_v48 = vmul.f32 %v2501_v25, %v4228_v45  ;;  %v4348_v35 = vadd.f32 %v4323_v23, %v1847_v13  ;;  %v4351_v52 = vadd.f32 %v4323_v23, %v1975_v34  ;;  %v3456_v32 = vpop.eup %3455 }
 0x1da   : > { %2707 = vst.msk [vmem:[%s4112_s28 + $0x160] sm:$0xff] %vm2662_vm5, %v2642_v31  ;;  %v2645_v8 = vmul.f32 %v2565_v41, %v4231_v11  ;;  %v2194_v53 = vmul.f32 1.442695, %v2076_v36  ;;  %v4357_v26 = vadd.f32 %v4323_v23, %v3128_v28  ;;  %v4360_v40 = vadd.f32 %v4323_v23, %v3160_v29  ;;  %v3458_v45 = vpop.eup %3457 }
 0x1db   : > { %2678 = vst.msk [vmem:[%s4112_s28 + $0x78] sm:$0xff] %vm2662_vm5, %v2613_v48  ;;  %v2497_v5 = vmul.f32 %v3456_v32, %v3011_v37  ;;  %3475 = vpow2.f32 %v2130_v39  ;;  %v2042_v42 = vmin.f32 %v4348_v35, 20.0  ;;  %v2074_v27 = vmin.f32 %v4351_v52, 20.0  ;;  %v3460_v47 = vpop.eup %3459 }
 0x1dc   : > { %2710 = vst.msk [vmem:[%s4112_s28 + $0x178] sm:$0xff] %vm2662_vm5, %v2645_v8  ;;  %v2561_v11 = vmul.f32 %v3458_v45, %v3043_v33  ;;  %3477 = vpow2.f32 %v2194_v53  ;;  %v2045_v49 = vmin.f32 %v4357_v26, 20.0  ;;  %v2077_v6 = vmin.f32 %v4360_v40, 20.0  ;;  %v3462_v50 = vpop.eup %3461 }
 0x1dd   : > { %v2611_v37 = vmul.f32 %v2497_v5, %v4236_v9  ;;  %v2231_v43 = vadd.f32 1.0, %v3460_v47  ;;  %v2126_v38 = vmul.f32 1.442695, %v2042_v42  ;;  %v2190_v54 = vmul.f32 1.442695, %v2074_v27 }
 0x1de   : > { %v2643_v24 = vmul.f32 %v2561_v11, %v4239_v17  ;;  %v2263_v13 = vadd.f32 1.0, %v3462_v50  ;;  %v2132_v34 = vmul.f32 1.442695, %v2045_v49  ;;  %v2196_v59 = vmul.f32 1.442695, %v2077_v6 }
 0x1df   : > { %2676 = vst.msk [vmem:[%s4112_s28 + $0x68] sm:$0xff] %vm2662_vm5, %v2611_v37  ;;  %v3014_v33 = vadd.f32 -1.0, %v4313_v14  ;;  %v2295_v2 = vmul.f32 %v2231_v43, %v2231_v43  ;;  %3479 = vpow2.f32 %v2126_v38  ;;  %v4376_v30 = vadd.f32 %v4323_v23, %v1850_v44 }
 0x1e0   : > { %2708 = vst.msk [vmem:[%s4112_s28 + $0x168] sm:$0xff] %vm2662_vm5, %v2643_v24  ;;  %v3046_v9 = vadd.f32 -1.0, %v4315_v51  ;;  %v2327_v18 = vmul.f32 %v2263_v13, %v2263_v13  ;;  %3481 = vpow2.f32 %v2190_v54  ;;  %v4382_v17 = vadd.f32 %v4323_v23, %v1978_v58 }
 0x1e1   : > { %v3464_v61 = vpop.eup %3463  ;;  %v3017_v14 = vadd.f32 -1.0, %v4318_v60  ;;  %v2423_v22 = vadd.f32 1.0, %v2295_v2  ;;  %3483 = vpow2.f32 %v2132_v34  ;;  %v3049_v25 = vadd.f32 -1.0, %v4329_v21 }
 0x1e2   : > { %v3466_v20 = vpop.eup %3465  ;;  %v2507_v19 = vmul.f32 %v3464_v61, %v4334_v12  ;;  %v2455_v0 = vadd.f32 1.0, %v2327_v18  ;;  %3485 = vpow2.f32 %v2196_v59  ;;  %v2043_v12 = vmin.f32 %v4376_v30, 20.0 }
 0x1e3   : > { %v3468_v4 = vpop.eup %3467  ;;  %v2571_v15 = vmul.f32 %v3466_v20, %v4337_v10  ;;  %3487 = vrcp.f32 %v2423_v22  ;;  %v2075_v10 = vmin.f32 %v4382_v17, 20.0  ;;  %v3015_v54 = vadd.f32 -1.0, %v2295_v2 }
 0x1e4   : > { %v3470_v51 = vpop.eup %3469  ;;  %v2616_v28 = vmul.f32 %v2507_v19, %v4251_v55  ;;  %v2503_v29 = vmul.f32 %v3468_v4, %v3014_v33  ;;  %3489 = vrcp.f32 %v2455_v0  ;;  %v2128_v55 = vmul.f32 1.442695, %v2043_v12 }
 0x1e5   : > { %v3472_v60 = vpop.eup %3471  ;;  %v2648_v31 = vmul.f32 %v2571_v15, %v4254_v57  ;;  %v2567_v41 = vmul.f32 %v3470_v51, %v3046_v9  ;;  %v2192_v8 = vmul.f32 1.442695, %v2075_v10  ;;  %v3047_v34 = vadd.f32 -1.0, %v2327_v18 }
 0x1e6   : > { %v3474_v36 = vpop.eup %3473  ;;  %2681 = vst.msk [vmem:[%s4112_s28 + $0x90] sm:$0xff] %vm2662_vm5, %v2616_v28  ;;  %v2614_v21 = vmul.f32 %v2503_v29, %v4258_v62  ;;  %v2509_v48 = vmul.f32 %v3472_v60, %v3017_v14  ;;  %3491 = vpow2.f32 %v2128_v55 }
 0x1e7   : > { %2713 = vst.msk [vmem:[%s4112_s28 + $0x190] sm:$0xff] %vm2662_vm5, %v2648_v31  ;;  %v2646_v39 = vmul.f32 %v2567_v41, %v4261_v46  ;;  %v2573_v32 = vmul.f32 %v3474_v36, %v3049_v25  ;;  %v3163_v57 = vpop.f32.mrf.mxu1  ;;  %3493 = vpow2.f32 %v2192_v8 }
 0x1e8   : > { %2679 = vst.msk [vmem:[%s4112_s28 + $0x80] sm:$0xff] %vm2662_vm5, %v2614_v21  ;;  %v2617_v53 = vmul.f32 %v2509_v48, %v4275_v3  ;;  %v3131_v45 = vpop.f32.mrf.mxu0  ;;  %v4402_v5 = vadd.f32 %v4323_v23, %v3163_v57  ;;  %v3476_v62 = vpop.eup %3475 }
 0x1e9   : > { %2711 = vst.msk [vmem:[%s4112_s28 + $0x180] sm:$0xff] %vm2662_vm5, %v2646_v39  ;;  %v2649_v42 = vmul.f32 %v2573_v32, %v4268_v56  ;;  %v4408_v46 = vadd.f32 %v4323_v23, %v3131_v45  ;;  %v1991_v27 = vpop.f32.mrf.mxu1  ;;  %v3478_v47 = vpop.eup %3477  ;;  %v2236_v11 = vadd.f32 1.0, %v3476_v62 }
 0x1ea   : > { %2682 = vst.msk [vmem:[%s4112_s28 + $0x98] sm:$0xff] %vm2662_vm5, %v2617_v53  ;;  %v2080_v3 = vmin.f32 %v4402_v5, 20.0  ;;  %v1863_v49 = vpop.f32.mrf.mxu0  ;;  %v2268_v6 = vadd.f32 1.0, %v3478_v47  ;;  %v4417_v50 = vadd.f32 %v4323_v23, %v1991_v27 }
 0x1eb   : > { %2714 = vst.msk [vmem:[%s4112_s28 + $0x198] sm:$0xff] %vm2662_vm5, %v2649_v42  ;;  %v2048_v44 = vmin.f32 %v4408_v46, 20.0  ;;  %v4419_v56 = vmul.f32 %v2236_v11, %v2236_v11  ;;  %v4422_v43 = vadd.f32 %v4323_v23, %v1863_v49  ;;  %v3164_v61 = vpop.f32.mrf.mxu1 }
 0x1ec   : > { %v2202_v37 = vmul.f32 1.442695, %v2080_v3  ;;  %v3480_v38 = vpop.eup %3479  ;;  %v4424_v58 = vmul.f32 %v2268_v6, %v2268_v6  ;;  %v2078_v14 = vmin.f32 %v4417_v50, 20.0  ;;  %v3132_v22 = vpop.f32.mrf.mxu0  ;;  %v4433_v28 = vadd.f32 %v4323_v23, %v3164_v61 }
 0x1ed   : > { %v2138_v24 = vmul.f32 1.442695, %v2048_v44  ;;  %v3482_v13 = vpop.eup %3481  ;;  %v2428_v59 = vadd.f32 1.0, %v4419_v56  ;;  %v2234_v33 = vadd.f32 1.0, %v3480_v38  ;;  %v2046_v18 = vmin.f32 %v4422_v43, 20.0  ;;  %v1994_v8 = vpop.f32.mrf.mxu1 }
 0x1ee   : > { %3495 = vpow2.f32 %v2202_v37  ;;  %v3484_v9 = vpop.eup %3483  ;;  %v2460_v20 = vadd.f32 1.0, %v4424_v58  ;;  %v2266_v19 = vadd.f32 1.0, %v3482_v13  ;;  %v4437_v41 = vadd.f32 %v4323_v23, %v3132_v22  ;;  %v1866_v32 = vpop.f32.mrf.mxu0 }
 0x1ef   : > { %3497 = vpow2.f32 %v2138_v24  ;;  %v3486_v4 = vpop.eup %3485  ;;  %v4429_v2 = vmul.f32 %v2234_v33, %v2234_v33  ;;  %v2237_v15 = vadd.f32 1.0, %v3484_v9  ;;  %v2134_v39 = vmul.f32 1.442695, %v2046_v18 }
 0x1f0   : > { %3499 = vrcp.f32 %v2428_v59  ;;  %v3488_v25 = vpop.eup %3487  ;;  %v2330_v0 = vmul.f32 %v2266_v19, %v2266_v19  ;;  %v2269_v51 = vadd.f32 1.0, %v3486_v4  ;;  %v2198_v62 = vmul.f32 1.442695, %v2078_v14 }
 0x1f1   : > { %3501 = vrcp.f32 %v2460_v20  ;;  %v3490_v29 = vpop.eup %3489  ;;  %v2505_v12 = vmul.f32 %v3488_v25, %v3015_v54  ;;  %v2426_v60 = vadd.f32 1.0, %v4429_v2  ;;  %v2301_v31 = vmul.f32 %v2237_v15, %v2237_v15 }
 0x1f2   : > { %v2569_v10 = vmul.f32 %v3490_v29, %v3047_v34  ;;  %v2458_v36 = vadd.f32 1.0, %v2330_v0  ;;  %v4439_v21 = vmul.f32 %v2269_v51, %v2269_v51  ;;  %v2081_v47 = vmin.f32 %v4433_v28, 20.0 }
 0x1f3   : > { %v2615_v48 = vmul.f32 %v2505_v12, %v4300_v1  ;;  %3503 = vrcp.f32 %v2426_v60  ;;  %v2429_v55 = vadd.f32 1.0, %v2301_v31  ;;  %v3492_v57 = vpop.eup %3491  ;;  %v2049_v1 = vmin.f32 %v4437_v41, 20.0 }
 0x1f4   : > { %v2647_v53 = vmul.f32 %v2569_v10, %v4303_v7  ;;  %3505 = vrcp.f32 %v2458_v36  ;;  %v2461_v45 = vadd.f32 1.0, %v4439_v21  ;;  %v3494_v42 = vpop.eup %3493  ;;  %v2235_v27 = vadd.f32 1.0, %v3492_v57 }
 0x1f5   : > { %2680 = vst.msk [vmem:[%s4112_s28 + $0x88] sm:$0xff] %vm2662_vm5, %v2615_v48  ;;  %3507 = vrcp.f32 %v2429_v55  ;;  %v2267_v11 = vadd.f32 1.0, %v3494_v42  ;;  %v4451_v3 = vadd.f32 %v4323_v23, %v1866_v32  ;;  %v4454_v7 = vadd.f32 %v4323_v23, %v1994_v8 }
 0x1f6   : > { %2712 = vst.msk [vmem:[%s4112_s28 + $0x188] sm:$0xff] %vm2662_vm5, %v2647_v53  ;;  %3509 = vrcp.f32 %v2461_v45  ;;  %v4456_v49 = vmul.f32 %v2235_v27, %v2235_v27  ;;  %v2140_v6 = vmul.f32 1.442695, %v2049_v1  ;;  %v2204_v44 = vmul.f32 1.442695, %v2081_v47 }
 0x1f7   : > { %3511 = vpow2.f32 %v2134_v39  ;;  %v4458_v37 = vmul.f32 %v2267_v11, %v2267_v11  ;;  %v2047_v38 = vmin.f32 %v4451_v3, 20.0  ;;  %v2079_v54 = vmin.f32 %v4454_v7, 20.0 }
 0x1f8   : > { %3513 = vpow2.f32 %v2198_v62  ;;  %v2427_v24 = vadd.f32 1.0, %v4456_v49  ;;  %v3020_v61 = vadd.f32 -1.0, %v4419_v56  ;;  %v3052_v14 = vadd.f32 -1.0, %v4424_v58 }
 0x1f9   : > { %3515 = vpow2.f32 %v2140_v6  ;;  %v2459_v34 = vadd.f32 1.0, %v4458_v37  ;;  %v2136_v59 = vmul.f32 1.442695, %v2047_v38  ;;  %v2200_v20 = vmul.f32 1.442695, %v2079_v54 }
 0x1fa   : > { %3517 = vpow2.f32 %v2204_v44  ;;  %v3018_v18 = vadd.f32 -1.0, %v4429_v2  ;;  %v3050_v29 = vadd.f32 -1.0, %v2330_v0  ;;  %v3021_v10 = vadd.f32 -1.0, %v2301_v31 }
 0x1fb   : > { %v3496_v13 = vpop.eup %3495  ;;  %3519 = vrcp.f32 %v2427_v24  ;;  %v3053_v0 = vadd.f32 -1.0, %v4439_v21 }
 0x1fc   : > { %v3498_v33 = vpop.eup %3497  ;;  %v2272_v9 = vadd.f32 1.0, %v3496_v13  ;;  %3521 = vrcp.f32 %v2459_v34 }
 0x1fd   : > { %v3500_v19 = vpop.eup %3499  ;;  %v2240_v22 = vadd.f32 1.0, %v3498_v33  ;;  %3523 = vpow2.f32 %v2136_v59 }
 0x1fe   : > { %v3502_v4 = vpop.eup %3501  ;;  %v2515_v15 = vmul.f32 %v3500_v19, %v3020_v61  ;;  %v4467_v25 = vmul.f32 %v2272_v9, %v2272_v9  ;;  %3525 = vpow2.f32 %v2200_v20 }
 0x1ff   : > { %v2579_v51 = vmul.f32 %v3502_v4, %v3052_v14  ;;  %v4469_v12 = vmul.f32 %v2240_v22, %v2240_v22  ;;  %v3167_v56 = vpop.f32.mrf.mxu1  ;;  %v3019_v22 = vadd.f32 -1.0, %v4456_v49 }
 0x200   : > { %v2620_v60 = vmul.f32 %v2515_v15, %v4326_v63  ;;  %v2464_v58 = vadd.f32 1.0, %v4467_v25  ;;  %v3135_v36 = vpop.f32.mrf.mxu0  ;;  %v4474_v48 = vadd.f32 %v4323_v23, %v3167_v56  ;;  %v3504_v2 = vpop.eup %3503 }
 0x201   : > { %v2652_v55 = vmul.f32 %v2579_v51, %v4332_v16  ;;  %v2432_v39 = vadd.f32 1.0, %v4469_v12  ;;  %v4480_v32 = vadd.f32 %v4323_v23, %v3135_v36  ;;  %v2007_v8 = vpop.f32.mrf.mxu1  ;;  %v3506_v63 = vpop.eup %3505  ;;  %v2511_v31 = vmul.f32 %v3504_v2, %v3018_v18 }
 0x202   : > { %2685 = vst.msk [vmem:[%s4112_s28 + $0xb0] sm:$0xff] %vm2662_vm5, %v2620_v60  ;;  %3527 = vrcp.f32 %v2464_v58  ;;  %v2084_v57 = vmin.f32 %v4474_v48, 20.0  ;;  %v1879_v53 = vpop.f32.mrf.mxu0  ;;  %v4486_v45 = vadd.f32 %v4323_v23, %v2007_v8  ;;  %v3508_v16 = vpop.eup %3507  ;;  %v2575_v21 = vmul.f32 %v3506_v63, %v3050_v29 }
 0x203   : > { %2717 = vst.msk [vmem:[%s4112_s28 + $0x1b0] sm:$0xff] %vm2662_vm5, %v2652_v55  ;;  %3529 = vrcp.f32 %v2432_v39  ;;  %v2052_v62 = vmin.f32 %v4480_v32, 20.0  ;;  %v4492_v42 = vadd.f32 %v4323_v23, %v1879_v53  ;;  %v3510_v27 = vpop.eup %3509  ;;  %v2618_v1 = vmul.f32 %v2511_v31, %v4348_v35  ;;  %v3168_v15 = vpop.f32.mrf.mxu1 }
 0x204   : > { %v2517_v47 = vmul.f32 %v3508_v16, %v3021_v10  ;;  %v2210_v11 = vmul.f32 1.442695, %v2084_v57  ;;  %v2082_v6 = vmin.f32 %v4486_v45, 20.0  ;;  %v3512_v44 = vpop.eup %3511  ;;  %v2650_v38 = vmul.f32 %v2575_v21, %v4351_v52  ;;  %v3136_v19 = vpop.f32.mrf.mxu0 }
 0x205   : > { %v2581_v54 = vmul.f32 %v3510_v27, %v3053_v0  ;;  %v2146_v24 = vmul.f32 1.442695, %v2052_v62  ;;  %v2050_v13 = vmin.f32 %v4492_v42, 20.0  ;;  %v3514_v34 = vpop.eup %3513  ;;  %2683 = vst.msk [vmem:[%s4112_s28 + $0xa0] sm:$0xff] %vm2662_vm5, %v2618_v1  ;;  %v2238_v33 = vadd.f32 1.0, %v3512_v44  ;;  %v2010_v53 = vpop.f32.mrf.mxu1 }
 0x206   : > { %v2621_v59 = vmul.f32 %v2517_v47, %v4357_v26  ;;  %3531 = vpow2.f32 %v2210_v11  ;;  %v2206_v35 = vmul.f32 1.442695, %v2082_v6  ;;  %v3516_v61 = vpop.eup %3515  ;;  %2715 = vst.msk [vmem:[%s4112_s28 + $0x1a0] sm:$0xff] %vm2662_vm5, %v2650_v38  ;;  %v2270_v52 = vadd.f32 1.0, %v3514_v34  ;;  %v1882_v57 = vpop.f32.mrf.mxu0 }
 0x207   : > { %v2653_v9 = vmul.f32 %v2581_v54, %v4360_v40  ;;  %3533 = vpow2.f32 %v2146_v24  ;;  %v2142_v20 = vmul.f32 1.442695, %v2050_v13  ;;  %v3518_v14 = vpop.eup %3517  ;;  %v4507_v4 = vmul.f32 %v2238_v33, %v2238_v33 }
 0x208   : > { %2686 = vst.msk [vmem:[%s4112_s28 + $0xb8] sm:$0xff] %vm2662_vm5, %v2621_v59  ;;  %v2241_v26 = vadd.f32 1.0, %v3516_v61  ;;  %3535 = vpow2.f32 %v2206_v35  ;;  %v3520_v18 = vpop.eup %3519  ;;  %v3051_v51 = vadd.f32 -1.0, %v4458_v37  ;;  %v4512_v40 = vmul.f32 %v2270_v52, %v2270_v52 }
 0x209   : > { %2718 = vst.msk [vmem:[%s4112_s28 + $0x1b8] sm:$0xff] %vm2662_vm5, %v2653_v9  ;;  %v2273_v29 = vadd.f32 1.0, %v3518_v14  ;;  %3537 = vpow2.f32 %v2142_v20  ;;  %v3522_v56 = vpop.eup %3521  ;;  %v2513_v60 = vmul.f32 %v3520_v18, %v3019_v22  ;;  %v2430_v10 = vadd.f32 1.0, %v4507_v4 }
 0x20a   : > { %v4515_v58 = vmul.f32 %v2241_v26, %v2241_v26  ;;  %v4518_v49 = vadd.f32 %v4323_v23, %v3136_v19  ;;  %v3524_v36 = vpop.eup %3523  ;;  %v2577_v2 = vmul.f32 %v3522_v56, %v3051_v51  ;;  %v2462_v55 = vadd.f32 1.0, %v4512_v40 }
 0x20b   : > { %v4521_v0 = vmul.f32 %v2273_v29, %v2273_v29  ;;  %v4524_v37 = vadd.f32 %v4323_v23, %v3168_v15  ;;  %v3526_v39 = vpop.eup %3525  ;;  %v2619_v8 = vmul.f32 %v2513_v60, %v4376_v30  ;;  %v3056_v63 = vadd.f32 -1.0, %v4467_v25 }
 0x20c   : > { %3539 = vrcp.f32 %v2430_v10  ;;  %v2433_v31 = vadd.f32 1.0, %v4515_v58  ;;  %v2651_v16 = vmul.f32 %v2577_v2, %v4382_v17  ;;  %v3024_v21 = vadd.f32 -1.0, %v4469_v12 }
 0x20d   : > { %3541 = vrcp.f32 %v2462_v55  ;;  %v2465_v62 = vadd.f32 1.0, %v4521_v0  ;;  %2684 = vst.msk [vmem:[%s4112_s28 + $0xa8] sm:$0xff] %vm2662_vm5, %v2619_v8  ;;  %v2239_v27 = vadd.f32 1.0, %v3524_v36  ;;  %v2271_v30 = vadd.f32 1.0, %v3526_v39 }
 0x20e   : > { %3543 = vrcp.f32 %v2433_v31  ;;  %v2053_v1 = vmin.f32 %v4518_v49, 20.0  ;;  %2716 = vst.msk [vmem:[%s4112_s28 + $0x1a8] sm:$0xff] %vm2662_vm5, %v2651_v16  ;;  %v2085_v47 = vmin.f32 %v4524_v37, 20.0  ;;  %v4539_v17 = vadd.f32 %v4323_v23, %v1882_v57 }
 0x20f   : > { %v3528_v25 = vpop.eup %3527  ;;  %3545 = vrcp.f32 %v2465_v62  ;;  %v4542_v12 = vadd.f32 %v4323_v23, %v2010_v53  ;;  %v2303_v44 = vmul.f32 %v2239_v27, %v2239_v27  ;;  %v4544_v38 = vmul.f32 %v2271_v30, %v2271_v30 }
 0x210   : > { %v3530_v11 = vpop.eup %3529  ;;  %v2587_v6 = vmul.f32 %v3528_v25, %v3056_v63  ;;  %v2148_v54 = vmul.f32 1.442695, %v2053_v1  ;;  %v2051_v13 = vmin.f32 %v4539_v17, 20.0  ;;  %v2212_v35 = vmul.f32 1.442695, %v2085_v47 }
 0x211   : > { %v2523_v24 = vmul.f32 %v3530_v11, %v3024_v21  ;;  %v2083_v34 = vmin.f32 %v4542_v12, 20.0  ;;  %v2431_v33 = vadd.f32 1.0, %v2303_v44  ;;  %v2463_v9 = vadd.f32 1.0, %v4544_v38 }
 0x212   : > { %v2656_v59 = vmul.f32 %v2587_v6, %v4402_v5  ;;  %3547 = vpow2.f32 %v2148_v54  ;;  %v2144_v52 = vmul.f32 1.442695, %v2051_v13  ;;  %v3022_v29 = vadd.f32 -1.0, %v4507_v4 }
 0x213   : > { %v3532_v61 = vpop.eup %3531  ;;  %v2624_v23 = vmul.f32 %v2523_v24, %v4408_v46  ;;  %3549 = vrcp.f32 %v2431_v33  ;;  %v2208_v14 = vmul.f32 1.442695, %v2083_v34  ;;  %v3054_v36 = vadd.f32 -1.0, %v4512_v40 }
 0x214   : > { %v3534_v20 = vpop.eup %3533  ;;  %2721 = vst.msk [vmem:[%s4112_s28 + $0x1d0] sm:$0xff] %vm2662_vm5, %v2656_v59  ;;  %v2276_v19 = vadd.f32 1.0, %v3532_v61  ;;  %3551 = vrcp.f32 %v2463_v9  ;;  %v3025_v63 = vadd.f32 -1.0, %v4515_v58  ;;  %v3057_v4 = vadd.f32 -1.0, %v4521_v0 }
 0x215   : > { %v3536_v22 = vpop.eup %3535  ;;  %2689 = vst.msk [vmem:[%s4112_s28 + $0xd0] sm:$0xff] %vm2662_vm5, %v2624_v23  ;;  %v2244_v5 = vadd.f32 1.0, %v3534_v20  ;;  %3553 = vpow2.f32 %v2212_v35  ;;  %v3023_v25 = vadd.f32 -1.0, %v2303_v44 }
 0x216   : > { %v3538_v26 = vpop.eup %3537  ;;  %v2340_v15 = vmul.f32 %v2276_v19, %v2276_v19  ;;  %v2274_v18 = vadd.f32 1.0, %v3536_v22  ;;  %3555 = vpow2.f32 %v2144_v52 }
 0x217   : > { %v2308_v46 = vmul.f32 %v2244_v5, %v2244_v5  ;;  %v2242_v51 = vadd.f32 1.0, %v3538_v26  ;;  %3557 = vpow2.f32 %v2208_v14 }
 0x218   : > { %v2468_v56 = vadd.f32 1.0, %v2340_v15  ;;  %v2338_v60 = vmul.f32 %v2274_v18, %v2274_v18  ;;  %v3060_v61 = vadd.f32 -1.0, %v2340_v15 }
 0x219   : > { %v3540_v10 = vpop.eup %3539  ;;  %v2436_v2 = vadd.f32 1.0, %v2308_v46  ;;  %v2306_v55 = vmul.f32 %v2242_v51, %v2242_v51  ;;  %v3028_v52 = vadd.f32 -1.0, %v2308_v46 }
 0x21a   : > { %v3542_v39 = vpop.eup %3541  ;;  %v2519_v8 = vmul.f32 %v3540_v10, %v3022_v29  ;;  %3559 = vrcp.f32 %v2468_v56  ;;  %v2466_v31 = vadd.f32 1.0, %v2338_v60 }
 0x21b   : > { %v3544_v57 = vpop.eup %3543  ;;  %v2583_v53 = vmul.f32 %v3542_v39, %v3054_v36  ;;  %3561 = vrcp.f32 %v2436_v2  ;;  %v2434_v16 = vadd.f32 1.0, %v2306_v55  ;;  %v3026_v18 = vadd.f32 -1.0, %v2306_v55 }
 0x21c   : > { %v3546_v21 = vpop.eup %3545  ;;  %v2622_v40 = vmul.f32 %v2519_v8, %v4422_v43  ;;  %v2525_v62 = vmul.f32 %v3544_v57, %v3025_v63  ;;  %3563 = vrcp.f32 %v2466_v31 }
 0x21d   : > { %v2654_v27 = vmul.f32 %v2583_v53, %v4417_v50  ;;  %v2589_v30 = vmul.f32 %v3546_v21, %v3057_v4  ;;  %3565 = vrcp.f32 %v2434_v16  ;;  %v3055_v50 = vadd.f32 -1.0, %v4544_v38 }
 0x21e   : > { %2687 = vst.msk [vmem:[%s4112_s28 + $0xc0] sm:$0xff] %vm2662_vm5, %v2622_v40  ;;  %v2625_v58 = vmul.f32 %v2525_v62, %v4437_v41 }
 0x21f   : > { %2719 = vst.msk [vmem:[%s4112_s28 + $0x1c0] sm:$0xff] %vm2662_vm5, %v2654_v27  ;;  %v2657_v0 = vmul.f32 %v2589_v30, %v4433_v28  ;;  %v3548_v1 = vpop.eup %3547 }
 0x220   : > { %2690 = vst.msk [vmem:[%s4112_s28 + $0xd8] sm:$0xff] %vm2662_vm5, %v2625_v58  ;;  %v3550_v47 = vpop.eup %3549  ;;  %v2245_v43 = vadd.f32 1.0, %v3548_v1 }
 0x221   : > { %2722 = vst.msk [vmem:[%s4112_s28 + $0x1d8] sm:$0xff] %vm2662_vm5, %v2657_v0  ;;  %v3552_v11 = vpop.eup %3551  ;;  %v2521_v6 = vmul.f32 %v3550_v47, %v3023_v25 }
 0x222   : > { %v3554_v54 = vpop.eup %3553  ;;  %v2585_v41 = vmul.f32 %v3552_v11, %v3055_v50  ;;  %v2309_v24 = vmul.f32 %v2245_v43, %v2245_v43 }
 0x223   : > { %v3556_v13 = vpop.eup %3555  ;;  %v2623_v28 = vmul.f32 %v2521_v6, %v4451_v3  ;;  %v2277_v34 = vadd.f32 1.0, %v3554_v54  ;;  %v3058_v3 = vadd.f32 -1.0, %v2338_v60 }
 0x224   : > { %v3558_v59 = vpop.eup %3557  ;;  %v2655_v44 = vmul.f32 %v2585_v41, %v4454_v7  ;;  %v2437_v33 = vadd.f32 1.0, %v2309_v24  ;;  %v2243_v35 = vadd.f32 1.0, %v3556_v13 }
 0x225   : > { %2688 = vst.msk [vmem:[%s4112_s28 + $0xc8] sm:$0xff] %vm2662_vm5, %v2623_v28  ;;  %v2341_v38 = vmul.f32 %v2277_v34, %v2277_v34  ;;  %v2275_v23 = vadd.f32 1.0, %v3558_v59 }
 0x226   : > { %2720 = vst.msk [vmem:[%s4112_s28 + $0x1c8] sm:$0xff] %vm2662_vm5, %v2655_v44  ;;  %3567 = vrcp.f32 %v2437_v33  ;;  %v2307_v20 = vmul.f32 %v2243_v35, %v2243_v35 }
 0x227   : > { %v3560_v9 = vpop.eup %3559  ;;  %v2469_v22 = vadd.f32 1.0, %v2341_v38  ;;  %v2339_v7 = vmul.f32 %v2275_v23, %v2275_v23  ;;  %v3061_v39 = vadd.f32 -1.0, %v2341_v38 }
 0x228   : > { %v3562_v19 = vpop.eup %3561  ;;  %v2595_v14 = vmul.f32 %v3560_v9, %v3060_v61  ;;  %v2435_v15 = vadd.f32 1.0, %v2307_v20 }
 0x229   : > { %v3564_v5 = vpop.eup %3563  ;;  %v2531_v26 = vmul.f32 %v3562_v19, %v3028_v52  ;;  %3569 = vrcp.f32 %v2469_v22  ;;  %v2467_v36 = vadd.f32 1.0, %v2339_v7  ;;  %v3059_v53 = vadd.f32 -1.0, %v2339_v7 }
 0x22a   : > { %v3566_v51 = vpop.eup %3565  ;;  %v2660_v29 = vmul.f32 %v2595_v14, %v4474_v48  ;;  %v2591_v56 = vmul.f32 %v3564_v5, %v3058_v3  ;;  %3571 = vrcp.f32 %v2435_v15  ;;  %v3029_v48 = vadd.f32 -1.0, %v2309_v24 }
 0x22b   : > { %v2628_v46 = vmul.f32 %v2531_v26, %v4480_v32  ;;  %v2527_v10 = vmul.f32 %v3566_v51, %v3026_v18  ;;  %3573 = vrcp.f32 %v2467_v36 }
 0x22c   : > { %2725 = vst.msk [vmem:[%s4112_s28 + $0x1f0] sm:$0xff] %vm2662_vm5, %v2660_v29  ;;  %v2658_v60 = vmul.f32 %v2591_v56, %v4486_v45  ;;  %v3027_v45 = vadd.f32 -1.0, %v2307_v20 }
 0x22d   : > { %2693 = vst.msk [vmem:[%s4112_s28 + $0xf0] sm:$0xff] %vm2662_vm5, %v2628_v46  ;;  %v2626_v2 = vmul.f32 %v2527_v10, %v4492_v42 }
 0x22e   : > { %2723 = vst.msk [vmem:[%s4112_s28 + $0x1e0] sm:$0xff] %vm2662_vm5, %v2658_v60 }
 0x22f   : > { %2691 = vst.msk [vmem:[%s4112_s28 + $0xe0] sm:$0xff] %vm2662_vm5, %v2626_v2 }
 0x233   : > { %v3568_v32 = vpop.eup %3567 }
 0x234   : > { %v2533_v55 = vmul.f32 %v3568_v32, %v3029_v48 }
 0x236   : > { %v3570_v8 = vpop.eup %3569  ;;  %v2629_v63 = vmul.f32 %v2533_v55, %v4518_v49 }
 0x237   : > { %v3572_v31 = vpop.eup %3571  ;;  %v2597_v57 = vmul.f32 %v3570_v8, %v3061_v39 }
 0x238   : > { %2694 = vst.msk [vmem:[%s4112_s28 + $0xf8] sm:$0xff] %vm2662_vm5, %v2629_v63  ;;  %v2529_v42 = vmul.f32 %v3572_v31, %v3027_v45  ;;  %v3574_v4 = vpop.eup %3573 }
 0x239   : > { %v2661_v16 = vmul.f32 %v2597_v57, %v4524_v37  ;;  %v2593_v40 = vmul.f32 %v3574_v4, %v3059_v53 }
 0x23a   : > { %v2627_v21 = vmul.f32 %v2529_v42, %v4539_v17 }
 0x23b   : > { %2726 = vst.msk [vmem:[%s4112_s28 + $0x1f8] sm:$0xff] %vm2662_vm5, %v2661_v16  ;;  %v2659_v62 = vmul.f32 %v2593_v40, %v4542_v12 }
 0x23c   : > { %2692 = vst.msk [vmem:[%s4112_s28 + $0xe8] sm:$0xff] %vm2662_vm5, %v2627_v21 }
 0x23d   : > { %2724 = vst.msk [vmem:[%s4112_s28 + $0x1e8] sm:$0xff] %vm2662_vm5, %v2659_v62 }
 0x23e PF: > { %s16_s21 = sadd.s32 1, %s3582_s21  }
 0x23f   : > { %p13_p4 = scmp.ge.s32.totalorder %s16_s21, 4  }
 0x241   :  { %15 = sbr.rel (!%p13_p4) target bundleno = 1 (0x1), region = 83 }

</bundles_post_ra>
